<compile_context>
chip_gen: v6e
topology: v6e:2x2x1
jax: 0.10.0
libtpu: 0.0.40
codegen_flags: <defaults>
</compile_context>

<pallas_src>
import functools
import math

import jax
import jax.numpy as jnp
from jax import lax
from jax.experimental import pallas as pl
from jax.experimental.pallas import tpu as pltpu

GAMMA = 5.0 / 3.0        # eos.gamma_th
N_ENS = 4                # ensemble size (len(pressnet))
HIDDEN = 32              # MLP hidden width per member
SUBLANES = 8             # cells per grid step are packed as (SUBLANES, 128)
LANES = 128
TILE = SUBLANES * LANES  # 1024 cells per grid step
N_RAREF_ITERS = 24       # bisection iterations (enough for f32 precision)


def _act_dtype():
    """bf16 tanh on chips with a bf16 EUP (v6e/v7x); f32 on v5e and older."""
    try:
        kind = jax.devices()[0].device_kind.lower()
    except Exception:
        return jnp.bfloat16
    if any(t in kind for t in ("v2", "v3", "v4", "v5")):
        return jnp.float32
    return jnp.bfloat16


# ----------------------------- Pallas kernel -----------------------------------

def _solver_kernel(P_ref, F_ref, w1_ref, w2_ref, b2_ref, w3_ref, b3_ref,
                   out_ref, x_scr, xi_scr, *, gamma, n_ens, sub, act_dtype):
    f32 = jnp.float32
    bf16 = jnp.bfloat16
    gm1 = gamma - 1.0
    gp = gamma / gm1
    inv_gamma = 1.0 / gamma
    sq = gm1 ** 0.5                      # sqrt(gamma - 1), compile-time constant
    c2 = 2.0 / sq
    c_1msq = 1.0 - sq
    c_1psq = 1.0 + sq
    # t-space bracket endpoint corresponding to cs = 1e-6 (compile-time scalar)
    t_hi_const = math.log(sq - 1e-6) - math.log(sq + 1e-6)

    # ---------------- load prims (cells sublane x lane dense) ----------------
    PL = P_ref[0]            # (3, SUB, 128): rho, p, v (left state)
    PR = P_ref[1]            # (3, SUB, 128) (right state)
    rhoL, pL, vL = PL[0], PL[1], PL[2]
    rhoR, pR, vR = PR[0], PR[1], PR[2]

    lrhoL = jnp.log(rhoL)
    lpL = jnp.log(pL)
    lrhoR = jnp.log(rhoR)
    lpR = jnp.log(pR)

    # ---------------- build the MLP input (lane-flat) via scratch relayout ---
    # [log rhoL, log pL, log rhoR, log pR, vL, vR, 1] -> (7, TILE); the ones row
    # folds the layer-1 bias into W1.
    ones = jnp.ones_like(vL)
    stacked = jnp.stack([lrhoL, lpL, lrhoR, lpR, vL, vR, ones], axis=0)  # (7,SUB,128)
    for s in range(sub):
        x_scr[:, s * LANES:(s + 1) * LANES] = stacked[:, s, :]
    Xb = x_scr[...].astype(bf16)                                          # (7, TILE)

    # ---------------- fused ensemble pressnet (cells on the lane axis) -------
    h1p = jnp.dot(w1_ref[...], Xb, preferred_element_type=f32)            # (E*H, TILE)
    h1 = jnp.tanh(h1p.astype(act_dtype)).astype(bf16)
    h2p = jnp.dot(w2_ref[...], h1, preferred_element_type=f32) + b2_ref[...]
    h2 = jnp.tanh(h2p.astype(act_dtype)).astype(bf16)
    y = jnp.dot(w3_ref[...], h2, preferred_element_type=f32) + b3_ref[...]  # (E, TILE)
    xi_flat = jax.nn.sigmoid(y)

    # re-pack xi from lane-flat (E, SUB*128) into sublane-dense (E, SUB, 128)
    for s in range(sub):
        xi_scr[:, s, :] = xi_flat[:, s * LANES:(s + 1) * LANES]

    # ---------------- per-cell hoisted left / right state quantities ---------
    hL = 1.0 + gp * pL / rhoL
    csL = jnp.sqrt(gamma * pL / (rhoL * hL))
    log_ratio_aL = jnp.log(sq + csL) - jnp.log(sq - csL)   # log((sq+csL)/(sq-csL))
    onePvL = 1.0 + vL
    oneMvL = 1.0 - vL
    dpLR = pL - pR

    inv_rhoR = pl.reciprocal(rhoR, approx=True)
    hR = 1.0 + gp * pR * inv_rhoR
    one_m_vR2 = 1.0 - vR * vR
    WR = lax.rsqrt(one_m_vR2)
    rW2 = (rhoR * WR) ** 2
    hWR = hR * WR
    hWvR = hWR * vR
    inv_rhoWR = inv_rhoR * jnp.sqrt(one_m_vR2)             # (1/rhoR)/WR

    # ---------------- running-best loop over the ensemble --------------------
    def member(xi_e):
        # Compactification(method='affine', a=pR, b=pL).xi_to_x
        pressC = pR + dpLR * xi_e
        lpC = jnp.log(pressC)
        # left rarefaction (sign = -1): isentrope in log space
        lrhoCL = lrhoL + (lpC - lpL) * inv_gamma
        rhoCL = jnp.exp(lrhoCL)
        xCL = jnp.exp(lpC - lrhoCL)                        # pressC / rhoCL
        hCL = 1.0 + gp * xCL
        csCL = jnp.sqrt(gamma * xCL / hCL)
        A = jnp.exp(c2 * (log_ratio_aL + jnp.log(sq - csCL) - jnp.log(sq + csCL)))
        numL = onePvL * A
        vstarL = (numL - oneMvL) * pl.reciprocal(numL + oneMvL, approx=True)
        # right shock (sign = +1): Taub adiabat + mass flux
        dp = pressC - pR
        inv_gpp = pl.reciprocal(gp * pressC, approx=True)
        qa = 1.0 - dp * inv_gpp
        qb = dp * inv_gpp
        qc = -(hR * hR + hR * dp * inv_rhoR)
        disc = jnp.maximum(qb * qb - 4.0 * qa * qc, 0.0)
        qa_safe = jnp.where(qa >= 0.0, jnp.maximum(qa, 1e-12),
                            jnp.minimum(qa, -1e-12))
        hCR = (-qb + jnp.sqrt(disc)) / (2.0 * qa_safe)
        rhoCR = gp * pressC / (hCR - 1.0)
        # h_a/rho_a - h/rho  with rho = gp*p/(h-1)  =>  h/rho = h*(h-1)*inv_gpp
        denom = jnp.maximum(hR * inv_rhoR - hCR * (hCR - 1.0) * inv_gpp, 1e-12)
        j = jnp.sqrt(jnp.maximum(dp, 1e-12) / denom)
        vshock = (rW2 * vR + j * jnp.sqrt(j * j + rW2 * one_m_vR2)) / (rW2 + j * j)
        Ws = lax.rsqrt(jnp.maximum(1.0 - vshock * vshock, 1e-12))
        inv_j = pl.reciprocal(j, approx=True)
        vstarR = (hWvR + Ws * dp * inv_j) / (hWR + dp * (Ws * vR * inv_j + inv_rhoWR))
        res = jnp.abs(vstarL - vstarR)
        lamC = 0.5 * (vstarR + vstarL)
        return res, (pressC, rhoCL, hCL, csCL, rhoCR, hCR, vshock, lamC)

    best_res, best = member(xi_scr[0])
    for e in range(1, n_ens):
        res, vals = member(xi_scr[e])
        upd = res < best_res            # strict '<' keeps first member on ties (argmin)
        best_res = jnp.where(upd, res, best_res)
        best = tuple(jnp.where(upd, v, b) for v, b in zip(vals, best))
    pressC_s, rhoCL_s, hCL_s, csCL_s, rhoCR_s, hCR_s, vshock_s, lambdaC = best

    # ---------------- central-state wave speeds & fluxes ---------------------
    lambdaRL = (lambdaC - csCL_s) * pl.reciprocal(1.0 - lambdaC * csCL_s, approx=True)
    lambdaL = (vL - csL) * pl.reciprocal(1.0 - vL * csL, approx=True)
    WC = lax.rsqrt(1.0 - lambdaC * lambdaC)

    densCL = WC * rhoCL_s
    densCR = WC * rhoCR_s
    momCL = WC * WC * rhoCL_s * hCL_s * lambdaC
    momCR = WC * WC * rhoCR_s * hCR_s * lambdaC

    FCL = jnp.stack([densCL * lambdaC,
                     densCL * (WC * hCL_s - 1.0) * lambdaC,
                     momCL * lambdaC + pressC_s], axis=0)            # (3, SUB, 128)
    FCR = jnp.stack([densCR * lambdaC,
                     densCR * (WC * hCR_s - 1.0) * lambdaC,
                     momCR * lambdaC + pressC_s], axis=0)

    # ---------------- rarefaction fan state at xi = 0 (raref_solver) ---------
    # bisection for cs with v(cs) = cs, done on t = log((sq-cs)/(sq+cs)) so each
    # step needs only 2 exp (A = exp(cA + c2*t), e^t) instead of 1 exp + 2 log.
    cA = c2 * log_ratio_aL
    lo0 = -log_ratio_aL                         # t at cs = csL
    hi0 = jnp.full_like(csL, t_hi_const)        # t at cs = 1e-6

    def body(_, carry):
        lo_c, hi_c = carry
        mid = 0.5 * (lo_c + hi_c)
        et = jnp.exp(mid)
        A_m = jnp.exp(cA + c2 * mid)
        # v_of_cs(cs(mid)) > cs(mid)  <=>  (both sides scaled by 1+et > 0)
        pred = onePvL * A_m * (c_1msq + et * c_1psq) > oneMvL * (c_1psq + et * c_1msq)
        # pred true => cs too small => t too large => move hi down (cs dec. in t)
        lo_n = jnp.where(pred, lo_c, mid)
        hi_n = jnp.where(pred, mid, hi_c)
        return (lo_n, hi_n)

    lo, hi = lax.fori_loop(0, N_RAREF_ITERS, body, (lo0, hi0), unroll=True)
    t_f = 0.5 * (lo + hi)
    et_f = jnp.exp(t_f)
    cs_f = sq * (1.0 - et_f) / (1.0 + et_f)
    cs2 = cs_f * cs_f
    x_f = cs2 * gm1 / (gamma * jnp.maximum(gm1 - cs2, 1e-12))        # p/rho in the fan
    # rho = (x / K)**(1/(gamma-1)),  K = pL / rhoL**gamma   (log space, reuse logs)
    log_rho_f = (jnp.log(x_f) - (lpL - gamma * lrhoL)) * (1.0 / gm1)
    rho_f = jnp.exp(log_rho_f)
    p_f = x_f * rho_f
    h_f = 1.0 + gp * x_f
    v_f = cs_f

    WRL = lax.rsqrt(1.0 - v_f * v_f)
    densRL = WRL * rho_f
    momRL = WRL * WRL * rho_f * h_f * v_f
    FRL = jnp.stack([densRL * v_f,
                     densRL * (WRL * h_f - 1.0) * v_f,
                     momRL * v_f + p_f], axis=0)                     # (3, SUB, 128)

    # ---------------- wave-pattern selection (same cascade as PyTorch) -------
    FL = F_ref[0]            # (3, SUB, 128): F[:, :, 0]
    FR = F_ref[1]            # (3, SUB, 128): F[:, :, 1]
    mask_L = (lambdaL >= 0.0)[None]
    mask_RL = ((lambdaL < 0.0) & (lambdaRL >= 0.0))[None]
    mask_CL = ((lambdaRL < 0.0) & (lambdaC > 0.0))[None]
    mask_CR = ((lambdaC <= 0.0) & (vshock_s > 0.0))[None]
    mask_R = (vshock_s <= 0.0)[None]

    fluxes = jnp.zeros_like(FL)
    fluxes = jnp.where(mask_L, FL, fluxes)
    fluxes = jnp.where(mask_RL, FRL, fluxes)
    fluxes = jnp.where(mask_CL, FCL, fluxes)
    fluxes = jnp.where(mask_CR, FCR, fluxes)
    fluxes = jnp.where(mask_R, FR, fluxes)
    out_ref[...] = fluxes


# ----------------------------- wrapper ------------------------------------------

def make_params(key, n_ens=N_ENS, hidden=HIDDEN):
    """Synthetic ensemble pressnet parameters (per-member MLP 6 -> H -> H -> 1)."""
    ks = jax.random.split(key, 6)
    w1 = jax.random.normal(ks[0], (n_ens, hidden, 6), jnp.float32) / jnp.sqrt(6.0)
    b1 = 0.1 * jax.random.normal(ks[1], (n_ens, hidden, 1), jnp.float32)
    w2 = jax.random.normal(ks[2], (n_ens, hidden, hidden), jnp.float32) / jnp.sqrt(float(hidden))
    b2 = 0.1 * jax.random.normal(ks[3], (n_ens, hidden, 1), jnp.float32)
    w3 = jax.random.normal(ks[4], (n_ens, 1, hidden), jnp.float32) / jnp.sqrt(float(hidden))
    b3 = 0.1 * jax.random.normal(ks[5], (n_ens, 1, 1), jnp.float32)
    return (w1, b1, w2, b2, w3, b3)


def fuse_params(params):
    """Fuse the E-member MLP into 3 matmuls: stacked W1 (layer-1 bias folded as an
    extra input column), block-diagonal W2, stacked W3. Weights are bf16 (matmul
    operands); remaining biases stay f32 (added after the f32 MXU accumulation)."""
    w1, b1, w2, b2, w3, b3 = params
    E, H, Fin = w1.shape
    W1f = jnp.concatenate([w1.reshape(E * H, Fin), b1.reshape(E * H, 1)],
                          axis=1).astype(jnp.bfloat16)               # (E*H, Fin+1)
    W2f = jnp.zeros((E * H, E * H), jnp.float32)
    for e in range(E):
        W2f = W2f.at[e * H:(e + 1) * H, e * H:(e + 1) * H].set(w2[e])
    W2f = W2f.astype(jnp.bfloat16)
    b2f = b2.reshape(E * H, 1).astype(jnp.float32)
    W3f = jnp.zeros((E, E * H), jnp.float32)
    for e in range(E):
        W3f = W3f.at[e, e * H:(e + 1) * H].set(w3[e, 0])
    W3f = W3f.astype(jnp.bfloat16)
    b3f = b3.reshape(E, 1).astype(jnp.float32)
    return W1f, W2f, b2f, W3f, b3f


def ensemble_raref_shock_solver(P, U, F, cmax, cmin, params, gamma=GAMMA):
    """P, F: (ncells, nvars=3, 2). Returns fluxes (ncells, 3). U/cmax/cmin unused."""
    del U, cmax, cmin
    N = P.shape[0]
    assert N % TILE == 0, "ncells must be a multiple of SUBLANES*128"

    # channel-major, cells last, reshaped into sublane-dense (.., N//128, 128) blocks
    P_t = jnp.transpose(P, (2, 1, 0)).astype(jnp.float32)
    F_t = jnp.transpose(F, (2, 1, 0)).astype(jnp.float32)
    P4 = P_t.reshape(2, 3, N // LANES, LANES)
    F4 = F_t.reshape(2, 3, N // LANES, LANES)

    W1f, W2f, b2f, W3f, b3f = fuse_params(params)
    n_ens = b3f.shape[0]
    n_feat = W1f.shape[1]
    act_dtype = _act_dtype()

    def full_spec(arr):
        nd = arr.ndim
        return pl.BlockSpec(arr.shape, lambda i, _nd=nd: (0,) * _nd)

    out = pl.pallas_call(
        functools.partial(_solver_kernel, gamma=float(gamma), n_ens=n_ens,
                          sub=SUBLANES, act_dtype=act_dtype),
        out_shape=jax.ShapeDtypeStruct((3, N // LANES, LANES), jnp.float32),
        grid_spec=pltpu.PrefetchScalarGridSpec(
            num_scalar_prefetch=0,
            grid=(N // TILE,),
            in_specs=[
                pl.BlockSpec((2, 3, SUBLANES, LANES), lambda i: (0, 0, i, 0)),
                pl.BlockSpec((2, 3, SUBLANES, LANES), lambda i: (0, 0, i, 0)),
                full_spec(W1f), full_spec(W2f), full_spec(b2f),
                full_spec(W3f), full_spec(b3f),
            ],
            out_specs=pl.BlockSpec((3, SUBLANES, LANES), lambda i: (0, i, 0)),
            scratch_shapes=[
                pltpu.VMEM((n_feat, TILE), jnp.float32),        # MLP input slab
                pltpu.VMEM((n_ens, SUBLANES, LANES), jnp.float32),  # xi repack
            ],
        ),
        compiler_params=pltpu.CompilerParams(dimension_semantics=("parallel",)),
    )(P4, F4, W1f, W2f, b2f, W3f, b3f)

    return jnp.transpose(out.reshape(3, N), (1, 0))     # (ncells, nvars)


# ----------------------------- demo ----------------------------------------------

if __name__ == "__main__":
    key = jax.random.PRNGKey(0)
    kP, kF, kW = jax.random.split(key, 3)
    N = 4 * TILE   # 4096 cells -> grid of 4 steps (>= 2 per TensorCore on v7x)

    k1, k2, k3, k4, k5, k6 = jax.random.split(kP, 6)
    rhoL = jax.random.uniform(k1, (N,), minval=0.5, maxval=2.0)
    rhoR = jax.random.uniform(k2, (N,), minval=0.1, maxval=1.0)
    pL = jax.random.uniform(k3, (N,), minval=1.0, maxval=3.0)
    pR = jax.random.uniform(k4, (N,), minval=0.05, maxval=0.5)
    vL = jax.random.uniform(k5, (N,), minval=-0.3, maxval=0.3)
    vR = jax.random.uniform(k6, (N,), minval=-0.3, maxval=0.3)

    P = jnp.stack([jnp.stack([rhoL, rhoR], axis=-1),
                   jnp.stack([pL, pR], axis=-1),
                   jnp.stack([vL, vR], axis=-1)], axis=1).astype(jnp.float32)  # (N,3,2)
    F = jax.random.normal(kF, (N, 3, 2), jnp.float32)
    U = jnp.zeros_like(P)

    params = make_params(kW)
    fluxes = ensemble_raref_shock_solver(P, U, F, 1.0, -1.0, params)
    jax.block_until_ready(fluxes)

    assert fluxes.shape == (N, 3)
    assert bool(jnp.all(jnp.isfinite(fluxes)))
    print("KERNEL_OK")
</pallas_src>

<mosaic_0001>
module attributes {stable_mosaic.version = 11 : i64} {
  func.func @_solver_kernel(%arg0: i32, %arg1: memref<2x3x8x128xf32, #tpu.memory_space<vmem>>, %arg2: memref<2x3x8x128xf32, #tpu.memory_space<vmem>>, %arg3: memref<128x7xbf16, #tpu.memory_space<vmem>>, %arg4: memref<128x128xbf16, #tpu.memory_space<vmem>>, %arg5: memref<128x1xf32, #tpu.memory_space<vmem>>, %arg6: memref<4x128xbf16, #tpu.memory_space<vmem>>, %arg7: memref<4x1xf32, #tpu.memory_space<vmem>>, %arg8: memref<3x8x128xf32, #tpu.memory_space<vmem>>, %arg9: memref<7x1024xf32, #tpu.memory_space<vmem>>, %arg10: memref<4x8x128xf32, #tpu.memory_space<vmem>>) attributes {dimension_semantics = [#tpu.dimension_semantics<parallel>], iteration_bounds = array<i64: 4>, scalar_prefetch = 0 : i64, scratch_operands = 2 : i64, tpu.core_type = #tpu.core_type<tc>, window_params = [{transform_indices = @transform_0, window_bounds = array<i64: 2, 3, 8, 128>}, {transform_indices = @transform_1, window_bounds = array<i64: 2, 3, 8, 128>}, {pipeline_mode = #tpu.pipeline_mode<synchronous>, transform_indices = @transform_2, window_bounds = array<i64: 128, 7>}, {pipeline_mode = #tpu.pipeline_mode<synchronous>, transform_indices = @transform_3, window_bounds = array<i64: 128, 128>}, {pipeline_mode = #tpu.pipeline_mode<synchronous>, transform_indices = @transform_4, window_bounds = array<i64: 128, 1>}, {pipeline_mode = #tpu.pipeline_mode<synchronous>, transform_indices = @transform_5, window_bounds = array<i64: 4, 128>}, {pipeline_mode = #tpu.pipeline_mode<synchronous>, transform_indices = @transform_6, window_bounds = array<i64: 4, 1>}, {transform_indices = @transform_7, window_bounds = array<i64: 3, 8, 128>}]} {
    %c0 = arith.constant 0 : index
    %c0_0 = arith.constant 0 : index
    %c0_1 = arith.constant 0 : index
    %c0_2 = arith.constant 0 : index
    %0 = vector.load %arg1[%c0, %c0_0, %c0_1, %c0_2] : memref<2x3x8x128xf32, #tpu.memory_space<vmem>>, vector<1x3x8x128xf32>
    %1 = vector.shape_cast %0 : vector<1x3x8x128xf32> to vector<3x8x128xf32>
    %c1 = arith.constant 1 : index
    %c0_3 = arith.constant 0 : index
    %c0_4 = arith.constant 0 : index
    %c0_5 = arith.constant 0 : index
    %2 = vector.load %arg1[%c1, %c0_3, %c0_4, %c0_5] : memref<2x3x8x128xf32, #tpu.memory_space<vmem>>, vector<1x3x8x128xf32>
    %3 = vector.shape_cast %2 : vector<1x3x8x128xf32> to vector<3x8x128xf32>
    %4 = vector.extract_strided_slice %1 {offsets = [0, 0, 0], sizes = [1, 8, 128], strides = [1, 1, 1]} : vector<3x8x128xf32> to vector<1x8x128xf32>
    %5 = vector.shape_cast %4 : vector<1x8x128xf32> to vector<8x128xf32>
    %6 = vector.extract_strided_slice %1 {offsets = [1, 0, 0], sizes = [1, 8, 128], strides = [1, 1, 1]} : vector<3x8x128xf32> to vector<1x8x128xf32>
    %7 = vector.shape_cast %6 : vector<1x8x128xf32> to vector<8x128xf32>
    %8 = vector.extract_strided_slice %1 {offsets = [2, 0, 0], sizes = [1, 8, 128], strides = [1, 1, 1]} : vector<3x8x128xf32> to vector<1x8x128xf32>
    %9 = vector.shape_cast %8 : vector<1x8x128xf32> to vector<8x128xf32>
    %10 = vector.extract_strided_slice %3 {offsets = [0, 0, 0], sizes = [1, 8, 128], strides = [1, 1, 1]} : vector<3x8x128xf32> to vector<1x8x128xf32>
    %11 = vector.shape_cast %10 : vector<1x8x128xf32> to vector<8x128xf32>
    %12 = vector.extract_strided_slice %3 {offsets = [1, 0, 0], sizes = [1, 8, 128], strides = [1, 1, 1]} : vector<3x8x128xf32> to vector<1x8x128xf32>
    %13 = vector.shape_cast %12 : vector<1x8x128xf32> to vector<8x128xf32>
    %14 = vector.extract_strided_slice %3 {offsets = [2, 0, 0], sizes = [1, 8, 128], strides = [1, 1, 1]} : vector<3x8x128xf32> to vector<1x8x128xf32>
    %15 = vector.shape_cast %14 : vector<1x8x128xf32> to vector<8x128xf32>
    %16 = math.log %5 : vector<8x128xf32>
    %17 = math.log %7 : vector<8x128xf32>
    %18 = math.log %11 : vector<8x128xf32>
    %19 = math.log %13 : vector<8x128xf32>
    %cst = arith.constant 1.000000e+00 : f32
    %20 = vector.broadcast %cst : f32 to vector<8x128xf32>
    %21 = vector.shape_cast %16 : vector<8x128xf32> to vector<1x8x128xf32>
    %22 = vector.shape_cast %17 : vector<8x128xf32> to vector<1x8x128xf32>
    %23 = vector.shape_cast %18 : vector<8x128xf32> to vector<1x8x128xf32>
    %24 = vector.shape_cast %19 : vector<8x128xf32> to vector<1x8x128xf32>
    %25 = vector.shape_cast %9 : vector<8x128xf32> to vector<1x8x128xf32>
    %26 = vector.shape_cast %15 : vector<8x128xf32> to vector<1x8x128xf32>
    %27 = vector.shape_cast %20 : vector<8x128xf32> to vector<1x8x128xf32>
    %28 = tpu.concatenate %21, %22, %23, %24, %25, %26, %27 in 0 : vector<1x8x128xf32>, vector<1x8x128xf32>, vector<1x8x128xf32>, vector<1x8x128xf32>, vector<1x8x128xf32>, vector<1x8x128xf32>, vector<1x8x128xf32> -> vector<7x8x128xf32>
    %29 = vector.extract_strided_slice %28 {offsets = [0, 0, 0], sizes = [7, 1, 128], strides = [1, 1, 1]} : vector<7x8x128xf32> to vector<7x1x128xf32>
    %30 = vector.shape_cast %29 : vector<7x1x128xf32> to vector<7x128xf32>
    %c0_6 = arith.constant 0 : index
    %c0_7 = arith.constant 0 : index
    %31 = vector.load %arg9[%c0_6, %c0_7] : memref<7x1024xf32, #tpu.memory_space<vmem>>, vector<7x128xf32>
    tpu.vector_store %arg9[%c0_6, %c0_7], %30 {strides = array<i32>} : memref<7x1024xf32, #tpu.memory_space<vmem>>, vector<7x128xf32>,
    %32 = vector.extract_strided_slice %28 {offsets = [0, 1, 0], sizes = [7, 1, 128], strides = [1, 1, 1]} : vector<7x8x128xf32> to vector<7x1x128xf32>
    %33 = vector.shape_cast %32 : vector<7x1x128xf32> to vector<7x128xf32>
    %c0_8 = arith.constant 0 : index
    %c128 = arith.constant 128 : index
    %34 = vector.load %arg9[%c0_8, %c128] : memref<7x1024xf32, #tpu.memory_space<vmem>>, vector<7x128xf32>
    tpu.vector_store %arg9[%c0_8, %c128], %33 {strides = array<i32>} : memref<7x1024xf32, #tpu.memory_space<vmem>>, vector<7x128xf32>,
    %35 = vector.extract_strided_slice %28 {offsets = [0, 2, 0], sizes = [7, 1, 128], strides = [1, 1, 1]} : vector<7x8x128xf32> to vector<7x1x128xf32>
    %36 = vector.shape_cast %35 : vector<7x1x128xf32> to vector<7x128xf32>
    %c0_9 = arith.constant 0 : index
    %c256 = arith.constant 256 : index
    %37 = vector.load %arg9[%c0_9, %c256] : memref<7x1024xf32, #tpu.memory_space<vmem>>, vector<7x128xf32>
    tpu.vector_store %arg9[%c0_9, %c256], %36 {strides = array<i32>} : memref<7x1024xf32, #tpu.memory_space<vmem>>, vector<7x128xf32>,
    %38 = vector.extract_strided_slice %28 {offsets = [0, 3, 0], sizes = [7, 1, 128], strides = [1, 1, 1]} : vector<7x8x128xf32> to vector<7x1x128xf32>
    %39 = vector.shape_cast %38 : vector<7x1x128xf32> to vector<7x128xf32>
    %c0_10 = arith.constant 0 : index
    %c384 = arith.constant 384 : index
    %40 = vector.load %arg9[%c0_10, %c384] : memref<7x1024xf32, #tpu.memory_space<vmem>>, vector<7x128xf32>
    tpu.vector_store %arg9[%c0_10, %c384], %39 {strides = array<i32>} : memref<7x1024xf32, #tpu.memory_space<vmem>>, vector<7x128xf32>,
    %41 = vector.extract_strided_slice %28 {offsets = [0, 4, 0], sizes = [7, 1, 128], strides = [1, 1, 1]} : vector<7x8x128xf32> to vector<7x1x128xf32>
    %42 = vector.shape_cast %41 : vector<7x1x128xf32> to vector<7x128xf32>
    %c0_11 = arith.constant 0 : index
    %c512 = arith.constant 512 : index
    %43 = vector.load %arg9[%c0_11, %c512] : memref<7x1024xf32, #tpu.memory_space<vmem>>, vector<7x128xf32>
    tpu.vector_store %arg9[%c0_11, %c512], %42 {strides = array<i32>} : memref<7x1024xf32, #tpu.memory_space<vmem>>, vector<7x128xf32>,
    %44 = vector.extract_strided_slice %28 {offsets = [0, 5, 0], sizes = [7, 1, 128], strides = [1, 1, 1]} : vector<7x8x128xf32> to vector<7x1x128xf32>
    %45 = vector.shape_cast %44 : vector<7x1x128xf32> to vector<7x128xf32>
    %c0_12 = arith.constant 0 : index
    %c640 = arith.constant 640 : index
    %46 = vector.load %arg9[%c0_12, %c640] : memref<7x1024xf32, #tpu.memory_space<vmem>>, vector<7x128xf32>
    tpu.vector_store %arg9[%c0_12, %c640], %45 {strides = array<i32>} : memref<7x1024xf32, #tpu.memory_space<vmem>>, vector<7x128xf32>,
    %47 = vector.extract_strided_slice %28 {offsets = [0, 6, 0], sizes = [7, 1, 128], strides = [1, 1, 1]} : vector<7x8x128xf32> to vector<7x1x128xf32>
    %48 = vector.shape_cast %47 : vector<7x1x128xf32> to vector<7x128xf32>
    %c0_13 = arith.constant 0 : index
    %c768 = arith.constant 768 : index
    %49 = vector.load %arg9[%c0_13, %c768] : memref<7x1024xf32, #tpu.memory_space<vmem>>, vector<7x128xf32>
    tpu.vector_store %arg9[%c0_13, %c768], %48 {strides = array<i32>} : memref<7x1024xf32, #tpu.memory_space<vmem>>, vector<7x128xf32>,
    %50 = vector.extract_strided_slice %28 {offsets = [0, 7, 0], sizes = [7, 1, 128], strides = [1, 1, 1]} : vector<7x8x128xf32> to vector<7x1x128xf32>
    %51 = vector.shape_cast %50 : vector<7x1x128xf32> to vector<7x128xf32>
    %c0_14 = arith.constant 0 : index
    %c896 = arith.constant 896 : index
    %52 = vector.load %arg9[%c0_14, %c896] : memref<7x1024xf32, #tpu.memory_space<vmem>>, vector<7x128xf32>
    tpu.vector_store %arg9[%c0_14, %c896], %51 {strides = array<i32>} : memref<7x1024xf32, #tpu.memory_space<vmem>>, vector<7x128xf32>,
    %c0_15 = arith.constant 0 : index
    %c0_16 = arith.constant 0 : index
    %53 = vector.load %arg9[%c0_15, %c0_16] : memref<7x1024xf32, #tpu.memory_space<vmem>>, vector<7x1024xf32>
    %54 = arith.truncf %53 : vector<7x1024xf32> to vector<7x1024xbf16>
    %c0_17 = arith.constant 0 : index
    %c0_18 = arith.constant 0 : index
    %55 = vector.load %arg3[%c0_17, %c0_18] : memref<128x7xbf16, #tpu.memory_space<vmem>>, vector<128x7xbf16>
    %cst_19 = arith.constant dense<0.000000e+00> : vector<128x1024xf32>
    %56 = tpu.matmul %55, %54, %cst_19 {dimension_numbers = #tpu.dot_dimension_numbers<[1], [0], [0], [1], [0, 0, 1, 1], [], []>} : vector<128x7xbf16>, vector<7x1024xbf16>, vector<128x1024xf32> -> vector<128x1024xf32>
    %57 = arith.truncf %56 : vector<128x1024xf32> to vector<128x1024xbf16>
    %58 = math.tanh %57 : vector<128x1024xbf16>
    %c0_20 = arith.constant 0 : index
    %c0_21 = arith.constant 0 : index
    %59 = vector.load %arg4[%c0_20, %c0_21] : memref<128x128xbf16, #tpu.memory_space<vmem>>, vector<128x128xbf16>
    %cst_22 = arith.constant dense<0.000000e+00> : vector<128x1024xf32>
    %60 = tpu.matmul %59, %58, %cst_22 {dimension_numbers = #tpu.dot_dimension_numbers<[1], [0], [0], [1], [0, 0, 1, 1], [], []>} : vector<128x128xbf16>, vector<128x1024xbf16>, vector<128x1024xf32> -> vector<128x1024xf32>
    %c0_23 = arith.constant 0 : index
    %c0_24 = arith.constant 0 : index
    %61 = vector.load %arg5[%c0_23, %c0_24] : memref<128x1xf32, #tpu.memory_space<vmem>>, vector<128x1xf32>
    %62 = vector.broadcast %61 : vector<128x1xf32> to vector<128x1024xf32>
    %63 = arith.addf %60, %62 : vector<128x1024xf32>
    %64 = arith.truncf %63 : vector<128x1024xf32> to vector<128x1024xbf16>
    %65 = math.tanh %64 : vector<128x1024xbf16>
    %c0_25 = arith.constant 0 : index
    %c0_26 = arith.constant 0 : index
    %66 = vector.load %arg6[%c0_25, %c0_26] : memref<4x128xbf16, #tpu.memory_space<vmem>>, vector<4x128xbf16>
    %cst_27 = arith.constant dense<0.000000e+00> : vector<4x1024xf32>
    %67 = tpu.matmul %66, %65, %cst_27 {dimension_numbers = #tpu.dot_dimension_numbers<[1], [0], [0], [1], [0, 0, 1, 1], [], []>} : vector<4x128xbf16>, vector<128x1024xbf16>, vector<4x1024xf32> -> vector<4x1024xf32>
    %c0_28 = arith.constant 0 : index
    %c0_29 = arith.constant 0 : index
    %68 = vector.load %arg7[%c0_28, %c0_29] : memref<4x1xf32, #tpu.memory_space<vmem>>, vector<4x1xf32>
    %69 = vector.broadcast %68 : vector<4x1xf32> to vector<4x1024xf32>
    %70 = arith.addf %67, %69 : vector<4x1024xf32>
    %71 = arith.negf %70 : vector<4x1024xf32>
    %72 = math.exp %71 : vector<4x1024xf32>
    %cst_30 = arith.constant 1.000000e+00 : f32
    %73 = vector.broadcast %cst_30 : f32 to vector<4x1024xf32>
    %74 = arith.addf %73, %72 : vector<4x1024xf32>
    %75 = arith.divf %73, %74 : vector<4x1024xf32>
    %76 = vector.extract_strided_slice %75 {offsets = [0, 0], sizes = [4, 128], strides = [1, 1]} : vector<4x1024xf32> to vector<4x128xf32>
    %c0_31 = arith.constant 0 : index
    %c0_32 = arith.constant 0 : index
    %c0_33 = arith.constant 0 : index
    %77 = vector.load %arg10[%c0_31, %c0_32, %c0_33] : memref<4x8x128xf32, #tpu.memory_space<vmem>>, vector<4x1x128xf32>
    %78 = vector.shape_cast %77 : vector<4x1x128xf32> to vector<4x128xf32>
    %79 = vector.shape_cast %76 : vector<4x128xf32> to vector<4x1x128xf32>
    tpu.vector_store %arg10[%c0_31, %c0_32, %c0_33], %79 {strides = array<i32>} : memref<4x8x128xf32, #tpu.memory_space<vmem>>, vector<4x1x128xf32>,
    %80 = vector.extract_strided_slice %75 {offsets = [0, 128], sizes = [4, 128], strides = [1, 1]} : vector<4x1024xf32> to vector<4x128xf32>
    %c0_34 = arith.constant 0 : index
    %c1_35 = arith.constant 1 : index
    %c0_36 = arith.constant 0 : index
    %81 = vector.load %arg10[%c0_34, %c1_35, %c0_36] : memref<4x8x128xf32, #tpu.memory_space<vmem>>, vector<4x1x128xf32>
    %82 = vector.shape_cast %81 : vector<4x1x128xf32> to vector<4x128xf32>
    %83 = vector.shape_cast %80 : vector<4x128xf32> to vector<4x1x128xf32>
    tpu.vector_store %arg10[%c0_34, %c1_35, %c0_36], %83 {strides = array<i32>} : memref<4x8x128xf32, #tpu.memory_space<vmem>>, vector<4x1x128xf32>,
    %84 = vector.extract_strided_slice %75 {offsets = [0, 256], sizes = [4, 128], strides = [1, 1]} : vector<4x1024xf32> to vector<4x128xf32>
    %c0_37 = arith.constant 0 : index
    %c2 = arith.constant 2 : index
    %c0_38 = arith.constant 0 : index
    %85 = vector.load %arg10[%c0_37, %c2, %c0_38] : memref<4x8x128xf32, #tpu.memory_space<vmem>>, vector<4x1x128xf32>
    %86 = vector.shape_cast %85 : vector<4x1x128xf32> to vector<4x128xf32>
    %87 = vector.shape_cast %84 : vector<4x128xf32> to vector<4x1x128xf32>
    tpu.vector_store %arg10[%c0_37, %c2, %c0_38], %87 {strides = array<i32>} : memref<4x8x128xf32, #tpu.memory_space<vmem>>, vector<4x1x128xf32>,
    %88 = vector.extract_strided_slice %75 {offsets = [0, 384], sizes = [4, 128], strides = [1, 1]} : vector<4x1024xf32> to vector<4x128xf32>
    %c0_39 = arith.constant 0 : index
    %c3 = arith.constant 3 : index
    %c0_40 = arith.constant 0 : index
    %89 = vector.load %arg10[%c0_39, %c3, %c0_40] : memref<4x8x128xf32, #tpu.memory_space<vmem>>, vector<4x1x128xf32>
    %90 = vector.shape_cast %89 : vector<4x1x128xf32> to vector<4x128xf32>
    %91 = vector.shape_cast %88 : vector<4x128xf32> to vector<4x1x128xf32>
    tpu.vector_store %arg10[%c0_39, %c3, %c0_40], %91 {strides = array<i32>} : memref<4x8x128xf32, #tpu.memory_space<vmem>>, vector<4x1x128xf32>,
    %92 = vector.extract_strided_slice %75 {offsets = [0, 512], sizes = [4, 128], strides = [1, 1]} : vector<4x1024xf32> to vector<4x128xf32>
    %c0_41 = arith.constant 0 : index
    %c4 = arith.constant 4 : index
    %c0_42 = arith.constant 0 : index
    %93 = vector.load %arg10[%c0_41, %c4, %c0_42] : memref<4x8x128xf32, #tpu.memory_space<vmem>>, vector<4x1x128xf32>
    %94 = vector.shape_cast %93 : vector<4x1x128xf32> to vector<4x128xf32>
    %95 = vector.shape_cast %92 : vector<4x128xf32> to vector<4x1x128xf32>
    tpu.vector_store %arg10[%c0_41, %c4, %c0_42], %95 {strides = array<i32>} : memref<4x8x128xf32, #tpu.memory_space<vmem>>, vector<4x1x128xf32>,
    %96 = vector.extract_strided_slice %75 {offsets = [0, 640], sizes = [4, 128], strides = [1, 1]} : vector<4x1024xf32> to vector<4x128xf32>
    %c0_43 = arith.constant 0 : index
    %c5 = arith.constant 5 : index
    %c0_44 = arith.constant 0 : index
    %97 = vector.load %arg10[%c0_43, %c5, %c0_44] : memref<4x8x128xf32, #tpu.memory_space<vmem>>, vector<4x1x128xf32>
    %98 = vector.shape_cast %97 : vector<4x1x128xf32> to vector<4x128xf32>
    %99 = vector.shape_cast %96 : vector<4x128xf32> to vector<4x1x128xf32>
    tpu.vector_store %arg10[%c0_43, %c5, %c0_44], %99 {strides = array<i32>} : memref<4x8x128xf32, #tpu.memory_space<vmem>>, vector<4x1x128xf32>,
    %100 = vector.extract_strided_slice %75 {offsets = [0, 768], sizes = [4, 128], strides = [1, 1]} : vector<4x1024xf32> to vector<4x128xf32>
    %c0_45 = arith.constant 0 : index
    %c6 = arith.constant 6 : index
    %c0_46 = arith.constant 0 : index
    %101 = vector.load %arg10[%c0_45, %c6, %c0_46] : memref<4x8x128xf32, #tpu.memory_space<vmem>>, vector<4x1x128xf32>
    %102 = vector.shape_cast %101 : vector<4x1x128xf32> to vector<4x128xf32>
    %103 = vector.shape_cast %100 : vector<4x128xf32> to vector<4x1x128xf32>
    tpu.vector_store %arg10[%c0_45, %c6, %c0_46], %103 {strides = array<i32>} : memref<4x8x128xf32, #tpu.memory_space<vmem>>, vector<4x1x128xf32>,
    %104 = vector.extract_strided_slice %75 {offsets = [0, 896], sizes = [4, 128], strides = [1, 1]} : vector<4x1024xf32> to vector<4x128xf32>
    %c0_47 = arith.constant 0 : index
    %c7 = arith.constant 7 : index
    %c0_48 = arith.constant 0 : index
    %105 = vector.load %arg10[%c0_47, %c7, %c0_48] : memref<4x8x128xf32, #tpu.memory_space<vmem>>, vector<4x1x128xf32>
    %106 = vector.shape_cast %105 : vector<4x1x128xf32> to vector<4x128xf32>
    %107 = vector.shape_cast %104 : vector<4x128xf32> to vector<4x1x128xf32>
    tpu.vector_store %arg10[%c0_47, %c7, %c0_48], %107 {strides = array<i32>} : memref<4x8x128xf32, #tpu.memory_space<vmem>>, vector<4x1x128xf32>,
    %cst_49 = arith.constant 2.500000e+00 : f32
    %108 = vector.broadcast %cst_49 : f32 to vector<8x128xf32>
    %109 = arith.mulf %108, %7 : vector<8x128xf32>
    %110 = arith.divf %109, %5 : vector<8x128xf32>
    %cst_50 = arith.constant 1.000000e+00 : f32
    %111 = vector.broadcast %cst_50 : f32 to vector<8x128xf32>
    %112 = arith.addf %111, %110 : vector<8x128xf32>
    %cst_51 = arith.constant 1.66666663 : f32
    %113 = vector.broadcast %cst_51 : f32 to vector<8x128xf32>
    %114 = arith.mulf %113, %7 : vector<8x128xf32>
    %115 = arith.mulf %5, %112 : vector<8x128xf32>
    %116 = arith.divf %114, %115 : vector<8x128xf32>
    %117 = math.sqrt %116 : vector<8x128xf32>
    %cst_52 = arith.constant 0.816496611 : f32
    %118 = vector.broadcast %cst_52 : f32 to vector<8x128xf32>
    %119 = arith.addf %118, %117 : vector<8x128xf32>
    %120 = math.log %119 : vector<8x128xf32>
    %cst_53 = arith.constant 0.816496611 : f32
    %121 = vector.broadcast %cst_53 : f32 to vector<8x128xf32>
    %122 = arith.subf %121, %117 : vector<8x128xf32>
    %123 = math.log %122 : vector<8x128xf32>
    %124 = arith.subf %120, %123 : vector<8x128xf32>
    %cst_54 = arith.constant 1.000000e+00 : f32
    %125 = vector.broadcast %cst_54 : f32 to vector<8x128xf32>
    %126 = arith.addf %125, %9 : vector<8x128xf32>
    %cst_55 = arith.constant 1.000000e+00 : f32
    %127 = vector.broadcast %cst_55 : f32 to vector<8x128xf32>
    %128 = arith.subf %127, %9 : vector<8x128xf32>
    %129 = arith.subf %7, %13 : vector<8x128xf32>
    %130 = tpu.reciprocal %11 {approx = true} : vector<8x128xf32> -> vector<8x128xf32>
    %cst_56 = arith.constant 2.500000e+00 : f32
    %131 = vector.broadcast %cst_56 : f32 to vector<8x128xf32>
    %132 = arith.mulf %131, %13 : vector<8x128xf32>
    %133 = arith.mulf %132, %130 : vector<8x128xf32>
    %cst_57 = arith.constant 1.000000e+00 : f32
    %134 = vector.broadcast %cst_57 : f32 to vector<8x128xf32>
    %135 = arith.addf %134, %133 : vector<8x128xf32>
    %136 = arith.mulf %15, %15 : vector<8x128xf32>
    %cst_58 = arith.constant 1.000000e+00 : f32
    %137 = vector.broadcast %cst_58 : f32 to vector<8x128xf32>
    %138 = arith.subf %137, %136 : vector<8x128xf32>
    %139 = math.rsqrt %138 : vector<8x128xf32>
    %140 = arith.mulf %11, %139 : vector<8x128xf32>
    %141 = arith.mulf %140, %140 : vector<8x128xf32>
    %142 = arith.mulf %135, %139 : vector<8x128xf32>
    %143 = arith.mulf %142, %15 : vector<8x128xf32>
    %144 = math.sqrt %138 : vector<8x128xf32>
    %145 = arith.mulf %130, %144 : vector<8x128xf32>
    %c0_59 = arith.constant 0 : index
    %c0_60 = arith.constant 0 : index
    %c0_61 = arith.constant 0 : index
    %146 = vector.load %arg10[%c0_59, %c0_60, %c0_61] : memref<4x8x128xf32, #tpu.memory_space<vmem>>, vector<1x8x128xf32>
    %147 = vector.shape_cast %146 : vector<1x8x128xf32> to vector<8x128xf32>
    %148 = arith.mulf %129, %147 : vector<8x128xf32>
    %149 = arith.addf %13, %148 : vector<8x128xf32>
    %150 = math.log %149 : vector<8x128xf32>
    %151 = arith.subf %150, %17 : vector<8x128xf32>
    %cst_62 = arith.constant 6.000000e-01 : f32
    %152 = vector.broadcast %cst_62 : f32 to vector<8x128xf32>
    %153 = arith.mulf %151, %152 : vector<8x128xf32>
    %154 = arith.addf %16, %153 : vector<8x128xf32>
    %155 = math.exp %154 : vector<8x128xf32>
    %156 = arith.subf %150, %154 : vector<8x128xf32>
    %157 = math.exp %156 : vector<8x128xf32>
    %cst_63 = arith.constant 2.500000e+00 : f32
    %158 = vector.broadcast %cst_63 : f32 to vector<8x128xf32>
    %159 = arith.mulf %158, %157 : vector<8x128xf32>
    %cst_64 = arith.constant 1.000000e+00 : f32
    %160 = vector.broadcast %cst_64 : f32 to vector<8x128xf32>
    %161 = arith.addf %160, %159 : vector<8x128xf32>
    %cst_65 = arith.constant 1.66666663 : f32
    %162 = vector.broadcast %cst_65 : f32 to vector<8x128xf32>
    %163 = arith.mulf %162, %157 : vector<8x128xf32>
    %164 = arith.divf %163, %161 : vector<8x128xf32>
    %165 = math.sqrt %164 : vector<8x128xf32>
    %cst_66 = arith.constant 0.816496611 : f32
    %166 = vector.broadcast %cst_66 : f32 to vector<8x128xf32>
    %167 = arith.subf %166, %165 : vector<8x128xf32>
    %168 = math.log %167 : vector<8x128xf32>
    %169 = arith.addf %124, %168 : vector<8x128xf32>
    %cst_67 = arith.constant 0.816496611 : f32
    %170 = vector.broadcast %cst_67 : f32 to vector<8x128xf32>
    %171 = arith.addf %170, %165 : vector<8x128xf32>
    %172 = math.log %171 : vector<8x128xf32>
    %173 = arith.subf %169, %172 : vector<8x128xf32>
    %cst_68 = arith.constant 2.44948983 : f32
    %174 = vector.broadcast %cst_68 : f32 to vector<8x128xf32>
    %175 = arith.mulf %174, %173 : vector<8x128xf32>
    %176 = math.exp %175 : vector<8x128xf32>
    %177 = arith.mulf %126, %176 : vector<8x128xf32>
    %178 = arith.subf %177, %128 : vector<8x128xf32>
    %179 = arith.addf %177, %128 : vector<8x128xf32>
    %180 = tpu.reciprocal %179 {approx = true} : vector<8x128xf32> -> vector<8x128xf32>
    %181 = arith.mulf %178, %180 : vector<8x128xf32>
    %182 = arith.subf %149, %13 : vector<8x128xf32>
    %cst_69 = arith.constant 2.500000e+00 : f32
    %183 = vector.broadcast %cst_69 : f32 to vector<8x128xf32>
    %184 = arith.mulf %183, %149 : vector<8x128xf32>
    %185 = tpu.reciprocal %184 {approx = true} : vector<8x128xf32> -> vector<8x128xf32>
    %186 = arith.mulf %182, %185 : vector<8x128xf32>
    %cst_70 = arith.constant 1.000000e+00 : f32
    %187 = vector.broadcast %cst_70 : f32 to vector<8x128xf32>
    %188 = arith.subf %187, %186 : vector<8x128xf32>
    %189 = arith.mulf %182, %185 : vector<8x128xf32>
    %190 = arith.mulf %135, %135 : vector<8x128xf32>
    %191 = arith.mulf %135, %182 : vector<8x128xf32>
    %192 = arith.mulf %191, %130 : vector<8x128xf32>
    %193 = arith.addf %190, %192 : vector<8x128xf32>
    %cst_71 = arith.constant 0.000000e+00 : f32
    %194 = vector.broadcast %cst_71 : f32 to vector<8x128xf32>
    %195 = arith.subf %194, %193 : vector<8x128xf32>
    %196 = arith.mulf %189, %189 : vector<8x128xf32>
    %cst_72 = arith.constant 4.000000e+00 : f32
    %197 = vector.broadcast %cst_72 : f32 to vector<8x128xf32>
    %198 = arith.mulf %197, %188 : vector<8x128xf32>
    %199 = arith.mulf %198, %195 : vector<8x128xf32>
    %200 = arith.subf %196, %199 : vector<8x128xf32>
    %cst_73 = arith.constant 0.000000e+00 : f32
    %201 = vector.broadcast %cst_73 : f32 to vector<8x128xf32>
    %202 = arith.maximumf %200, %201 : vector<8x128xf32>
    %cst_74 = arith.constant 0.000000e+00 : f32
    %203 = vector.broadcast %cst_74 : f32 to vector<8x128xf32>
    %204 = arith.cmpf oge, %188, %203 : vector<8x128xf32>
    %cst_75 = arith.constant 9.99999996E-13 : f32
    %205 = vector.broadcast %cst_75 : f32 to vector<8x128xf32>
    %206 = arith.maximumf %188, %205 : vector<8x128xf32>
    %cst_76 = arith.constant -9.99999996E-13 : f32
    %207 = vector.broadcast %cst_76 : f32 to vector<8x128xf32>
    %208 = arith.minimumf %188, %207 : vector<8x128xf32>
    %209 = arith.select %204, %206, %208 : vector<8x128xi1>, vector<8x128xf32>
    %cst_77 = arith.constant 0.000000e+00 : f32
    %210 = vector.broadcast %cst_77 : f32 to vector<8x128xf32>
    %211 = arith.subf %210, %189 : vector<8x128xf32>
    %212 = math.sqrt %202 : vector<8x128xf32>
    %213 = arith.addf %211, %212 : vector<8x128xf32>
    %cst_78 = arith.constant 2.000000e+00 : f32
    %214 = vector.broadcast %cst_78 : f32 to vector<8x128xf32>
    %215 = arith.mulf %214, %209 : vector<8x128xf32>
    %216 = arith.divf %213, %215 : vector<8x128xf32>
    %cst_79 = arith.constant 2.500000e+00 : f32
    %217 = vector.broadcast %cst_79 : f32 to vector<8x128xf32>
    %218 = arith.mulf %217, %149 : vector<8x128xf32>
    %cst_80 = arith.constant 1.000000e+00 : f32
    %219 = vector.broadcast %cst_80 : f32 to vector<8x128xf32>
    %220 = arith.subf %216, %219 : vector<8x128xf32>
    %221 = arith.divf %218, %220 : vector<8x128xf32>
    %222 = arith.mulf %135, %130 : vector<8x128xf32>
    %cst_81 = arith.constant 1.000000e+00 : f32
    %223 = vector.broadcast %cst_81 : f32 to vector<8x128xf32>
    %224 = arith.subf %216, %223 : vector<8x128xf32>
    %225 = arith.mulf %216, %224 : vector<8x128xf32>
    %226 = arith.mulf %225, %185 : vector<8x128xf32>
    %227 = arith.subf %222, %226 : vector<8x128xf32>
    %cst_82 = arith.constant 9.99999996E-13 : f32
    %228 = vector.broadcast %cst_82 : f32 to vector<8x128xf32>
    %229 = arith.maximumf %227, %228 : vector<8x128xf32>
    %cst_83 = arith.constant 9.99999996E-13 : f32
    %230 = vector.broadcast %cst_83 : f32 to vector<8x128xf32>
    %231 = arith.maximumf %182, %230 : vector<8x128xf32>
    %232 = arith.divf %231, %229 : vector<8x128xf32>
    %233 = math.sqrt %232 : vector<8x128xf32>
    %234 = arith.mulf %141, %15 : vector<8x128xf32>
    %235 = arith.mulf %233, %233 : vector<8x128xf32>
    %236 = arith.mulf %141, %138 : vector<8x128xf32>
    %237 = arith.addf %235, %236 : vector<8x128xf32>
    %238 = math.sqrt %237 : vector<8x128xf32>
    %239 = arith.mulf %233, %238 : vector<8x128xf32>
    %240 = arith.addf %234, %239 : vector<8x128xf32>
    %241 = arith.mulf %233, %233 : vector<8x128xf32>
    %242 = arith.addf %141, %241 : vector<8x128xf32>
    %243 = arith.divf %240, %242 : vector<8x128xf32>
    %244 = arith.mulf %243, %243 : vector<8x128xf32>
    %cst_84 = arith.constant 1.000000e+00 : f32
    %245 = vector.broadcast %cst_84 : f32 to vector<8x128xf32>
    %246 = arith.subf %245, %244 : vector<8x128xf32>
    %cst_85 = arith.constant 9.99999996E-13 : f32
    %247 = vector.broadcast %cst_85 : f32 to vector<8x128xf32>
    %248 = arith.maximumf %246, %247 : vector<8x128xf32>
    %249 = math.rsqrt %248 : vector<8x128xf32>
    %250 = tpu.reciprocal %233 {approx = true} : vector<8x128xf32> -> vector<8x128xf32>
    %251 = arith.mulf %249, %182 : vector<8x128xf32>
    %252 = arith.mulf %251, %250 : vector<8x128xf32>
    %253 = arith.addf %143, %252 : vector<8x128xf32>
    %254 = arith.mulf %249, %15 : vector<8x128xf32>
    %255 = arith.mulf %254, %250 : vector<8x128xf32>
    %256 = arith.addf %255, %145 : vector<8x128xf32>
    %257 = arith.mulf %182, %256 : vector<8x128xf32>
    %258 = arith.addf %142, %257 : vector<8x128xf32>
    %259 = arith.divf %253, %258 : vector<8x128xf32>
    %260 = arith.subf %181, %259 : vector<8x128xf32>
    %261 = math.absf %260 : vector<8x128xf32>
    %262 = arith.addf %259, %181 : vector<8x128xf32>
    %cst_86 = arith.constant 5.000000e-01 : f32
    %263 = vector.broadcast %cst_86 : f32 to vector<8x128xf32>
    %264 = arith.mulf %263, %262 : vector<8x128xf32>
    %c1_87 = arith.constant 1 : index
    %c0_88 = arith.constant 0 : index
    %c0_89 = arith.constant 0 : index
    %265 = vector.load %arg10[%c1_87, %c0_88, %c0_89] : memref<4x8x128xf32, #tpu.memory_space<vmem>>, vector<1x8x128xf32>
    %266 = vector.shape_cast %265 : vector<1x8x128xf32> to vector<8x128xf32>
    %267 = arith.mulf %129, %266 : vector<8x128xf32>
    %268 = arith.addf %13, %267 : vector<8x128xf32>
    %269 = math.log %268 : vector<8x128xf32>
    %270 = arith.subf %269, %17 : vector<8x128xf32>
    %cst_90 = arith.constant 6.000000e-01 : f32
    %271 = vector.broadcast %cst_90 : f32 to vector<8x128xf32>
    %272 = arith.mulf %270, %271 : vector<8x128xf32>
    %273 = arith.addf %16, %272 : vector<8x128xf32>
    %274 = math.exp %273 : vector<8x128xf32>
    %275 = arith.subf %269, %273 : vector<8x128xf32>
    %276 = math.exp %275 : vector<8x128xf32>
    %cst_91 = arith.constant 2.500000e+00 : f32
    %277 = vector.broadcast %cst_91 : f32 to vector<8x128xf32>
    %278 = arith.mulf %277, %276 : vector<8x128xf32>
    %cst_92 = arith.constant 1.000000e+00 : f32
    %279 = vector.broadcast %cst_92 : f32 to vector<8x128xf32>
    %280 = arith.addf %279, %278 : vector<8x128xf32>
    %cst_93 = arith.constant 1.66666663 : f32
    %281 = vector.broadcast %cst_93 : f32 to vector<8x128xf32>
    %282 = arith.mulf %281, %276 : vector<8x128xf32>
    %283 = arith.divf %282, %280 : vector<8x128xf32>
    %284 = math.sqrt %283 : vector<8x128xf32>
    %cst_94 = arith.constant 0.816496611 : f32
    %285 = vector.broadcast %cst_94 : f32 to vector<8x128xf32>
    %286 = arith.subf %285, %284 : vector<8x128xf32>
    %287 = math.log %286 : vector<8x128xf32>
    %288 = arith.addf %124, %287 : vector<8x128xf32>
    %cst_95 = arith.constant 0.816496611 : f32
    %289 = vector.broadcast %cst_95 : f32 to vector<8x128xf32>
    %290 = arith.addf %289, %284 : vector<8x128xf32>
    %291 = math.log %290 : vector<8x128xf32>
    %292 = arith.subf %288, %291 : vector<8x128xf32>
    %cst_96 = arith.constant 2.44948983 : f32
    %293 = vector.broadcast %cst_96 : f32 to vector<8x128xf32>
    %294 = arith.mulf %293, %292 : vector<8x128xf32>
    %295 = math.exp %294 : vector<8x128xf32>
    %296 = arith.mulf %126, %295 : vector<8x128xf32>
    %297 = arith.subf %296, %128 : vector<8x128xf32>
    %298 = arith.addf %296, %128 : vector<8x128xf32>
    %299 = tpu.reciprocal %298 {approx = true} : vector<8x128xf32> -> vector<8x128xf32>
    %300 = arith.mulf %297, %299 : vector<8x128xf32>
    %301 = arith.subf %268, %13 : vector<8x128xf32>
    %cst_97 = arith.constant 2.500000e+00 : f32
    %302 = vector.broadcast %cst_97 : f32 to vector<8x128xf32>
    %303 = arith.mulf %302, %268 : vector<8x128xf32>
    %304 = tpu.reciprocal %303 {approx = true} : vector<8x128xf32> -> vector<8x128xf32>
    %305 = arith.mulf %301, %304 : vector<8x128xf32>
    %cst_98 = arith.constant 1.000000e+00 : f32
    %306 = vector.broadcast %cst_98 : f32 to vector<8x128xf32>
    %307 = arith.subf %306, %305 : vector<8x128xf32>
    %308 = arith.mulf %301, %304 : vector<8x128xf32>
    %309 = arith.mulf %135, %135 : vector<8x128xf32>
    %310 = arith.mulf %135, %301 : vector<8x128xf32>
    %311 = arith.mulf %310, %130 : vector<8x128xf32>
    %312 = arith.addf %309, %311 : vector<8x128xf32>
    %cst_99 = arith.constant 0.000000e+00 : f32
    %313 = vector.broadcast %cst_99 : f32 to vector<8x128xf32>
    %314 = arith.subf %313, %312 : vector<8x128xf32>
    %315 = arith.mulf %308, %308 : vector<8x128xf32>
    %cst_100 = arith.constant 4.000000e+00 : f32
    %316 = vector.broadcast %cst_100 : f32 to vector<8x128xf32>
    %317 = arith.mulf %316, %307 : vector<8x128xf32>
    %318 = arith.mulf %317, %314 : vector<8x128xf32>
    %319 = arith.subf %315, %318 : vector<8x128xf32>
    %cst_101 = arith.constant 0.000000e+00 : f32
    %320 = vector.broadcast %cst_101 : f32 to vector<8x128xf32>
    %321 = arith.maximumf %319, %320 : vector<8x128xf32>
    %cst_102 = arith.constant 0.000000e+00 : f32
    %322 = vector.broadcast %cst_102 : f32 to vector<8x128xf32>
    %323 = arith.cmpf oge, %307, %322 : vector<8x128xf32>
    %cst_103 = arith.constant 9.99999996E-13 : f32
    %324 = vector.broadcast %cst_103 : f32 to vector<8x128xf32>
    %325 = arith.maximumf %307, %324 : vector<8x128xf32>
    %cst_104 = arith.constant -9.99999996E-13 : f32
    %326 = vector.broadcast %cst_104 : f32 to vector<8x128xf32>
    %327 = arith.minimumf %307, %326 : vector<8x128xf32>
    %328 = arith.select %323, %325, %327 : vector<8x128xi1>, vector<8x128xf32>
    %cst_105 = arith.constant 0.000000e+00 : f32
    %329 = vector.broadcast %cst_105 : f32 to vector<8x128xf32>
    %330 = arith.subf %329, %308 : vector<8x128xf32>
    %331 = math.sqrt %321 : vector<8x128xf32>
    %332 = arith.addf %330, %331 : vector<8x128xf32>
    %cst_106 = arith.constant 2.000000e+00 : f32
    %333 = vector.broadcast %cst_106 : f32 to vector<8x128xf32>
    %334 = arith.mulf %333, %328 : vector<8x128xf32>
    %335 = arith.divf %332, %334 : vector<8x128xf32>
    %cst_107 = arith.constant 2.500000e+00 : f32
    %336 = vector.broadcast %cst_107 : f32 to vector<8x128xf32>
    %337 = arith.mulf %336, %268 : vector<8x128xf32>
    %cst_108 = arith.constant 1.000000e+00 : f32
    %338 = vector.broadcast %cst_108 : f32 to vector<8x128xf32>
    %339 = arith.subf %335, %338 : vector<8x128xf32>
    %340 = arith.divf %337, %339 : vector<8x128xf32>
    %341 = arith.mulf %135, %130 : vector<8x128xf32>
    %cst_109 = arith.constant 1.000000e+00 : f32
    %342 = vector.broadcast %cst_109 : f32 to vector<8x128xf32>
    %343 = arith.subf %335, %342 : vector<8x128xf32>
    %344 = arith.mulf %335, %343 : vector<8x128xf32>
    %345 = arith.mulf %344, %304 : vector<8x128xf32>
    %346 = arith.subf %341, %345 : vector<8x128xf32>
    %cst_110 = arith.constant 9.99999996E-13 : f32
    %347 = vector.broadcast %cst_110 : f32 to vector<8x128xf32>
    %348 = arith.maximumf %346, %347 : vector<8x128xf32>
    %cst_111 = arith.constant 9.99999996E-13 : f32
    %349 = vector.broadcast %cst_111 : f32 to vector<8x128xf32>
    %350 = arith.maximumf %301, %349 : vector<8x128xf32>
    %351 = arith.divf %350, %348 : vector<8x128xf32>
    %352 = math.sqrt %351 : vector<8x128xf32>
    %353 = arith.mulf %141, %15 : vector<8x128xf32>
    %354 = arith.mulf %352, %352 : vector<8x128xf32>
    %355 = arith.mulf %141, %138 : vector<8x128xf32>
    %356 = arith.addf %354, %355 : vector<8x128xf32>
    %357 = math.sqrt %356 : vector<8x128xf32>
    %358 = arith.mulf %352, %357 : vector<8x128xf32>
    %359 = arith.addf %353, %358 : vector<8x128xf32>
    %360 = arith.mulf %352, %352 : vector<8x128xf32>
    %361 = arith.addf %141, %360 : vector<8x128xf32>
    %362 = arith.divf %359, %361 : vector<8x128xf32>
    %363 = arith.mulf %362, %362 : vector<8x128xf32>
    %cst_112 = arith.constant 1.000000e+00 : f32
    %364 = vector.broadcast %cst_112 : f32 to vector<8x128xf32>
    %365 = arith.subf %364, %363 : vector<8x128xf32>
    %cst_113 = arith.constant 9.99999996E-13 : f32
    %366 = vector.broadcast %cst_113 : f32 to vector<8x128xf32>
    %367 = arith.maximumf %365, %366 : vector<8x128xf32>
    %368 = math.rsqrt %367 : vector<8x128xf32>
    %369 = tpu.reciprocal %352 {approx = true} : vector<8x128xf32> -> vector<8x128xf32>
    %370 = arith.mulf %368, %301 : vector<8x128xf32>
    %371 = arith.mulf %370, %369 : vector<8x128xf32>
    %372 = arith.addf %143, %371 : vector<8x128xf32>
    %373 = arith.mulf %368, %15 : vector<8x128xf32>
    %374 = arith.mulf %373, %369 : vector<8x128xf32>
    %375 = arith.addf %374, %145 : vector<8x128xf32>
    %376 = arith.mulf %301, %375 : vector<8x128xf32>
    %377 = arith.addf %142, %376 : vector<8x128xf32>
    %378 = arith.divf %372, %377 : vector<8x128xf32>
    %379 = arith.subf %300, %378 : vector<8x128xf32>
    %380 = math.absf %379 : vector<8x128xf32>
    %381 = arith.addf %378, %300 : vector<8x128xf32>
    %cst_114 = arith.constant 5.000000e-01 : f32
    %382 = vector.broadcast %cst_114 : f32 to vector<8x128xf32>
    %383 = arith.mulf %382, %381 : vector<8x128xf32>
    %384 = arith.cmpf olt, %380, %261 : vector<8x128xf32>
    %385 = arith.select %384, %380, %261 : vector<8x128xi1>, vector<8x128xf32>
    %386 = arith.select %384, %268, %149 : vector<8x128xi1>, vector<8x128xf32>
    %387 = arith.select %384, %274, %155 : vector<8x128xi1>, vector<8x128xf32>
    %388 = arith.select %384, %280, %161 : vector<8x128xi1>, vector<8x128xf32>
    %389 = arith.select %384, %284, %165 : vector<8x128xi1>, vector<8x128xf32>
    %390 = arith.select %384, %340, %221 : vector<8x128xi1>, vector<8x128xf32>
    %391 = arith.select %384, %335, %216 : vector<8x128xi1>, vector<8x128xf32>
    %392 = arith.select %384, %362, %243 : vector<8x128xi1>, vector<8x128xf32>
    %393 = arith.select %384, %383, %264 : vector<8x128xi1>, vector<8x128xf32>
    %c2_115 = arith.constant 2 : index
    %c0_116 = arith.constant 0 : index
    %c0_117 = arith.constant 0 : index
    %394 = vector.load %arg10[%c2_115, %c0_116, %c0_117] : memref<4x8x128xf32, #tpu.memory_space<vmem>>, vector<1x8x128xf32>
    %395 = vector.shape_cast %394 : vector<1x8x128xf32> to vector<8x128xf32>
    %396 = arith.mulf %129, %395 : vector<8x128xf32>
    %397 = arith.addf %13, %396 : vector<8x128xf32>
    %398 = math.log %397 : vector<8x128xf32>
    %399 = arith.subf %398, %17 : vector<8x128xf32>
    %cst_118 = arith.constant 6.000000e-01 : f32
    %400 = vector.broadcast %cst_118 : f32 to vector<8x128xf32>
    %401 = arith.mulf %399, %400 : vector<8x128xf32>
    %402 = arith.addf %16, %401 : vector<8x128xf32>
    %403 = math.exp %402 : vector<8x128xf32>
    %404 = arith.subf %398, %402 : vector<8x128xf32>
    %405 = math.exp %404 : vector<8x128xf32>
    %cst_119 = arith.constant 2.500000e+00 : f32
    %406 = vector.broadcast %cst_119 : f32 to vector<8x128xf32>
    %407 = arith.mulf %406, %405 : vector<8x128xf32>
    %cst_120 = arith.constant 1.000000e+00 : f32
    %408 = vector.broadcast %cst_120 : f32 to vector<8x128xf32>
    %409 = arith.addf %408, %407 : vector<8x128xf32>
    %cst_121 = arith.constant 1.66666663 : f32
    %410 = vector.broadcast %cst_121 : f32 to vector<8x128xf32>
    %411 = arith.mulf %410, %405 : vector<8x128xf32>
    %412 = arith.divf %411, %409 : vector<8x128xf32>
    %413 = math.sqrt %412 : vector<8x128xf32>
    %cst_122 = arith.constant 0.816496611 : f32
    %414 = vector.broadcast %cst_122 : f32 to vector<8x128xf32>
    %415 = arith.subf %414, %413 : vector<8x128xf32>
    %416 = math.log %415 : vector<8x128xf32>
    %417 = arith.addf %124, %416 : vector<8x128xf32>
    %cst_123 = arith.constant 0.816496611 : f32
    %418 = vector.broadcast %cst_123 : f32 to vector<8x128xf32>
    %419 = arith.addf %418, %413 : vector<8x128xf32>
    %420 = math.log %419 : vector<8x128xf32>
    %421 = arith.subf %417, %420 : vector<8x128xf32>
    %cst_124 = arith.constant 2.44948983 : f32
    %422 = vector.broadcast %cst_124 : f32 to vector<8x128xf32>
    %423 = arith.mulf %422, %421 : vector<8x128xf32>
    %424 = math.exp %423 : vector<8x128xf32>
    %425 = arith.mulf %126, %424 : vector<8x128xf32>
    %426 = arith.subf %425, %128 : vector<8x128xf32>
    %427 = arith.addf %425, %128 : vector<8x128xf32>
    %428 = tpu.reciprocal %427 {approx = true} : vector<8x128xf32> -> vector<8x128xf32>
    %429 = arith.mulf %426, %428 : vector<8x128xf32>
    %430 = arith.subf %397, %13 : vector<8x128xf32>
    %cst_125 = arith.constant 2.500000e+00 : f32
    %431 = vector.broadcast %cst_125 : f32 to vector<8x128xf32>
    %432 = arith.mulf %431, %397 : vector<8x128xf32>
    %433 = tpu.reciprocal %432 {approx = true} : vector<8x128xf32> -> vector<8x128xf32>
    %434 = arith.mulf %430, %433 : vector<8x128xf32>
    %cst_126 = arith.constant 1.000000e+00 : f32
    %435 = vector.broadcast %cst_126 : f32 to vector<8x128xf32>
    %436 = arith.subf %435, %434 : vector<8x128xf32>
    %437 = arith.mulf %430, %433 : vector<8x128xf32>
    %438 = arith.mulf %135, %135 : vector<8x128xf32>
    %439 = arith.mulf %135, %430 : vector<8x128xf32>
    %440 = arith.mulf %439, %130 : vector<8x128xf32>
    %441 = arith.addf %438, %440 : vector<8x128xf32>
    %cst_127 = arith.constant 0.000000e+00 : f32
    %442 = vector.broadcast %cst_127 : f32 to vector<8x128xf32>
    %443 = arith.subf %442, %441 : vector<8x128xf32>
    %444 = arith.mulf %437, %437 : vector<8x128xf32>
    %cst_128 = arith.constant 4.000000e+00 : f32
    %445 = vector.broadcast %cst_128 : f32 to vector<8x128xf32>
    %446 = arith.mulf %445, %436 : vector<8x128xf32>
    %447 = arith.mulf %446, %443 : vector<8x128xf32>
    %448 = arith.subf %444, %447 : vector<8x128xf32>
    %cst_129 = arith.constant 0.000000e+00 : f32
    %449 = vector.broadcast %cst_129 : f32 to vector<8x128xf32>
    %450 = arith.maximumf %448, %449 : vector<8x128xf32>
    %cst_130 = arith.constant 0.000000e+00 : f32
    %451 = vector.broadcast %cst_130 : f32 to vector<8x128xf32>
    %452 = arith.cmpf oge, %436, %451 : vector<8x128xf32>
    %cst_131 = arith.constant 9.99999996E-13 : f32
    %453 = vector.broadcast %cst_131 : f32 to vector<8x128xf32>
    %454 = arith.maximumf %436, %453 : vector<8x128xf32>
    %cst_132 = arith.constant -9.99999996E-13 : f32
    %455 = vector.broadcast %cst_132 : f32 to vector<8x128xf32>
    %456 = arith.minimumf %436, %455 : vector<8x128xf32>
    %457 = arith.select %452, %454, %456 : vector<8x128xi1>, vector<8x128xf32>
    %cst_133 = arith.constant 0.000000e+00 : f32
    %458 = vector.broadcast %cst_133 : f32 to vector<8x128xf32>
    %459 = arith.subf %458, %437 : vector<8x128xf32>
    %460 = math.sqrt %450 : vector<8x128xf32>
    %461 = arith.addf %459, %460 : vector<8x128xf32>
    %cst_134 = arith.constant 2.000000e+00 : f32
    %462 = vector.broadcast %cst_134 : f32 to vector<8x128xf32>
    %463 = arith.mulf %462, %457 : vector<8x128xf32>
    %464 = arith.divf %461, %463 : vector<8x128xf32>
    %cst_135 = arith.constant 2.500000e+00 : f32
    %465 = vector.broadcast %cst_135 : f32 to vector<8x128xf32>
    %466 = arith.mulf %465, %397 : vector<8x128xf32>
    %cst_136 = arith.constant 1.000000e+00 : f32
    %467 = vector.broadcast %cst_136 : f32 to vector<8x128xf32>
    %468 = arith.subf %464, %467 : vector<8x128xf32>
    %469 = arith.divf %466, %468 : vector<8x128xf32>
    %470 = arith.mulf %135, %130 : vector<8x128xf32>
    %cst_137 = arith.constant 1.000000e+00 : f32
    %471 = vector.broadcast %cst_137 : f32 to vector<8x128xf32>
    %472 = arith.subf %464, %471 : vector<8x128xf32>
    %473 = arith.mulf %464, %472 : vector<8x128xf32>
    %474 = arith.mulf %473, %433 : vector<8x128xf32>
    %475 = arith.subf %470, %474 : vector<8x128xf32>
    %cst_138 = arith.constant 9.99999996E-13 : f32
    %476 = vector.broadcast %cst_138 : f32 to vector<8x128xf32>
    %477 = arith.maximumf %475, %476 : vector<8x128xf32>
    %cst_139 = arith.constant 9.99999996E-13 : f32
    %478 = vector.broadcast %cst_139 : f32 to vector<8x128xf32>
    %479 = arith.maximumf %430, %478 : vector<8x128xf32>
    %480 = arith.divf %479, %477 : vector<8x128xf32>
    %481 = math.sqrt %480 : vector<8x128xf32>
    %482 = arith.mulf %141, %15 : vector<8x128xf32>
    %483 = arith.mulf %481, %481 : vector<8x128xf32>
    %484 = arith.mulf %141, %138 : vector<8x128xf32>
    %485 = arith.addf %483, %484 : vector<8x128xf32>
    %486 = math.sqrt %485 : vector<8x128xf32>
    %487 = arith.mulf %481, %486 : vector<8x128xf32>
    %488 = arith.addf %482, %487 : vector<8x128xf32>
    %489 = arith.mulf %481, %481 : vector<8x128xf32>
    %490 = arith.addf %141, %489 : vector<8x128xf32>
    %491 = arith.divf %488, %490 : vector<8x128xf32>
    %492 = arith.mulf %491, %491 : vector<8x128xf32>
    %cst_140 = arith.constant 1.000000e+00 : f32
    %493 = vector.broadcast %cst_140 : f32 to vector<8x128xf32>
    %494 = arith.subf %493, %492 : vector<8x128xf32>
    %cst_141 = arith.constant 9.99999996E-13 : f32
    %495 = vector.broadcast %cst_141 : f32 to vector<8x128xf32>
    %496 = arith.maximumf %494, %495 : vector<8x128xf32>
    %497 = math.rsqrt %496 : vector<8x128xf32>
    %498 = tpu.reciprocal %481 {approx = true} : vector<8x128xf32> -> vector<8x128xf32>
    %499 = arith.mulf %497, %430 : vector<8x128xf32>
    %500 = arith.mulf %499, %498 : vector<8x128xf32>
    %501 = arith.addf %143, %500 : vector<8x128xf32>
    %502 = arith.mulf %497, %15 : vector<8x128xf32>
    %503 = arith.mulf %502, %498 : vector<8x128xf32>
    %504 = arith.addf %503, %145 : vector<8x128xf32>
    %505 = arith.mulf %430, %504 : vector<8x128xf32>
    %506 = arith.addf %142, %505 : vector<8x128xf32>
    %507 = arith.divf %501, %506 : vector<8x128xf32>
    %508 = arith.subf %429, %507 : vector<8x128xf32>
    %509 = math.absf %508 : vector<8x128xf32>
    %510 = arith.addf %507, %429 : vector<8x128xf32>
    %cst_142 = arith.constant 5.000000e-01 : f32
    %511 = vector.broadcast %cst_142 : f32 to vector<8x128xf32>
    %512 = arith.mulf %511, %510 : vector<8x128xf32>
    %513 = arith.cmpf olt, %509, %385 : vector<8x128xf32>
    %514 = arith.select %513, %509, %385 : vector<8x128xi1>, vector<8x128xf32>
    %515 = arith.select %513, %397, %386 : vector<8x128xi1>, vector<8x128xf32>
    %516 = arith.select %513, %403, %387 : vector<8x128xi1>, vector<8x128xf32>
    %517 = arith.select %513, %409, %388 : vector<8x128xi1>, vector<8x128xf32>
    %518 = arith.select %513, %413, %389 : vector<8x128xi1>, vector<8x128xf32>
    %519 = arith.select %513, %469, %390 : vector<8x128xi1>, vector<8x128xf32>
    %520 = arith.select %513, %464, %391 : vector<8x128xi1>, vector<8x128xf32>
    %521 = arith.select %513, %491, %392 : vector<8x128xi1>, vector<8x128xf32>
    %522 = arith.select %513, %512, %393 : vector<8x128xi1>, vector<8x128xf32>
    %c3_143 = arith.constant 3 : index
    %c0_144 = arith.constant 0 : index
    %c0_145 = arith.constant 0 : index
    %523 = vector.load %arg10[%c3_143, %c0_144, %c0_145] : memref<4x8x128xf32, #tpu.memory_space<vmem>>, vector<1x8x128xf32>
    %524 = vector.shape_cast %523 : vector<1x8x128xf32> to vector<8x128xf32>
    %525 = arith.mulf %129, %524 : vector<8x128xf32>
    %526 = arith.addf %13, %525 : vector<8x128xf32>
    %527 = math.log %526 : vector<8x128xf32>
    %528 = arith.subf %527, %17 : vector<8x128xf32>
    %cst_146 = arith.constant 6.000000e-01 : f32
    %529 = vector.broadcast %cst_146 : f32 to vector<8x128xf32>
    %530 = arith.mulf %528, %529 : vector<8x128xf32>
    %531 = arith.addf %16, %530 : vector<8x128xf32>
    %532 = math.exp %531 : vector<8x128xf32>
    %533 = arith.subf %527, %531 : vector<8x128xf32>
    %534 = math.exp %533 : vector<8x128xf32>
    %cst_147 = arith.constant 2.500000e+00 : f32
    %535 = vector.broadcast %cst_147 : f32 to vector<8x128xf32>
    %536 = arith.mulf %535, %534 : vector<8x128xf32>
    %cst_148 = arith.constant 1.000000e+00 : f32
    %537 = vector.broadcast %cst_148 : f32 to vector<8x128xf32>
    %538 = arith.addf %537, %536 : vector<8x128xf32>
    %cst_149 = arith.constant 1.66666663 : f32
    %539 = vector.broadcast %cst_149 : f32 to vector<8x128xf32>
    %540 = arith.mulf %539, %534 : vector<8x128xf32>
    %541 = arith.divf %540, %538 : vector<8x128xf32>
    %542 = math.sqrt %541 : vector<8x128xf32>
    %cst_150 = arith.constant 0.816496611 : f32
    %543 = vector.broadcast %cst_150 : f32 to vector<8x128xf32>
    %544 = arith.subf %543, %542 : vector<8x128xf32>
    %545 = math.log %544 : vector<8x128xf32>
    %546 = arith.addf %124, %545 : vector<8x128xf32>
    %cst_151 = arith.constant 0.816496611 : f32
    %547 = vector.broadcast %cst_151 : f32 to vector<8x128xf32>
    %548 = arith.addf %547, %542 : vector<8x128xf32>
    %549 = math.log %548 : vector<8x128xf32>
    %550 = arith.subf %546, %549 : vector<8x128xf32>
    %cst_152 = arith.constant 2.44948983 : f32
    %551 = vector.broadcast %cst_152 : f32 to vector<8x128xf32>
    %552 = arith.mulf %551, %550 : vector<8x128xf32>
    %553 = math.exp %552 : vector<8x128xf32>
    %554 = arith.mulf %126, %553 : vector<8x128xf32>
    %555 = arith.subf %554, %128 : vector<8x128xf32>
    %556 = arith.addf %554, %128 : vector<8x128xf32>
    %557 = tpu.reciprocal %556 {approx = true} : vector<8x128xf32> -> vector<8x128xf32>
    %558 = arith.mulf %555, %557 : vector<8x128xf32>
    %559 = arith.subf %526, %13 : vector<8x128xf32>
    %cst_153 = arith.constant 2.500000e+00 : f32
    %560 = vector.broadcast %cst_153 : f32 to vector<8x128xf32>
    %561 = arith.mulf %560, %526 : vector<8x128xf32>
    %562 = tpu.reciprocal %561 {approx = true} : vector<8x128xf32> -> vector<8x128xf32>
    %563 = arith.mulf %559, %562 : vector<8x128xf32>
    %cst_154 = arith.constant 1.000000e+00 : f32
    %564 = vector.broadcast %cst_154 : f32 to vector<8x128xf32>
    %565 = arith.subf %564, %563 : vector<8x128xf32>
    %566 = arith.mulf %559, %562 : vector<8x128xf32>
    %567 = arith.mulf %135, %135 : vector<8x128xf32>
    %568 = arith.mulf %135, %559 : vector<8x128xf32>
    %569 = arith.mulf %568, %130 : vector<8x128xf32>
    %570 = arith.addf %567, %569 : vector<8x128xf32>
    %cst_155 = arith.constant 0.000000e+00 : f32
    %571 = vector.broadcast %cst_155 : f32 to vector<8x128xf32>
    %572 = arith.subf %571, %570 : vector<8x128xf32>
    %573 = arith.mulf %566, %566 : vector<8x128xf32>
    %cst_156 = arith.constant 4.000000e+00 : f32
    %574 = vector.broadcast %cst_156 : f32 to vector<8x128xf32>
    %575 = arith.mulf %574, %565 : vector<8x128xf32>
    %576 = arith.mulf %575, %572 : vector<8x128xf32>
    %577 = arith.subf %573, %576 : vector<8x128xf32>
    %cst_157 = arith.constant 0.000000e+00 : f32
    %578 = vector.broadcast %cst_157 : f32 to vector<8x128xf32>
    %579 = arith.maximumf %577, %578 : vector<8x128xf32>
    %cst_158 = arith.constant 0.000000e+00 : f32
    %580 = vector.broadcast %cst_158 : f32 to vector<8x128xf32>
    %581 = arith.cmpf oge, %565, %580 : vector<8x128xf32>
    %cst_159 = arith.constant 9.99999996E-13 : f32
    %582 = vector.broadcast %cst_159 : f32 to vector<8x128xf32>
    %583 = arith.maximumf %565, %582 : vector<8x128xf32>
    %cst_160 = arith.constant -9.99999996E-13 : f32
    %584 = vector.broadcast %cst_160 : f32 to vector<8x128xf32>
    %585 = arith.minimumf %565, %584 : vector<8x128xf32>
    %586 = arith.select %581, %583, %585 : vector<8x128xi1>, vector<8x128xf32>
    %cst_161 = arith.constant 0.000000e+00 : f32
    %587 = vector.broadcast %cst_161 : f32 to vector<8x128xf32>
    %588 = arith.subf %587, %566 : vector<8x128xf32>
    %589 = math.sqrt %579 : vector<8x128xf32>
    %590 = arith.addf %588, %589 : vector<8x128xf32>
    %cst_162 = arith.constant 2.000000e+00 : f32
    %591 = vector.broadcast %cst_162 : f32 to vector<8x128xf32>
    %592 = arith.mulf %591, %586 : vector<8x128xf32>
    %593 = arith.divf %590, %592 : vector<8x128xf32>
    %cst_163 = arith.constant 2.500000e+00 : f32
    %594 = vector.broadcast %cst_163 : f32 to vector<8x128xf32>
    %595 = arith.mulf %594, %526 : vector<8x128xf32>
    %cst_164 = arith.constant 1.000000e+00 : f32
    %596 = vector.broadcast %cst_164 : f32 to vector<8x128xf32>
    %597 = arith.subf %593, %596 : vector<8x128xf32>
    %598 = arith.divf %595, %597 : vector<8x128xf32>
    %599 = arith.mulf %135, %130 : vector<8x128xf32>
    %cst_165 = arith.constant 1.000000e+00 : f32
    %600 = vector.broadcast %cst_165 : f32 to vector<8x128xf32>
    %601 = arith.subf %593, %600 : vector<8x128xf32>
    %602 = arith.mulf %593, %601 : vector<8x128xf32>
    %603 = arith.mulf %602, %562 : vector<8x128xf32>
    %604 = arith.subf %599, %603 : vector<8x128xf32>
    %cst_166 = arith.constant 9.99999996E-13 : f32
    %605 = vector.broadcast %cst_166 : f32 to vector<8x128xf32>
    %606 = arith.maximumf %604, %605 : vector<8x128xf32>
    %cst_167 = arith.constant 9.99999996E-13 : f32
    %607 = vector.broadcast %cst_167 : f32 to vector<8x128xf32>
    %608 = arith.maximumf %559, %607 : vector<8x128xf32>
    %609 = arith.divf %608, %606 : vector<8x128xf32>
    %610 = math.sqrt %609 : vector<8x128xf32>
    %611 = arith.mulf %141, %15 : vector<8x128xf32>
    %612 = arith.mulf %610, %610 : vector<8x128xf32>
    %613 = arith.mulf %141, %138 : vector<8x128xf32>
    %614 = arith.addf %612, %613 : vector<8x128xf32>
    %615 = math.sqrt %614 : vector<8x128xf32>
    %616 = arith.mulf %610, %615 : vector<8x128xf32>
    %617 = arith.addf %611, %616 : vector<8x128xf32>
    %618 = arith.mulf %610, %610 : vector<8x128xf32>
    %619 = arith.addf %141, %618 : vector<8x128xf32>
    %620 = arith.divf %617, %619 : vector<8x128xf32>
    %621 = arith.mulf %620, %620 : vector<8x128xf32>
    %cst_168 = arith.constant 1.000000e+00 : f32
    %622 = vector.broadcast %cst_168 : f32 to vector<8x128xf32>
    %623 = arith.subf %622, %621 : vector<8x128xf32>
    %cst_169 = arith.constant 9.99999996E-13 : f32
    %624 = vector.broadcast %cst_169 : f32 to vector<8x128xf32>
    %625 = arith.maximumf %623, %624 : vector<8x128xf32>
    %626 = math.rsqrt %625 : vector<8x128xf32>
    %627 = tpu.reciprocal %610 {approx = true} : vector<8x128xf32> -> vector<8x128xf32>
    %628 = arith.mulf %626, %559 : vector<8x128xf32>
    %629 = arith.mulf %628, %627 : vector<8x128xf32>
    %630 = arith.addf %143, %629 : vector<8x128xf32>
    %631 = arith.mulf %626, %15 : vector<8x128xf32>
    %632 = arith.mulf %631, %627 : vector<8x128xf32>
    %633 = arith.addf %632, %145 : vector<8x128xf32>
    %634 = arith.mulf %559, %633 : vector<8x128xf32>
    %635 = arith.addf %142, %634 : vector<8x128xf32>
    %636 = arith.divf %630, %635 : vector<8x128xf32>
    %637 = arith.subf %558, %636 : vector<8x128xf32>
    %638 = math.absf %637 : vector<8x128xf32>
    %639 = arith.addf %636, %558 : vector<8x128xf32>
    %cst_170 = arith.constant 5.000000e-01 : f32
    %640 = vector.broadcast %cst_170 : f32 to vector<8x128xf32>
    %641 = arith.mulf %640, %639 : vector<8x128xf32>
    %642 = arith.cmpf olt, %638, %514 : vector<8x128xf32>
    %643 = arith.select %642, %526, %515 : vector<8x128xi1>, vector<8x128xf32>
    %644 = arith.select %642, %532, %516 : vector<8x128xi1>, vector<8x128xf32>
    %645 = arith.select %642, %538, %517 : vector<8x128xi1>, vector<8x128xf32>
    %646 = arith.select %642, %542, %518 : vector<8x128xi1>, vector<8x128xf32>
    %647 = arith.select %642, %598, %519 : vector<8x128xi1>, vector<8x128xf32>
    %648 = arith.select %642, %593, %520 : vector<8x128xi1>, vector<8x128xf32>
    %649 = arith.select %642, %620, %521 : vector<8x128xi1>, vector<8x128xf32>
    %650 = arith.select %642, %641, %522 : vector<8x128xi1>, vector<8x128xf32>
    %651 = arith.subf %650, %646 : vector<8x128xf32>
    %652 = arith.mulf %650, %646 : vector<8x128xf32>
    %cst_171 = arith.constant 1.000000e+00 : f32
    %653 = vector.broadcast %cst_171 : f32 to vector<8x128xf32>
    %654 = arith.subf %653, %652 : vector<8x128xf32>
    %655 = tpu.reciprocal %654 {approx = true} : vector<8x128xf32> -> vector<8x128xf32>
    %656 = arith.mulf %651, %655 : vector<8x128xf32>
    %657 = arith.subf %9, %117 : vector<8x128xf32>
    %658 = arith.mulf %9, %117 : vector<8x128xf32>
    %cst_172 = arith.constant 1.000000e+00 : f32
    %659 = vector.broadcast %cst_172 : f32 to vector<8x128xf32>
    %660 = arith.subf %659, %658 : vector<8x128xf32>
    %661 = tpu.reciprocal %660 {approx = true} : vector<8x128xf32> -> vector<8x128xf32>
    %662 = arith.mulf %657, %661 : vector<8x128xf32>
    %663 = arith.mulf %650, %650 : vector<8x128xf32>
    %cst_173 = arith.constant 1.000000e+00 : f32
    %664 = vector.broadcast %cst_173 : f32 to vector<8x128xf32>
    %665 = arith.subf %664, %663 : vector<8x128xf32>
    %666 = math.rsqrt %665 : vector<8x128xf32>
    %667 = arith.mulf %666, %644 : vector<8x128xf32>
    %668 = arith.mulf %666, %647 : vector<8x128xf32>
    %669 = arith.mulf %666, %666 : vector<8x128xf32>
    %670 = arith.mulf %669, %644 : vector<8x128xf32>
    %671 = arith.mulf %670, %645 : vector<8x128xf32>
    %672 = arith.mulf %671, %650 : vector<8x128xf32>
    %673 = arith.mulf %666, %666 : vector<8x128xf32>
    %674 = arith.mulf %673, %647 : vector<8x128xf32>
    %675 = arith.mulf %674, %648 : vector<8x128xf32>
    %676 = arith.mulf %675, %650 : vector<8x128xf32>
    %677 = arith.mulf %667, %650 : vector<8x128xf32>
    %678 = arith.mulf %666, %645 : vector<8x128xf32>
    %cst_174 = arith.constant 1.000000e+00 : f32
    %679 = vector.broadcast %cst_174 : f32 to vector<8x128xf32>
    %680 = arith.subf %678, %679 : vector<8x128xf32>
    %681 = arith.mulf %667, %680 : vector<8x128xf32>
    %682 = arith.mulf %681, %650 : vector<8x128xf32>
    %683 = arith.mulf %672, %650 : vector<8x128xf32>
    %684 = arith.addf %683, %643 : vector<8x128xf32>
    %685 = vector.shape_cast %677 : vector<8x128xf32> to vector<1x8x128xf32>
    %686 = vector.shape_cast %682 : vector<8x128xf32> to vector<1x8x128xf32>
    %687 = vector.shape_cast %684 : vector<8x128xf32> to vector<1x8x128xf32>
    %688 = tpu.concatenate %685, %686, %687 in 0 : vector<1x8x128xf32>, vector<1x8x128xf32>, vector<1x8x128xf32> -> vector<3x8x128xf32>
    %689 = arith.mulf %668, %650 : vector<8x128xf32>
    %690 = arith.mulf %666, %648 : vector<8x128xf32>
    %cst_175 = arith.constant 1.000000e+00 : f32
    %691 = vector.broadcast %cst_175 : f32 to vector<8x128xf32>
    %692 = arith.subf %690, %691 : vector<8x128xf32>
    %693 = arith.mulf %668, %692 : vector<8x128xf32>
    %694 = arith.mulf %693, %650 : vector<8x128xf32>
    %695 = arith.mulf %676, %650 : vector<8x128xf32>
    %696 = arith.addf %695, %643 : vector<8x128xf32>
    %697 = vector.shape_cast %689 : vector<8x128xf32> to vector<1x8x128xf32>
    %698 = vector.shape_cast %694 : vector<8x128xf32> to vector<1x8x128xf32>
    %699 = vector.shape_cast %696 : vector<8x128xf32> to vector<1x8x128xf32>
    %700 = tpu.concatenate %697, %698, %699 in 0 : vector<1x8x128xf32>, vector<1x8x128xf32>, vector<1x8x128xf32> -> vector<3x8x128xf32>
    %cst_176 = arith.constant 2.44948983 : f32
    %701 = vector.broadcast %cst_176 : f32 to vector<8x128xf32>
    %702 = arith.mulf %701, %124 : vector<8x128xf32>
    %cst_177 = arith.constant 0.000000e+00 : f32
    %703 = vector.broadcast %cst_177 : f32 to vector<8x128xf32>
    %704 = arith.subf %703, %124 : vector<8x128xf32>
    %cst_178 = arith.constant -2.44948978E-6 : f32
    %705 = vector.broadcast %cst_178 : f32 to vector<8x128xf32>
    %c0_i32 = arith.constant 0 : i32
    %706 = arith.addf %704, %705 : vector<8x128xf32>
    %cst_179 = arith.constant 5.000000e-01 : f32
    %707 = vector.broadcast %cst_179 : f32 to vector<8x128xf32>
    %708 = arith.mulf %707, %706 : vector<8x128xf32>
    %709 = math.exp %708 : vector<8x128xf32>
    %cst_180 = arith.constant 2.44948983 : f32
    %710 = vector.broadcast %cst_180 : f32 to vector<8x128xf32>
    %711 = arith.mulf %710, %708 : vector<8x128xf32>
    %712 = arith.addf %702, %711 : vector<8x128xf32>
    %713 = math.exp %712 : vector<8x128xf32>
    %714 = arith.mulf %126, %713 : vector<8x128xf32>
    %cst_181 = arith.constant 1.81649661 : f32
    %715 = vector.broadcast %cst_181 : f32 to vector<8x128xf32>
    %716 = arith.mulf %709, %715 : vector<8x128xf32>
    %cst_182 = arith.constant 0.183503419 : f32
    %717 = vector.broadcast %cst_182 : f32 to vector<8x128xf32>
    %718 = arith.addf %717, %716 : vector<8x128xf32>
    %719 = arith.mulf %714, %718 : vector<8x128xf32>
    %cst_183 = arith.constant 0.183503419 : f32
    %720 = vector.broadcast %cst_183 : f32 to vector<8x128xf32>
    %721 = arith.mulf %709, %720 : vector<8x128xf32>
    %cst_184 = arith.constant 1.81649661 : f32
    %722 = vector.broadcast %cst_184 : f32 to vector<8x128xf32>
    %723 = arith.addf %722, %721 : vector<8x128xf32>
    %724 = arith.mulf %128, %723 : vector<8x128xf32>
    %725 = arith.cmpf ogt, %719, %724 : vector<8x128xf32>
    %726 = arith.select %725, %704, %708 : vector<8x128xi1>, vector<8x128xf32>
    %727 = arith.select %725, %708, %705 : vector<8x128xi1>, vector<8x128xf32>
    %c1_i32 = arith.constant 1 : i32
    %728 = arith.addf %726, %727 : vector<8x128xf32>
    %cst_185 = arith.constant 5.000000e-01 : f32
    %729 = vector.broadcast %cst_185 : f32 to vector<8x128xf32>
    %730 = arith.mulf %729, %728 : vector<8x128xf32>
    %731 = math.exp %730 : vector<8x128xf32>
    %cst_186 = arith.constant 2.44948983 : f32
    %732 = vector.broadcast %cst_186 : f32 to vector<8x128xf32>
    %733 = arith.mulf %732, %730 : vector<8x128xf32>
    %734 = arith.addf %702, %733 : vector<8x128xf32>
    %735 = math.exp %734 : vector<8x128xf32>
    %736 = arith.mulf %126, %735 : vector<8x128xf32>
    %cst_187 = arith.constant 1.81649661 : f32
    %737 = vector.broadcast %cst_187 : f32 to vector<8x128xf32>
    %738 = arith.mulf %731, %737 : vector<8x128xf32>
    %cst_188 = arith.constant 0.183503419 : f32
    %739 = vector.broadcast %cst_188 : f32 to vector<8x128xf32>
    %740 = arith.addf %739, %738 : vector<8x128xf32>
    %741 = arith.mulf %736, %740 : vector<8x128xf32>
    %cst_189 = arith.constant 0.183503419 : f32
    %742 = vector.broadcast %cst_189 : f32 to vector<8x128xf32>
    %743 = arith.mulf %731, %742 : vector<8x128xf32>
    %cst_190 = arith.constant 1.81649661 : f32
    %744 = vector.broadcast %cst_190 : f32 to vector<8x128xf32>
    %745 = arith.addf %744, %743 : vector<8x128xf32>
    %746 = arith.mulf %128, %745 : vector<8x128xf32>
    %747 = arith.cmpf ogt, %741, %746 : vector<8x128xf32>
    %748 = arith.select %747, %726, %730 : vector<8x128xi1>, vector<8x128xf32>
    %749 = arith.select %747, %730, %727 : vector<8x128xi1>, vector<8x128xf32>
    %c2_i32 = arith.constant 2 : i32
    %750 = arith.addf %748, %749 : vector<8x128xf32>
    %cst_191 = arith.constant 5.000000e-01 : f32
    %751 = vector.broadcast %cst_191 : f32 to vector<8x128xf32>
    %752 = arith.mulf %751, %750 : vector<8x128xf32>
    %753 = math.exp %752 : vector<8x128xf32>
    %cst_192 = arith.constant 2.44948983 : f32
    %754 = vector.broadcast %cst_192 : f32 to vector<8x128xf32>
    %755 = arith.mulf %754, %752 : vector<8x128xf32>
    %756 = arith.addf %702, %755 : vector<8x128xf32>
    %757 = math.exp %756 : vector<8x128xf32>
    %758 = arith.mulf %126, %757 : vector<8x128xf32>
    %cst_193 = arith.constant 1.81649661 : f32
    %759 = vector.broadcast %cst_193 : f32 to vector<8x128xf32>
    %760 = arith.mulf %753, %759 : vector<8x128xf32>
    %cst_194 = arith.constant 0.183503419 : f32
    %761 = vector.broadcast %cst_194 : f32 to vector<8x128xf32>
    %762 = arith.addf %761, %760 : vector<8x128xf32>
    %763 = arith.mulf %758, %762 : vector<8x128xf32>
    %cst_195 = arith.constant 0.183503419 : f32
    %764 = vector.broadcast %cst_195 : f32 to vector<8x128xf32>
    %765 = arith.mulf %753, %764 : vector<8x128xf32>
    %cst_196 = arith.constant 1.81649661 : f32
    %766 = vector.broadcast %cst_196 : f32 to vector<8x128xf32>
    %767 = arith.addf %766, %765 : vector<8x128xf32>
    %768 = arith.mulf %128, %767 : vector<8x128xf32>
    %769 = arith.cmpf ogt, %763, %768 : vector<8x128xf32>
    %770 = arith.select %769, %748, %752 : vector<8x128xi1>, vector<8x128xf32>
    %771 = arith.select %769, %752, %749 : vector<8x128xi1>, vector<8x128xf32>
    %c3_i32 = arith.constant 3 : i32
    %772 = arith.addf %770, %771 : vector<8x128xf32>
    %cst_197 = arith.constant 5.000000e-01 : f32
    %773 = vector.broadcast %cst_197 : f32 to vector<8x128xf32>
    %774 = arith.mulf %773, %772 : vector<8x128xf32>
    %775 = math.exp %774 : vector<8x128xf32>
    %cst_198 = arith.constant 2.44948983 : f32
    %776 = vector.broadcast %cst_198 : f32 to vector<8x128xf32>
    %777 = arith.mulf %776, %774 : vector<8x128xf32>
    %778 = arith.addf %702, %777 : vector<8x128xf32>
    %779 = math.exp %778 : vector<8x128xf32>
    %780 = arith.mulf %126, %779 : vector<8x128xf32>
    %cst_199 = arith.constant 1.81649661 : f32
    %781 = vector.broadcast %cst_199 : f32 to vector<8x128xf32>
    %782 = arith.mulf %775, %781 : vector<8x128xf32>
    %cst_200 = arith.constant 0.183503419 : f32
    %783 = vector.broadcast %cst_200 : f32 to vector<8x128xf32>
    %784 = arith.addf %783, %782 : vector<8x128xf32>
    %785 = arith.mulf %780, %784 : vector<8x128xf32>
    %cst_201 = arith.constant 0.183503419 : f32
    %786 = vector.broadcast %cst_201 : f32 to vector<8x128xf32>
    %787 = arith.mulf %775, %786 : vector<8x128xf32>
    %cst_202 = arith.constant 1.81649661 : f32
    %788 = vector.broadcast %cst_202 : f32 to vector<8x128xf32>
    %789 = arith.addf %788, %787 : vector<8x128xf32>
    %790 = arith.mulf %128, %789 : vector<8x128xf32>
    %791 = arith.cmpf ogt, %785, %790 : vector<8x128xf32>
    %792 = arith.select %791, %770, %774 : vector<8x128xi1>, vector<8x128xf32>
    %793 = arith.select %791, %774, %771 : vector<8x128xi1>, vector<8x128xf32>
    %c4_i32 = arith.constant 4 : i32
    %794 = arith.addf %792, %793 : vector<8x128xf32>
    %cst_203 = arith.constant 5.000000e-01 : f32
    %795 = vector.broadcast %cst_203 : f32 to vector<8x128xf32>
    %796 = arith.mulf %795, %794 : vector<8x128xf32>
    %797 = math.exp %796 : vector<8x128xf32>
    %cst_204 = arith.constant 2.44948983 : f32
    %798 = vector.broadcast %cst_204 : f32 to vector<8x128xf32>
    %799 = arith.mulf %798, %796 : vector<8x128xf32>
    %800 = arith.addf %702, %799 : vector<8x128xf32>
    %801 = math.exp %800 : vector<8x128xf32>
    %802 = arith.mulf %126, %801 : vector<8x128xf32>
    %cst_205 = arith.constant 1.81649661 : f32
    %803 = vector.broadcast %cst_205 : f32 to vector<8x128xf32>
    %804 = arith.mulf %797, %803 : vector<8x128xf32>
    %cst_206 = arith.constant 0.183503419 : f32
    %805 = vector.broadcast %cst_206 : f32 to vector<8x128xf32>
    %806 = arith.addf %805, %804 : vector<8x128xf32>
    %807 = arith.mulf %802, %806 : vector<8x128xf32>
    %cst_207 = arith.constant 0.183503419 : f32
    %808 = vector.broadcast %cst_207 : f32 to vector<8x128xf32>
    %809 = arith.mulf %797, %808 : vector<8x128xf32>
    %cst_208 = arith.constant 1.81649661 : f32
    %810 = vector.broadcast %cst_208 : f32 to vector<8x128xf32>
    %811 = arith.addf %810, %809 : vector<8x128xf32>
    %812 = arith.mulf %128, %811 : vector<8x128xf32>
    %813 = arith.cmpf ogt, %807, %812 : vector<8x128xf32>
    %814 = arith.select %813, %792, %796 : vector<8x128xi1>, vector<8x128xf32>
    %815 = arith.select %813, %796, %793 : vector<8x128xi1>, vector<8x128xf32>
    %c5_i32 = arith.constant 5 : i32
    %816 = arith.addf %814, %815 : vector<8x128xf32>
    %cst_209 = arith.constant 5.000000e-01 : f32
    %817 = vector.broadcast %cst_209 : f32 to vector<8x128xf32>
    %818 = arith.mulf %817, %816 : vector<8x128xf32>
    %819 = math.exp %818 : vector<8x128xf32>
    %cst_210 = arith.constant 2.44948983 : f32
    %820 = vector.broadcast %cst_210 : f32 to vector<8x128xf32>
    %821 = arith.mulf %820, %818 : vector<8x128xf32>
    %822 = arith.addf %702, %821 : vector<8x128xf32>
    %823 = math.exp %822 : vector<8x128xf32>
    %824 = arith.mulf %126, %823 : vector<8x128xf32>
    %cst_211 = arith.constant 1.81649661 : f32
    %825 = vector.broadcast %cst_211 : f32 to vector<8x128xf32>
    %826 = arith.mulf %819, %825 : vector<8x128xf32>
    %cst_212 = arith.constant 0.183503419 : f32
    %827 = vector.broadcast %cst_212 : f32 to vector<8x128xf32>
    %828 = arith.addf %827, %826 : vector<8x128xf32>
    %829 = arith.mulf %824, %828 : vector<8x128xf32>
    %cst_213 = arith.constant 0.183503419 : f32
    %830 = vector.broadcast %cst_213 : f32 to vector<8x128xf32>
    %831 = arith.mulf %819, %830 : vector<8x128xf32>
    %cst_214 = arith.constant 1.81649661 : f32
    %832 = vector.broadcast %cst_214 : f32 to vector<8x128xf32>
    %833 = arith.addf %832, %831 : vector<8x128xf32>
    %834 = arith.mulf %128, %833 : vector<8x128xf32>
    %835 = arith.cmpf ogt, %829, %834 : vector<8x128xf32>
    %836 = arith.select %835, %814, %818 : vector<8x128xi1>, vector<8x128xf32>
    %837 = arith.select %835, %818, %815 : vector<8x128xi1>, vector<8x128xf32>
    %c6_i32 = arith.constant 6 : i32
    %838 = arith.addf %836, %837 : vector<8x128xf32>
    %cst_215 = arith.constant 5.000000e-01 : f32
    %839 = vector.broadcast %cst_215 : f32 to vector<8x128xf32>
    %840 = arith.mulf %839, %838 : vector<8x128xf32>
    %841 = math.exp %840 : vector<8x128xf32>
    %cst_216 = arith.constant 2.44948983 : f32
    %842 = vector.broadcast %cst_216 : f32 to vector<8x128xf32>
    %843 = arith.mulf %842, %840 : vector<8x128xf32>
    %844 = arith.addf %702, %843 : vector<8x128xf32>
    %845 = math.exp %844 : vector<8x128xf32>
    %846 = arith.mulf %126, %845 : vector<8x128xf32>
    %cst_217 = arith.constant 1.81649661 : f32
    %847 = vector.broadcast %cst_217 : f32 to vector<8x128xf32>
    %848 = arith.mulf %841, %847 : vector<8x128xf32>
    %cst_218 = arith.constant 0.183503419 : f32
    %849 = vector.broadcast %cst_218 : f32 to vector<8x128xf32>
    %850 = arith.addf %849, %848 : vector<8x128xf32>
    %851 = arith.mulf %846, %850 : vector<8x128xf32>
    %cst_219 = arith.constant 0.183503419 : f32
    %852 = vector.broadcast %cst_219 : f32 to vector<8x128xf32>
    %853 = arith.mulf %841, %852 : vector<8x128xf32>
    %cst_220 = arith.constant 1.81649661 : f32
    %854 = vector.broadcast %cst_220 : f32 to vector<8x128xf32>
    %855 = arith.addf %854, %853 : vector<8x128xf32>
    %856 = arith.mulf %128, %855 : vector<8x128xf32>
    %857 = arith.cmpf ogt, %851, %856 : vector<8x128xf32>
    %858 = arith.select %857, %836, %840 : vector<8x128xi1>, vector<8x128xf32>
    %859 = arith.select %857, %840, %837 : vector<8x128xi1>, vector<8x128xf32>
    %c7_i32 = arith.constant 7 : i32
    %860 = arith.addf %858, %859 : vector<8x128xf32>
    %cst_221 = arith.constant 5.000000e-01 : f32
    %861 = vector.broadcast %cst_221 : f32 to vector<8x128xf32>
    %862 = arith.mulf %861, %860 : vector<8x128xf32>
    %863 = math.exp %862 : vector<8x128xf32>
    %cst_222 = arith.constant 2.44948983 : f32
    %864 = vector.broadcast %cst_222 : f32 to vector<8x128xf32>
    %865 = arith.mulf %864, %862 : vector<8x128xf32>
    %866 = arith.addf %702, %865 : vector<8x128xf32>
    %867 = math.exp %866 : vector<8x128xf32>
    %868 = arith.mulf %126, %867 : vector<8x128xf32>
    %cst_223 = arith.constant 1.81649661 : f32
    %869 = vector.broadcast %cst_223 : f32 to vector<8x128xf32>
    %870 = arith.mulf %863, %869 : vector<8x128xf32>
    %cst_224 = arith.constant 0.183503419 : f32
    %871 = vector.broadcast %cst_224 : f32 to vector<8x128xf32>
    %872 = arith.addf %871, %870 : vector<8x128xf32>
    %873 = arith.mulf %868, %872 : vector<8x128xf32>
    %cst_225 = arith.constant 0.183503419 : f32
    %874 = vector.broadcast %cst_225 : f32 to vector<8x128xf32>
    %875 = arith.mulf %863, %874 : vector<8x128xf32>
    %cst_226 = arith.constant 1.81649661 : f32
    %876 = vector.broadcast %cst_226 : f32 to vector<8x128xf32>
    %877 = arith.addf %876, %875 : vector<8x128xf32>
    %878 = arith.mulf %128, %877 : vector<8x128xf32>
    %879 = arith.cmpf ogt, %873, %878 : vector<8x128xf32>
    %880 = arith.select %879, %858, %862 : vector<8x128xi1>, vector<8x128xf32>
    %881 = arith.select %879, %862, %859 : vector<8x128xi1>, vector<8x128xf32>
    %c8_i32 = arith.constant 8 : i32
    %882 = arith.addf %880, %881 : vector<8x128xf32>
    %cst_227 = arith.constant 5.000000e-01 : f32
    %883 = vector.broadcast %cst_227 : f32 to vector<8x128xf32>
    %884 = arith.mulf %883, %882 : vector<8x128xf32>
    %885 = math.exp %884 : vector<8x128xf32>
    %cst_228 = arith.constant 2.44948983 : f32
    %886 = vector.broadcast %cst_228 : f32 to vector<8x128xf32>
    %887 = arith.mulf %886, %884 : vector<8x128xf32>
    %888 = arith.addf %702, %887 : vector<8x128xf32>
    %889 = math.exp %888 : vector<8x128xf32>
    %890 = arith.mulf %126, %889 : vector<8x128xf32>
    %cst_229 = arith.constant 1.81649661 : f32
    %891 = vector.broadcast %cst_229 : f32 to vector<8x128xf32>
    %892 = arith.mulf %885, %891 : vector<8x128xf32>
    %cst_230 = arith.constant 0.183503419 : f32
    %893 = vector.broadcast %cst_230 : f32 to vector<8x128xf32>
    %894 = arith.addf %893, %892 : vector<8x128xf32>
    %895 = arith.mulf %890, %894 : vector<8x128xf32>
    %cst_231 = arith.constant 0.183503419 : f32
    %896 = vector.broadcast %cst_231 : f32 to vector<8x128xf32>
    %897 = arith.mulf %885, %896 : vector<8x128xf32>
    %cst_232 = arith.constant 1.81649661 : f32
    %898 = vector.broadcast %cst_232 : f32 to vector<8x128xf32>
    %899 = arith.addf %898, %897 : vector<8x128xf32>
    %900 = arith.mulf %128, %899 : vector<8x128xf32>
    %901 = arith.cmpf ogt, %895, %900 : vector<8x128xf32>
    %902 = arith.select %901, %880, %884 : vector<8x128xi1>, vector<8x128xf32>
    %903 = arith.select %901, %884, %881 : vector<8x128xi1>, vector<8x128xf32>
    %c9_i32 = arith.constant 9 : i32
    %904 = arith.addf %902, %903 : vector<8x128xf32>
    %cst_233 = arith.constant 5.000000e-01 : f32
    %905 = vector.broadcast %cst_233 : f32 to vector<8x128xf32>
    %906 = arith.mulf %905, %904 : vector<8x128xf32>
    %907 = math.exp %906 : vector<8x128xf32>
    %cst_234 = arith.constant 2.44948983 : f32
    %908 = vector.broadcast %cst_234 : f32 to vector<8x128xf32>
    %909 = arith.mulf %908, %906 : vector<8x128xf32>
    %910 = arith.addf %702, %909 : vector<8x128xf32>
    %911 = math.exp %910 : vector<8x128xf32>
    %912 = arith.mulf %126, %911 : vector<8x128xf32>
    %cst_235 = arith.constant 1.81649661 : f32
    %913 = vector.broadcast %cst_235 : f32 to vector<8x128xf32>
    %914 = arith.mulf %907, %913 : vector<8x128xf32>
    %cst_236 = arith.constant 0.183503419 : f32
    %915 = vector.broadcast %cst_236 : f32 to vector<8x128xf32>
    %916 = arith.addf %915, %914 : vector<8x128xf32>
    %917 = arith.mulf %912, %916 : vector<8x128xf32>
    %cst_237 = arith.constant 0.183503419 : f32
    %918 = vector.broadcast %cst_237 : f32 to vector<8x128xf32>
    %919 = arith.mulf %907, %918 : vector<8x128xf32>
    %cst_238 = arith.constant 1.81649661 : f32
    %920 = vector.broadcast %cst_238 : f32 to vector<8x128xf32>
    %921 = arith.addf %920, %919 : vector<8x128xf32>
    %922 = arith.mulf %128, %921 : vector<8x128xf32>
    %923 = arith.cmpf ogt, %917, %922 : vector<8x128xf32>
    %924 = arith.select %923, %902, %906 : vector<8x128xi1>, vector<8x128xf32>
    %925 = arith.select %923, %906, %903 : vector<8x128xi1>, vector<8x128xf32>
    %c10_i32 = arith.constant 10 : i32
    %926 = arith.addf %924, %925 : vector<8x128xf32>
    %cst_239 = arith.constant 5.000000e-01 : f32
    %927 = vector.broadcast %cst_239 : f32 to vector<8x128xf32>
    %928 = arith.mulf %927, %926 : vector<8x128xf32>
    %929 = math.exp %928 : vector<8x128xf32>
    %cst_240 = arith.constant 2.44948983 : f32
    %930 = vector.broadcast %cst_240 : f32 to vector<8x128xf32>
    %931 = arith.mulf %930, %928 : vector<8x128xf32>
    %932 = arith.addf %702, %931 : vector<8x128xf32>
    %933 = math.exp %932 : vector<8x128xf32>
    %934 = arith.mulf %126, %933 : vector<8x128xf32>
    %cst_241 = arith.constant 1.81649661 : f32
    %935 = vector.broadcast %cst_241 : f32 to vector<8x128xf32>
    %936 = arith.mulf %929, %935 : vector<8x128xf32>
    %cst_242 = arith.constant 0.183503419 : f32
    %937 = vector.broadcast %cst_242 : f32 to vector<8x128xf32>
    %938 = arith.addf %937, %936 : vector<8x128xf32>
    %939 = arith.mulf %934, %938 : vector<8x128xf32>
    %cst_243 = arith.constant 0.183503419 : f32
    %940 = vector.broadcast %cst_243 : f32 to vector<8x128xf32>
    %941 = arith.mulf %929, %940 : vector<8x128xf32>
    %cst_244 = arith.constant 1.81649661 : f32
    %942 = vector.broadcast %cst_244 : f32 to vector<8x128xf32>
    %943 = arith.addf %942, %941 : vector<8x128xf32>
    %944 = arith.mulf %128, %943 : vector<8x128xf32>
    %945 = arith.cmpf ogt, %939, %944 : vector<8x128xf32>
    %946 = arith.select %945, %924, %928 : vector<8x128xi1>, vector<8x128xf32>
    %947 = arith.select %945, %928, %925 : vector<8x128xi1>, vector<8x128xf32>
    %c11_i32 = arith.constant 11 : i32
    %948 = arith.addf %946, %947 : vector<8x128xf32>
    %cst_245 = arith.constant 5.000000e-01 : f32
    %949 = vector.broadcast %cst_245 : f32 to vector<8x128xf32>
    %950 = arith.mulf %949, %948 : vector<8x128xf32>
    %951 = math.exp %950 : vector<8x128xf32>
    %cst_246 = arith.constant 2.44948983 : f32
    %952 = vector.broadcast %cst_246 : f32 to vector<8x128xf32>
    %953 = arith.mulf %952, %950 : vector<8x128xf32>
    %954 = arith.addf %702, %953 : vector<8x128xf32>
    %955 = math.exp %954 : vector<8x128xf32>
    %956 = arith.mulf %126, %955 : vector<8x128xf32>
    %cst_247 = arith.constant 1.81649661 : f32
    %957 = vector.broadcast %cst_247 : f32 to vector<8x128xf32>
    %958 = arith.mulf %951, %957 : vector<8x128xf32>
    %cst_248 = arith.constant 0.183503419 : f32
    %959 = vector.broadcast %cst_248 : f32 to vector<8x128xf32>
    %960 = arith.addf %959, %958 : vector<8x128xf32>
    %961 = arith.mulf %956, %960 : vector<8x128xf32>
    %cst_249 = arith.constant 0.183503419 : f32
    %962 = vector.broadcast %cst_249 : f32 to vector<8x128xf32>
    %963 = arith.mulf %951, %962 : vector<8x128xf32>
    %cst_250 = arith.constant 1.81649661 : f32
    %964 = vector.broadcast %cst_250 : f32 to vector<8x128xf32>
    %965 = arith.addf %964, %963 : vector<8x128xf32>
    %966 = arith.mulf %128, %965 : vector<8x128xf32>
    %967 = arith.cmpf ogt, %961, %966 : vector<8x128xf32>
    %968 = arith.select %967, %946, %950 : vector<8x128xi1>, vector<8x128xf32>
    %969 = arith.select %967, %950, %947 : vector<8x128xi1>, vector<8x128xf32>
    %c12_i32 = arith.constant 12 : i32
    %970 = arith.addf %968, %969 : vector<8x128xf32>
    %cst_251 = arith.constant 5.000000e-01 : f32
    %971 = vector.broadcast %cst_251 : f32 to vector<8x128xf32>
    %972 = arith.mulf %971, %970 : vector<8x128xf32>
    %973 = math.exp %972 : vector<8x128xf32>
    %cst_252 = arith.constant 2.44948983 : f32
    %974 = vector.broadcast %cst_252 : f32 to vector<8x128xf32>
    %975 = arith.mulf %974, %972 : vector<8x128xf32>
    %976 = arith.addf %702, %975 : vector<8x128xf32>
    %977 = math.exp %976 : vector<8x128xf32>
    %978 = arith.mulf %126, %977 : vector<8x128xf32>
    %cst_253 = arith.constant 1.81649661 : f32
    %979 = vector.broadcast %cst_253 : f32 to vector<8x128xf32>
    %980 = arith.mulf %973, %979 : vector<8x128xf32>
    %cst_254 = arith.constant 0.183503419 : f32
    %981 = vector.broadcast %cst_254 : f32 to vector<8x128xf32>
    %982 = arith.addf %981, %980 : vector<8x128xf32>
    %983 = arith.mulf %978, %982 : vector<8x128xf32>
    %cst_255 = arith.constant 0.183503419 : f32
    %984 = vector.broadcast %cst_255 : f32 to vector<8x128xf32>
    %985 = arith.mulf %973, %984 : vector<8x128xf32>
    %cst_256 = arith.constant 1.81649661 : f32
    %986 = vector.broadcast %cst_256 : f32 to vector<8x128xf32>
    %987 = arith.addf %986, %985 : vector<8x128xf32>
    %988 = arith.mulf %128, %987 : vector<8x128xf32>
    %989 = arith.cmpf ogt, %983, %988 : vector<8x128xf32>
    %990 = arith.select %989, %968, %972 : vector<8x128xi1>, vector<8x128xf32>
    %991 = arith.select %989, %972, %969 : vector<8x128xi1>, vector<8x128xf32>
    %c13_i32 = arith.constant 13 : i32
    %992 = arith.addf %990, %991 : vector<8x128xf32>
    %cst_257 = arith.constant 5.000000e-01 : f32
    %993 = vector.broadcast %cst_257 : f32 to vector<8x128xf32>
    %994 = arith.mulf %993, %992 : vector<8x128xf32>
    %995 = math.exp %994 : vector<8x128xf32>
    %cst_258 = arith.constant 2.44948983 : f32
    %996 = vector.broadcast %cst_258 : f32 to vector<8x128xf32>
    %997 = arith.mulf %996, %994 : vector<8x128xf32>
    %998 = arith.addf %702, %997 : vector<8x128xf32>
    %999 = math.exp %998 : vector<8x128xf32>
    %1000 = arith.mulf %126, %999 : vector<8x128xf32>
    %cst_259 = arith.constant 1.81649661 : f32
    %1001 = vector.broadcast %cst_259 : f32 to vector<8x128xf32>
    %1002 = arith.mulf %995, %1001 : vector<8x128xf32>
    %cst_260 = arith.constant 0.183503419 : f32
    %1003 = vector.broadcast %cst_260 : f32 to vector<8x128xf32>
    %1004 = arith.addf %1003, %1002 : vector<8x128xf32>
    %1005 = arith.mulf %1000, %1004 : vector<8x128xf32>
    %cst_261 = arith.constant 0.183503419 : f32
    %1006 = vector.broadcast %cst_261 : f32 to vector<8x128xf32>
    %1007 = arith.mulf %995, %1006 : vector<8x128xf32>
    %cst_262 = arith.constant 1.81649661 : f32
    %1008 = vector.broadcast %cst_262 : f32 to vector<8x128xf32>
    %1009 = arith.addf %1008, %1007 : vector<8x128xf32>
    %1010 = arith.mulf %128, %1009 : vector<8x128xf32>
    %1011 = arith.cmpf ogt, %1005, %1010 : vector<8x128xf32>
    %1012 = arith.select %1011, %990, %994 : vector<8x128xi1>, vector<8x128xf32>
    %1013 = arith.select %1011, %994, %991 : vector<8x128xi1>, vector<8x128xf32>
    %c14_i32 = arith.constant 14 : i32
    %1014 = arith.addf %1012, %1013 : vector<8x128xf32>
    %cst_263 = arith.constant 5.000000e-01 : f32
    %1015 = vector.broadcast %cst_263 : f32 to vector<8x128xf32>
    %1016 = arith.mulf %1015, %1014 : vector<8x128xf32>
    %1017 = math.exp %1016 : vector<8x128xf32>
    %cst_264 = arith.constant 2.44948983 : f32
    %1018 = vector.broadcast %cst_264 : f32 to vector<8x128xf32>
    %1019 = arith.mulf %1018, %1016 : vector<8x128xf32>
    %1020 = arith.addf %702, %1019 : vector<8x128xf32>
    %1021 = math.exp %1020 : vector<8x128xf32>
    %1022 = arith.mulf %126, %1021 : vector<8x128xf32>
    %cst_265 = arith.constant 1.81649661 : f32
    %1023 = vector.broadcast %cst_265 : f32 to vector<8x128xf32>
    %1024 = arith.mulf %1017, %1023 : vector<8x128xf32>
    %cst_266 = arith.constant 0.183503419 : f32
    %1025 = vector.broadcast %cst_266 : f32 to vector<8x128xf32>
    %1026 = arith.addf %1025, %1024 : vector<8x128xf32>
    %1027 = arith.mulf %1022, %1026 : vector<8x128xf32>
    %cst_267 = arith.constant 0.183503419 : f32
    %1028 = vector.broadcast %cst_267 : f32 to vector<8x128xf32>
    %1029 = arith.mulf %1017, %1028 : vector<8x128xf32>
    %cst_268 = arith.constant 1.81649661 : f32
    %1030 = vector.broadcast %cst_268 : f32 to vector<8x128xf32>
    %1031 = arith.addf %1030, %1029 : vector<8x128xf32>
    %1032 = arith.mulf %128, %1031 : vector<8x128xf32>
    %1033 = arith.cmpf ogt, %1027, %1032 : vector<8x128xf32>
    %1034 = arith.select %1033, %1012, %1016 : vector<8x128xi1>, vector<8x128xf32>
    %1035 = arith.select %1033, %1016, %1013 : vector<8x128xi1>, vector<8x128xf32>
    %c15_i32 = arith.constant 15 : i32
    %1036 = arith.addf %1034, %1035 : vector<8x128xf32>
    %cst_269 = arith.constant 5.000000e-01 : f32
    %1037 = vector.broadcast %cst_269 : f32 to vector<8x128xf32>
    %1038 = arith.mulf %1037, %1036 : vector<8x128xf32>
    %1039 = math.exp %1038 : vector<8x128xf32>
    %cst_270 = arith.constant 2.44948983 : f32
    %1040 = vector.broadcast %cst_270 : f32 to vector<8x128xf32>
    %1041 = arith.mulf %1040, %1038 : vector<8x128xf32>
    %1042 = arith.addf %702, %1041 : vector<8x128xf32>
    %1043 = math.exp %1042 : vector<8x128xf32>
    %1044 = arith.mulf %126, %1043 : vector<8x128xf32>
    %cst_271 = arith.constant 1.81649661 : f32
    %1045 = vector.broadcast %cst_271 : f32 to vector<8x128xf32>
    %1046 = arith.mulf %1039, %1045 : vector<8x128xf32>
    %cst_272 = arith.constant 0.183503419 : f32
    %1047 = vector.broadcast %cst_272 : f32 to vector<8x128xf32>
    %1048 = arith.addf %1047, %1046 : vector<8x128xf32>
    %1049 = arith.mulf %1044, %1048 : vector<8x128xf32>
    %cst_273 = arith.constant 0.183503419 : f32
    %1050 = vector.broadcast %cst_273 : f32 to vector<8x128xf32>
    %1051 = arith.mulf %1039, %1050 : vector<8x128xf32>
    %cst_274 = arith.constant 1.81649661 : f32
    %1052 = vector.broadcast %cst_274 : f32 to vector<8x128xf32>
    %1053 = arith.addf %1052, %1051 : vector<8x128xf32>
    %1054 = arith.mulf %128, %1053 : vector<8x128xf32>
    %1055 = arith.cmpf ogt, %1049, %1054 : vector<8x128xf32>
    %1056 = arith.select %1055, %1034, %1038 : vector<8x128xi1>, vector<8x128xf32>
    %1057 = arith.select %1055, %1038, %1035 : vector<8x128xi1>, vector<8x128xf32>
    %c16_i32 = arith.constant 16 : i32
    %1058 = arith.addf %1056, %1057 : vector<8x128xf32>
    %cst_275 = arith.constant 5.000000e-01 : f32
    %1059 = vector.broadcast %cst_275 : f32 to vector<8x128xf32>
    %1060 = arith.mulf %1059, %1058 : vector<8x128xf32>
    %1061 = math.exp %1060 : vector<8x128xf32>
    %cst_276 = arith.constant 2.44948983 : f32
    %1062 = vector.broadcast %cst_276 : f32 to vector<8x128xf32>
    %1063 = arith.mulf %1062, %1060 : vector<8x128xf32>
    %1064 = arith.addf %702, %1063 : vector<8x128xf32>
    %1065 = math.exp %1064 : vector<8x128xf32>
    %1066 = arith.mulf %126, %1065 : vector<8x128xf32>
    %cst_277 = arith.constant 1.81649661 : f32
    %1067 = vector.broadcast %cst_277 : f32 to vector<8x128xf32>
    %1068 = arith.mulf %1061, %1067 : vector<8x128xf32>
    %cst_278 = arith.constant 0.183503419 : f32
    %1069 = vector.broadcast %cst_278 : f32 to vector<8x128xf32>
    %1070 = arith.addf %1069, %1068 : vector<8x128xf32>
    %1071 = arith.mulf %1066, %1070 : vector<8x128xf32>
    %cst_279 = arith.constant 0.183503419 : f32
    %1072 = vector.broadcast %cst_279 : f32 to vector<8x128xf32>
    %1073 = arith.mulf %1061, %1072 : vector<8x128xf32>
    %cst_280 = arith.constant 1.81649661 : f32
    %1074 = vector.broadcast %cst_280 : f32 to vector<8x128xf32>
    %1075 = arith.addf %1074, %1073 : vector<8x128xf32>
    %1076 = arith.mulf %128, %1075 : vector<8x128xf32>
    %1077 = arith.cmpf ogt, %1071, %1076 : vector<8x128xf32>
    %1078 = arith.select %1077, %1056, %1060 : vector<8x128xi1>, vector<8x128xf32>
    %1079 = arith.select %1077, %1060, %1057 : vector<8x128xi1>, vector<8x128xf32>
    %c17_i32 = arith.constant 17 : i32
    %1080 = arith.addf %1078, %1079 : vector<8x128xf32>
    %cst_281 = arith.constant 5.000000e-01 : f32
    %1081 = vector.broadcast %cst_281 : f32 to vector<8x128xf32>
    %1082 = arith.mulf %1081, %1080 : vector<8x128xf32>
    %1083 = math.exp %1082 : vector<8x128xf32>
    %cst_282 = arith.constant 2.44948983 : f32
    %1084 = vector.broadcast %cst_282 : f32 to vector<8x128xf32>
    %1085 = arith.mulf %1084, %1082 : vector<8x128xf32>
    %1086 = arith.addf %702, %1085 : vector<8x128xf32>
    %1087 = math.exp %1086 : vector<8x128xf32>
    %1088 = arith.mulf %126, %1087 : vector<8x128xf32>
    %cst_283 = arith.constant 1.81649661 : f32
    %1089 = vector.broadcast %cst_283 : f32 to vector<8x128xf32>
    %1090 = arith.mulf %1083, %1089 : vector<8x128xf32>
    %cst_284 = arith.constant 0.183503419 : f32
    %1091 = vector.broadcast %cst_284 : f32 to vector<8x128xf32>
    %1092 = arith.addf %1091, %1090 : vector<8x128xf32>
    %1093 = arith.mulf %1088, %1092 : vector<8x128xf32>
    %cst_285 = arith.constant 0.183503419 : f32
    %1094 = vector.broadcast %cst_285 : f32 to vector<8x128xf32>
    %1095 = arith.mulf %1083, %1094 : vector<8x128xf32>
    %cst_286 = arith.constant 1.81649661 : f32
    %1096 = vector.broadcast %cst_286 : f32 to vector<8x128xf32>
    %1097 = arith.addf %1096, %1095 : vector<8x128xf32>
    %1098 = arith.mulf %128, %1097 : vector<8x128xf32>
    %1099 = arith.cmpf ogt, %1093, %1098 : vector<8x128xf32>
    %1100 = arith.select %1099, %1078, %1082 : vector<8x128xi1>, vector<8x128xf32>
    %1101 = arith.select %1099, %1082, %1079 : vector<8x128xi1>, vector<8x128xf32>
    %c18_i32 = arith.constant 18 : i32
    %1102 = arith.addf %1100, %1101 : vector<8x128xf32>
    %cst_287 = arith.constant 5.000000e-01 : f32
    %1103 = vector.broadcast %cst_287 : f32 to vector<8x128xf32>
    %1104 = arith.mulf %1103, %1102 : vector<8x128xf32>
    %1105 = math.exp %1104 : vector<8x128xf32>
    %cst_288 = arith.constant 2.44948983 : f32
    %1106 = vector.broadcast %cst_288 : f32 to vector<8x128xf32>
    %1107 = arith.mulf %1106, %1104 : vector<8x128xf32>
    %1108 = arith.addf %702, %1107 : vector<8x128xf32>
    %1109 = math.exp %1108 : vector<8x128xf32>
    %1110 = arith.mulf %126, %1109 : vector<8x128xf32>
    %cst_289 = arith.constant 1.81649661 : f32
    %1111 = vector.broadcast %cst_289 : f32 to vector<8x128xf32>
    %1112 = arith.mulf %1105, %1111 : vector<8x128xf32>
    %cst_290 = arith.constant 0.183503419 : f32
    %1113 = vector.broadcast %cst_290 : f32 to vector<8x128xf32>
    %1114 = arith.addf %1113, %1112 : vector<8x128xf32>
    %1115 = arith.mulf %1110, %1114 : vector<8x128xf32>
    %cst_291 = arith.constant 0.183503419 : f32
    %1116 = vector.broadcast %cst_291 : f32 to vector<8x128xf32>
    %1117 = arith.mulf %1105, %1116 : vector<8x128xf32>
    %cst_292 = arith.constant 1.81649661 : f32
    %1118 = vector.broadcast %cst_292 : f32 to vector<8x128xf32>
    %1119 = arith.addf %1118, %1117 : vector<8x128xf32>
    %1120 = arith.mulf %128, %1119 : vector<8x128xf32>
    %1121 = arith.cmpf ogt, %1115, %1120 : vector<8x128xf32>
    %1122 = arith.select %1121, %1100, %1104 : vector<8x128xi1>, vector<8x128xf32>
    %1123 = arith.select %1121, %1104, %1101 : vector<8x128xi1>, vector<8x128xf32>
    %c19_i32 = arith.constant 19 : i32
    %1124 = arith.addf %1122, %1123 : vector<8x128xf32>
    %cst_293 = arith.constant 5.000000e-01 : f32
    %1125 = vector.broadcast %cst_293 : f32 to vector<8x128xf32>
    %1126 = arith.mulf %1125, %1124 : vector<8x128xf32>
    %1127 = math.exp %1126 : vector<8x128xf32>
    %cst_294 = arith.constant 2.44948983 : f32
    %1128 = vector.broadcast %cst_294 : f32 to vector<8x128xf32>
    %1129 = arith.mulf %1128, %1126 : vector<8x128xf32>
    %1130 = arith.addf %702, %1129 : vector<8x128xf32>
    %1131 = math.exp %1130 : vector<8x128xf32>
    %1132 = arith.mulf %126, %1131 : vector<8x128xf32>
    %cst_295 = arith.constant 1.81649661 : f32
    %1133 = vector.broadcast %cst_295 : f32 to vector<8x128xf32>
    %1134 = arith.mulf %1127, %1133 : vector<8x128xf32>
    %cst_296 = arith.constant 0.183503419 : f32
    %1135 = vector.broadcast %cst_296 : f32 to vector<8x128xf32>
    %1136 = arith.addf %1135, %1134 : vector<8x128xf32>
    %1137 = arith.mulf %1132, %1136 : vector<8x128xf32>
    %cst_297 = arith.constant 0.183503419 : f32
    %1138 = vector.broadcast %cst_297 : f32 to vector<8x128xf32>
    %1139 = arith.mulf %1127, %1138 : vector<8x128xf32>
    %cst_298 = arith.constant 1.81649661 : f32
    %1140 = vector.broadcast %cst_298 : f32 to vector<8x128xf32>
    %1141 = arith.addf %1140, %1139 : vector<8x128xf32>
    %1142 = arith.mulf %128, %1141 : vector<8x128xf32>
    %1143 = arith.cmpf ogt, %1137, %1142 : vector<8x128xf32>
    %1144 = arith.select %1143, %1122, %1126 : vector<8x128xi1>, vector<8x128xf32>
    %1145 = arith.select %1143, %1126, %1123 : vector<8x128xi1>, vector<8x128xf32>
    %c20_i32 = arith.constant 20 : i32
    %1146 = arith.addf %1144, %1145 : vector<8x128xf32>
    %cst_299 = arith.constant 5.000000e-01 : f32
    %1147 = vector.broadcast %cst_299 : f32 to vector<8x128xf32>
    %1148 = arith.mulf %1147, %1146 : vector<8x128xf32>
    %1149 = math.exp %1148 : vector<8x128xf32>
    %cst_300 = arith.constant 2.44948983 : f32
    %1150 = vector.broadcast %cst_300 : f32 to vector<8x128xf32>
    %1151 = arith.mulf %1150, %1148 : vector<8x128xf32>
    %1152 = arith.addf %702, %1151 : vector<8x128xf32>
    %1153 = math.exp %1152 : vector<8x128xf32>
    %1154 = arith.mulf %126, %1153 : vector<8x128xf32>
    %cst_301 = arith.constant 1.81649661 : f32
    %1155 = vector.broadcast %cst_301 : f32 to vector<8x128xf32>
    %1156 = arith.mulf %1149, %1155 : vector<8x128xf32>
    %cst_302 = arith.constant 0.183503419 : f32
    %1157 = vector.broadcast %cst_302 : f32 to vector<8x128xf32>
    %1158 = arith.addf %1157, %1156 : vector<8x128xf32>
    %1159 = arith.mulf %1154, %1158 : vector<8x128xf32>
    %cst_303 = arith.constant 0.183503419 : f32
    %1160 = vector.broadcast %cst_303 : f32 to vector<8x128xf32>
    %1161 = arith.mulf %1149, %1160 : vector<8x128xf32>
    %cst_304 = arith.constant 1.81649661 : f32
    %1162 = vector.broadcast %cst_304 : f32 to vector<8x128xf32>
    %1163 = arith.addf %1162, %1161 : vector<8x128xf32>
    %1164 = arith.mulf %128, %1163 : vector<8x128xf32>
    %1165 = arith.cmpf ogt, %1159, %1164 : vector<8x128xf32>
    %1166 = arith.select %1165, %1144, %1148 : vector<8x128xi1>, vector<8x128xf32>
    %1167 = arith.select %1165, %1148, %1145 : vector<8x128xi1>, vector<8x128xf32>
    %c21_i32 = arith.constant 21 : i32
    %1168 = arith.addf %1166, %1167 : vector<8x128xf32>
    %cst_305 = arith.constant 5.000000e-01 : f32
    %1169 = vector.broadcast %cst_305 : f32 to vector<8x128xf32>
    %1170 = arith.mulf %1169, %1168 : vector<8x128xf32>
    %1171 = math.exp %1170 : vector<8x128xf32>
    %cst_306 = arith.constant 2.44948983 : f32
    %1172 = vector.broadcast %cst_306 : f32 to vector<8x128xf32>
    %1173 = arith.mulf %1172, %1170 : vector<8x128xf32>
    %1174 = arith.addf %702, %1173 : vector<8x128xf32>
    %1175 = math.exp %1174 : vector<8x128xf32>
    %1176 = arith.mulf %126, %1175 : vector<8x128xf32>
    %cst_307 = arith.constant 1.81649661 : f32
    %1177 = vector.broadcast %cst_307 : f32 to vector<8x128xf32>
    %1178 = arith.mulf %1171, %1177 : vector<8x128xf32>
    %cst_308 = arith.constant 0.183503419 : f32
    %1179 = vector.broadcast %cst_308 : f32 to vector<8x128xf32>
    %1180 = arith.addf %1179, %1178 : vector<8x128xf32>
    %1181 = arith.mulf %1176, %1180 : vector<8x128xf32>
    %cst_309 = arith.constant 0.183503419 : f32
    %1182 = vector.broadcast %cst_309 : f32 to vector<8x128xf32>
    %1183 = arith.mulf %1171, %1182 : vector<8x128xf32>
    %cst_310 = arith.constant 1.81649661 : f32
    %1184 = vector.broadcast %cst_310 : f32 to vector<8x128xf32>
    %1185 = arith.addf %1184, %1183 : vector<8x128xf32>
    %1186 = arith.mulf %128, %1185 : vector<8x128xf32>
    %1187 = arith.cmpf ogt, %1181, %1186 : vector<8x128xf32>
    %1188 = arith.select %1187, %1166, %1170 : vector<8x128xi1>, vector<8x128xf32>
    %1189 = arith.select %1187, %1170, %1167 : vector<8x128xi1>, vector<8x128xf32>
    %c22_i32 = arith.constant 22 : i32
    %1190 = arith.addf %1188, %1189 : vector<8x128xf32>
    %cst_311 = arith.constant 5.000000e-01 : f32
    %1191 = vector.broadcast %cst_311 : f32 to vector<8x128xf32>
    %1192 = arith.mulf %1191, %1190 : vector<8x128xf32>
    %1193 = math.exp %1192 : vector<8x128xf32>
    %cst_312 = arith.constant 2.44948983 : f32
    %1194 = vector.broadcast %cst_312 : f32 to vector<8x128xf32>
    %1195 = arith.mulf %1194, %1192 : vector<8x128xf32>
    %1196 = arith.addf %702, %1195 : vector<8x128xf32>
    %1197 = math.exp %1196 : vector<8x128xf32>
    %1198 = arith.mulf %126, %1197 : vector<8x128xf32>
    %cst_313 = arith.constant 1.81649661 : f32
    %1199 = vector.broadcast %cst_313 : f32 to vector<8x128xf32>
    %1200 = arith.mulf %1193, %1199 : vector<8x128xf32>
    %cst_314 = arith.constant 0.183503419 : f32
    %1201 = vector.broadcast %cst_314 : f32 to vector<8x128xf32>
    %1202 = arith.addf %1201, %1200 : vector<8x128xf32>
    %1203 = arith.mulf %1198, %1202 : vector<8x128xf32>
    %cst_315 = arith.constant 0.183503419 : f32
    %1204 = vector.broadcast %cst_315 : f32 to vector<8x128xf32>
    %1205 = arith.mulf %1193, %1204 : vector<8x128xf32>
    %cst_316 = arith.constant 1.81649661 : f32
    %1206 = vector.broadcast %cst_316 : f32 to vector<8x128xf32>
    %1207 = arith.addf %1206, %1205 : vector<8x128xf32>
    %1208 = arith.mulf %128, %1207 : vector<8x128xf32>
    %1209 = arith.cmpf ogt, %1203, %1208 : vector<8x128xf32>
    %1210 = arith.select %1209, %1188, %1192 : vector<8x128xi1>, vector<8x128xf32>
    %1211 = arith.select %1209, %1192, %1189 : vector<8x128xi1>, vector<8x128xf32>
    %c23_i32 = arith.constant 23 : i32
    %1212 = arith.addf %1210, %1211 : vector<8x128xf32>
    %cst_317 = arith.constant 5.000000e-01 : f32
    %1213 = vector.broadcast %cst_317 : f32 to vector<8x128xf32>
    %1214 = arith.mulf %1213, %1212 : vector<8x128xf32>
    %1215 = math.exp %1214 : vector<8x128xf32>
    %cst_318 = arith.constant 2.44948983 : f32
    %1216 = vector.broadcast %cst_318 : f32 to vector<8x128xf32>
    %1217 = arith.mulf %1216, %1214 : vector<8x128xf32>
    %1218 = arith.addf %702, %1217 : vector<8x128xf32>
    %1219 = math.exp %1218 : vector<8x128xf32>
    %1220 = arith.mulf %126, %1219 : vector<8x128xf32>
    %cst_319 = arith.constant 1.81649661 : f32
    %1221 = vector.broadcast %cst_319 : f32 to vector<8x128xf32>
    %1222 = arith.mulf %1215, %1221 : vector<8x128xf32>
    %cst_320 = arith.constant 0.183503419 : f32
    %1223 = vector.broadcast %cst_320 : f32 to vector<8x128xf32>
    %1224 = arith.addf %1223, %1222 : vector<8x128xf32>
    %1225 = arith.mulf %1220, %1224 : vector<8x128xf32>
    %cst_321 = arith.constant 0.183503419 : f32
    %1226 = vector.broadcast %cst_321 : f32 to vector<8x128xf32>
    %1227 = arith.mulf %1215, %1226 : vector<8x128xf32>
    %cst_322 = arith.constant 1.81649661 : f32
    %1228 = vector.broadcast %cst_322 : f32 to vector<8x128xf32>
    %1229 = arith.addf %1228, %1227 : vector<8x128xf32>
    %1230 = arith.mulf %128, %1229 : vector<8x128xf32>
    %1231 = arith.cmpf ogt, %1225, %1230 : vector<8x128xf32>
    %1232 = arith.select %1231, %1210, %1214 : vector<8x128xi1>, vector<8x128xf32>
    %1233 = arith.select %1231, %1214, %1211 : vector<8x128xi1>, vector<8x128xf32>
    %1234 = arith.addf %1232, %1233 : vector<8x128xf32>
    %cst_323 = arith.constant 5.000000e-01 : f32
    %1235 = vector.broadcast %cst_323 : f32 to vector<8x128xf32>
    %1236 = arith.mulf %1235, %1234 : vector<8x128xf32>
    %1237 = math.exp %1236 : vector<8x128xf32>
    %cst_324 = arith.constant 1.000000e+00 : f32
    %1238 = vector.broadcast %cst_324 : f32 to vector<8x128xf32>
    %1239 = arith.subf %1238, %1237 : vector<8x128xf32>
    %cst_325 = arith.constant 0.816496611 : f32
    %1240 = vector.broadcast %cst_325 : f32 to vector<8x128xf32>
    %1241 = arith.mulf %1240, %1239 : vector<8x128xf32>
    %cst_326 = arith.constant 1.000000e+00 : f32
    %1242 = vector.broadcast %cst_326 : f32 to vector<8x128xf32>
    %1243 = arith.addf %1242, %1237 : vector<8x128xf32>
    %1244 = arith.divf %1241, %1243 : vector<8x128xf32>
    %1245 = arith.mulf %1244, %1244 : vector<8x128xf32>
    %cst_327 = arith.constant 0.666666686 : f32
    %1246 = vector.broadcast %cst_327 : f32 to vector<8x128xf32>
    %1247 = arith.mulf %1245, %1246 : vector<8x128xf32>
    %cst_328 = arith.constant 0.666666686 : f32
    %1248 = vector.broadcast %cst_328 : f32 to vector<8x128xf32>
    %1249 = arith.subf %1248, %1245 : vector<8x128xf32>
    %cst_329 = arith.constant 9.99999996E-13 : f32
    %1250 = vector.broadcast %cst_329 : f32 to vector<8x128xf32>
    %1251 = arith.maximumf %1249, %1250 : vector<8x128xf32>
    %cst_330 = arith.constant 1.66666663 : f32
    %1252 = vector.broadcast %cst_330 : f32 to vector<8x128xf32>
    %1253 = arith.mulf %1252, %1251 : vector<8x128xf32>
    %1254 = arith.divf %1247, %1253 : vector<8x128xf32>
    %1255 = math.log %1254 : vector<8x128xf32>
    %cst_331 = arith.constant 1.66666663 : f32
    %1256 = vector.broadcast %cst_331 : f32 to vector<8x128xf32>
    %1257 = arith.mulf %1256, %16 : vector<8x128xf32>
    %1258 = arith.subf %17, %1257 : vector<8x128xf32>
    %1259 = arith.subf %1255, %1258 : vector<8x128xf32>
    %cst_332 = arith.constant 1.500000e+00 : f32
    %1260 = vector.broadcast %cst_332 : f32 to vector<8x128xf32>
    %1261 = arith.mulf %1259, %1260 : vector<8x128xf32>
    %1262 = math.exp %1261 : vector<8x128xf32>
    %1263 = arith.mulf %1254, %1262 : vector<8x128xf32>
    %cst_333 = arith.constant 2.500000e+00 : f32
    %1264 = vector.broadcast %cst_333 : f32 to vector<8x128xf32>
    %1265 = arith.mulf %1264, %1254 : vector<8x128xf32>
    %cst_334 = arith.constant 1.000000e+00 : f32
    %1266 = vector.broadcast %cst_334 : f32 to vector<8x128xf32>
    %1267 = arith.addf %1266, %1265 : vector<8x128xf32>
    %1268 = arith.mulf %1244, %1244 : vector<8x128xf32>
    %cst_335 = arith.constant 1.000000e+00 : f32
    %1269 = vector.broadcast %cst_335 : f32 to vector<8x128xf32>
    %1270 = arith.subf %1269, %1268 : vector<8x128xf32>
    %1271 = math.rsqrt %1270 : vector<8x128xf32>
    %1272 = arith.mulf %1271, %1262 : vector<8x128xf32>
    %1273 = arith.mulf %1271, %1271 : vector<8x128xf32>
    %1274 = arith.mulf %1273, %1262 : vector<8x128xf32>
    %1275 = arith.mulf %1274, %1267 : vector<8x128xf32>
    %1276 = arith.mulf %1275, %1244 : vector<8x128xf32>
    %1277 = arith.mulf %1272, %1244 : vector<8x128xf32>
    %1278 = arith.mulf %1271, %1267 : vector<8x128xf32>
    %cst_336 = arith.constant 1.000000e+00 : f32
    %1279 = vector.broadcast %cst_336 : f32 to vector<8x128xf32>
    %1280 = arith.subf %1278, %1279 : vector<8x128xf32>
    %1281 = arith.mulf %1272, %1280 : vector<8x128xf32>
    %1282 = arith.mulf %1281, %1244 : vector<8x128xf32>
    %1283 = arith.mulf %1276, %1244 : vector<8x128xf32>
    %1284 = arith.addf %1283, %1263 : vector<8x128xf32>
    %1285 = vector.shape_cast %1277 : vector<8x128xf32> to vector<1x8x128xf32>
    %1286 = vector.shape_cast %1282 : vector<8x128xf32> to vector<1x8x128xf32>
    %1287 = vector.shape_cast %1284 : vector<8x128xf32> to vector<1x8x128xf32>
    %1288 = tpu.concatenate %1285, %1286, %1287 in 0 : vector<1x8x128xf32>, vector<1x8x128xf32>, vector<1x8x128xf32> -> vector<3x8x128xf32>
    %c0_337 = arith.constant 0 : index
    %c0_338 = arith.constant 0 : index
    %c0_339 = arith.constant 0 : index
    %c0_340 = arith.constant 0 : index
    %1289 = vector.load %arg2[%c0_337, %c0_338, %c0_339, %c0_340] : memref<2x3x8x128xf32, #tpu.memory_space<vmem>>, vector<1x3x8x128xf32>
    %1290 = vector.shape_cast %1289 : vector<1x3x8x128xf32> to vector<3x8x128xf32>
    %c1_341 = arith.constant 1 : index
    %c0_342 = arith.constant 0 : index
    %c0_343 = arith.constant 0 : index
    %c0_344 = arith.constant 0 : index
    %1291 = vector.load %arg2[%c1_341, %c0_342, %c0_343, %c0_344] : memref<2x3x8x128xf32, #tpu.memory_space<vmem>>, vector<1x3x8x128xf32>
    %1292 = vector.shape_cast %1291 : vector<1x3x8x128xf32> to vector<3x8x128xf32>
    %cst_345 = arith.constant 0.000000e+00 : f32
    %1293 = vector.broadcast %cst_345 : f32 to vector<8x128xf32>
    %1294 = arith.cmpf oge, %662, %1293 : vector<8x128xf32>
    %1295 = vector.shape_cast %1294 : vector<8x128xi1> to vector<1x8x128xi1>
    %cst_346 = arith.constant 0.000000e+00 : f32
    %1296 = vector.broadcast %cst_346 : f32 to vector<8x128xf32>
    %1297 = arith.cmpf olt, %662, %1296 : vector<8x128xf32>
    %cst_347 = arith.constant 0.000000e+00 : f32
    %1298 = vector.broadcast %cst_347 : f32 to vector<8x128xf32>
    %1299 = arith.cmpf oge, %656, %1298 : vector<8x128xf32>
    %1300 = arith.andi %1297, %1299 : vector<8x128xi1>
    %1301 = vector.shape_cast %1300 : vector<8x128xi1> to vector<1x8x128xi1>
    %cst_348 = arith.constant 0.000000e+00 : f32
    %1302 = vector.broadcast %cst_348 : f32 to vector<8x128xf32>
    %1303 = arith.cmpf olt, %656, %1302 : vector<8x128xf32>
    %cst_349 = arith.constant 0.000000e+00 : f32
    %1304 = vector.broadcast %cst_349 : f32 to vector<8x128xf32>
    %1305 = arith.cmpf ogt, %650, %1304 : vector<8x128xf32>
    %1306 = arith.andi %1303, %1305 : vector<8x128xi1>
    %1307 = vector.shape_cast %1306 : vector<8x128xi1> to vector<1x8x128xi1>
    %cst_350 = arith.constant 0.000000e+00 : f32
    %1308 = vector.broadcast %cst_350 : f32 to vector<8x128xf32>
    %1309 = arith.cmpf ole, %650, %1308 : vector<8x128xf32>
    %cst_351 = arith.constant 0.000000e+00 : f32
    %1310 = vector.broadcast %cst_351 : f32 to vector<8x128xf32>
    %1311 = arith.cmpf ogt, %649, %1310 : vector<8x128xf32>
    %1312 = arith.andi %1309, %1311 : vector<8x128xi1>
    %1313 = vector.shape_cast %1312 : vector<8x128xi1> to vector<1x8x128xi1>
    %cst_352 = arith.constant 0.000000e+00 : f32
    %1314 = vector.broadcast %cst_352 : f32 to vector<8x128xf32>
    %1315 = arith.cmpf ole, %649, %1314 : vector<8x128xf32>
    %1316 = vector.shape_cast %1315 : vector<8x128xi1> to vector<1x8x128xi1>
    %cst_353 = arith.constant 0.000000e+00 : f32
    %1317 = vector.broadcast %cst_353 : f32 to vector<3x8x128xf32>
    %1318 = vector.shape_cast %1295 : vector<1x8x128xi1> to vector<1x8x128xi1>
    %1319 = vector.broadcast %1318 : vector<1x8x128xi1> to vector<3x8x128xi1>
    %1320 = arith.select %1319, %1290, %1317 : vector<3x8x128xi1>, vector<3x8x128xf32>
    %1321 = vector.shape_cast %1301 : vector<1x8x128xi1> to vector<1x8x128xi1>
    %1322 = vector.broadcast %1321 : vector<1x8x128xi1> to vector<3x8x128xi1>
    %1323 = arith.select %1322, %1288, %1320 : vector<3x8x128xi1>, vector<3x8x128xf32>
    %1324 = vector.shape_cast %1307 : vector<1x8x128xi1> to vector<1x8x128xi1>
    %1325 = vector.broadcast %1324 : vector<1x8x128xi1> to vector<3x8x128xi1>
    %1326 = arith.select %1325, %688, %1323 : vector<3x8x128xi1>, vector<3x8x128xf32>
    %1327 = vector.shape_cast %1313 : vector<1x8x128xi1> to vector<1x8x128xi1>
    %1328 = vector.broadcast %1327 : vector<1x8x128xi1> to vector<3x8x128xi1>
    %1329 = arith.select %1328, %700, %1326 : vector<3x8x128xi1>, vector<3x8x128xf32>
    %1330 = vector.shape_cast %1316 : vector<1x8x128xi1> to vector<1x8x128xi1>
    %1331 = vector.broadcast %1330 : vector<1x8x128xi1> to vector<3x8x128xi1>
    %1332 = arith.select %1331, %1292, %1329 : vector<3x8x128xi1>, vector<3x8x128xf32>
    %c0_354 = arith.constant 0 : index
    %c0_355 = arith.constant 0 : index
    %c0_356 = arith.constant 0 : index
    %1333 = vector.load %arg8[%c0_354, %c0_355, %c0_356] : memref<3x8x128xf32, #tpu.memory_space<vmem>>, vector<3x8x128xf32>
    tpu.vector_store %arg8[%c0_354, %c0_355, %c0_356], %1332 {strides = array<i32>} : memref<3x8x128xf32, #tpu.memory_space<vmem>>, vector<3x8x128xf32>,
    return
  }
  func.func @transform_0(%arg0: i32) -> (i32, i32, i32, i32) {
    %c0_i32 = arith.constant 0 : i32
    %c0_i32_0 = arith.constant 0 : i32
    %c0_i32_1 = arith.constant 0 : i32
    %c0_i32_2 = arith.constant 0 : i32
    return %c0_i32, %c0_i32_0, %arg0, %c0_i32_1 : i32, i32, i32, i32
  }
  func.func @transform_1(%arg0: i32) -> (i32, i32, i32, i32) {
    %c0_i32 = arith.constant 0 : i32
    %c0_i32_0 = arith.constant 0 : i32
    %c0_i32_1 = arith.constant 0 : i32
    %c0_i32_2 = arith.constant 0 : i32
    return %c0_i32, %c0_i32_0, %arg0, %c0_i32_1 : i32, i32, i32, i32
  }
  func.func @transform_2(%arg0: i32) -> (i32, i32) {
    %c0_i32 = arith.constant 0 : i32
    %c0_i32_0 = arith.constant 0 : i32
    %c0_i32_1 = arith.constant 0 : i32
    return %c0_i32, %c0_i32_0 : i32, i32
  }
  func.func @transform_3(%arg0: i32) -> (i32, i32) {
    %c0_i32 = arith.constant 0 : i32
    %c0_i32_0 = arith.constant 0 : i32
    %c0_i32_1 = arith.constant 0 : i32
    return %c0_i32, %c0_i32_0 : i32, i32
  }
  func.func @transform_4(%arg0: i32) -> (i32, i32) {
    %c0_i32 = arith.constant 0 : i32
    %c0_i32_0 = arith.constant 0 : i32
    %c0_i32_1 = arith.constant 0 : i32
    return %c0_i32, %c0_i32_0 : i32, i32
  }
  func.func @transform_5(%arg0: i32) -> (i32, i32) {
    %c0_i32 = arith.constant 0 : i32
    %c0_i32_0 = arith.constant 0 : i32
    %c0_i32_1 = arith.constant 0 : i32
    return %c0_i32, %c0_i32_0 : i32, i32
  }
  func.func @transform_6(%arg0: i32) -> (i32, i32) {
    %c0_i32 = arith.constant 0 : i32
    %c0_i32_0 = arith.constant 0 : i32
    %c0_i32_1 = arith.constant 0 : i32
    return %c0_i32, %c0_i32_0 : i32, i32
  }
  func.func @transform_7(%arg0: i32) -> (i32, i32, i32) {
    %c0_i32 = arith.constant 0 : i32
    %c0_i32_0 = arith.constant 0 : i32
    %c0_i32_1 = arith.constant 0 : i32
    return %c0_i32, %arg0, %c0_i32_0 : i32, i32, i32
  }
}

</mosaic_0001>

<bundles_post_ra>
// kernel: tpu_custom_call.1
= control target key start
LH: loop header
LB: loop body
LE: loop exit
PB: predicated region body
PF: predicated region fallthrough
CT: control target
= control target key end

     0   :  { %s7078_s0 = inlined_call_operand.vmem [shape: f32[2,3,32,128], index: 0, kind: input, shape index: {}]   ;;  %s7079_s1 = inlined_call_operand.hbm [shape: f32[2,3,32,128], index: 1, kind: input, shape index: {}]   ;;  %s7080_s2 = inlined_call_operand.vmem [shape: bf16[128,7], index: 2, kind: input, shape index: {}]   ;;  %s7081_s3 = inlined_call_operand.hbm [shape: bf16[128,128], index: 3, kind: input, shape index: {}]   ;;  %s7082_s4 = inlined_call_operand.vmem [shape: f32[128,1], index: 4, kind: input, shape index: {}]   ;;  %s7083_s5 = inlined_call_operand.vmem [shape: bf16[4,128], index: 5, kind: input, shape index: {}]   ;;  %s7084_s6 = inlined_call_operand.vmem [shape: f32[4,1], index: 6, kind: input, shape index: {}]   ;;  %s7085_s7 = inlined_call_operand.hbm [shape: f32[3,32,128], index: 7, kind: output, shape index: {}]  }
   0x1   :  { %7176 = sst [smem:[#allocation60_spill]] %s7078_s0 }
   0x2   :  { %12 = vsyncpa [#allocation6], 0 }
   0x3   :  { %14 = vsyncpa [#allocation6 + $0x1], 0 }
   0x4   :  { %15 = vsyncpa [#allocation9], 0 }
   0x5   :  { %16 = vsyncpa [#allocation7], 0 }
   0x6   :  { %18 = vsyncpa [#allocation7 + $0x1], 0  ;;  %s4639_s24 = smov 0   ;;  %s4641_s25 = smov 0  }
   0x7   :  { %s4643_s26 = smov 0   ;;  %s4645_s27 = smov 0  }
   0x8 LB: > { %s4660_s28 = sadd.s32 4294967295, %s4582_s27   ;;  %s3691_s29 = sadd.s32 4294967294, %s4582_s27   ;;  %s4582_s27 = sphi %s4645_s27, %s7437_s27   ;;  %s4578_s26 = sphi %s4643_s26, %s7436_s26   ;;  %s4574_s25 = sphi %s4641_s25, %s7435_s25   ;;  %s4570_s24 = sphi %s4639_s24, %s7434_s24  }
   0x9   : > { %s4664_s30 = sadd.s32 1, %s4582_s27   ;;  %s31_s8 = sadd.s32 1, %s4578_s26 }
   0xa   : > { %s28_s9 = ssub.s32 %s4582_s27, %s4664_s30  ;;  %p38_p0 = scmp.ne.s32.totalorder %s4578_s26, %s4574_s25 }
   0xb   : > { %p29_p1 = scmp.eq.s32.totalorder %s28_s9, 0  ;;  %p39_p2 = scmp.eq.s32.totalorder %s4582_s27, 0 }
   0xc   : > { %p70_p3 = scmp.ne.s32.totalorder %s4574_s25, %s4570_s24  ;;  %p7088_p4 = scmp.eq.s32.totalorder %s4660_s28, 0 }
   0xd   : > { %s4676_s10 = scalar_select %p29_p1, %s4578_s26, %s31_s8  }
   0xe   : > { %p4678_p5 = por %p39_p2, %p38_p0  ;;  %p4684_p6 = por %p7088_p4, %p70_p3 }
   0xf   : > { %p199_p7 = scmp.eq.s32.totalorder %s4660_s28, 3  ;;  %p205_p8 = scmp.eq.s32.totalorder %s3691_s29, 3 }
  0x10   : > { %s7178_s12 = scalar_select %p4684_p6, 1, 0 }
  0x11   : > { %p3692_p9 = scmp.ge.s32.totalorder %s4582_s27, 1  ;;  %p212_p10 = scmp.lt.s32.totalorder %s4582_s27, 5 }
  0x12   : > { %p4691_p11 = por %p199_p7, %p38_p0  ;;  %p4695_p12 = por %p205_p8, %p70_p3 }
  0x13   : > { %p4699_p13 = pnand %p3692_p9, %p212_p10  ;;  %s4584_s16 = smov [#allocation8]  }
  0x14   : > { %s7179_s13 = scalar_select %p4691_p11, 1, 0 }
  0x15   : > { %s7180_s14 = scalar_select %p4695_p12, 1, 0 }
  0x16   : > { %p3799_p1 = pneg %p4699_p13  ;;  %s227_s17 = sshll.u32 %s4584_s16, 4  ;;  %s228_s17 = int_to_ptr.vmem [resolvable:$true] %s227_s17 }
  0x17   : > { %s4473_s18 = scalar_lea.vmem %s228_s17, 1024  ;;  %p4481_p8 = scmp.lt.s32.totalorder %s228_s17, %s228_s17 }
  0x18   : > { %p3800_p2 = pnand %p3799_p1, %p7088_p4  ;;  %p4474_p7 = scmp.ne.s32.totalorder %s228_s17, %s4473_s18 }
  0x19   : > { %p4482_p6 = scmp.lt.s32.totalorder %s4473_s18, %s4473_s18 }
  0x1a   : > { %p4464_p0 = pneg %p3800_p2 }
  0x1b   : > { %p4483_p12 = por %p4482_p6, %p4481_p8 }
  0x1c   : > { %p4476_p11 = pnand %p4474_p7, %p4464_p0 }
  0x1e   : > { %p4477_p3 = pneg %p4476_p11 }
  0x20   : > { %p4484_p9 = pnand %p4483_p12, %p4477_p3 }
  0x22   : > { %4487 = shalt.err (!%p4484_p9)
}
  0x23   : > { %s4585_s19 = smov 64   ;;  %s4586_s20 = smov 4  }
  0x24   : > { %3802 = dma.hbm_to_vmem [thread:$0]  (!%p3800_p2), %s7081_s3, 1024, %s228_s17, [#allocation9], %s4585_s19, %s4585_s19, %s4586_s20  }
  0x25   : > { %p3694_p10 = scmp.ge.s32.totalorder %s4582_s27, 4 }
  0x27   : > { %246 = sbr.rel (%p3694_p10) target bundleno = 86 (0x56), region = 36 }
  0x2c   : > { %249 = sbr.rel (!%p4678_p5) target bundleno = 60 (0x3c), region = 40  ;;  %s251_s23 = sand.u32 (%p4678_p5), 1, %s4578_s26  }
  0x2d   : > { %s3695_s29 = sshll.u32 (%p4678_p5), %s4582_s27, 3  ;;  %s3787_s8 = smul.u32 (%p4678_p5), 48, %s251_s23 }
  0x2e   : > { %s7182_s0 = sld [smem:[#allocation60_spill]] (%p4678_p5) }
  0x2f   : > { %s253_s17 = scalar_lea.vmem (%p4678_p5), [#allocation4], %s3787_s8 }
  0x34   : > { %s255_s18 = scalar_lea.vmem %s7182_s0, %s3695_s29 }
  0x35   : > { %v294_v0 = vld [vmem:[%s255_s18] sm:$0xff] }
  0x36   : > { %v296_v1 = vld [vmem:[%s255_s18 + $0x20] sm:$0xff]  ;;  %295 = vst [vmem:[%s253_s17] sm:$0xff] %v294_v0 }
  0x37   : > { %v298_v2 = vld [vmem:[%s255_s18 + $0x40] sm:$0xff]  ;;  %297 = vst [vmem:[%s253_s17 + $0x8] sm:$0xff] %v296_v1 }
  0x38   : > { %v300_v3 = vld [vmem:[%s255_s18 + $0x60] sm:$0xff]  ;;  %299 = vst [vmem:[%s253_s17 + $0x10] sm:$0xff] %v298_v2 }
  0x39   : > { %v302_v4 = vld [vmem:[%s255_s18 + $0x80] sm:$0xff]  ;;  %301 = vst [vmem:[%s253_s17 + $0x18] sm:$0xff] %v300_v3 }
  0x3a   : > { %v304_v5 = vld [vmem:[%s255_s18 + $0xa0] sm:$0xff]  ;;  %303 = vst [vmem:[%s253_s17 + $0x20] sm:$0xff] %v302_v4 }
  0x3b   : > { %305 = vst [vmem:[%s253_s17 + $0x28] sm:$0xff] %v304_v5 }
  0x3c PF: > { %s312_s19 = sand.u32 1, %s4578_s26   ;;  %s3696_s20 = sshll.u32 %s4582_s27, 7 }
  0x3d   : > { %s3788_s21 = smul.u32 48, %s312_s19  ;;  %s4723_s29 = scalar_lea.hbm %s7079_s1, %s3696_s20 }
  0x3e   : > { %s4727_s16 = scalar_lea.sflag [#allocation6], %s312_s19  ;;  %s4488_s18 = scalar_lea.hbm %s4723_s29, 768 }
  0x3f   : > { %s316_s8 = scalar_lea.vmem [#allocation5], %s3788_s21  ;;  %p4489_p6 = scmp.ne.s32.totalorder %s4723_s29, %s4488_s18 }
  0x40   : > { %s322_s9 = sshll.u32 %s316_s8, 4  ;;  %s4492_s22 = scalar_lea.hbm %s7079_s1, 3072  ;;  %s4725_s9 = int_to_ptr.vmem [resolvable:$true] %s322_s9 }
  0x41   : > { %p4490_p11 = pnand %p4489_p6, %p4678_p5  ;;  %p4493_p1 = scmp.lt.s32.totalorder %s4723_s29, %s7079_s1 }
  0x42   : > { %p4494_p2 = scmp.lt.s32.totalorder %s4492_s22, %s4488_s18 }
  0x43   : > { %p4491_p12 = pneg %p4490_p11 }
  0x44   : > { %p4495_p0 = por %p4494_p2, %p4493_p1 }
  0x46   : > { %p4496_p7 = pnand %p4495_p0, %p4491_p12 }
  0x48   : > { %4499 = shalt.err (!%p4496_p7)
}
  0x49   : > { %s4500_s19 = scalar_lea.vmem %s4725_s9, 768  ;;  %s4587_s21 = smov [#allocation5]  }
  0x4a   : > { %p4501_p3 = scmp.ne.s32.totalorder %s4725_s9, %s4500_s19  ;;  %s4504_s0 = sshll.u32 %s4587_s21, 4  ;;  %s4505_s0 = int_to_ptr.vmem [resolvable:$false] %s4504_s0 }
  0x4b   : > { %s4506_s8 = scalar_lea.vmem %s4505_s0, 1536  ;;  %p4507_p10 = scmp.lt.s32.totalorder %s4725_s9, %s4505_s0 }
  0x4c   : > { %p4502_p8 = pnand %p4501_p3, %p4678_p5  ;;  %p4508_p6 = scmp.lt.s32.totalorder %s4506_s8, %s4500_s19 }
  0x4e   : > { %p4503_p9 = pneg %p4502_p8  ;;  %p4509_p11 = por %p4508_p6, %p4507_p10 }
  0x50   : > { %p4510_p4 = pnand %p4509_p11, %p4503_p9 }
  0x52   : > { %4513 = shalt.err (!%p4510_p4)
}
  0x53   : > { %s4588_s18 = smov 512   ;;  %s4589_s17 = smov 128  }
  0x54   : > { %s4590_s22 = smov 8  }
  0x55   : > { %3793 = dma.hbm_to_vmem [thread:$0]  (%p4678_p5), %s4723_s29, 768, %s4725_s9, %s4727_s16, %s4588_s18, %s4589_s17, %s4590_s22  }
  0x56 PF: > { %334 = sbr.rel (%p4699_p13) target bundleno = 1312 (0x520), region = 82 }
  0x5b   : > { %s4753_s20 = sand.u32 1, %s4574_s25   ;;  %p7183_p4 = scmp.ne.s32.totalorder %s7178_s12, 0 }
  0x5c   : > { %s3789_s23 = smul.u32 48, %s4753_s20  ;;  %s344_s21 = scalar_lea.sflag [#allocation6], %s4753_s20 }
  0x5e   : > { %s4756_s19 = scalar_lea.vmem [#allocation4], %s3789_s23  ;;  %s4759_s0 = scalar_lea.vmem [#allocation5], %s3789_s23 }
  0x5f   : > { %4557 = dma.done.wait (%p7183_p4), %s344_s21, 768  }
  0x60   : > { %4559 = vsyncadd (%p7183_p4), %s344_s21, 4294966528  ;;  %p7184_p5 = scmp.eq.s32.totalorder %s4660_s28, 0 }
  0x62   : > { %4561 = dma.done.wait (%p7184_p5), [#allocation9], 1024   ;;  %p7185_p13 = pmov %p7184_p5 }
  0x63   : > { %vm625_vm0 = vcmask 1042432   ;;  %v7089_v6 = vmov 0   ;;  %v4774_v7 = vld [vmem:[%s4756_s19] sm:$0xff]  ;;  %v4777_v8 = vld [vmem:[%s4756_s19 + $0x8] sm:$0xff]  ;;  %vm626_vm1 = vcmask 1043456   ;;  %v4592_v9 = vmov 65535  }
  0x64   : > { %4563 = vsyncadd (%p7185_p13), [#allocation9], 4294966272  ;;  %685 = vmatprep.mubr.bf16.mxu0 %v7089_v6  ;;  %798 = vmatprep.mubr.bf16.mxu1 %v7089_v6  ;;  %v627_v10 = vsel %vm625_vm0, 4294967295, %v4592_v9  ;;  %v3699_v11 = vld [vmem:[%s4756_s19 + $0x18] sm:$0xff]  ;;  %v3700_v12 = vld [vmem:[%s4756_s19 + $0x20] sm:$0xff]  ;;  %3873 = vlog2.f32 %v4774_v7  ;;  %v4593_v13 = vmov 1.0  }
  0x65   : > { %3856 = vset.pattern.permute.xlu1 %v7089_v6  ;;  %3855 = vset.pattern.permute.xlu0 %v7089_v6  ;;  %3875 = vlog2.f32 %v4777_v8  ;;  %v4783_v14 = vrot.slane %v4593_v13, 3  ;;  %v4785_v15 = vrot.slane %v4593_v13, 5  ;;  %v4787_v16 = vrot.slane %v4593_v13, 2  ;;  %v4790_v17 = vld [vmem:[%s4756_s19 + $0x10] sm:$0xff]  ;;  %v4799_v21 = vld [vmem:[%s4756_s19 + $0x28] sm:$0xff]  ;;  %s3784_s16 = sshll.u32 %s4660_s28, 7 }
  0x66   : > { %3877 = vlog2.f32 %v3699_v11  ;;  %v4792_v18 = vsel %vm626_vm1, %v627_v10, 0  ;;  %v4794_v19 = vrot.slane %v4593_v13, 4  ;;  %v4796_v20 = vrot.slane %v4593_v13, 7  ;;  %s7028_s17 = scalar_lea.hbm %s7085_s7, %s3784_s16  ;;  %p7432_p1 = scmp.ne.s32.totalorder %s7179_s13, 0 }
  0x67   : > { %3879 = vlog2.f32 %v3700_v12  ;;  %v4801_v22 = vrot.slane %v4593_v13, 1  ;;  %v435_v23 = vrot.slane %v4790_v17, 5  ;;  %v4804_v24 = vrot.slane %v4593_v13, 6  ;;  %s4595_s23 = smov [#allocation10]  }
  0x68   : > { %v437_v25 = vrot.slane %v4799_v21, 4  ;;  %v463_v26 = vrot.slane %v4790_v17, 7  ;;  %v465_v27 = vrot.slane %v4799_v21, 6  ;;  %v418_v28 = vrot.slane %v4790_v17, 4  ;;  %s4518_s21 = sshll.u32 %s4595_s23, 4  ;;  %s4519_s21 = int_to_ptr.vmem [resolvable:$false] %s4518_s21 }
  0x69   : > { %vm410_vm2 = vcmask 1041409   ;;  %v421_v29 = vrot.slane %v4799_v21, 3  ;;  %v449_v30 = vrot.slane %v4790_v17, 6  ;;  %v451_v31 = vrot.slane %v4799_v21, 5  ;;  %s4520_s11 = scalar_lea.vmem %s4519_s21, 768 }
  0x6a   : > { %v492_v32 = vrot.slane %v4790_v17, 1  ;;  %vm413_vm3 = vcmask 1042434   ;;  %v520_v33 = vrot.slane %v4790_v17, 3  ;;  %v522_v34 = vrot.slane %v4799_v21, 2 }
  0x6b   : > { %vm416_vm4 = vcmask 1043459   ;;  %v479_v35 = vrot.slane %v4799_v21, 7  ;;  %v506_v36 = vrot.slane %v4790_v17, 2  ;;  %vm419_vm5 = vcmask 1044484  }
  0x6c   : > { %vm422_vm6 = vcmask 1045509   ;;  %vm425_vm7 = vcmask 1046534   ;;  %vm600_vm8 = vcmask 56320   ;;  %3881 = vrcp.f32 %v4774_v7 }
  0x71   : > { %v3874_v37 = vpop.eup %3873 }
  0x72   : > { %v3876_v38 = vpop.eup %3875  ;;  %v4818_v39 = vmul.f32 0.6931472, %v3874_v37 }
  0x73   : > { %v3878_v40 = vpop.eup %3877  ;;  %v4820_v41 = vmul.f32 0.6931472, %v3876_v38 }
  0x74   : > { %7186 = vst [vmem:[#allocation14_spill] sm:$0xff] %v4818_v39  ;;  %v3880_v42 = vpop.eup %3879  ;;  %v4822_v43 = vmul.f32 0.6931472, %v3878_v40  ;;  %v429_v44 = vrot.slane %v4818_v39, 1  ;;  %v457_v45 = vrot.slane %v4818_v39, 3  ;;  %v443_v46 = vrot.slane %v4818_v39, 2 }
  0x75   : > { %7187 = vst [vmem:[#allocation15_spill] sm:$0xff] %v4820_v41  ;;  %v4827_v47 = vmul.f32 0.6931472, %v3880_v42  ;;  %v458_v48 = vrot.slane %v4820_v41, 2  ;;  %v409_v49 = vrot.slane %v4820_v41, 7  ;;  %v444_v50 = vrot.slane %v4820_v41, 1 }
  0x76   : > { %v430_v51 = vsel %vm410_vm2, %v4820_v41, %v429_v44  ;;  %v431_v52 = vrot.slane %v4822_v43, 7  ;;  %v460_v53 = vrot.slane %v4822_v43, 1  ;;  %v412_v54 = vrot.slane %v4822_v43, 6 }
  0x77   : > { %v433_v55 = vrot.slane %v4827_v47, 6  ;;  %v459_v56 = vsel %vm410_vm2, %v458_v48, %v457_v45  ;;  %v411_v57 = vsel %vm410_vm2, %v409_v49, %v4818_v39  ;;  %v415_v58 = vrot.slane %v4827_v47, 5 }
  0x78   : > { %v432_v59 = vsel %vm413_vm3, %v431_v52, %v430_v51  ;;  %v461_v60 = vsel %vm413_vm3, %v460_v53, %v459_v56  ;;  %v414_v61 = vsel %vm413_vm3, %v412_v54, %v411_v57  ;;  %v445_v62 = vsel %vm410_vm2, %v444_v50, %v443_v46 }
  0x79   : > { %v434_v63 = vsel %vm416_vm4, %v433_v55, %v432_v59  ;;  %v462_v0 = vsel %vm416_vm4, %v4827_v47, %v461_v60  ;;  %v417_v1 = vsel %vm416_vm4, %v415_v58, %v414_v61  ;;  %v446_v2 = vsel %vm413_vm3, %v4822_v43, %v445_v62 }
  0x7a   : > { %v436_v3 = vsel %vm419_vm5, %v435_v23, %v434_v63  ;;  %v464_v4 = vsel %vm419_vm5, %v463_v26, %v462_v0  ;;  %v420_v5 = vsel %vm419_vm5, %v418_v28, %v417_v1  ;;  %v447_v9 = vrot.slane %v4827_v47, 7 }
  0x7b   : > { %v438_v10 = vsel %vm422_vm6, %v437_v25, %v436_v3  ;;  %v466_v11 = vsel %vm422_vm6, %v465_v27, %v464_v4  ;;  %v423_v12 = vsel %vm422_vm6, %v421_v29, %v420_v5  ;;  %v485_v13 = vrot.slane %v4818_v39, 5 }
  0x7c   : > { %v440_v37 = vsel %vm425_vm7, %v4783_v14, %v438_v10  ;;  %v468_v23 = vsel %vm425_vm7, %v4785_v15, %v466_v11  ;;  %v426_v26 = vsel %vm425_vm7, %v4787_v16, %v423_v12  ;;  %v448_v28 = vsel %vm416_vm4, %v447_v9, %v446_v2 }
  0x7d   : > { %442 = vst [vmem:[#allocation2] sm:$0x7f] %v440_v37  ;;  %470 = vst [vmem:[#allocation2 + $0x10] sm:$0x7f] %v468_v23  ;;  %v450_v25 = vsel %vm419_vm5, %v449_v30, %v448_v28  ;;  %v486_v27 = vrot.slane %v4820_v41, 4  ;;  %v488_v29 = vrot.slane %v4822_v43, 3 }
  0x7e   : > { %428 = vst [vmem:[#allocation2 + $0x30] sm:$0x7f] %v426_v26  ;;  %v490_v38 = vrot.slane %v4827_v47, 2  ;;  %v452_v14 = vsel %vm422_vm6, %v451_v31, %v450_v25  ;;  %v513_v15 = vrot.slane %v4818_v39, 7  ;;  %v514_v40 = vrot.slane %v4820_v41, 6 }
  0x7f   : > { %v516_v16 = vrot.slane %v4822_v43, 5  ;;  %v454_v42 = vsel %vm425_vm7, %v4794_v19, %v452_v14  ;;  %v487_v44 = vsel %vm410_vm2, %v486_v27, %v485_v13  ;;  %v518_v30 = vrot.slane %v4827_v47, 4 }
  0x80   : > { %v471_v45 = vrot.slane %v4818_v39, 4  ;;  %456 = vst [vmem:[#allocation2 + $0x18] sm:$0x7f] %v454_v42  ;;  %v489_v46 = vsel %vm413_vm3, %v488_v29, %v487_v44  ;;  %v515_v31 = vsel %vm410_vm2, %v514_v40, %v513_v15  ;;  %v472_v48 = vrot.slane %v4820_v41, 3  ;;  %v3858_v40 = vld [vmem:[%s7080_s2 + $0x8] sm:$0xff]  }
  0x81   : > { %v474_v49 = vrot.slane %v4822_v43, 2  ;;  %v491_v50 = vsel %vm416_vm4, %v490_v38, %v489_v46  ;;  %v517_v51 = vsel %vm413_vm3, %v516_v16, %v515_v31  ;;  %v476_v19 = vrot.slane %v4827_v47, 1  ;;  %v3859_v46 = vld [vmem:[%s7080_s2 + $0x10] sm:$0xff]   ;;  %v3861_v31 = vld [vmem:[%s7080_s2 + $0x20] sm:$0xff]  }
  0x82   : > { %v499_v52 = vrot.slane %v4818_v39, 6  ;;  %v493_v53 = vsel %vm419_vm5, %v492_v32, %v491_v50  ;;  %v519_v54 = vsel %vm416_vm4, %v518_v30, %v517_v51  ;;  %v473_v55 = vsel %vm410_vm2, %v472_v48, %v471_v45  ;;  %v3862_v48 = vld [vmem:[%s7080_s2 + $0x28] sm:$0xff]   ;;  %v3864_v50 = vld [vmem:[%s7080_s2 + $0x38] sm:$0xff]  }
  0x83   : > { %v500_v56 = vrot.slane %v4820_v41, 5  ;;  %v494_v57 = vsel %vm422_vm6, %v4799_v21, %v493_v53  ;;  %v521_v58 = vsel %vm419_vm5, %v520_v33, %v519_v54  ;;  %v475_v59 = vsel %vm413_vm3, %v474_v49, %v473_v55  ;;  %v3863_v49 = vld [vmem:[%s7080_s2 + $0x30] sm:$0xff]  }
  0x84   : > { %v502_v60 = vrot.slane %v4822_v43, 4  ;;  %v529_v61 = vld [vmem:[#allocation2] sm:$0x7f]  ;;  %v531_v62 = vld [vmem:[#allocation2 + $0x10] sm:$0x7f]  ;;  %v496_v63 = vsel %vm425_vm7, %v4796_v20, %v494_v57  ;;  %v523_v0 = vsel %vm422_vm6, %v522_v34, %v521_v58  ;;  %v477_v1 = vsel %vm416_vm4, %v476_v19, %v475_v59  ;;  %v3882_v19 = vpop.eup %3881 }
  0x85   : > { %v528_v32 = vld [vmem:[#allocation2 + $0x30] sm:$0x7f]  ;;  %v501_v2 = vsel %vm410_vm2, %v500_v56, %v499_v52  ;;  %v537_v3 = vpack.c.bf16 %v529_v61, %v529_v61  ;;  %v539_v33 = vpack.c.bf16 %v531_v62, %v531_v62  ;;  %498 = vst [vmem:[#allocation2 + $0x20] sm:$0x7f] %v496_v63  ;;  %v525_v43 = vsel %vm425_vm7, %v4801_v22, %v523_v0 }
  0x86   : > { %v536_v4 = vpack.c.bf16 %v528_v32, %v528_v32  ;;  %527 = vst [vmem:[#allocation2 + $0x38] sm:$0x7f] %v525_v43  ;;  %v478_v5 = vsel %vm419_vm5, %v4790_v17, %v477_v1  ;;  %v503_v20 = vsel %vm413_vm3, %v502_v60, %v501_v2  ;;  %v504_v9 = vrot.slane %v4827_v47, 3  ;;  %v4927_v47 = vld [vmem:[%s7080_s2] sm:$0xff]  }
  0x87   : > { %v508_v34 = vrot.slane %v4799_v21, 1  ;;  %v633_v10 = vand.u32 %v4792_v18, %v537_v3  ;;  %v639_v11 = vand.u32 %v4792_v18, %v539_v33  ;;  %v530_v13 = vld [vmem:[#allocation2 + $0x18] sm:$0x7f]  ;;  %v480_v22 = vsel %vm422_vm6, %v479_v35, %v478_v5 }
  0x88   : > { %v630_v12 = vand.u32 %v4792_v18, %v536_v4  ;;  %v538_v37 = vpack.c.bf16 %v530_v13, %v530_v13  ;;  %v482_v23 = vsel %vm425_vm7, %v4804_v24, %v480_v22  ;;  %v505_v26 = vsel %vm416_vm4, %v504_v9, %v503_v20 }
  0x89   : > { %667 = vmatprep.subr.bf16.mxu0 %v633_v10  ;;  %780 = vmatprep.subr.bf16.mxu1 %v639_v11  ;;  %484 = vst [vmem:[#allocation2 + $0x8] sm:$0x7f] %v482_v23  ;;  %v507_v21 = vsel %vm419_vm5, %v506_v36, %v505_v26  ;;  %v2456_v51 = vmul.f32 2.5, %v4777_v8  ;;  %v2460_v55 = vmul.f32 1.6666666, %v4777_v8  ;;  %v1256_v10 = vld [vmem:[%s7082_s4 + $0x38] sm:$0xff] }
  0x8a   : > { %668 = vmatpush1.bf16.msra.mxu0 %v630_v12  ;;  %v636_v35 = vand.u32 %v4792_v18, %v538_v37  ;;  %v509_v24 = vsel %vm422_vm6, %v508_v34, %v507_v21 }
  0x8b   : > { %v510_v28 = vsel %vm425_vm7, 1.0, %v509_v24  ;;  %v2458_v52 = vmul.f32 %v3882_v19, %v2456_v51  ;;  %v5107_v51 = vsub.f32 1.0, %v4790_v17 }
  0x8c   : > { %781 = vmatpush1.bf16.msra.mxu1 %v636_v35  ;;  %v533_v25 = vld [vmem:[#allocation2 + $0x20] sm:$0x7f]  ;;  %512 = vst [vmem:[#allocation2 + $0x28] sm:$0x7f] %v510_v28 }
  0x8d   : > { %3710 = vmatmul.mubr.msk.bf16.vlgmr.msra.gmra.mxu0 %vm600_vm8, %v4927_v47  ;;  %v541_v27 = vpack.c.bf16 %v533_v25, %v533_v25  ;;  %v535_v29 = vld [vmem:[#allocation2 + $0x38] sm:$0x7f]  ;;  %v2459_v53 = vadd.f32 1.0, %v2458_v52 }
  0x8e   : > { %695 = vmatprep.mubr.bf16.mxu0 %v7089_v6  ;;  %v543_v38 = vpack.c.bf16 %v535_v29, %v535_v29  ;;  %v1254_v29 = vld [vmem:[%s7082_s4 + $0x28] sm:$0xff] }
  0x8f   : > { %3718 = vmatmul.mubr.msk.bf16.vlgmr.msra.gmra.mxu1 %vm600_vm8, %v4927_v47  ;;  %v645_v36 = vand.u32 %v4792_v18, %v541_v27  ;;  %v2461_v54 = vmul.f32 %v2459_v53, %v4774_v7  ;;  %v1263_v53 = vld [vmem:[%s7082_s4 + $0x70] sm:$0xff] }
  0x90   : > { %808 = vmatprep.mubr.bf16.mxu1 %v7089_v6  ;;  %v651_v14 = vand.u32 %v4792_v18, %v543_v38  ;;  %v532_v15 = vld [vmem:[#allocation2 + $0x8] sm:$0x7f]  ;;  %1337 = vperm.xlu0 %3855, %v1263_v53  }
  0x91   : > { %893 = vmatprep.subr.bf16.mxu0 %v645_v36  ;;  %v540_v16 = vpack.c.bf16 %v532_v15, %v532_v15  ;;  %3883 = vrcp.f32 %v2461_v54 }
  0x92   : > { %1006 = vmatprep.subr.bf16.mxu1 %v651_v14  ;;  %v1253_v14 = vld [vmem:[%s7082_s4 + $0x20] sm:$0xff] }
  0x93   : > { %v642_v42 = vand.u32 %v4792_v18, %v540_v16  ;;  %v534_v44 = vld [vmem:[#allocation2 + $0x28] sm:$0x7f] }
  0x94   : > { %v542_v30 = vpack.c.bf16 %v534_v44, %v534_v44 }
  0x95   : > { %3711 = vmatmul.mubr.msk.bf16.gmra.mxu0 %vm600_vm8, %v3858_v40 }
  0x96   : > { %705 = vmatprep.mubr.bf16.mxu0 %v7089_v6  ;;  %894 = vmatpush1.bf16.msra.mxu0 %v642_v42  ;;  %v648_v45 = vand.u32 %v4792_v18, %v542_v30  ;;  %v3860_v18 = vld [vmem:[%s7080_s2 + $0x18] sm:$0xff]  }
  0x97   : > { %3719 = vmatmul.mubr.msk.bf16.gmra.mxu1 %vm600_vm8, %v3858_v40 }
  0x98   : > { %818 = vmatprep.mubr.bf16.mxu1 %v7089_v6  ;;  %1007 = vmatpush1.bf16.msra.mxu1 %v648_v45 }
  0x9d   : > { %3712 = vmatmul.mubr.msk.bf16.gmra.mxu0 %vm600_vm8, %v3859_v46 }
  0x9e   : > { %715 = vmatprep.mubr.bf16.mxu0 %v7089_v6  ;;  %v3884_v56 = vpop.eup %3883 }
  0x9f   : > { %3720 = vmatmul.mubr.msk.bf16.gmra.mxu1 %vm600_vm8, %v3859_v46  ;;  %v2463_v57 = vmul.f32 %v3884_v56, %v2460_v55 }
  0xa0   : > { %828 = vmatprep.mubr.bf16.mxu1 %v7089_v6 }
  0xa1   : > { %3885 = vrsqrt.f32 %v2463_v57  ;;  %vm2466_vm9 = vcmp.eq.f32.partialorder %v2463_v57, inf  ;;  %v2469_v59 = vand.u32 2147483648, %v2463_v57  ;;  %vm2468_vm10 = vcmp.eq.f32.partialorder %v2463_v57, 0.0 }
  0xa5   : > { %3713 = vmatmul.mubr.msk.bf16.gmra.mxu0 %vm600_vm8, %v3860_v18 }
  0xa6   : > { %725 = vmatprep.mubr.bf16.mxu0 %v7089_v6 }
  0xa7   : > { %3721 = vmatmul.mubr.msk.bf16.gmra.mxu1 %vm600_vm8, %v3860_v18 }
  0xa8   : > { %838 = vmatprep.mubr.bf16.mxu1 %v7089_v6 }
  0xad   : > { %3714 = vmatmul.mubr.msk.bf16.gmra.mxu0 %vm600_vm8, %v3861_v31 }
  0xae   : > { %735 = vmatprep.mubr.bf16.mxu0 %v7089_v6  ;;  %v3886_v58 = vpop.eup %3885 }
  0xaf   : > { %3722 = vmatmul.mubr.msk.bf16.gmra.mxu1 %vm600_vm8, %v3861_v31  ;;  %v2465_v7 = vmul.f32 %v3886_v58, %v2463_v57 }
  0xb0   : > { %848 = vmatprep.mubr.bf16.mxu1 %v7089_v6 }
  0xb1   : > { %v2467_v60 = vsel %vm2466_vm9, %v2463_v57, %v2465_v7 }
  0xb2   : > { %v5032_v61 = vsel %vm2468_vm10, %v2469_v59, %v2467_v60 }
  0xb3   : > { %7188 = vst [vmem:[#allocation16_spill] sm:$0xff] %v5032_v61  ;;  %v2471_v62 = vadd.f32 0.8164966, %v5032_v61  ;;  %v2474_v32 = vsub.f32 0.8164966, %v5032_v61  ;;  %v1251_v61 = vld [vmem:[%s7082_s4 + $0x10] sm:$0xff] }
  0xb5   : > { %3715 = vmatmul.mubr.msk.bf16.gmra.mxu0 %vm600_vm8, %v3862_v48  ;;  %3887 = vlog2.f32 %v2471_v62  ;;  %v1261_v62 = vld [vmem:[%s7082_s4 + $0x60] sm:$0xff] }
  0xb6   : > { %745 = vmatprep.mubr.bf16.mxu0 %v7089_v6  ;;  %3889 = vlog2.f32 %v2474_v32  ;;  %v1264_v32 = vld [vmem:[%s7082_s4 + $0x78] sm:$0xff]  ;;  %1327 = vperm.xlu1 %3856, %v1261_v62  }
  0xb7   : > { %3723 = vmatmul.mubr.msk.bf16.gmra.mxu1 %vm600_vm8, %v3862_v48  ;;  %1342 = vperm.xlu0 %3855, %v1264_v32  }
  0xb8   : > { %858 = vmatprep.mubr.bf16.mxu1 %v7089_v6 }
  0xbd   : > { %3716 = vmatmul.mubr.msk.bf16.gmra.mxu0 %vm600_vm8, %v3863_v49 }
  0xbe   : > { %755 = vmatprep.mubr.bf16.mxu0 %v7089_v6 }
  0xbf   : > { %3724 = vmatmul.mubr.msk.bf16.gmra.mxu1 %vm600_vm8, %v3863_v49 }
  0xc0   : > { %868 = vmatprep.mubr.bf16.mxu1 %v7089_v6 }
  0xc2   : > { %v3888_v63 = vpop.eup %3887 }
  0xc3   : > { %v3890_v0 = vpop.eup %3889  ;;  %v2473_v8 = vmul.f32 0.6931472, %v3888_v63 }
  0xc4   : > { %v2476_v1 = vmul.f32 0.6931472, %v3890_v0 }
  0xc5   : > { %3717 = vmatmul.mubr.msk.bf16.gmra.mxu0 %vm600_vm8, %v3864_v50 }
  0xc6   : > { %911 = vmatprep.mubr.bf16.mxu0 %v7089_v6  ;;  %v5036_v2 = vsub.f32 %v2473_v8, %v2476_v1 }
  0xc7   : > { %3725 = vmatmul.mubr.msk.bf16.gmra.mxu1 %vm600_vm8, %v3864_v50 }
  0xc8   : > { %1024 = vmatprep.mubr.bf16.mxu1 %v7089_v6  ;;  %7189 = vst [vmem:[#allocation17_spill] sm:$0xff] %v5036_v2  ;;  %v3057_v33 = vsub.f32 0.0, %v5036_v2  ;;  %v5058_v13 = vmul.f32 2.4494898, %v5036_v2 }
  0xca   : > { %v3058_v5 = vadd.f32 -2.4494898e-06, %v3057_v33 }
  0xcc   : > { %v3059_v34 = vmul.f32 0.5, %v3058_v5 }
  0xcd   : > { %3726 = vmatmul.mubr.msk.bf16.vlgmr.msra.gmra.mxu0 %vm600_vm8, %v4927_v47 }
  0xce   : > { %921 = vmatprep.mubr.bf16.mxu0 %v7089_v6  ;;  %v3062_v22 = vmul.f32 2.4494898, %v3059_v34 }
  0xcf   : > { %3734 = vmatmul.mubr.msk.bf16.vlgmr.msra.gmra.mxu1 %vm600_vm8, %v4927_v47  ;;  %v3060_v47 = vmul.f32 1.442695, %v3059_v34 }
  0xd0   : > { %1034 = vmatprep.mubr.bf16.mxu1 %v7089_v6  ;;  %v3063_v21 = vadd.f32 %v3062_v22, %v5058_v13 }
  0xd1   : > { %3891 = vpow2.f32 %v3060_v47 }
  0xd2   : > { %v3064_v28 = vmul.f32 1.442695, %v3063_v21 }
  0xd4   : > { %3893 = vpow2.f32 %v3064_v28  ;;  %v1262_v28 = vld [vmem:[%s7082_s4 + $0x68] sm:$0xff] }
  0xd5   : > { %3727 = vmatmul.mubr.msk.bf16.gmra.mxu0 %vm600_vm8, %v3858_v40  ;;  %1332 = vperm.xlu1 %3856, %v1262_v28  }
  0xd6   : > { %931 = vmatprep.mubr.bf16.mxu0 %v7089_v6 }
  0xd7   : > { %3735 = vmatmul.mubr.msk.bf16.gmra.mxu1 %vm600_vm8, %v3858_v40 }
  0xd8   : > { %1044 = vmatprep.mubr.bf16.mxu1 %v7089_v6 }
  0xdd   : > { %3728 = vmatmul.mubr.msk.bf16.gmra.mxu0 %vm600_vm8, %v3859_v46 }
  0xde   : > { %941 = vmatprep.mubr.bf16.mxu0 %v7089_v6 }
  0xdf   : > { %3736 = vmatmul.mubr.msk.bf16.gmra.mxu1 %vm600_vm8, %v3859_v46 }
  0xe0   : > { %1054 = vmatprep.mubr.bf16.mxu1 %v7089_v6 }
  0xe5   : > { %3729 = vmatmul.mubr.msk.bf16.gmra.mxu0 %vm600_vm8, %v3860_v18 }
  0xe6   : > { %951 = vmatprep.mubr.bf16.mxu0 %v7089_v6 }
  0xe7   : > { %3737 = vmatmul.mubr.msk.bf16.gmra.mxu1 %vm600_vm8, %v3860_v18  ;;  %v5100_v18 = vadd.f32 1.0, %v4790_v17 }
  0xe8   : > { %1064 = vmatprep.mubr.bf16.mxu1 %v7089_v6 }
  0xed   : > { %3730 = vmatmul.mubr.msk.bf16.gmra.mxu0 %vm600_vm8, %v3861_v31 }
  0xee   : > { %961 = vmatprep.mubr.bf16.mxu0 %v7089_v6 }
  0xef   : > { %3738 = vmatmul.mubr.msk.bf16.gmra.mxu1 %vm600_vm8, %v3861_v31 }
  0xf0   : > { %1074 = vmatprep.mubr.bf16.mxu1 %v7089_v6 }
  0xf5   : > { %3731 = vmatmul.mubr.msk.bf16.gmra.mxu0 %vm600_vm8, %v3862_v48 }
  0xf6   : > { %971 = vmatprep.mubr.bf16.mxu0 %v7089_v6 }
  0xf7   : > { %3739 = vmatmul.mubr.msk.bf16.gmra.mxu1 %vm600_vm8, %v3862_v48 }
  0xf8   : > { %1084 = vmatprep.mubr.bf16.mxu1 %v7089_v6 }
  0xfd   : > { %3732 = vmatmul.mubr.msk.bf16.gmra.mxu0 %vm600_vm8, %v3863_v49 }
  0xfe   : > { %981 = vmatprep.mubr.bf16.mxu0 %v7089_v6 }
  0xff   : > { %3740 = vmatmul.mubr.msk.bf16.gmra.mxu1 %vm600_vm8, %v3863_v49  ;;  %v3892_v49 = vpop.eup %3891 }
 0x100   : > { %1094 = vmatprep.mubr.bf16.mxu1 %v7089_v6  ;;  %v3067_v54 = vmul.f32 1.8164966, %v3892_v49  ;;  %v3070_v55 = vmul.f32 0.18350342, %v3892_v49  ;;  %v1259_v49 = vld [vmem:[%s7082_s4 + $0x50] sm:$0xff] }
 0x101   : > { %1317 = vperm.xlu0 %3855, %v1259_v49  }
 0x102   : > { %v3068_v7 = vadd.f32 0.18350342, %v3067_v54  ;;  %v3071_v17 = vadd.f32 1.8164966, %v3070_v55 }
 0x104   : > { %v3072_v0 = vmul.f32 %v3071_v17, %v5107_v51 }
 0x105   : > { %3733 = vmatmul.mubr.msk.bf16.gmra.mxu0 %vm600_vm8, %v3864_v50 }
 0x106   : > { %1425 = vmatprep.mubr.bf16.mxu0 %v7089_v6 }
 0x107   : > { %3741 = vmatmul.mubr.msk.bf16.gmra.mxu1 %vm600_vm8, %v3864_v50  ;;  %v3894_v50 = vpop.eup %3893 }
 0x108   : > { %1538 = vmatprep.mubr.bf16.mxu1 %v7089_v6  ;;  %v3066_v56 = vmul.f32 %v3894_v50, %v5100_v18  ;;  %v1255_v6 = vld [vmem:[%s7082_s4 + $0x30] sm:$0xff] }
 0x10a   : > { %v3069_v63 = vmul.f32 %v3068_v7, %v3066_v56  ;;  %v1260_v56 = vld [vmem:[%s7082_s4 + $0x58] sm:$0xff]  ;;  %v1257_v7 = vld [vmem:[%s7082_s4 + $0x40] sm:$0xff] }
 0x10b   : > { %1322 = vperm.xlu1 %3856, %v1260_v56   ;;  %1307 = vperm.xlu0 %3855, %v1257_v7  }
 0x10c   : > { %vm3073_vm11 = vcmp.gt.f32.partialorder %v3069_v63, %v3072_v0 }
 0x10d   : > { %v5138_v5 = vsel %vm3073_vm11, %v3057_v33, %v3059_v34  ;;  %v5140_v22 = vsel %vm3073_vm11, %v3059_v34, -2.4494898e-06 }
 0x10e   : > { %v3076_v50 = vadd.f32 %v5140_v22, %v5138_v5 }
 0x10f   : > { %1297 = vperm.xlu0 %3855, %v1255_v6  }
 0x110   : > { %v5158_v53 = vmul.f32 0.5, %v3076_v50  ;;  %v1258_v50 = vld [vmem:[%s7082_s4 + $0x48] sm:$0xff] }
 0x111   : > { %1312 = vperm.xlu1 %3856, %v1258_v50  }
 0x112   : > { %v3078_v17 = vmul.f32 1.442695, %v5158_v53  ;;  %v3080_v62 = vmul.f32 2.4494898, %v5158_v53 }
 0x113   : > { %1287 = vperm.xlu0 %3855, %v1253_v14  }
 0x114   : > { %3895 = vpow2.f32 %v3078_v17  ;;  %v3081_v0 = vadd.f32 %v3080_v62, %v5058_v13 }
 0x115   : > { %1302 = vperm.xlu1 %3856, %v1256_v10  }
 0x116   : > { %v3082_v56 = vmul.f32 1.442695, %v3081_v0 }
 0x117   : > { %1277 = vperm.xlu0 %3855, %v1251_v61  }
 0x118   : > { %3897 = vpow2.f32 %v3082_v56 }
 0x119   : > { %1292 = vperm.xlu1 %3856, %v1254_v29  }
 0x121   : > { %v3896_v14 = vpop.eup %3895 }
 0x14d   : > { %v5038_v3 = vpop.f32.mrf.mxu0 }
 0x14e   : > { %7190 = vst [vmem:[#allocation18_spill] sm:$0xff] %v5038_v3  ;;  %v3085_v3 = vmul.f32 1.8164966, %v3896_v14 }
 0x14f   : > { %v5041_v4 = vpop.f32.mrf.mxu1  ;;  %v5043_v43 = vpop.f32.mrf.mxu0 }
 0x150   : > { %7191 = vst [vmem:[#allocation19_spill] sm:$0xff] %v5041_v4  ;;  %7192 = vst [vmem:[#allocation20_spill] sm:$0xff] %v5043_v43  ;;  %v1252_v4 = vld [vmem:[%s7082_s4 + $0x18] sm:$0xff]  ;;  %v3086_v61 = vadd.f32 0.18350342, %v3085_v3 }
 0x151   : > { %v5047_v20 = vpop.f32.mrf.mxu1  ;;  %v5049_v9 = vpop.f32.mrf.mxu0  ;;  %1282 = vperm.xlu1 %3856, %v1252_v4  }
 0x152   : > { %7193 = vst [vmem:[#allocation21_spill] sm:$0xff] %v5047_v20  ;;  %7194 = vst [vmem:[#allocation22_spill] sm:$0xff] %v5049_v9  ;;  %v3088_v9 = vmul.f32 0.18350342, %v3896_v14 }
 0x153   : > { %v5053_v11 = vpop.f32.mrf.mxu1  ;;  %v5055_v12 = vpop.f32.mrf.mxu0 }
 0x154   : > { %7195 = vst [vmem:[#allocation23_spill] sm:$0xff] %v5053_v11  ;;  %7196 = vst [vmem:[#allocation24_spill] sm:$0xff] %v5055_v12  ;;  %v1249_v11 = vld [vmem:[%s7082_s4] sm:$0xff]  ;;  %v1250_v12 = vld [vmem:[%s7082_s4 + $0x8] sm:$0xff] }
 0x155   : > { %v5062_v23 = vpop.f32.mrf.mxu1  ;;  %v5064_v26 = vpop.f32.mrf.mxu0  ;;  %1267 = vperm.xlu0 %3855, %v1249_v11   ;;  %1272 = vperm.xlu1 %3856, %v1250_v12  }
 0x156   : > { %7197 = vst [vmem:[#allocation25_spill] sm:$0xff] %v5062_v23  ;;  %7198 = vst [vmem:[#allocation26_spill] sm:$0xff] %v5064_v26  ;;  %v3898_v26 = vpop.eup %3897 }
 0x157   : > { %v5067_v35 = vpop.f32.mrf.mxu1  ;;  %v5069_v24 = vpop.f32.mrf.mxu0  ;;  %v3084_v43 = vmul.f32 %v3898_v26, %v5100_v18 }
 0x158   : > { %7199 = vst [vmem:[#allocation27_spill] sm:$0xff] %v5067_v35 }
 0x159   : > { %v5071_v25 = vpop.f32.mrf.mxu1  ;;  %v5073_v27 = vpop.f32.mrf.mxu0 }
 0x15a   : > { %7200 = vst [vmem:[#allocation28_spill] sm:$0xff] %v5071_v25  ;;  %7201 = vst [vmem:[#allocation29_spill] sm:$0xff] %v5073_v27 }
 0x15b   : > { %v5077_v38 = vpop.f32.mrf.mxu1  ;;  %v5079_v36 = vpop.f32.mrf.mxu0 }
 0x15c   : > { %7202 = vst [vmem:[#allocation30_spill] sm:$0xff] %v5077_v38  ;;  %v3089_v38 = vadd.f32 1.8164966, %v3088_v9  ;;  %v3087_v9 = vmul.f32 %v3086_v61, %v3084_v43 }
 0x15d   : > { %v5083_v15 = vpop.f32.mrf.mxu1  ;;  %v5085_v40 = vpop.f32.mrf.mxu0 }
 0x15e   : > { %7203 = vst [vmem:[#allocation31_spill] sm:$0xff] %v5083_v15  ;;  %v3090_v14 = vmul.f32 %v3089_v38, %v5107_v51 }
 0x15f   : > { %v5087_v16 = vpop.f32.mrf.mxu1  ;;  %v5089_v42 = vpop.f32.mrf.mxu0 }
 0x160   : > { %7204 = vst [vmem:[#allocation32_spill] sm:$0xff] %v5087_v16  ;;  %vm3091_vm12 = vcmp.gt.f32.partialorder %v3087_v9, %v3090_v14 }
 0x161   : > { %v5091_v44 = vpop.f32.mrf.mxu1  ;;  %v5093_v30 = vpop.f32.mrf.mxu0  ;;  %v5224_v16 = vsel %vm3091_vm12, %v5138_v5, %v5158_v53 }
 0x163   : > { %v5095_v45 = vpop.f32.mrf.mxu1  ;;  %v5097_v46 = vpop.f32.mrf.mxu0 }
 0x164   : > { %7205 = vst [vmem:[#allocation33_spill] sm:$0xff] %v5095_v45 }
 0x165   : > { %v5102_v31 = vpop.f32.mrf.mxu1  ;;  %v5104_v48 = vpop.f32.mrf.mxu0 }
 0x167   : > { %v5109_v19 = vpop.f32.mrf.mxu1  ;;  %v5111_v52 = vpop.f32.mrf.mxu0 }
 0x169   : > { %v5117_v57 = vpop.f32.mrf.mxu1  ;;  %v5119_v58 = vpop.f32.mrf.mxu0 }
 0x16b   : > { %v5121_v59 = vpop.f32.mrf.mxu1  ;;  %v5123_v60 = vpop.f32.mrf.mxu0 }
 0x16c   : > { %v1130_v61 = vpack.c.bf16 %v5123_v60, %v5111_v52 }
 0x16d   : > { %v5132_v8 = vpop.f32.mrf.mxu1  ;;  %v5134_v1 = vpop.f32.mrf.mxu0 }
 0x16e   : > { %v1132_v60 = vpack.c.bf16 %v5132_v8, %v5117_v57  ;;  %v5430_v8 = vld [vmem:[#allocation8 + $0x8] sm:$0xff]  }
 0x16f   : > { %v5142_v47 = vpop.f32.mrf.mxu1  ;;  %v5144_v21 = vpop.f32.mrf.mxu0 }
 0x171   : > { %v5154_v33 = vpop.f32.mrf.mxu1  ;;  %v5156_v34 = vpop.f32.mrf.mxu0 }
 0x173   : > { %v5160_v54 = vpop.f32.mrf.mxu1  ;;  %v5162_v55 = vpop.f32.mrf.mxu0 }
 0x174   : > { %v1138_v27 = vpack.c.bf16 %v5162_v55, %v5144_v21 }
 0x175   : > { %v5172_v32 = vpop.f32.mrf.mxu1  ;;  %v5174_v63 = vpop.f32.mrf.mxu0 }
 0x176   : > { %3899 = vtanh.bf16 %v1138_v27 }
 0x177   : > { %v5177_v28 = vpop.f32.mrf.mxu1  ;;  %v739_v49 = vpop.f32.mrf.mxu0 }
 0x179   : > { %v5185_v7 = vpop.f32.mrf.mxu1  ;;  %v5187_v37 = vpop.f32.mrf.mxu0 }
 0x17b   : > { %v5189_v17 = vpop.f32.mrf.mxu1  ;;  %v743_v62 = vpop.f32.mrf.mxu0 }
 0x17c   : > { %v1146_v4 = vpack.c.bf16 %v743_v62, %v739_v49 }
 0x17d   : > { %v5197_v0 = vpop.f32.mrf.mxu1  ;;  %v5199_v6 = vpop.f32.mrf.mxu0 }
 0x17e   : > { %3901 = vtanh.bf16 %v1146_v4 }
 0x17f   : > { %v5201_v50 = vpop.f32.mrf.mxu1  ;;  %v749_v56 = vpop.f32.mrf.mxu0 }
 0x181   : > { %v862_v2 = vpop.f32.mrf.mxu1  ;;  %v751_v10 = vpop.f32.mrf.mxu0 }
 0x183   : > { %v864_v39 = vpop.f32.mrf.mxu1  ;;  %v753_v41 = vpop.f32.mrf.mxu0 }
 0x184   : > { %v1154_v11 = vpack.c.bf16 %v753_v41, %v749_v56  ;;  %v5230_v41 = vsel %vm3091_vm12, %v5158_v53, %v5140_v22 }
 0x185   : > { %v866_v35 = vpop.f32.mrf.mxu1  ;;  %v757_v29 = vpop.f32.mrf.mxu0  ;;  %v3094_v27 = vadd.f32 %v5230_v41, %v5224_v16 }
 0x186   : > { %3903 = vtanh.bf16 %v1154_v11  ;;  %v1156_v43 = vpack.c.bf16 %v866_v35, %v862_v2  ;;  %v1148_v2 = vpack.c.bf16 %v5197_v0, %v5185_v7  ;;  %v1137_v11 = vpack.c.bf16 %v5156_v34, %v5134_v1 }
 0x187   : > { %v870_v23 = vpop.f32.mrf.mxu1  ;;  %v759_v20 = vpop.f32.mrf.mxu0  ;;  %v1122_v34 = vpack.c.bf16 %v5097_v46, %v5089_v42  ;;  %v1131_v42 = vpack.c.bf16 %v5121_v59, %v5109_v19 }
 0x189   : > { %v872_v15 = vpop.f32.mrf.mxu1  ;;  %v761_v3 = vpop.f32.mrf.mxu0 }
 0x18a   : > { %v1161_v25 = vpack.c.bf16 %v761_v3, %v757_v29  ;;  %v5281_v3 = vpop.eup %3899 }
 0x18b   : > { %v874_v45 = vpop.f32.mrf.mxu1  ;;  %v763_v21 = vpop.f32.mrf.mxu0 }
 0x18c   : > { %v1162_v55 = vpack.c.bf16 %v763_v21, %v759_v20  ;;  %v1163_v26 = vpack.c.bf16 %v874_v45, %v870_v23  ;;  %3905 = vtanh.bf16 %v1161_v25  ;;  %v1153_v20 = vpack.c.bf16 %v751_v10, %v5199_v6  ;;  %v3902_v52 = vpop.eup %3901 }
 0x18d   : > { %v876_v38 = vpop.f32.mrf.mxu1  ;;  %v5226_v49 = vpop.f32.mrf.mxu0  ;;  %v1155_v23 = vpack.c.bf16 %v864_v39, %v5201_v50  ;;  %v5240_v45 = vmul.f32 0.5, %v3094_v27  ;;  %v1145_v39 = vpack.c.bf16 %v5187_v37, %v5174_v63  ;;  %v1147_v6 = vpack.c.bf16 %v5189_v17, %v5177_v28 }
 0x18e   : > { %7206 = vst [vmem:[#allocation34_spill] sm:$0xff] %v5226_v49  ;;  %v1164_v12 = vpack.c.bf16 %v876_v38, %v872_v15  ;;  %3907 = vtanh.bf16 %v1162_v55  ;;  %v1140_v63 = vpack.c.bf16 %v5172_v32, %v5154_v33  ;;  %v1139_v33 = vpack.c.bf16 %v5160_v54, %v5142_v47 }
 0x18f   : > { %v5235_v5 = vpop.f32.mrf.mxu1  ;;  %v5237_v62 = vpop.f32.mrf.mxu0  ;;  %v3096_v22 = vmul.f32 1.442695, %v5240_v45  ;;  %v3098_v53 = vmul.f32 2.4494898, %v5240_v45 }
 0x190   : > { %7207 = vst [vmem:[#allocation35_spill] sm:$0xff] %v5235_v5  ;;  %7208 = vst [vmem:[#allocation36_spill] sm:$0xff] %v5237_v62  ;;  %3909 = vtanh.bf16 %v1164_v12 }
 0x191   : > { %3911 = vtanh.bf16 %v1163_v26  ;;  %v5244_v35 = vpop.f32.mrf.mxu1  ;;  %v5246_v25 = vpop.f32.mrf.mxu0  ;;  %v3099_v10 = vadd.f32 %v3098_v53, %v5058_v13  ;;  %v1129_v26 = vpack.c.bf16 %v5119_v58, %v5104_v48  ;;  %v1124_v48 = vpack.c.bf16 %v5102_v31, %v5091_v44 }
 0x192   : > { %7209 = vst [vmem:[#allocation37_spill] sm:$0xff] %v5244_v35  ;;  %7210 = vst [vmem:[#allocation38_spill] sm:$0xff] %v5246_v25  ;;  %3913 = vtanh.bf16 %v1156_v43  ;;  %v1121_v44 = vpack.c.bf16 %v5093_v30, %v5085_v40  ;;  %v7226_v30 = vld [vmem:[#allocation20_spill] sm:$0xff] }
 0x193   : > { %3915 = vtanh.bf16 %v1153_v20  ;;  %v5256_v7 = vpop.f32.mrf.mxu1  ;;  %v5258_v0 = vpop.f32.mrf.mxu0  ;;  %v3100_v17 = vmul.f32 1.442695, %v3099_v10  ;;  %v1114_v20 = vpack.c.bf16 %v5079_v36, %v5069_v24  ;;  %v7224_v10 = vld [vmem:[#allocation28_spill] sm:$0xff] }
 0x194   : > { %7211 = vst [vmem:[#allocation39_spill] sm:$0xff] %v5256_v7  ;;  %7212 = vst [vmem:[#allocation40_spill] sm:$0xff] %v5258_v0  ;;  %3917 = vtanh.bf16 %v1155_v23  ;;  %v3904_v1 = vpop.eup %3903 }
 0x195   : > { %v5265_v29 = vpop.f32.mrf.mxu1  ;;  %v5267_v37 = vpop.f32.mrf.mxu0  ;;  %3919 = vpow2.f32 %v3096_v22  ;;  %v7222_v22 = vld [vmem:[#allocation33_spill] sm:$0xff]  ;;  %7244 = vst [vmem:[#allocation28_spill] sm:$0xff] %v5430_v8 }
 0x196   : > { %7213 = vst [vmem:[#allocation41_spill] sm:$0xff] %v5265_v29  ;;  %7214 = vst [vmem:[#allocation42_spill] sm:$0xff] %v5267_v37  ;;  %3921 = vtanh.bf16 %v1148_v2  ;;  %v7221_v2 = vld [vmem:[#allocation32_spill] sm:$0xff] }
 0x197   : > { %3923 = vtanh.bf16 %v1145_v39  ;;  %v5275_v14 = vpop.f32.mrf.mxu1  ;;  %v5277_v4 = vpop.f32.mrf.mxu0  ;;  %v1123_v53 = vpack.c.bf16 %v7222_v22, %v7221_v2 }
 0x198   : > { %7215 = vst [vmem:[#allocation43_spill] sm:$0xff] %v5275_v14  ;;  %3925 = vtanh.bf16 %v1147_v6 }
 0x199   : > { %v5285_v32 = vpop.f32.mrf.mxu1  ;;  %v5287_v9 = vpop.f32.mrf.mxu0  ;;  %3927 = vpow2.f32 %v3100_v17 }
 0x19a   : > { %7216 = vst [vmem:[#allocation44_spill] sm:$0xff] %v5285_v32  ;;  %7217 = vst [vmem:[#allocation45_spill] sm:$0xff] %v5287_v9  ;;  %3929 = vtanh.bf16 %v1140_v63  ;;  %v3906_v54 = vpop.eup %3905  ;;  %v7225_v63 = vld [vmem:[#allocation31_spill] sm:$0xff] }
 0x19b   : > { %3931 = vtanh.bf16 %v1130_v61  ;;  %v5295_v55 = vpop.f32.mrf.mxu1  ;;  %v5297_v47 = vpop.f32.mrf.mxu0  ;;  %v1116_v17 = vpack.c.bf16 %v7225_v63, %v7224_v10  ;;  %v7227_v61 = vld [vmem:[#allocation24_spill] sm:$0xff]  ;;  %v7231_v10 = vld [vmem:[#allocation26_spill] sm:$0xff] }
 0x19c   : > { %7218 = vst [vmem:[#allocation46_spill] sm:$0xff] %v5295_v55  ;;  %3933 = vtanh.bf16 %v1137_v11  ;;  %v3908_v38 = vpop.eup %3907  ;;  %v1106_v11 = vpack.c.bf16 %v7227_v61, %v7226_v30  ;;  %v7234_v61 = vld [vmem:[#allocation27_spill] sm:$0xff] }
 0x19d   : > { %3935 = vtanh.bf16 %v1139_v33  ;;  %v5307_v46 = vpop.f32.mrf.mxu1  ;;  %v5309_v43 = vpop.f32.mrf.mxu0  ;;  %1393 = vmatprep.subr.bf16.mxu0 %v3908_v38 }
 0x19e   : > { %7219 = vst [vmem:[#allocation47_spill] sm:$0xff] %v5307_v46  ;;  %7220 = vst [vmem:[#allocation48_spill] sm:$0xff] %v5309_v43  ;;  %v3910_v12 = vpop.eup %3909  ;;  %3937 = vtanh.bf16 %v1132_v60  ;;  %1394 = vmatpush1.bf16.msra.mxu0 %v3906_v54 }
 0x19f   : > { %v3912_v27 = vpop.eup %3911  ;;  %3939 = vtanh.bf16 %v1122_v34  ;;  %v5317_v19 = vpop.f32.mrf.mxu1  ;;  %1506 = vmatprep.subr.bf16.mxu1 %v3910_v12  ;;  %1395 = vmatprep.subr.bf16.mxu0 %v3904_v1 }
 0x1a0   : > { %v5319_v59 = vpop.f32.mrf.mxu0  ;;  %v3914_v23 = vpop.eup %3913  ;;  %3941 = vtanh.bf16 %v1129_v26  ;;  %1507 = vmatpush1.bf16.msra.mxu1 %v3912_v27 }
 0x1a1   : > { %v3916_v31 = vpop.eup %3915  ;;  %3943 = vtanh.bf16 %v1131_v42  ;;  %v5325_v24 = vpop.f32.mrf.mxu1  ;;  %1508 = vmatprep.subr.bf16.mxu1 %v3914_v23  ;;  %v7228_v23 = vld [vmem:[#allocation21_spill] sm:$0xff] }
 0x1a2   : > { %v5327_v36 = vpop.f32.mrf.mxu0  ;;  %v3918_v39 = vpop.eup %3917  ;;  %3945 = vtanh.bf16 %v1124_v48  ;;  %1396 = vmatpush1.bf16.msra.mxu0 %v3916_v31  ;;  %v7229_v31 = vld [vmem:[#allocation25_spill] sm:$0xff] }
 0x1a3   : > { %7223 = vst [vmem:[#allocation32_spill] sm:$0xff] %v5327_v36  ;;  %v3920_v6 = vpop.eup %3919  ;;  %3947 = vtanh.bf16 %v1114_v20  ;;  %v5335_v33 = vpop.f32.mrf.mxu1  ;;  %1397 = vmatprep.subr.bf16.mxu0 %v3902_v52  ;;  %v1108_v2 = vpack.c.bf16 %v7229_v31, %v7228_v23  ;;  %v7236_v23 = vld [vmem:[#allocation22_spill] sm:$0xff] }
 0x1a4   : > { %v5337_v60 = vpop.f32.mrf.mxu0  ;;  %v3103_v1 = vmul.f32 1.8164966, %v3920_v6  ;;  %v3106_v34 = vmul.f32 0.18350342, %v3920_v6  ;;  %v3922_v54 = vpop.eup %3921  ;;  %3949 = vtanh.bf16 %v1121_v44  ;;  %1509 = vmatpush1.bf16.msra.mxu1 %v3918_v39  ;;  %v7230_v6 = vld [vmem:[#allocation29_spill] sm:$0xff]  ;;  %v7237_v31 = vld [vmem:[#allocation18_spill] sm:$0xff] }
 0x1a5   : > { %v3924_v26 = vpop.eup %3923  ;;  %3951 = vtanh.bf16 %v1123_v53  ;;  %v5339_v38 = vpop.f32.mrf.mxu1  ;;  %1510 = vmatprep.subr.bf16.mxu1 %v3922_v54  ;;  %v7232_v63 = vpack.c.bf16 %v7230_v6, %v7231_v10  ;;  %v7238_v6 = vpack.c.bf16 %v7236_v23, %v7237_v31  ;;  %v5440_v36 = vld [vmem:[#allocation8 + $0x10] sm:$0xff]  }
 0x1a6   : > { %v5341_v42 = vpop.f32.mrf.mxu0  ;;  %v3104_v12 = vadd.f32 0.18350342, %v3103_v1  ;;  %v3107_v48 = vadd.f32 1.8164966, %v3106_v34  ;;  %v3926_v27 = vpop.eup %3925  ;;  %3953 = vtanh.bf16 %v1116_v17  ;;  %1398 = vmatpush1.bf16.msra.mxu0 %v3924_v26  ;;  %v7233_v17 = vld [vmem:[#allocation30_spill] sm:$0xff] }
 0x1a7   : > { %v3928_v20 = vpop.eup %3927  ;;  %3955 = vtanh.bf16 %v1106_v11  ;;  %v5345_v22 = vpop.f32.mrf.mxu1  ;;  %1399 = vmatprep.subr.bf16.mxu0 %v5281_v3  ;;  %v7235_v11 = vpack.c.bf16 %v7233_v17, %v7234_v61 }
 0x1a8   : > { %v5347_v52 = vpop.f32.mrf.mxu0  ;;  %v3102_v44 = vmul.f32 %v3928_v20, %v5100_v18  ;;  %v3108_v53 = vmul.f32 %v3107_v48, %v5107_v51  ;;  %v3930_v39 = vpop.eup %3929  ;;  %3957 = vtanh.bf16 %v7232_v63  ;;  %1511 = vmatpush1.bf16.msra.mxu1 %v3926_v27 }
 0x1a9   : > { %v3932_v30 = vpop.eup %3931  ;;  %3959 = vtanh.bf16 %v7235_v11  ;;  %v5358_v1 = vpop.f32.mrf.mxu1  ;;  %1512 = vmatprep.subr.bf16.mxu1 %v3930_v39 }
 0x1aa   : > { %v5360_v34 = vpop.f32.mrf.mxu0  ;;  %v3105_v54 = vmul.f32 %v3104_v12, %v3102_v44  ;;  %v3934_v26 = vpop.eup %3933  ;;  %3961 = vtanh.bf16 %v1108_v2  ;;  %v7239_v2 = vld [vmem:[#allocation23_spill] sm:$0xff] }
 0x1ab   : > { %v3936_v48 = vpop.eup %3935  ;;  %v5362_v20 = vpop.f32.mrf.mxu1  ;;  %1400 = vmatpush1.bf16.msra.mxu0 %v3934_v26  ;;  %3963 = vtanh.bf16 %v7238_v6  ;;  %v7240_v44 = vld [vmem:[#allocation19_spill] sm:$0xff] }
 0x1ac   : > { %v5364_v27 = vpop.f32.mrf.mxu0  ;;  %vm3109_vm13 = vcmp.gt.f32.partialorder %v3105_v54, %v3108_v53  ;;  %v3938_v3 = vpop.eup %3937  ;;  %1513 = vmatpush1.bf16.msra.mxu1 %v3936_v48  ;;  %1401 = vmatprep.subr.bf16.mxu0 %v3932_v30  ;;  %v7241_v10 = vpack.c.bf16 %v7239_v2, %v7240_v44 }
 0x1ad   : > { %v5371_v39 = vsel %vm3109_vm13, %v5224_v16, %v5240_v45  ;;  %v3940_v12 = vpop.eup %3939  ;;  %v5376_v63 = vpop.f32.mrf.mxu1  ;;  %1514 = vmatprep.subr.bf16.mxu1 %v3938_v3  ;;  %v5382_v17 = vsel %vm3109_vm13, %v5240_v45, %v5230_v41 }
 0x1ae   : > { %3965 = vtanh.bf16 %v7241_v10  ;;  %v5378_v53 = vpop.f32.mrf.mxu0  ;;  %v3942_v61 = vpop.eup %3941  ;;  %v3112_v30 = vadd.f32 %v5382_v17, %v5371_v39 }
 0x1af   : > { %v3944_v16 = vpop.eup %3943  ;;  %v5386_v11 = vpop.f32.mrf.mxu1  ;;  %1402 = vmatpush1.bf16.msra.mxu0 %v3942_v61 }
 0x1b0   : > { %v5388_v54 = vpop.f32.mrf.mxu0  ;;  %v3946_v26 = vpop.eup %3945  ;;  %1515 = vmatpush1.bf16.msra.mxu1 %v3944_v16  ;;  %1403 = vmatprep.subr.bf16.mxu0 %v3940_v12  ;;  %v5390_v48 = vmul.f32 0.5, %v3112_v30 }
 0x1b1   : > { %v3948_v3 = vpop.eup %3947  ;;  %v5392_v23 = vpop.f32.mrf.mxu1  ;;  %1516 = vmatprep.subr.bf16.mxu1 %v3946_v26 }
 0x1b2   : > { %v5394_v41 = vpop.f32.mrf.mxu0  ;;  %v3950_v45 = vpop.eup %3949  ;;  %v3114_v31 = vmul.f32 1.442695, %v5390_v48  ;;  %v3116_v6 = vmul.f32 2.4494898, %v5390_v48 }
 0x1b3   : > { %v3952_v2 = vpop.eup %3951  ;;  %v5398_v44 = vpop.f32.mrf.mxu1  ;;  %1404 = vmatpush1.bf16.msra.mxu0 %v3950_v45 }
 0x1b4   : > { %v5400_v10 = vpop.f32.mrf.mxu0  ;;  %v3954_v12 = vpop.eup %3953  ;;  %1517 = vmatpush1.bf16.msra.mxu1 %v3952_v2  ;;  %1405 = vmatprep.subr.bf16.mxu0 %v3948_v3  ;;  %v3117_v61 = vadd.f32 %v3116_v6, %v5058_v13  ;;  %3967 = vpow2.f32 %v3114_v31  ;;  %v1974_v3 = vld [vmem:[%s7084_s6] sm:$0xf] }
 0x1b5   : > { %v3956_v30 = vpop.eup %3955  ;;  %v5403_v16 = vpop.f32.mrf.mxu1  ;;  %1518 = vmatprep.subr.bf16.mxu1 %v3954_v12  ;;  %1977 = vperm.xlu0 %3855, %v1974_v3   ;;  %v7243_v3 = vmov 0  }
 0x1b6   : > { %v5405_v26 = vpop.f32.mrf.mxu0  ;;  %v3958_v50 = vpop.eup %3957  ;;  %v3118_v15 = vmul.f32 1.442695, %v3117_v61  ;;  %v5416_v61 = vld [vmem:[#allocation8] sm:$0xff]  }
 0x1b7   : > { %v3960_v28 = vpop.eup %3959  ;;  %v5407_v57 = vpop.f32.mrf.mxu1  ;;  %1406 = vmatpush1.bf16.msra.mxu0 %v3958_v50  ;;  %7242 = vst [vmem:[#allocation33_spill] sm:$0xff] %v5416_v61 }
 0x1b8   : > { %v965_v45 = vpop.f32.mrf.mxu0  ;;  %v3962_v2 = vpop.eup %3961  ;;  %1519 = vmatpush1.bf16.msra.mxu1 %v3960_v28  ;;  %1407 = vmatprep.subr.bf16.mxu0 %v3956_v30  ;;  %3969 = vpow2.f32 %v3118_v15 }
 0x1b9   : > { %v5412_v6 = vpop.f32.mrf.mxu1  ;;  %1520 = vmatprep.subr.bf16.mxu1 %v3962_v2  ;;  %v3964_v31 = vpop.eup %3963 }
 0x1ba   : > { %v5414_v12 = vpop.f32.mrf.mxu0 }
 0x1bb   : > { %v5418_v50 = vpop.f32.mrf.mxu1  ;;  %1408 = vmatpush1.bf16.msra.mxu0 %v3964_v31 }
 0x1bc   : > { %v3966_v21 = vpop.eup %3965  ;;  %v969_v56 = vpop.f32.mrf.mxu0 }
 0x1bd   : > { %1521 = vmatpush1.bf16.msra.mxu1 %v3966_v21  ;;  %v5420_v58 = vpop.f32.mrf.mxu1  ;;  %v1150_v0 = vpack.c.bf16 %v969_v56, %v965_v45 }
 0x1be   : > { %v5422_v28 = vpop.f32.mrf.mxu0  ;;  %1426 = vmatmul.mubr.bf16.vlgmr.msra.gmra.mxu0 %v5416_v61 }
 0x1bf   : > { %v5425_v30 = vpop.f32.mrf.mxu1  ;;  %1435 = vmatprep.mubr.bf16.mxu0 %v7243_v3 }
 0x1c0   : > { %1539 = vmatmul.mubr.bf16.vlgmr.msra.gmra.mxu1 %v5416_v61  ;;  %v975_v15 = vpop.f32.mrf.mxu0  ;;  %v1142_v61 = vpack.c.bf16 %v5400_v10, %v5388_v54 }
 0x1c1   : > { %1548 = vmatprep.mubr.bf16.mxu1 %v7243_v3  ;;  %v1088_v2 = vpop.f32.mrf.mxu1  ;;  %v3968_v31 = vpop.eup %3967 }
 0x1c2   : > { %v977_v40 = vpop.f32.mrf.mxu0  ;;  %v3121_v7 = vmul.f32 1.8164966, %v3968_v31  ;;  %v3124_v49 = vmul.f32 0.18350342, %v3968_v31  ;;  %3971 = vtanh.bf16 %v1142_v61  ;;  %v7245_v61 = vpack.c.bf16 %v5297_v47, %v5277_v4 }
 0x1c3   : > { %v1090_v21 = vpop.f32.mrf.mxu1  ;;  %3973 = vtanh.bf16 %v1150_v0 }
 0x1c4   : > { %v979_v5 = vpop.f32.mrf.mxu0  ;;  %v3122_v29 = vadd.f32 0.18350342, %v3121_v7  ;;  %v3125_v14 = vadd.f32 1.8164966, %v3124_v49 }
 0x1c5   : > { %v1092_v25 = vpop.f32.mrf.mxu1  ;;  %v3970_v55 = vpop.eup %3969  ;;  %v1158_v49 = vpack.c.bf16 %v979_v5, %v975_v15 }
 0x1c6   : > { %v983_v35 = vpop.f32.mrf.mxu0  ;;  %1436 = vmatmul.mubr.bf16.gmra.mxu0 %v5430_v8  ;;  %v3120_v62 = vmul.f32 %v3970_v55, %v5100_v18  ;;  %v3126_v31 = vmul.f32 %v3125_v14, %v5107_v51 }
 0x1c7   : > { %v1096_v37 = vpop.f32.mrf.mxu1  ;;  %1445 = vmatprep.mubr.bf16.mxu0 %v7243_v3  ;;  %3975 = vtanh.bf16 %v1158_v49  ;;  %v7250_v49 = vld [vmem:[#allocation44_spill] sm:$0xff] }
 0x1c8   : > { %1549 = vmatmul.mubr.bf16.gmra.mxu1 %v5430_v8  ;;  %v985_v9 = vpop.f32.mrf.mxu0  ;;  %v3123_v46 = vmul.f32 %v3122_v29, %v3120_v62  ;;  %v1160_v62 = vpack.c.bf16 %v1092_v25, %v1088_v2  ;;  %v1157_v29 = vpack.c.bf16 %v977_v40, %v5422_v28  ;;  %v1159_v25 = vpack.c.bf16 %v1090_v21, %v5425_v30  ;;  %v7246_v28 = vld [vmem:[#allocation32_spill] sm:$0xff] }
 0x1c9   : > { %1558 = vmatprep.mubr.bf16.mxu1 %v7243_v3  ;;  %v1098_v7 = vpop.f32.mrf.mxu1 }
 0x1ca   : > { %v987_v32 = vpop.f32.mrf.mxu0  ;;  %vm3127_vm14 = vcmp.gt.f32.partialorder %v3123_v46, %v3126_v31  ;;  %v7249_v31 = vld [vmem:[#allocation47_spill] sm:$0xff] }
 0x1cb   : > { %v1165_v43 = vpack.c.bf16 %v987_v32, %v983_v35  ;;  %v1100_v54 = vpop.f32.mrf.mxu1  ;;  %v5444_v55 = vsel %vm3127_vm14, %v5371_v39, %v5390_v48  ;;  %v5448_v5 = vsel %vm3127_vm14, %v5390_v48, %v5382_v17  ;;  %v1152_v32 = vpack.c.bf16 %v5420_v58, %v5412_v6 }
 0x1cc   : > { %v989_v10 = vpop.f32.mrf.mxu0  ;;  %v1167_v56 = vpack.c.bf16 %v1100_v54, %v1096_v37  ;;  %v3130_v0 = vadd.f32 %v5448_v5, %v5444_v55  ;;  %v1151_v39 = vpack.c.bf16 %v5418_v50, %v5407_v57  ;;  %v1144_v58 = vpack.c.bf16 %v5403_v16, %v5392_v23 }
 0x1cd   : > { %v1166_v8 = vpack.c.bf16 %v989_v10, %v985_v9  ;;  %v1102_v14 = vpop.f32.mrf.mxu1  ;;  %3977 = vtanh.bf16 %v1165_v43  ;;  %v5462_v9 = vld [vmem:[#allocation8 + $0x18] sm:$0xff]   ;;  %v1149_v43 = vpack.c.bf16 %v5414_v12, %v5405_v26  ;;  %v1134_v48 = vpack.c.bf16 %v5364_v27, %v5347_v52  ;;  %v5487_v27 = vld [vmem:[#allocation8 + $0x20] sm:$0xff]  }
 0x1ce   : > { %v1168_v35 = vpack.c.bf16 %v1102_v14, %v1098_v7  ;;  %1446 = vmatmul.mubr.bf16.gmra.mxu0 %v5440_v36  ;;  %v5457_v37 = vmul.f32 0.5, %v3130_v0  ;;  %v1141_v26 = vpack.c.bf16 %v5394_v41, %v5378_v53  ;;  %v1143_v23 = vpack.c.bf16 %v5398_v44, %v5386_v11  ;;  %v7252_v10 = vld [vmem:[#allocation40_spill] sm:$0xff]  ;;  %v7256_v0 = vld [vmem:[#allocation42_spill] sm:$0xff] }
 0x1cf   : > { %3979 = vtanh.bf16 %v1166_v8  ;;  %1455 = vmatprep.mubr.bf16.mxu0 %v7243_v3  ;;  %v1136_v52 = vpack.c.bf16 %v5376_v63, %v5358_v1  ;;  %v1126_v53 = vpack.c.bf16 %v5337_v60, %v5319_v59  ;;  %v1133_v6 = vpack.c.bf16 %v5360_v34, %v5341_v42 }
 0x1d0   : > { %1559 = vmatmul.mubr.bf16.gmra.mxu1 %v5440_v36  ;;  %3981 = vtanh.bf16 %v1168_v35  ;;  %v3132_v8 = vmul.f32 1.442695, %v5457_v37  ;;  %v3134_v46 = vmul.f32 2.4494898, %v5457_v37  ;;  %v5481_v57 = vpop.eup %3971  ;;  %v1135_v11 = vpack.c.bf16 %v5362_v20, %v5345_v22  ;;  %v7255_v35 = vld [vmem:[#allocation45_spill] sm:$0xff] }
 0x1d1   : > { %1568 = vmatprep.mubr.bf16.mxu1 %v7243_v3  ;;  %3983 = vtanh.bf16 %v1167_v56  ;;  %v3974_v16 = vpop.eup %3973  ;;  %v1128_v1 = vpack.c.bf16 %v5339_v38, %v5325_v24  ;;  %v1127_v34 = vpack.c.bf16 %v5335_v33, %v5317_v19  ;;  %v5503_v24 = vld [vmem:[#allocation8 + $0x28] sm:$0xff]   ;;  %v7247_v19 = vld [vmem:[#allocation48_spill] sm:$0xff]  ;;  %v7251_v7 = vpack.c.bf16 %v7249_v31, %v7250_v49 }
 0x1d2   : > { %3985 = vtanh.bf16 %v1160_v62  ;;  %v3135_v40 = vadd.f32 %v3134_v46, %v5058_v13  ;;  %v7248_v33 = vpack.c.bf16 %v7246_v28, %v7247_v19  ;;  %v7253_v56 = vld [vmem:[#allocation36_spill] sm:$0xff]  ;;  %v7259_v46 = vld [vmem:[#allocation43_spill] sm:$0xff] }
 0x1d3   : > { %3987 = vtanh.bf16 %v1157_v29  ;;  %v7254_v14 = vpack.c.bf16 %v7252_v10, %v7253_v56  ;;  %v7257_v29 = vpack.c.bf16 %v7255_v35, %v7256_v0 }
 0x1d4   : > { %3989 = vpow2.f32 %v3132_v8  ;;  %v3136_v17 = vmul.f32 1.442695, %v3135_v40  ;;  %v7258_v8 = vld [vmem:[#allocation46_spill] sm:$0xff] }
 0x1d5   : > { %3991 = vtanh.bf16 %v1159_v25  ;;  %v3976_v45 = vpop.eup %3975 }
 0x1d6   : > { %3993 = vtanh.bf16 %v1152_v32  ;;  %1456 = vmatmul.mubr.bf16.gmra.mxu0 %v5462_v9 }
 0x1d7   : > { %3995 = vtanh.bf16 %v1149_v43  ;;  %1465 = vmatprep.mubr.bf16.mxu0 %v7243_v3  ;;  %v7260_v43 = vpack.c.bf16 %v7258_v8, %v7259_v46 }
 0x1d8   : > { %1569 = vmatmul.mubr.bf16.gmra.mxu1 %v5462_v9  ;;  %3997 = vpow2.f32 %v3136_v17 }
 0x1d9   : > { %1578 = vmatprep.mubr.bf16.mxu1 %v7243_v3  ;;  %3999 = vtanh.bf16 %v1151_v39  ;;  %v7261_v39 = vld [vmem:[#allocation41_spill] sm:$0xff] }
 0x1da   : > { %4001 = vtanh.bf16 %v1144_v58  ;;  %v7262_v58 = vld [vmem:[#allocation37_spill] sm:$0xff] }
 0x1db   : > { %4003 = vtanh.bf16 %v1134_v48  ;;  %v3978_v41 = vpop.eup %3977  ;;  %v7263_v17 = vpack.c.bf16 %v7261_v39, %v7262_v58  ;;  %v5533_v48 = vld [vmem:[#allocation8 + $0x30] sm:$0xff]  }
 0x1dc   : > { %4005 = vtanh.bf16 %v1141_v26 }
 0x1dd   : > { %v3980_v12 = vpop.eup %3979  ;;  %4007 = vtanh.bf16 %v1143_v23 }
 0x1de   : > { %v3982_v44 = vpop.eup %3981  ;;  %4009 = vtanh.bf16 %v1136_v52  ;;  %1466 = vmatmul.mubr.bf16.gmra.mxu0 %v5487_v27  ;;  %1619 = vmatprep.subr.bf16.mxu0 %v3980_v12  ;;  %v7264_v52 = vld [vmem:[#allocation38_spill] sm:$0xff]  ;;  %v7267_v12 = vld [vmem:[#allocation39_spill] sm:$0xff] }
 0x1df   : > { %v3984_v59 = vpop.eup %3983  ;;  %4011 = vtanh.bf16 %v1126_v53  ;;  %1732 = vmatprep.subr.bf16.mxu1 %v3982_v44  ;;  %1620 = vmatpush1.bf16.msra.mxu0 %v3978_v41 }
 0x1e0   : > { %1579 = vmatmul.mubr.bf16.gmra.mxu1 %v5487_v27  ;;  %v3986_v60 = vpop.eup %3985  ;;  %4013 = vtanh.bf16 %v1133_v6  ;;  %1621 = vmatprep.subr.bf16.mxu0 %v3976_v45  ;;  %v7265_v45 = vld [vmem:[#allocation34_spill] sm:$0xff] }
 0x1e1   : > { %1733 = vmatpush1.bf16.msra.mxu1 %v3984_v59  ;;  %v3988_v42 = vpop.eup %3987  ;;  %4015 = vtanh.bf16 %v1135_v11  ;;  %1475 = vmatprep.mubr.bf16.mxu0 %v7243_v3  ;;  %v7266_v53 = vpack.c.bf16 %v7264_v52, %v7265_v45  ;;  %v7268_v11 = vld [vmem:[#allocation35_spill] sm:$0xff] }
 0x1e2   : > { %v3990_v22 = vpop.eup %3989  ;;  %1734 = vmatprep.subr.bf16.mxu1 %v3986_v60  ;;  %4017 = vtanh.bf16 %v1128_v1  ;;  %1588 = vmatprep.mubr.bf16.mxu1 %v7243_v3  ;;  %v7269_v44 = vpack.c.bf16 %v7267_v12, %v7268_v11 }
 0x1e3   : > { %v3139_v38 = vmul.f32 1.8164966, %v3990_v22  ;;  %v3142_v20 = vmul.f32 0.18350342, %v3990_v22  ;;  %v3992_v63 = vpop.eup %3991  ;;  %4019 = vtanh.bf16 %v7245_v61  ;;  %1622 = vmatpush1.bf16.msra.mxu0 %v3988_v42 }
 0x1e4   : > { %v3994_v50 = vpop.eup %3993  ;;  %4021 = vtanh.bf16 %v7248_v33  ;;  %1623 = vmatprep.subr.bf16.mxu0 %v3974_v16 }
 0x1e5   : > { %1735 = vmatpush1.bf16.msra.mxu1 %v3992_v63  ;;  %v3140_v30 = vadd.f32 0.18350342, %v3139_v38  ;;  %v3143_v15 = vadd.f32 1.8164966, %v3142_v20  ;;  %v3996_v2 = vpop.eup %3995  ;;  %4023 = vtanh.bf16 %v1127_v34  ;;  %v5555_v34 = vld [vmem:[#allocation8 + $0x38] sm:$0xff]  }
 0x1e6   : > { %v3998_v21 = vpop.eup %3997  ;;  %1736 = vmatprep.subr.bf16.mxu1 %v3994_v50  ;;  %4025 = vtanh.bf16 %v7251_v7  ;;  %1476 = vmatmul.mubr.bf16.gmra.mxu0 %v5503_v24 }
 0x1e7   : > { %v3138_v4 = vmul.f32 %v3998_v21, %v5100_v18  ;;  %v3144_v47 = vmul.f32 %v3143_v15, %v5107_v51  ;;  %v4000_v54 = vpop.eup %3999  ;;  %4027 = vtanh.bf16 %v7254_v14  ;;  %1485 = vmatprep.mubr.bf16.mxu0 %v7243_v3  ;;  %1624 = vmatpush1.bf16.msra.mxu0 %v3996_v2  ;;  %v7270_v21 = vld [vmem:[#allocation33_spill] sm:$0xff]  ;;  %v7271_v14 = vld [vmem:[#allocation28_spill] sm:$0xff] }
 0x1e8   : > { %1589 = vmatmul.mubr.bf16.gmra.mxu1 %v5503_v24  ;;  %v4002_v62 = vpop.eup %4001  ;;  %4029 = vtanh.bf16 %v7257_v29  ;;  %1625 = vmatprep.subr.bf16.mxu0 %v5481_v57 }
 0x1e9   : > { %1737 = vmatpush1.bf16.msra.mxu1 %v4000_v54  ;;  %v3141_v25 = vmul.f32 %v3140_v30, %v3138_v4  ;;  %v4004_v32 = vpop.eup %4003  ;;  %4031 = vtanh.bf16 %v7260_v43  ;;  %1598 = vmatprep.mubr.bf16.mxu1 %v7243_v3 }
 0x1ea   : > { %1738 = vmatprep.subr.bf16.mxu1 %v4002_v62  ;;  %v4006_v40 = vpop.eup %4005  ;;  %4033 = vtanh.bf16 %v7263_v17 }
 0x1eb   : > { %vm3145_vm15 = vcmp.gt.f32.partialorder %v3141_v25, %v3144_v47  ;;  %v4008_v26 = vpop.eup %4007  ;;  %4035 = vtanh.bf16 %v7266_v53  ;;  %1626 = vmatpush1.bf16.msra.mxu0 %v4006_v40 }
 0x1ec   : > { %v5537_v23 = vsel %vm3145_vm15, %v5444_v55, %v5457_v37  ;;  %v5541_v16 = vsel %vm3145_vm15, %v5457_v37, %v5448_v5  ;;  %v4010_v57 = vpop.eup %4009  ;;  %4037 = vtanh.bf16 %v7269_v44  ;;  %1627 = vmatprep.subr.bf16.mxu0 %v4004_v32 }
 0x1ed   : > { %1739 = vmatpush1.bf16.msra.mxu1 %v4008_v26  ;;  %v3148_v41 = vadd.f32 %v5541_v16, %v5537_v23  ;;  %v4012_v6 = vpop.eup %4011 }
 0x1ee   : > { %1740 = vmatprep.subr.bf16.mxu1 %v4010_v57  ;;  %v4014_v55 = vpop.eup %4013  ;;  %1486 = vmatmul.mubr.bf16.gmra.mxu0 %v5533_v48 }
 0x1ef   : > { %v3149_v5 = vmul.f32 0.5, %v3148_v41  ;;  %v4016_v37 = vpop.eup %4015  ;;  %1495 = vmatprep.mubr.bf16.mxu0 %v7243_v3  ;;  %1628 = vmatpush1.bf16.msra.mxu0 %v4014_v55 }
 0x1f0   : > { %1599 = vmatmul.mubr.bf16.gmra.mxu1 %v5533_v48  ;;  %v4018_v1 = vpop.eup %4017  ;;  %1629 = vmatprep.subr.bf16.mxu0 %v4012_v6 }
 0x1f1   : > { %1741 = vmatpush1.bf16.msra.mxu1 %v4016_v37  ;;  %v3150_v59 = vmul.f32 1.442695, %v3149_v5  ;;  %v3152_v60 = vmul.f32 2.4494898, %v3149_v5  ;;  %v4020_v42 = vpop.eup %4019  ;;  %1608 = vmatprep.mubr.bf16.mxu1 %v7243_v3 }
 0x1f2   : > { %1742 = vmatprep.subr.bf16.mxu1 %v4018_v1  ;;  %v4022_v22 = vpop.eup %4021 }
 0x1f3   : > { %4039 = vpow2.f32 %v3150_v59  ;;  %v3153_v38 = vadd.f32 %v3152_v60, %v5058_v13  ;;  %v4024_v20 = vpop.eup %4023  ;;  %1630 = vmatpush1.bf16.msra.mxu0 %v4022_v22 }
 0x1f4   : > { %v4026_v63 = vpop.eup %4025  ;;  %1631 = vmatprep.subr.bf16.mxu0 %v4020_v42 }
 0x1f5   : > { %1743 = vmatpush1.bf16.msra.mxu1 %v4024_v20  ;;  %v3154_v61 = vmul.f32 1.442695, %v3153_v38  ;;  %v4028_v50 = vpop.eup %4027 }
 0x1f6   : > { %1744 = vmatprep.subr.bf16.mxu1 %v4026_v63  ;;  %v4030_v28 = vpop.eup %4029  ;;  %1496 = vmatmul.mubr.bf16.gmra.mxu0 %v5555_v34 }
 0x1f7   : > { %4041 = vpow2.f32 %v3154_v61  ;;  %v4032_v19 = vpop.eup %4031  ;;  %1651 = vmatprep.mubr.bf16.mxu0 %v7243_v3  ;;  %1632 = vmatpush1.bf16.msra.mxu0 %v4030_v28  ;;  %v5605_v61 = vpop.permute.xlu0 %1337 }
 0x1f8   : > { %1609 = vmatmul.mubr.bf16.gmra.mxu1 %v5555_v34  ;;  %v4034_v33 = vpop.eup %4033  ;;  %1633 = vmatprep.subr.bf16.mxu0 %v4028_v50  ;;  %v5607_v50 = vpop.permute.xlu1 %1327 }
 0x1f9   : > { %1745 = vmatpush1.bf16.msra.mxu1 %v4032_v19  ;;  %v4036_v30 = vpop.eup %4035  ;;  %1764 = vmatprep.mubr.bf16.mxu1 %v7243_v3 }
 0x1fa   : > { %1746 = vmatprep.subr.bf16.mxu1 %v4034_v33  ;;  %v4038_v15 = vpop.eup %4037 }
 0x1fb   : > { %1634 = vmatpush1.bf16.msra.mxu0 %v4036_v30  ;;  %v5609_v30 = vpop.permute.xlu0 %1342 }
 0x1fd   : > { %1747 = vmatpush1.bf16.msra.mxu1 %v4038_v15  ;;  %v5611_v15 = vpop.permute.xlu1 %1332 }
 0x1fe   : > { %1652 = vmatmul.mubr.bf16.vlgmr.msra.gmra.mxu0 %v7270_v21 }
 0x1ff   : > { %1661 = vmatprep.mubr.bf16.mxu0 %v7243_v3 }
 0x200   : > { %v4040_v2 = vpop.eup %4039  ;;  %1765 = vmatmul.mubr.bf16.vlgmr.msra.gmra.mxu1 %v7270_v21 }
 0x201   : > { %1774 = vmatprep.mubr.bf16.mxu1 %v7243_v3  ;;  %v3157_v31 = vmul.f32 1.8164966, %v4040_v2  ;;  %v3160_v49 = vmul.f32 0.18350342, %v4040_v2 }
 0x203   : > { %v3158_v7 = vadd.f32 0.18350342, %v3157_v31  ;;  %v3161_v4 = vadd.f32 1.8164966, %v3160_v49 }
 0x204   : > { %v4042_v47 = vpop.eup %4041 }
 0x205   : > { %v3156_v54 = vmul.f32 %v4042_v47, %v5100_v18  ;;  %v3162_v10 = vmul.f32 %v3161_v4, %v5107_v51  ;;  %v5615_v47 = vpop.permute.xlu0 %1317 }
 0x206   : > { %1662 = vmatmul.mubr.bf16.gmra.mxu0 %v7271_v14 }
 0x207   : > { %v3159_v56 = vmul.f32 %v3158_v7, %v3156_v54  ;;  %1671 = vmatprep.mubr.bf16.mxu0 %v7243_v3  ;;  %v5617_v54 = vpop.permute.xlu1 %1322 }
 0x208   : > { %1775 = vmatmul.mubr.bf16.gmra.mxu1 %v7271_v14 }
 0x209   : > { %1784 = vmatprep.mubr.bf16.mxu1 %v7243_v3  ;;  %vm3163_vm0 = vcmp.gt.f32.partialorder %v3159_v56, %v3162_v10 }
 0x20a   : > { %v3164_v62 = vsel %vm3163_vm0, %v5537_v23, %v3149_v5  ;;  %v3165_v35 = vsel %vm3163_vm0, %v3149_v5, %v5541_v16 }
 0x20b   : > { %v3166_v0 = vadd.f32 %v3165_v35, %v3164_v62 }
 0x20d   : > { %v3167_v29 = vmul.f32 0.5, %v3166_v0  ;;  %v5621_v0 = vpop.permute.xlu1 %1312 }
 0x20e   : > { %1672 = vmatmul.mubr.bf16.gmra.mxu0 %v5440_v36 }
 0x20f   : > { %v3168_v25 = vmul.f32 1.442695, %v3167_v29  ;;  %v3170_v32 = vmul.f32 2.4494898, %v3167_v29  ;;  %1681 = vmatprep.mubr.bf16.mxu0 %v7243_v3 }
 0x210   : > { %1785 = vmatmul.mubr.bf16.gmra.mxu1 %v5440_v36 }
 0x211   : > { %1794 = vmatprep.mubr.bf16.mxu1 %v7243_v3  ;;  %4043 = vpow2.f32 %v3168_v25  ;;  %v3171_v8 = vadd.f32 %v3170_v32, %v5058_v13 }
 0x213   : > { %v3172_v46 = vmul.f32 1.442695, %v3171_v8 }
 0x215   : > { %4045 = vpow2.f32 %v3172_v46 }
 0x216   : > { %1682 = vmatmul.mubr.bf16.gmra.mxu0 %v5462_v9 }
 0x217   : > { %1691 = vmatprep.mubr.bf16.mxu0 %v7243_v3 }
 0x218   : > { %1795 = vmatmul.mubr.bf16.gmra.mxu1 %v5462_v9 }
 0x219   : > { %1804 = vmatprep.mubr.bf16.mxu1 %v7243_v3 }
 0x21e   : > { %v4044_v43 = vpop.eup %4043  ;;  %1692 = vmatmul.mubr.bf16.gmra.mxu0 %v5487_v27 }
 0x21f   : > { %v3175_v40 = vmul.f32 1.8164966, %v4044_v43  ;;  %v3178_v36 = vmul.f32 0.18350342, %v4044_v43  ;;  %1701 = vmatprep.mubr.bf16.mxu0 %v7243_v3  ;;  %v5626_v43 = vpop.permute.xlu1 %1302 }
 0x220   : > { %1805 = vmatmul.mubr.bf16.gmra.mxu1 %v5487_v27 }
 0x221   : > { %1814 = vmatprep.mubr.bf16.mxu1 %v7243_v3  ;;  %v3176_v39 = vadd.f32 0.18350342, %v3175_v40  ;;  %v3179_v58 = vadd.f32 1.8164966, %v3178_v36 }
 0x222   : > { %v4046_v17 = vpop.eup %4045 }
 0x223   : > { %v3174_v9 = vmul.f32 %v4046_v17, %v5100_v18  ;;  %v3180_v26 = vmul.f32 %v3179_v58, %v5107_v51  ;;  %v5630_v36 = vpop.permute.xlu1 %1292 }
 0x224   : > { %7273 = vst [vmem:[#allocation20_spill] sm:$0xff] %v5630_v36 }
 0x225   : > { %v3177_v23 = vmul.f32 %v3176_v39, %v3174_v9 }
 0x226   : > { %1702 = vmatmul.mubr.bf16.gmra.mxu0 %v5503_v24 }
 0x227   : > { %vm3181_vm1 = vcmp.gt.f32.partialorder %v3177_v23, %v3180_v26  ;;  %1711 = vmatprep.mubr.bf16.mxu0 %v7243_v3  ;;  %v5634_v26 = vpop.permute.xlu1 %1282 }
 0x228   : > { %1815 = vmatmul.mubr.bf16.gmra.mxu1 %v5503_v24  ;;  %v3182_v16 = vsel %vm3181_vm1, %v3164_v62, %v3167_v29  ;;  %v3183_v57 = vsel %vm3181_vm1, %v3167_v29, %v3165_v35  ;;  %v5619_v35 = vpop.permute.xlu0 %1307 }
 0x229   : > { %1824 = vmatprep.mubr.bf16.mxu1 %v7243_v3  ;;  %v3184_v27 = vadd.f32 %v3183_v57, %v3182_v16 }
 0x22b   : > { %v3185_v52 = vmul.f32 0.5, %v3184_v27 }
 0x22c   : > { %v5624_v46 = vpop.permute.xlu0 %1297 }
 0x22d   : > { %v3186_v45 = vmul.f32 1.442695, %v3185_v52  ;;  %v3188_v53 = vmul.f32 2.4494898, %v3185_v52 }
 0x22e   : > { %1712 = vmatmul.mubr.bf16.gmra.mxu0 %v5533_v48 }
 0x22f   : > { %4047 = vpow2.f32 %v3186_v45  ;;  %v3189_v41 = vadd.f32 %v3188_v53, %v5058_v13  ;;  %1721 = vmatprep.mubr.bf16.mxu0 %v7243_v3 }
 0x230   : > { %1825 = vmatmul.mubr.bf16.gmra.mxu1 %v5533_v48  ;;  %v5628_v40 = vpop.permute.xlu0 %1287 }
 0x231   : > { %1834 = vmatprep.mubr.bf16.mxu1 %v7243_v3  ;;  %v3190_v24 = vmul.f32 1.442695, %v3189_v41  ;;  %7272 = vst [vmem:[#allocation31_spill] sm:$0xff] %v5628_v40 }
 0x233   : > { %4049 = vpow2.f32 %v3190_v24 }
 0x234   : > { %v5632_v9 = vpop.permute.xlu0 %1277 }
 0x236   : > { %1722 = vmatmul.mubr.bf16.gmra.mxu0 %v5555_v34 }
 0x237   : > { %2012 = vmatprep.mubr.bf16.mxu0 %v7243_v3 }
 0x238   : > { %1835 = vmatmul.mubr.bf16.gmra.mxu1 %v5555_v34  ;;  %v5638_v24 = vpop.permute.xlu0 %1267 }
 0x239   : > { %2053 = vmatprep.mubr.bf16.mxu1 %v7243_v3 }
 0x23c   : > { %v4048_v6 = vpop.eup %4047 }
 0x23d   : > { %v3193_v12 = vmul.f32 1.8164966, %v4048_v6  ;;  %v3196_v11 = vmul.f32 0.18350342, %v4048_v6 }
 0x23f   : > { %v3194_v44 = vadd.f32 0.18350342, %v3193_v12  ;;  %v3197_v55 = vadd.f32 1.8164966, %v3196_v11  ;;  %v5640_v12 = vpop.permute.xlu1 %1272 }
 0x240   : > { %v4050_v48 = vpop.eup %4049 }
 0x241   : > { %v3192_v5 = vmul.f32 %v4050_v48, %v5100_v18  ;;  %v3198_v37 = vmul.f32 %v3197_v55, %v5107_v51 }
 0x243   : > { %v3195_v1 = vmul.f32 %v3194_v44, %v3192_v5 }
 0x245   : > { %vm3199_vm2 = vcmp.gt.f32.partialorder %v3195_v1, %v3198_v37 }
 0x246   : > { %v3200_v59 = vsel %vm3199_vm2, %v3182_v16, %v3185_v52  ;;  %v3201_v60 = vsel %vm3199_vm2, %v3185_v52, %v3183_v57 }
 0x247   : > { %v3202_v42 = vadd.f32 %v3201_v60, %v3200_v59 }
 0x249   : > { %v3203_v22 = vmul.f32 0.5, %v3202_v42 }
 0x24b   : > { %v3204_v34 = vmul.f32 1.442695, %v3203_v22  ;;  %v3206_v38 = vmul.f32 2.4494898, %v3203_v22 }
 0x24d   : > { %4051 = vpow2.f32 %v3204_v34  ;;  %v3207_v20 = vadd.f32 %v3206_v38, %v5058_v13 }
 0x24f   : > { %v3208_v63 = vmul.f32 1.442695, %v3207_v20 }
 0x251   : > { %4053 = vpow2.f32 %v3208_v63 }
 0x25a   : > { %v4052_v28 = vpop.eup %4051 }
 0x25b   : > { %v3211_v19 = vmul.f32 1.8164966, %v4052_v28  ;;  %v3214_v33 = vmul.f32 0.18350342, %v4052_v28 }
 0x25d   : > { %v3212_v2 = vadd.f32 0.18350342, %v3211_v19  ;;  %v3215_v21 = vadd.f32 1.8164966, %v3214_v33 }
 0x25e   : > { %v4054_v31 = vpop.eup %4053 }
 0x25f   : > { %v3210_v49 = vmul.f32 %v4054_v31, %v5100_v18  ;;  %v3216_v7 = vmul.f32 %v3215_v21, %v5107_v51 }
 0x261   : > { %v3213_v4 = vmul.f32 %v3212_v2, %v3210_v49 }
 0x263   : > { %vm3217_vm3 = vcmp.gt.f32.partialorder %v3213_v4, %v3216_v7 }
 0x264   : > { %v3218_v10 = vsel %vm3217_vm3, %v3200_v59, %v3203_v22  ;;  %v3219_v56 = vsel %vm3217_vm3, %v3203_v22, %v3201_v60 }
 0x265   : > { %v3220_v14 = vadd.f32 %v3219_v56, %v3218_v10 }
 0x267   : > { %v3221_v62 = vmul.f32 0.5, %v3220_v14 }
 0x269   : > { %v3222_v29 = vmul.f32 1.442695, %v3221_v62  ;;  %v3224_v25 = vmul.f32 2.4494898, %v3221_v62 }
 0x26b   : > { %4055 = vpow2.f32 %v3222_v29  ;;  %v3225_v32 = vadd.f32 %v3224_v25, %v5058_v13 }
 0x26d   : > { %v3226_v8 = vmul.f32 1.442695, %v3225_v32 }
 0x26f   : > { %4057 = vpow2.f32 %v3226_v8 }
 0x278   : > { %v4056_v39 = vpop.eup %4055 }
 0x279   : > { %v3229_v58 = vmul.f32 1.8164966, %v4056_v39  ;;  %v3232_v17 = vmul.f32 0.18350342, %v4056_v39 }
 0x27b   : > { %v3230_v23 = vadd.f32 0.18350342, %v3229_v58  ;;  %v3233_v16 = vadd.f32 1.8164966, %v3232_v17 }
 0x27c   : > { %v4058_v57 = vpop.eup %4057 }
 0x27d   : > { %v3228_v27 = vmul.f32 %v4058_v57, %v5100_v18  ;;  %v3234_v52 = vmul.f32 %v3233_v16, %v5107_v51 }
 0x27e   : > { %v1427_v45 = vpop.f32.mrf.mxu0 }
 0x27f   : > { %v3231_v53 = vmul.f32 %v3230_v23, %v3228_v27  ;;  %v5652_v59 = vadd.f32 %v1427_v45, %v5638_v24 }
 0x280   : > { %v1540_v41 = vpop.f32.mrf.mxu1  ;;  %v1429_v6 = vpop.f32.mrf.mxu0 }
 0x281   : > { %vm3235_vm4 = vcmp.gt.f32.partialorder %v3231_v53, %v3234_v52  ;;  %7275 = vst [vmem:[#allocation21_spill] sm:$0xff] %v5652_v59  ;;  %v5658_v22 = vadd.f32 %v1540_v41, %v5638_v24  ;;  %v5666_v63 = vadd.f32 %v1429_v6, %v5638_v24 }
 0x282   : > { %v1542_v11 = vpop.f32.mrf.mxu1  ;;  %v5642_v44 = vsel %vm3235_vm4, %v3218_v10, %v3221_v62  ;;  %v5644_v55 = vsel %vm3235_vm4, %v3221_v62, %v3219_v56  ;;  %v1431_v48 = vpop.f32.mrf.mxu0 }
 0x283   : > { %v3238_v5 = vadd.f32 %v5644_v55, %v5642_v44  ;;  %v5649_v1 = vadd.f32 %v1431_v48, %v5640_v12  ;;  %7277 = vst [vmem:[#allocation29_spill] sm:$0xff] %v5658_v22  ;;  %7279 = vst [vmem:[#allocation30_spill] sm:$0xff] %v5666_v63  ;;  %v5674_v2 = vadd.f32 %v1542_v11, %v5638_v24 }
 0x284   : > { %v1544_v37 = vpop.f32.mrf.mxu1  ;;  %v1433_v60 = vpop.f32.mrf.mxu0 }
 0x285   : > { %7274 = vst [vmem:[#allocation24_spill] sm:$0xff] %v5649_v1  ;;  %v5655_v42 = vadd.f32 %v1544_v37, %v5640_v12  ;;  %v5660_v34 = vmul.f32 0.5, %v3238_v5  ;;  %v5663_v20 = vadd.f32 %v1433_v60, %v5640_v12  ;;  %7281 = vst [vmem:[#allocation22_spill] sm:$0xff] %v5674_v2 }
 0x286   : > { %v1546_v38 = vpop.f32.mrf.mxu1  ;;  %v1437_v19 = vpop.f32.mrf.mxu0 }
 0x287   : > { %7276 = vst [vmem:[#allocation25_spill] sm:$0xff] %v5655_v42  ;;  %7278 = vst [vmem:[#allocation26_spill] sm:$0xff] %v5663_v20  ;;  %v5671_v33 = vadd.f32 %v1546_v38, %v5640_v12  ;;  %v3242_v31 = vmul.f32 2.4494898, %v5660_v34  ;;  %v3240_v4 = vmul.f32 1.442695, %v5660_v34  ;;  %v5689_v39 = vadd.f32 %v1437_v19, %v5632_v9 }
 0x288   : > { %v1550_v49 = vpop.f32.mrf.mxu1  ;;  %v1439_v10 = vpop.f32.mrf.mxu0 }
 0x289   : > { %7280 = vst [vmem:[#allocation27_spill] sm:$0xff] %v5671_v33  ;;  %v3243_v14 = vadd.f32 %v3242_v31, %v5058_v13  ;;  %7283 = vst [vmem:[#allocation23_spill] sm:$0xff] %v5689_v39  ;;  %4059 = vpow2.f32 %v3240_v4  ;;  %v5695_v23 = vadd.f32 %v1550_v49, %v5632_v9  ;;  %v5701_v27 = vadd.f32 %v1439_v10, %v5632_v9 }
 0x28a   : > { %v1552_v62 = vpop.f32.mrf.mxu1  ;;  %v1441_v29 = vpop.f32.mrf.mxu0 }
 0x28b   : > { %v3244_v25 = vmul.f32 1.442695, %v3243_v14  ;;  %v5686_v8 = vadd.f32 %v1441_v29, %v5634_v26  ;;  %7285 = vst [vmem:[#allocation32_spill] sm:$0xff] %v5695_v23  ;;  %7287 = vst [vmem:[#allocation47_spill] sm:$0xff] %v5701_v27  ;;  %v5711_v41 = vadd.f32 %v1552_v62, %v5632_v9 }
 0x28c   : > { %v1554_v32 = vpop.f32.mrf.mxu1  ;;  %v1443_v58 = vpop.f32.mrf.mxu0 }
 0x28d   : > { %7282 = vst [vmem:[#allocation18_spill] sm:$0xff] %v5686_v8  ;;  %v5692_v17 = vadd.f32 %v1554_v32, %v5634_v26  ;;  %4061 = vpow2.f32 %v3244_v25  ;;  %v5698_v57 = vadd.f32 %v1443_v58, %v5634_v26  ;;  %7290 = vst [vmem:[#allocation36_spill] sm:$0xff] %v5711_v41 }
 0x28e   : > { %v1556_v16 = vpop.f32.mrf.mxu1  ;;  %v5705_v45 = vpop.f32.mrf.mxu0 }
 0x28f   : > { %7284 = vst [vmem:[#allocation19_spill] sm:$0xff] %v5692_v17  ;;  %7286 = vst [vmem:[#allocation48_spill] sm:$0xff] %v5698_v57  ;;  %v5708_v53 = vadd.f32 %v1556_v16, %v5634_v26 }
 0x290   : > { %7288 = vst [vmem:[#allocation44_spill] sm:$0xff] %v5705_v45  ;;  %v5715_v11 = vpop.f32.mrf.mxu1  ;;  %v5719_v5 = vpop.f32.mrf.mxu0 }
 0x291   : > { %7289 = vst [vmem:[#allocation40_spill] sm:$0xff] %v5708_v53  ;;  %7291 = vst [vmem:[#allocation45_spill] sm:$0xff] %v5715_v11 }
 0x292   : > { %v5723_v60 = vpop.f32.mrf.mxu1  ;;  %v5725_v38 = vpop.f32.mrf.mxu0 }
 0x294   : > { %v5727_v19 = vpop.f32.mrf.mxu1  ;;  %v1453_v31 = vpop.f32.mrf.mxu0 }
 0x295   : > { %7292 = vst [vmem:[#allocation42_spill] sm:$0xff] %v5727_v19 }
 0x296   : > { %v5729_v49 = vpop.f32.mrf.mxu1  ;;  %v5731_v4 = vpop.f32.mrf.mxu0 }
 0x297   : > { %v4060_v14 = vpop.eup %4059 }
 0x298   : > { %v5733_v10 = vpop.f32.mrf.mxu1  ;;  %v1459_v62 = vpop.f32.mrf.mxu0  ;;  %v3247_v32 = vmul.f32 1.8164966, %v4060_v14  ;;  %v3250_v58 = vmul.f32 0.18350342, %v4060_v14 }
 0x299   : > { %v1460_v27 = vadd.f32 %v1459_v62, %v5624_v46  ;;  %v5786_v62 = vadd.f32 %v5723_v60, %v5628_v40  ;;  %v5802_v60 = vadd.f32 %v5731_v4, %v5624_v46 }
 0x29a   : > { %v4062_v29 = vpop.eup %4061  ;;  %v5735_v25 = vpop.f32.mrf.mxu1  ;;  %v3248_v56 = vadd.f32 0.18350342, %v3247_v32  ;;  %v3251_v6 = vadd.f32 1.8164966, %v3250_v58 }
 0x29b   : > { %v5737_v16 = vpop.f32.mrf.mxu0  ;;  %v3246_v21 = vmul.f32 %v4062_v29, %v5100_v18  ;;  %7295 = vst [vmem:[#allocation41_spill] sm:$0xff] %v5786_v62  ;;  %7298 = vst [vmem:[#allocation34_spill] sm:$0xff] %v5802_v60 }
 0x29c   : > { %v5740_v28 = vpop.f32.mrf.mxu1  ;;  %v3252_v48 = vmul.f32 %v3251_v6, %v5107_v51 }
 0x29d   : > { %v1463_v52 = vpop.f32.mrf.mxu0  ;;  %v3249_v37 = vmul.f32 %v3248_v56, %v3246_v21 }
 0x29e   : > { %v1576_v7 = vpop.f32.mrf.mxu1  ;;  %v1464_v63 = vadd.f32 %v1463_v52, %v5626_v43 }
 0x29f   : > { %v1467_v3 = vpop.f32.mrf.mxu0  ;;  %vm3253_vm5 = vcmp.gt.f32.partialorder %v3249_v37, %v3252_v48 }
 0x2a0   : > { %v5743_v22 = vpop.f32.mrf.mxu1  ;;  %v5747_v14 = vsel %vm3253_vm5, %v5642_v44, %v5660_v34  ;;  %v5751_v29 = vsel %vm3253_vm5, %v5660_v34, %v5644_v55 }
 0x2a1   : > { %v1469_v42 = vpop.f32.mrf.mxu0  ;;  %v3256_v21 = vadd.f32 %v5751_v29, %v5747_v14 }
 0x2a2   : > { %v1582_v59 = vpop.f32.mrf.mxu1  ;;  %v1470_v45 = vadd.f32 %v1469_v42, %v5619_v35  ;;  %v5797_v42 = vadd.f32 %v5729_v49, %v5630_v36 }
 0x2a3   : > { %v1471_v32 = vpop.f32.mrf.mxu0  ;;  %v5757_v58 = vmul.f32 0.5, %v3256_v21 }
 0x2a4   : > { %v5755_v56 = vpop.f32.mrf.mxu1  ;;  %v1472_v41 = vadd.f32 %v1471_v32, %v5621_v0  ;;  %v5782_v32 = vadd.f32 %v5719_v5, %v5628_v40  ;;  %7297 = vst [vmem:[#allocation38_spill] sm:$0xff] %v5797_v42 }
 0x2a5   : > { %v1473_v6 = vpop.f32.mrf.mxu0  ;;  %v3260_v1 = vmul.f32 2.4494898, %v5757_v58  ;;  %v3258_v2 = vmul.f32 1.442695, %v5757_v58 }
 0x2a6   : > { %v1586_v48 = vpop.f32.mrf.mxu1  ;;  %7294 = vst [vmem:[#allocation43_spill] sm:$0xff] %v5782_v32 }
 0x2a7   : > { %v1477_v37 = vpop.f32.mrf.mxu0  ;;  %v3261_v55 = vadd.f32 %v3260_v1, %v5058_v13  ;;  %4063 = vpow2.f32 %v3258_v2  ;;  %v1474_v1 = vadd.f32 %v1473_v6, %v5621_v0  ;;  %v1468_v2 = vadd.f32 %v1467_v3, %v5619_v35 }
 0x2a8   : > { %v5760_v44 = vpop.f32.mrf.mxu1 }
 0x2a9   : > { %v1479_v33 = vpop.f32.mrf.mxu0  ;;  %v3262_v17 = vmul.f32 1.442695, %v3261_v55  ;;  %v5775_v55 = vadd.f32 %v1453_v31, %v5630_v36  ;;  %v1877_v6 = vpack.c.bf16 %v1472_v41, %v1468_v2  ;;  %v5789_v31 = vadd.f32 %v1586_v48, %v5621_v0 }
 0x2aa   : > { %v1592_v34 = vpop.f32.mrf.mxu1  ;;  %v1480_v5 = vadd.f32 %v1479_v33, %v5615_v47  ;;  %v5808_v48 = vadd.f32 %v5735_v25, %v5624_v46  ;;  %v5820_v41 = vadd.f32 %v1477_v37, %v5615_v47 }
 0x2ab   : > { %v5764_v23 = vpop.f32.mrf.mxu0  ;;  %4065 = vpow2.f32 %v3262_v17  ;;  %7293 = vst [vmem:[#allocation46_spill] sm:$0xff] %v5775_v55  ;;  %v1870_v17 = vpack.c.bf16 %v1464_v63, %v1460_v27  ;;  %v5793_v63 = vadd.f32 %v5725_v38, %v5630_v36  ;;  %v1878_v27 = vpack.c.bf16 %v1474_v1, %v1470_v45 }
 0x2ac   : > { %v5766_v39 = vpop.f32.mrf.mxu1  ;;  %v5811_v38 = vadd.f32 %v1582_v59, %v5619_v35  ;;  %v5814_v45 = vadd.f32 %v1576_v7, %v5626_v43 }
 0x2ad   : > { %v1483_v21 = vpop.f32.mrf.mxu0  ;;  %7296 = vst [vmem:[#allocation37_spill] sm:$0xff] %v5793_v63  ;;  %4067 = vtanh.bf16 %v1870_v17  ;;  %v5824_v17 = vadd.f32 %v1592_v34, %v5615_v47 }
 0x2ae   : > { %v1596_v8 = vpop.f32.mrf.mxu1  ;;  %v1484_v52 = vadd.f32 %v1483_v21, %v5617_v54  ;;  %4069 = vtanh.bf16 %v1877_v6 }
 0x2af   : > { %v1487_v20 = vpop.f32.mrf.mxu0  ;;  %4071 = vtanh.bf16 %v1878_v27  ;;  %v5827_v7 = vadd.f32 %v1596_v8, %v5617_v54 }
 0x2b0   : > { %v5770_v53 = vpop.f32.mrf.mxu1  ;;  %v1886_v33 = vpack.c.bf16 %v1484_v52, %v1480_v5 }
 0x2b1   : > { %v1489_v57 = vpop.f32.mrf.mxu0 }
 0x2b2   : > { %v1602_v11 = vpop.f32.mrf.mxu1  ;;  %v1490_v52 = vadd.f32 %v1489_v57, %v5607_v50  ;;  %4073 = vtanh.bf16 %v1886_v33 }
 0x2b3   : > { %v1491_v19 = vpop.f32.mrf.mxu0  ;;  %v1603_v37 = vadd.f32 %v1602_v11, %v5607_v50 }
 0x2b4   : > { %v1604_v3 = vpop.f32.mrf.mxu1  ;;  %v4064_v63 = vpop.eup %4063 }
 0x2b5   : > { %v1493_v21 = vpop.f32.mrf.mxu0  ;;  %v3265_v32 = vmul.f32 1.8164966, %v4064_v63 }
 0x2b6   : > { %v1606_v49 = vpop.f32.mrf.mxu1  ;;  %v1494_v1 = vadd.f32 %v1493_v21, %v5611_v15  ;;  %v1488_v21 = vadd.f32 %v1487_v20, %v5607_v50  ;;  %v1492_v20 = vadd.f32 %v1491_v19, %v5611_v15 }
 0x2b7   : > { %v1497_v4 = vpop.f32.mrf.mxu0  ;;  %v1607_v25 = vadd.f32 %v1606_v49, %v5611_v15  ;;  %v3268_v49 = vmul.f32 0.18350342, %v4064_v63  ;;  %v3266_v40 = vadd.f32 0.18350342, %v3265_v32 }
 0x2b8   : > { %v1610_v59 = vpop.f32.mrf.mxu1  ;;  %v4066_v5 = vpop.eup %4065  ;;  %v1894_v55 = vpack.c.bf16 %v1494_v1, %v1490_v52  ;;  %v1498_v27 = vadd.f32 %v1497_v4, %v5605_v61 }
 0x2b9   : > { %v1499_v6 = vpop.f32.mrf.mxu0  ;;  %v3264_v42 = vmul.f32 %v4066_v5, %v5100_v18  ;;  %v1896_v8 = vpack.c.bf16 %v1607_v25, %v1603_v37  ;;  %v3269_v36 = vadd.f32 1.8164966, %v3268_v49  ;;  %v1611_v11 = vadd.f32 %v1610_v59, %v5605_v61 }
 0x2ba   : > { %v1612_v2 = vpop.f32.mrf.mxu1  ;;  %v1500_v60 = vadd.f32 %v1499_v6, %v5605_v61  ;;  %v1605_v37 = vadd.f32 %v1604_v3, %v5611_v15  ;;  %4075 = vtanh.bf16 %v1894_v55  ;;  %v1893_v3 = vpack.c.bf16 %v1492_v20, %v1488_v21 }
 0x2bb   : > { %v1501_v34 = vpop.f32.mrf.mxu0  ;;  %v3267_v5 = vmul.f32 %v3266_v40, %v3264_v42  ;;  %v3270_v25 = vmul.f32 %v3269_v36, %v5107_v51  ;;  %v1613_v32 = vadd.f32 %v1612_v2, %v5605_v61  ;;  %4077 = vtanh.bf16 %v1896_v8 }
 0x2bc   : > { %v1502_v62 = vadd.f32 %v1501_v34, %v5609_v30  ;;  %v1614_v57 = vpop.f32.mrf.mxu1  ;;  %v1601_v40 = vadd.f32 %v5770_v53, %v5607_v50  ;;  %v1595_v53 = vadd.f32 %v5766_v39, %v5617_v54 }
 0x2bd   : > { %v1615_v63 = vadd.f32 %v1614_v57, %v5609_v30  ;;  %v1503_v33 = vpop.f32.mrf.mxu0  ;;  %vm3271_vm6 = vcmp.gt.f32.partialorder %v3267_v5, %v3270_v25  ;;  %v5867_v57 = vpop.eup %4067  ;;  %v7323_v25 = vld [vmem:[#allocation41_spill] sm:$0xff] }
 0x2be   : > { %v1901_v1 = vpack.c.bf16 %v1502_v62, %v1498_v27  ;;  %v1504_v4 = vadd.f32 %v1503_v33, %v5609_v30  ;;  %v1616_v52 = vpop.f32.mrf.mxu1  ;;  %v1482_v62 = vadd.f32 %v5764_v23, %v5617_v54  ;;  %v5850_v2 = vsel %vm3271_vm6, %v5747_v14, %v5757_v58 }
 0x2bf   : > { %v1617_v19 = vadd.f32 %v1616_v52, %v5609_v30  ;;  %v1903_v59 = vpack.c.bf16 %v1615_v63, %v1611_v11  ;;  %v1653_v49 = vpop.f32.mrf.mxu0  ;;  %v1591_v23 = vadd.f32 %v5760_v44, %v5615_v47  ;;  %v1888_v27 = vpack.c.bf16 %v5827_v7, %v5824_v17  ;;  %v5880_v17 = vpop.eup %4069 }
 0x2c0   : > { %v1902_v6 = vpack.c.bf16 %v1504_v4, %v1500_v60  ;;  %v1766_v34 = vpop.f32.mrf.mxu1  ;;  %4079 = vtanh.bf16 %v1901_v1  ;;  %v5854_v60 = vsel %vm3271_vm6, %v5757_v58, %v5751_v29  ;;  %v1895_v8 = vpack.c.bf16 %v1605_v37, %v1601_v40  ;;  %v5889_v52 = vpop.eup %4071 }
 0x2c1   : > { %v1904_v36 = vpack.c.bf16 %v1617_v19, %v1613_v32  ;;  %v1655_v55 = vpop.f32.mrf.mxu0  ;;  %v3274_v21 = vadd.f32 %v5854_v60, %v5850_v2  ;;  %v5865_v14 = vadd.f32 %v1653_v49, %v5638_v24  ;;  %v5870_v44 = vadd.f32 %v1766_v34, %v5638_v24  ;;  %v5904_v49 = vpop.eup %4073 }
 0x2c2   : > { %4081 = vtanh.bf16 %v1902_v6  ;;  %v1768_v42 = vpop.f32.mrf.mxu1  ;;  %v1885_v7 = vpack.c.bf16 %v1482_v62, %v5820_v41  ;;  %v5884_v63 = vadd.f32 %v1655_v55, %v5638_v24  ;;  %v1887_v32 = vpack.c.bf16 %v1595_v53, %v1591_v23 }
 0x2c3   : > { %4083 = vtanh.bf16 %v1904_v36  ;;  %7299 = vst [vmem:[#allocation39_spill] sm:$0xff] %v5865_v14  ;;  %v1657_v29 = vpop.f32.mrf.mxu0  ;;  %7300 = vst [vmem:[#allocation35_spill] sm:$0xff] %v5870_v44  ;;  %v5878_v11 = vmul.f32 0.5, %v3274_v21  ;;  %v5887_v33 = vadd.f32 %v1768_v42, %v5638_v24  ;;  %v1585_v24 = vadd.f32 %v5755_v56, %v5621_v0  ;;  %v7353_v44 = vld [vmem:[#allocation27_spill] sm:$0xff]  ;;  %v7357_v14 = vld [vmem:[#allocation21_spill] sm:$0xff] }
 0x2c4   : > { %4085 = vtanh.bf16 %v1903_v59  ;;  %v1770_v58 = vpop.f32.mrf.mxu1  ;;  %v5873_v39 = vadd.f32 %v1657_v29, %v5640_v12  ;;  %7303 = vst [vmem:[#allocation49_spill] sm:$0xff] %v5884_v63  ;;  %v1462_v56 = vadd.f32 %v5737_v16, %v5626_v43  ;;  %v1581_v40 = vadd.f32 %v5743_v22, %v5619_v35 }
 0x2c5   : > { %v5876_v20 = vadd.f32 %v1770_v58, %v5640_v12  ;;  %4087 = vtanh.bf16 %v1893_v3  ;;  %7304 = vst [vmem:[#allocation50_spill] sm:$0xff] %v5887_v33  ;;  %v1659_v1 = vpop.f32.mrf.mxu0  ;;  %v3278_v6 = vmul.f32 2.4494898, %v5878_v11  ;;  %v7307_v36 = vpack.c.bf16 %v5789_v31, %v5811_v38 }
 0x2c6   : > { %7301 = vst [vmem:[#allocation33_spill] sm:$0xff] %v5873_v39  ;;  %v1772_v4 = vpop.f32.mrf.mxu1  ;;  %v5896_v37 = vadd.f32 %v1659_v1, %v5640_v12  ;;  %4089 = vtanh.bf16 %v1895_v8  ;;  %v1571_v23 = vadd.f32 %v5733_v10, %v5624_v46  ;;  %v1575_v53 = vadd.f32 %v5740_v28, %v5626_v43  ;;  %v7360_v39 = vld [vmem:[#allocation29_spill] sm:$0xff] }
 0x2c7   : > { %7302 = vst [vmem:[#allocation28_spill] sm:$0xff] %v5876_v20  ;;  %v5899_v41 = vadd.f32 %v1772_v4, %v5640_v12  ;;  %v1663_v19 = vpop.f32.mrf.mxu0  ;;  %4091 = vtanh.bf16 %v1888_v27  ;;  %v3276_v12 = vmul.f32 1.442695, %v5878_v11  ;;  %v3279_v42 = vadd.f32 %v3278_v6, %v5058_v13  ;;  %v7354_v20 = vld [vmem:[#allocation22_spill] sm:$0xff] }
 0x2c8   : > { %7305 = vst [vmem:[#allocation51_spill] sm:$0xff] %v5896_v37  ;;  %v1776_v59 = vpop.f32.mrf.mxu1  ;;  %4093 = vtanh.bf16 %v7307_v36  ;;  %v1872_v16 = vpack.c.bf16 %v5814_v45, %v5808_v48  ;;  %v1879_v21 = vpack.c.bf16 %v1585_v24, %v1581_v40  ;;  %v5926_v22 = vadd.f32 %v1663_v19, %v5632_v9  ;;  %v4076_v8 = vpop.eup %4075  ;;  %v7312_v45 = vld [vmem:[#allocation34_spill] sm:$0xff]  ;;  %v7317_v40 = vld [vmem:[#allocation20_spill] sm:$0xff] }
 0x2c9   : > { %7306 = vst [vmem:[#allocation52_spill] sm:$0xff] %v5899_v41  ;;  %v1665_v3 = vpop.f32.mrf.mxu0  ;;  %4095 = vtanh.bf16 %v1885_v7  ;;  %v3280_v27 = vmul.f32 1.442695, %v3279_v42  ;;  %v5929_v29 = vadd.f32 %v1776_v59, %v5632_v9  ;;  %v4078_v48 = vpop.eup %4077  ;;  %v1869_v58 = vpack.c.bf16 %v1462_v56, %v7312_v45 }
 0x2ca   : > { %v1778_v55 = vpop.f32.mrf.mxu1  ;;  %4097 = vtanh.bf16 %v1887_v32  ;;  %7308 = vst [vmem:[#allocation53_spill] sm:$0xff] %v5926_v22  ;;  %v5939_v7 = vadd.f32 %v1665_v3, %v5632_v9  ;;  %v7319_v3 = vld [vmem:[#allocation31_spill] sm:$0xff] }
 0x2cb   : > { %v1667_v31 = vpop.f32.mrf.mxu0  ;;  %7309 = vst [vmem:[#allocation54_spill] sm:$0xff] %v5929_v29  ;;  %4099 = vpow2.f32 %v3276_v12  ;;  %v5942_v1 = vadd.f32 %v1778_v55, %v5632_v9  ;;  %v7318_v9 = vld [vmem:[#allocation42_spill] sm:$0xff]  ;;  %v7320_v55 = vld [vmem:[#allocation44_spill] sm:$0xff] }
 0x2cc   : > { %v1780_v38 = vpop.f32.mrf.mxu1  ;;  %v5932_v10 = vadd.f32 %v1667_v31, %v5634_v26  ;;  %7313 = vst [vmem:[#allocation34_spill] sm:$0xff] %v5939_v7  ;;  %4101 = vpow2.f32 %v3280_v27  ;;  %v1565_v36 = vadd.f32 %v7318_v9, %v7317_v40  ;;  %v1448_v42 = vadd.f32 %v7320_v55, %v7319_v3  ;;  %v7327_v55 = vld [vmem:[#allocation43_spill] sm:$0xff] }
 0x2cd   : > { %v5935_v28 = vadd.f32 %v1780_v38, %v5634_v26  ;;  %7314 = vst [vmem:[#allocation57_spill] sm:$0xff] %v5942_v1  ;;  %v1669_v4 = vpop.f32.mrf.mxu0  ;;  %v1871_v31 = vpack.c.bf16 %v1575_v53, %v1571_v23  ;;  %4103 = vtanh.bf16 %v1879_v21  ;;  %v7325_v23 = vld [vmem:[#allocation45_spill] sm:$0xff]  ;;  %v7326_v21 = vld [vmem:[#allocation46_spill] sm:$0xff] }
 0x2ce   : > { %7310 = vst [vmem:[#allocation55_spill] sm:$0xff] %v5932_v10  ;;  %v1782_v24 = vpop.f32.mrf.mxu1  ;;  %v4080_v32 = vpop.eup %4079  ;;  %v5949_v6 = vadd.f32 %v1669_v4, %v5634_v26  ;;  %v7324_v4 = vld [vmem:[#allocation38_spill] sm:$0xff]  ;;  %4105 = vtanh.bf16 %v1872_v16  ;;  %v1561_v53 = vadd.f32 %v7325_v23, %v7319_v3  ;;  %v7328_v62 = vpack.c.bf16 %v7326_v21, %v7327_v55  ;;  %v7334_v21 = vld [vmem:[#allocation48_spill] sm:$0xff]  ;;  %v7335_v55 = vld [vmem:[#allocation47_spill] sm:$0xff] }
 0x2cf   : > { %7311 = vst [vmem:[#allocation56_spill] sm:$0xff] %v5935_v28  ;;  %v5952_v12 = vadd.f32 %v1782_v24, %v5634_v26  ;;  %v5958_v38 = vpop.f32.mrf.mxu0  ;;  %v1864_v5 = vpack.c.bf16 %v7324_v4, %v7323_v25  ;;  %v7331_v25 = vld [vmem:[#allocation37_spill] sm:$0xff]  ;;  %v7336_v24 = vpack.c.bf16 %v7334_v21, %v7335_v55  ;;  %v7346_v55 = vld [vmem:[#allocation18_spill] sm:$0xff] }
 0x2d0   : > { %7315 = vst [vmem:[#allocation58_spill] sm:$0xff] %v5949_v6  ;;  %v4082_v56 = vpop.eup %4081  ;;  %7321 = vst [vmem:[#allocation42_spill] sm:$0xff] %v5958_v38  ;;  %v5960_v27 = vpop.f32.mrf.mxu1  ;;  %4107 = vtanh.bf16 %v7328_v62  ;;  %v1861_v16 = vpack.c.bf16 %v7331_v25, %v1448_v42  ;;  %v1863_v4 = vpack.c.bf16 %v1565_v36, %v1561_v53  ;;  %v7343_v25 = vld [vmem:[#allocation26_spill] sm:$0xff] }
 0x2d1   : > { %7316 = vst [vmem:[#allocation59_spill] sm:$0xff] %v5952_v12  ;;  %7322 = vst [vmem:[#allocation31_spill] sm:$0xff] %v5960_v27  ;;  %v4084_v45 = vpop.eup %4083  ;;  %1980 = vmatprep.subr.bf16.mxu0 %v4082_v56  ;;  %v5973_v59 = vpop.f32.mrf.mxu0  ;;  %4109 = vtanh.bf16 %v1869_v58 }
 0x2d2   : > { %v4086_v9 = vpop.eup %4085  ;;  %7329 = vst [vmem:[#allocation44_spill] sm:$0xff] %v5973_v59  ;;  %v5975_v19 = vpop.f32.mrf.mxu1  ;;  %2021 = vmatprep.subr.bf16.mxu1 %v4084_v45  ;;  %1981 = vmatpush1.bf16.msra.mxu0 %v4080_v32  ;;  %4111 = vtanh.bf16 %v1871_v31  ;;  %v7341_v45 = vld [vmem:[#allocation36_spill] sm:$0xff] }
 0x2d3   : > { %7330 = vst [vmem:[#allocation41_spill] sm:$0xff] %v5975_v19  ;;  %2022 = vmatpush1.bf16.msra.mxu1 %v4086_v9  ;;  %1982 = vmatprep.subr.bf16.mxu0 %v4076_v8  ;;  %v4088_v56 = vpop.eup %4087  ;;  %v5978_v34 = vpop.f32.mrf.mxu0  ;;  %4113 = vtanh.bf16 %v1864_v5 }
 0x2d4   : > { %7332 = vst [vmem:[#allocation38_spill] sm:$0xff] %v5978_v34  ;;  %v5980_v23 = vpop.f32.mrf.mxu1  ;;  %2023 = vmatprep.subr.bf16.mxu1 %v4078_v48  ;;  %v4090_v62 = vpop.eup %4089  ;;  %4115 = vtanh.bf16 %v7336_v24  ;;  %v7340_v48 = vld [vmem:[#allocation40_spill] sm:$0xff] }
 0x2d5   : > { %7333 = vst [vmem:[#allocation45_spill] sm:$0xff] %v5980_v23  ;;  %v5985_v32 = vpop.f32.mrf.mxu0  ;;  %v4092_v8 = vpop.eup %4091  ;;  %4117 = vtanh.bf16 %v1861_v16  ;;  %v7342_v24 = vpack.c.bf16 %v7340_v48, %v7341_v45  ;;  %v7349_v45 = vld [vmem:[#allocation19_spill] sm:$0xff] }
 0x2d6   : > { %v5987_v42 = vpop.f32.mrf.mxu1  ;;  %1983 = vmatpush1.bf16.msra.mxu0 %v4088_v56  ;;  %v4094_v58 = vpop.eup %4093  ;;  %4119 = vtanh.bf16 %v1863_v4  ;;  %v7344_v56 = vld [vmem:[#allocation30_spill] sm:$0xff] }
 0x2d7   : > { %7337 = vst [vmem:[#allocation46_spill] sm:$0xff] %v5987_v42  ;;  %2024 = vmatpush1.bf16.msra.mxu1 %v4090_v62  ;;  %v5989_v36 = vpop.f32.mrf.mxu0  ;;  %1984 = vmatprep.subr.bf16.mxu0 %v5904_v49  ;;  %v4096_v5 = vpop.eup %4095  ;;  %4121 = vtanh.bf16 %v7342_v24  ;;  %v7345_v16 = vpack.c.bf16 %v7343_v25, %v7344_v56  ;;  %v7347_v49 = vld [vmem:[#allocation23_spill] sm:$0xff]  ;;  %v7350_v24 = vld [vmem:[#allocation32_spill] sm:$0xff] }
 0x2d8   : > { %7338 = vst [vmem:[#allocation43_spill] sm:$0xff] %v5989_v36  ;;  %v5991_v31 = vpop.f32.mrf.mxu1  ;;  %2025 = vmatprep.subr.bf16.mxu1 %v4092_v8  ;;  %v4098_v9 = vpop.eup %4097  ;;  %v7348_v8 = vpack.c.bf16 %v7346_v55, %v7347_v49  ;;  %v7351_v26 = vpack.c.bf16 %v7349_v45, %v7350_v24  ;;  %v7355_v55 = vpack.c.bf16 %v7353_v44, %v7354_v20  ;;  %v7356_v24 = vld [vmem:[#allocation24_spill] sm:$0xff] }
 0x2d9   : > { %7339 = vst [vmem:[#allocation37_spill] sm:$0xff] %v5991_v31  ;;  %v4100_v53 = vpop.eup %4099  ;;  %4123 = vtanh.bf16 %v7345_v16  ;;  %v6000_v62 = vpop.f32.mrf.mxu0 }
 0x2da   : > { %v6002_v4 = vpop.f32.mrf.mxu1  ;;  %1985 = vmatpush1.bf16.msra.mxu0 %v4096_v5  ;;  %v4102_v21 = vpop.eup %4101  ;;  %4125 = vtanh.bf16 %v7348_v8  ;;  %v3283_v48 = vmul.f32 1.8164966, %v4100_v53  ;;  %v3286_v16 = vmul.f32 0.18350342, %v4100_v53 }
 0x2db   : > { %2026 = vmatpush1.bf16.msra.mxu1 %v4098_v9  ;;  %1986 = vmatprep.subr.bf16.mxu0 %v5889_v52  ;;  %4127 = vtanh.bf16 %v7351_v26  ;;  %v6011_v25 = vpop.f32.mrf.mxu0  ;;  %v3282_v5 = vmul.f32 %v4102_v21, %v5100_v18  ;;  %v4104_v49 = vpop.eup %4103  ;;  %v7359_v21 = vld [vmem:[#allocation25_spill] sm:$0xff] }
 0x2dc   : > { %v6013_v56 = vpop.f32.mrf.mxu1  ;;  %2027 = vmatprep.subr.bf16.mxu1 %v4094_v58  ;;  %4129 = vtanh.bf16 %v7355_v55  ;;  %v3284_v9 = vadd.f32 0.18350342, %v3283_v48  ;;  %v3287_v26 = vadd.f32 1.8164966, %v3286_v16  ;;  %v4106_v45 = vpop.eup %4105  ;;  %v7358_v58 = vpack.c.bf16 %v7356_v24, %v7357_v14 }
 0x2dd   : > { %7352 = vst [vmem:[#allocation48_spill] sm:$0xff] %v6013_v56  ;;  %v6019_v52 = vpop.f32.mrf.mxu0  ;;  %v7361_v44 = vpack.c.bf16 %v7359_v21, %v7360_v39 }
 0x2de   : > { %v6021_v8 = vpop.f32.mrf.mxu1  ;;  %1987 = vmatpush1.bf16.msra.mxu0 %v5880_v17  ;;  %4131 = vtanh.bf16 %v7358_v58  ;;  %v4108_v53 = vpop.eup %4107  ;;  %v3285_v17 = vmul.f32 %v3284_v9, %v3282_v5  ;;  %v3288_v16 = vmul.f32 %v3287_v26, %v5107_v51 }
 0x2df   : > { %2028 = vmatpush1.bf16.msra.mxu1 %v4104_v49  ;;  %4133 = vtanh.bf16 %v7361_v44  ;;  %v6030_v20 = vpop.f32.mrf.mxu0  ;;  %1988 = vmatprep.subr.bf16.mxu0 %v5867_v57  ;;  %v4110_v55 = vpop.eup %4109 }
 0x2e0   : > { %v6032_v48 = vpop.f32.mrf.mxu1  ;;  %2029 = vmatprep.subr.bf16.mxu1 %v4106_v45  ;;  %v4112_v33 = vpop.eup %4111  ;;  %vm3289_vm7 = vcmp.gt.f32.partialorder %v3285_v17, %v3288_v16 }
 0x2e1   : > { %v1695_v14 = vpop.f32.mrf.mxu0  ;;  %v4114_v49 = vpop.eup %4113  ;;  %v6040_v39 = vsel %vm3289_vm7, %v5850_v2, %v5878_v11  ;;  %v6048_v9 = vsel %vm3289_vm7, %v5878_v11, %v5854_v60 }
 0x2e2   : > { %v6036_v24 = vpop.f32.mrf.mxu1  ;;  %1989 = vmatpush1.bf16.msra.mxu0 %v4110_v55  ;;  %v4116_v58 = vpop.eup %4115  ;;  %v3292_v45 = vadd.f32 %v6048_v9, %v6040_v39 }
 0x2e3   : > { %2030 = vmatpush1.bf16.msra.mxu1 %v4112_v33  ;;  %1990 = vmatprep.subr.bf16.mxu0 %v4108_v53  ;;  %v6042_v57 = vpop.f32.mrf.mxu0  ;;  %v4118_v26 = vpop.eup %4117 }
 0x2e4   : > { %v6044_v5 = vpop.f32.mrf.mxu1  ;;  %2031 = vmatprep.subr.bf16.mxu1 %v4114_v49  ;;  %v4120_v33 = vpop.eup %4119  ;;  %v6058_v60 = vmul.f32 0.5, %v3292_v45 }
 0x2e5   : > { %v1699_v53 = vpop.f32.mrf.mxu0  ;;  %v4122_v2 = vpop.eup %4121 }
 0x2e6   : > { %v6052_v21 = vpop.f32.mrf.mxu1  ;;  %1991 = vmatpush1.bf16.msra.mxu0 %v4118_v26  ;;  %v3294_v29 = vmul.f32 1.442695, %v6058_v60  ;;  %v3296_v26 = vmul.f32 2.4494898, %v6058_v60 }
 0x2e7   : > { %2032 = vmatpush1.bf16.msra.mxu1 %v4120_v33  ;;  %v4124_v44 = vpop.eup %4123  ;;  %v6054_v17 = vpop.f32.mrf.mxu0  ;;  %1992 = vmatprep.subr.bf16.mxu0 %v4116_v58 }
 0x2e8   : > { %v6056_v16 = vpop.f32.mrf.mxu1  ;;  %2033 = vmatprep.subr.bf16.mxu1 %v4122_v2  ;;  %v4126_v11 = vpop.eup %4125  ;;  %v3297_v58 = vadd.f32 %v3296_v26, %v5058_v13  ;;  %4135 = vpow2.f32 %v3294_v29  ;;  %v1700_v29 = vadd.f32 %v1699_v53, %v5621_v0 }
 0x2e9   : > { %v4128_v55 = vpop.eup %4127  ;;  %v1705_v49 = vpop.f32.mrf.mxu0 }
 0x2ea   : > { %v1818_v41 = vpop.f32.mrf.mxu1  ;;  %1993 = vmatpush1.bf16.msra.mxu0 %v4126_v11  ;;  %v4130_v28 = vpop.eup %4129  ;;  %v6070_v11 = vld [vmem:[%s7083_s5] sm:$0x3] }
 0x2eb   : > { %2034 = vmatpush1.bf16.msra.mxu1 %v4128_v55  ;;  %1994 = vmatprep.subr.bf16.mxu0 %v4124_v44  ;;  %v6062_v33 = vpop.f32.mrf.mxu0  ;;  %7362 = vst [vmem:[#allocation47_spill] sm:$0xff] %v6070_v11  ;;  %v3298_v55 = vmul.f32 1.442695, %v3297_v58  ;;  %v1696_v58 = vadd.f32 %v1695_v14, %v5619_v35  ;;  %v6093_v14 = vadd.f32 %v5985_v32, %v7317_v40 }
 0x2ec   : > { %v6064_v22 = vpop.f32.mrf.mxu1  ;;  %2035 = vmatprep.subr.bf16.mxu1 %v4130_v28  ;;  %v4132_v45 = vpop.eup %4131 }
 0x2ed   : > { %v4134_v2 = vpop.eup %4133  ;;  %v1709_v10 = vpop.f32.mrf.mxu0  ;;  %4137 = vpow2.f32 %v3298_v55  ;;  %v1706_v55 = vadd.f32 %v1705_v49, %v5615_v47  ;;  %v1882_v7 = vpack.c.bf16 %v1700_v29, %v1696_v58  ;;  %7364 = vst [vmem:[#allocation40_spill] sm:$0xff] %v6093_v14 }
 0x2ee   : > { %v1822_v63 = vpop.f32.mrf.mxu1  ;;  %1995 = vmatpush1.bf16.msra.mxu0 %v4132_v45  ;;  %v7363_v45 = vmov 0   ;;  %v1710_v1 = vadd.f32 %v1709_v10, %v5617_v54  ;;  %v6089_v10 = vadd.f32 %v1818_v41, %v5615_v47 }
 0x2ef   : > { %2036 = vmatpush1.bf16.msra.mxu1 %v4134_v2  ;;  %v6072_v44 = vpop.f32.mrf.mxu0  ;;  %v6085_v38 = vadd.f32 %v1822_v63, %v5617_v54  ;;  %4139 = vtanh.bf16 %v1882_v7  ;;  %v6098_v63 = vadd.f32 %v6052_v21, %v5621_v0 }
 0x2f0   : > { %v6074_v37 = vpop.f32.mrf.mxu1  ;;  %v1890_v53 = vpack.c.bf16 %v1710_v1, %v1706_v55 }
 0x2f1   : > { %2013 = vmatmul.mubr.bf16.vlgmr.msra.gmra.mxu0 %v6070_v11  ;;  %v1715_v28 = vpop.f32.mrf.mxu0 }
 0x2f2   : > { %v1828_v26 = vpop.f32.mrf.mxu1  ;;  %2054 = vmatmul.mubr.bf16.vlgmr.msra.gmra.mxu1 %v6070_v11  ;;  %2094 = vmatprep.mubr.bf16.mxu0 %v7363_v45  ;;  %v1716_v49 = vadd.f32 %v1715_v28, %v5607_v50  ;;  %4141 = vtanh.bf16 %v1890_v53 }
 0x2f3   : > { %2135 = vmatprep.mubr.bf16.mxu1 %v7363_v45  ;;  %v1717_v2 = vpop.f32.mrf.mxu0  ;;  %v1829_v58 = vadd.f32 %v1828_v26, %v5607_v50 }
 0x2f4   : > { %v1830_v12 = vpop.f32.mrf.mxu1 }
 0x2f5   : > { %v1719_v6 = vpop.f32.mrf.mxu0  ;;  %v4136_v45 = vpop.eup %4135 }
 0x2f6   : > { %v1832_v27 = vpop.f32.mrf.mxu1  ;;  %v1720_v11 = vadd.f32 %v1719_v6, %v5611_v15  ;;  %v1892_v6 = vpack.c.bf16 %v6085_v38, %v6089_v10  ;;  %v3301_v41 = vmul.f32 1.8164966, %v4136_v45  ;;  %v3304_v31 = vmul.f32 0.18350342, %v4136_v45 }
 0x2f7   : > { %v1723_v23 = vpop.f32.mrf.mxu0  ;;  %v1833_v32 = vadd.f32 %v1832_v27, %v5611_v15 }
 0x2f8   : > { %v1836_v34 = vpop.f32.mrf.mxu1  ;;  %v1898_v55 = vpack.c.bf16 %v1720_v11, %v1716_v49  ;;  %v1724_v14 = vadd.f32 %v1723_v23, %v5605_v61  ;;  %v3302_v53 = vadd.f32 0.18350342, %v3301_v41  ;;  %v3305_v27 = vadd.f32 1.8164966, %v3304_v31 }
 0x2f9   : > { %v1725_v29 = vpop.f32.mrf.mxu0  ;;  %v1837_v42 = vadd.f32 %v1836_v34, %v5605_v61  ;;  %v1831_v41 = vadd.f32 %v1830_v12, %v5611_v15  ;;  %v1714_v31 = vadd.f32 %v6072_v44, %v5607_v50 }
 0x2fa   : > { %v1838_v1 = vpop.f32.mrf.mxu1  ;;  %v4138_v28 = vpop.eup %4137  ;;  %v1726_v38 = vadd.f32 %v1725_v29, %v5605_v61  ;;  %v3306_v34 = vmul.f32 %v3305_v27, %v5107_v51  ;;  %4143 = vtanh.bf16 %v1898_v55  ;;  %v7366_v55 = vld [vmem:[#allocation48_spill] sm:$0xff] }
 0x2fb   : > { %v1727_v19 = vpop.f32.mrf.mxu0  ;;  %v3300_v11 = vmul.f32 %v4138_v28, %v5100_v18  ;;  %v1839_v49 = vadd.f32 %v1838_v1, %v5605_v61  ;;  %v1900_v61 = vpack.c.bf16 %v1833_v32, %v1829_v58  ;;  %v7365_v58 = vld [vmem:[#allocation44_spill] sm:$0xff]  ;;  %v1801_v32 = vadd.f32 %v7366_v55, %v5626_v43 }
 0x2fc   : > { %v1840_v7 = vpop.f32.mrf.mxu1  ;;  %v1728_v36 = vadd.f32 %v1727_v19, %v5609_v30  ;;  %v1718_v19 = vadd.f32 %v1717_v2, %v5611_v15  ;;  %v1686_v2 = vadd.f32 %v6000_v62, %v5624_v46  ;;  %v1807_v62 = vadd.f32 %v6032_v48, %v5619_v35 }
 0x2fd   : > { %v1841_v21 = vadd.f32 %v1840_v7, %v5609_v30  ;;  %v1729_v10 = vpop.f32.mrf.mxu0  ;;  %v3303_v7 = vmul.f32 %v3302_v53, %v3300_v11  ;;  %v7371_v11 = vld [vmem:[#allocation37_spill] sm:$0xff] }
 0x2fe   : > { %v1842_v26 = vpop.f32.mrf.mxu1  ;;  %v1905_v45 = vpack.c.bf16 %v1728_v36, %v1724_v14  ;;  %v1730_v40 = vadd.f32 %v1729_v10, %v5609_v30  ;;  %v7370_v10 = vld [vmem:[#allocation40_spill] sm:$0xff]  ;;  %v1797_v27 = vadd.f32 %v7371_v11, %v5624_v46 }
 0x2ff   : > { %v1843_v23 = vadd.f32 %v1842_v26, %v5609_v30  ;;  %v1907_v29 = vpack.c.bf16 %v1841_v21, %v1837_v42  ;;  %vm3307_vm8 = vcmp.gt.f32.partialorder %v3303_v7, %v3306_v34  ;;  %v1827_v30 = vadd.f32 %v6074_v37, %v5607_v50  ;;  %v7368_v21 = vld [vmem:[#allocation46_spill] sm:$0xff]  ;;  %v7374_v34 = vld [vmem:[#allocation45_spill] sm:$0xff] }
 0x300   : > { %v1906_v56 = vpack.c.bf16 %v1730_v40, %v1726_v38  ;;  %4145 = vtanh.bf16 %v1905_v45  ;;  %v6122_v15 = vsel %vm3307_vm8, %v6040_v39, %v6058_v60  ;;  %v6126_v12 = vsel %vm3307_vm8, %v6058_v60, %v6048_v9 }
 0x301   : > { %v1908_v59 = vpack.c.bf16 %v1843_v23, %v1839_v49  ;;  %v1708_v40 = vadd.f32 %v6062_v33, %v5617_v54  ;;  %v1897_v42 = vpack.c.bf16 %v1718_v19, %v1714_v31  ;;  %v3310_v36 = vadd.f32 %v6126_v12, %v6122_v15  ;;  %v7373_v23 = vld [vmem:[#allocation38_spill] sm:$0xff] }
 0x302   : > { %4147 = vtanh.bf16 %v1906_v56  ;;  %v1809_v50 = vadd.f32 %v6036_v24, %v5619_v35  ;;  %v1821_v37 = vadd.f32 %v6064_v22, %v5617_v54  ;;  %v1899_v56 = vpack.c.bf16 %v1831_v41, %v1827_v30  ;;  %v6147_v54 = vpop.eup %4139  ;;  %v7375_v30 = vld [vmem:[#allocation42_spill] sm:$0xff] }
 0x303   : > { %4149 = vtanh.bf16 %v1908_v59  ;;  %v1690_v39 = vadd.f32 %v6019_v52, %v5626_v43  ;;  %v1704_v9 = vadd.f32 %v6054_v17, %v5615_v47  ;;  %v6140_v60 = vmul.f32 0.5, %v3310_v36  ;;  %v6151_v44 = vpop.eup %4141  ;;  %v7376_v36 = vld [vmem:[#allocation31_spill] sm:$0xff] }
 0x304   : > { %4151 = vtanh.bf16 %v1907_v29  ;;  %v1698_v59 = vadd.f32 %v6042_v57, %v5621_v0  ;;  %v1884_v33 = vpack.c.bf16 %v6098_v63, %v1809_v50  ;;  %v1817_v24 = vadd.f32 %v6056_v16, %v5615_v47 }
 0x305   : > { %4153 = vtanh.bf16 %v1900_v61  ;;  %v1889_v22 = vpack.c.bf16 %v1708_v40, %v1704_v9  ;;  %v3312_v52 = vmul.f32 1.442695, %v6140_v60  ;;  %v3314_v17 = vmul.f32 2.4494898, %v6140_v60 }
 0x306   : > { %4155 = vtanh.bf16 %v1892_v6  ;;  %v1811_v57 = vadd.f32 %v6044_v5, %v5621_v0  ;;  %v1891_v14 = vpack.c.bf16 %v1821_v37, %v1817_v24  ;;  %v1803_v47 = vadd.f32 %v6021_v8, %v5626_v43 }
 0x307   : > { %4157 = vtanh.bf16 %v1897_v42  ;;  %v1694_v16 = vadd.f32 %v6030_v20, %v5619_v35  ;;  %v3315_v1 = vadd.f32 %v3314_v17, %v5058_v13  ;;  %v1799_v63 = vadd.f32 %v6002_v4, %v5624_v46  ;;  %v7367_v4 = vld [vmem:[#allocation20_spill] sm:$0xff]  ;;  %v7369_v35 = vld [vmem:[#allocation43_spill] sm:$0xff] }
 0x308   : > { %4159 = vtanh.bf16 %v1899_v56  ;;  %v1874_v6 = vpack.c.bf16 %v1690_v39, %v1686_v2  ;;  %v1688_v0 = vadd.f32 %v6011_v25, %v5626_v43  ;;  %v1676_v20 = vadd.f32 %v7365_v58, %v7319_v3  ;;  %v4144_v25 = vpop.eup %4143  ;;  %v7372_v43 = vld [vmem:[#allocation41_spill] sm:$0xff] }
 0x309   : > { %4161 = vpow2.f32 %v3312_v52  ;;  %v1881_v5 = vpack.c.bf16 %v1698_v59, %v1694_v16  ;;  %v3316_v8 = vmul.f32 1.442695, %v3315_v1  ;;  %v1883_v28 = vpack.c.bf16 %v1811_v57, %v1807_v62  ;;  %v7378_v52 = vld [vmem:[#allocation34_spill] sm:$0xff]  ;;  %v7381_v16 = vld [vmem:[#allocation57_spill] sm:$0xff] }
 0x30a   : > { %4163 = vtanh.bf16 %v1884_v33  ;;  %v1793_v53 = vadd.f32 %v7368_v21, %v7367_v4  ;;  %v1684_v48 = vadd.f32 %v7369_v35, %v5624_v46  ;;  %v1876_v38 = vpack.c.bf16 %v1803_v47, %v1799_v63  ;;  %v7380_v47 = vld [vmem:[#allocation59_spill] sm:$0xff]  ;;  %v7389_v21 = vld [vmem:[#allocation56_spill] sm:$0xff] }
 0x30b   : > { %4165 = vtanh.bf16 %v1889_v22  ;;  %v1866_v26 = vpack.c.bf16 %v7370_v10, %v1676_v20  ;;  %v1789_v45 = vadd.f32 %v7372_v43, %v7319_v3  ;;  %v1678_v19 = vadd.f32 %v7373_v23, %v7367_v4  ;;  %v7377_v22 = vld [vmem:[#allocation58_spill] sm:$0xff]  ;;  %v7387_v20 = vld [vmem:[#allocation53_spill] sm:$0xff]  ;;  %v7398_v23 = vld [vmem:[#allocation28_spill] sm:$0xff] }
 0x30c   : > { %4167 = vtanh.bf16 %v1891_v14  ;;  %v1873_v41 = vpack.c.bf16 %v1688_v0, %v1684_v48  ;;  %v1791_v29 = vadd.f32 %v7374_v34, %v7367_v4  ;;  %v1875_v31 = vpack.c.bf16 %v1801_v32, %v1797_v27 }
 0x30d   : > { %4169 = vpow2.f32 %v3316_v8  ;;  %v1674_v46 = vadd.f32 %v7375_v30, %v7319_v3  ;;  %v1868_v40 = vpack.c.bf16 %v1793_v53, %v1789_v45  ;;  %v1787_v50 = vadd.f32 %v7376_v36, %v7319_v3  ;;  %v7384_v8 = vld [vmem:[#allocation49_spill] sm:$0xff]  ;;  %v7390_v53 = vld [vmem:[#allocation54_spill] sm:$0xff] }
 0x30e   : > { %4171 = vtanh.bf16 %v1874_v6  ;;  %v4146_v49 = vpop.eup %4145  ;;  %v7379_v17 = vpack.c.bf16 %v7377_v22, %v7378_v52  ;;  %v7382_v1 = vpack.c.bf16 %v7380_v47, %v7381_v16  ;;  %v7391_v35 = vpack.c.bf16 %v7389_v21, %v7390_v53  ;;  %v7401_v22 = vld [vmem:[#allocation47_spill] sm:$0xff] }
 0x30f   : > { %4173 = vtanh.bf16 %v1881_v5  ;;  %v1865_v56 = vpack.c.bf16 %v1678_v19, %v1674_v46  ;;  %v1867_v9 = vpack.c.bf16 %v1791_v29, %v1787_v50  ;;  %v7383_v5 = vld [vmem:[#allocation51_spill] sm:$0xff] }
 0x310   : > { %v4148_v7 = vpop.eup %4147  ;;  %4175 = vtanh.bf16 %v1883_v28  ;;  %v7385_v58 = vpack.c.bf16 %v7383_v5, %v7384_v8  ;;  %v7399_v19 = vld [vmem:[#allocation35_spill] sm:$0xff] }
 0x311   : > { %v4150_v61 = vpop.eup %4149  ;;  %4177 = vtanh.bf16 %v1876_v38  ;;  %2062 = vmatprep.subr.bf16.mxu0 %v4148_v7  ;;  %v7392_v38 = vld [vmem:[#allocation52_spill] sm:$0xff] }
 0x312   : > { %v4152_v42 = vpop.eup %4151  ;;  %4179 = vtanh.bf16 %v1866_v26  ;;  %2103 = vmatprep.subr.bf16.mxu1 %v4150_v61  ;;  %2063 = vmatpush1.bf16.msra.mxu0 %v4146_v49  ;;  %v7396_v49 = vld [vmem:[#allocation39_spill] sm:$0xff] }
 0x313   : > { %v4154_v37 = vpop.eup %4153  ;;  %4181 = vtanh.bf16 %v1873_v41  ;;  %2104 = vmatpush1.bf16.msra.mxu1 %v4152_v42  ;;  %2064 = vmatprep.subr.bf16.mxu0 %v4144_v25  ;;  %v7393_v25 = vld [vmem:[#allocation50_spill] sm:$0xff]  ;;  %v7400_v41 = vpack.c.bf16 %v7398_v23, %v7399_v19 }
 0x314   : > { %v4156_v39 = vpop.eup %4155  ;;  %4183 = vtanh.bf16 %v1875_v31  ;;  %2105 = vmatprep.subr.bf16.mxu1 %v4154_v37  ;;  %v7394_v10 = vpack.c.bf16 %v7392_v38, %v7393_v25 }
 0x315   : > { %v4158_v59 = vpop.eup %4157  ;;  %4185 = vtanh.bf16 %v1868_v40 }
 0x316   : > { %v4160_v33 = vpop.eup %4159  ;;  %4187 = vtanh.bf16 %v7379_v17  ;;  %2065 = vmatpush1.bf16.msra.mxu0 %v4158_v59 }
 0x317   : > { %v4162_v24 = vpop.eup %4161  ;;  %4189 = vtanh.bf16 %v1865_v56  ;;  %2106 = vmatpush1.bf16.msra.mxu1 %v4160_v33  ;;  %2066 = vmatprep.subr.bf16.mxu0 %v6151_v44  ;;  %v7386_v44 = vld [vmem:[#allocation55_spill] sm:$0xff] }
 0x318   : > { %v3319_v3 = vmul.f32 1.8164966, %v4162_v24  ;;  %v3322_v2 = vmul.f32 0.18350342, %v4162_v24  ;;  %v4164_v57 = vpop.eup %4163  ;;  %4191 = vtanh.bf16 %v1867_v9  ;;  %2107 = vmatprep.subr.bf16.mxu1 %v4156_v39  ;;  %v7388_v55 = vpack.c.bf16 %v7386_v44, %v7387_v20 }
 0x319   : > { %v4166_v14 = vpop.eup %4165  ;;  %4193 = vtanh.bf16 %v7382_v1 }
 0x31a   : > { %v3320_v63 = vadd.f32 0.18350342, %v3319_v3  ;;  %v3323_v6 = vadd.f32 1.8164966, %v3322_v2  ;;  %v4168_v62 = vpop.eup %4167  ;;  %4195 = vtanh.bf16 %v7385_v58  ;;  %2067 = vmatpush1.bf16.msra.mxu0 %v4166_v14 }
 0x31b   : > { %v4170_v0 = vpop.eup %4169  ;;  %4197 = vtanh.bf16 %v7388_v55  ;;  %2108 = vmatpush1.bf16.msra.mxu1 %v4168_v62  ;;  %2068 = vmatprep.subr.bf16.mxu0 %v6147_v54  ;;  %v7395_v54 = vld [vmem:[#allocation33_spill] sm:$0xff] }
 0x31c   : > { %v3318_v32 = vmul.f32 %v4170_v0, %v5100_v18  ;;  %v3324_v28 = vmul.f32 %v3323_v6, %v5107_v51  ;;  %v4172_v4 = vpop.eup %4171  ;;  %4199 = vtanh.bf16 %v7391_v35  ;;  %2109 = vmatprep.subr.bf16.mxu1 %v4164_v57  ;;  %v7397_v43 = vpack.c.bf16 %v7395_v54, %v7396_v49 }
 0x31d   : > { %v4174_v48 = vpop.eup %4173  ;;  %4201 = vtanh.bf16 %v7394_v10 }
 0x31e   : > { %v3321_v26 = vmul.f32 %v3320_v63, %v3318_v32  ;;  %v4176_v11 = vpop.eup %4175  ;;  %2069 = vmatpush1.bf16.msra.mxu0 %v4174_v48  ;;  %4203 = vtanh.bf16 %v7397_v43 }
 0x31f   : > { %v4178_v27 = vpop.eup %4177  ;;  %2110 = vmatpush1.bf16.msra.mxu1 %v4176_v11  ;;  %2070 = vmatprep.subr.bf16.mxu0 %v4172_v4  ;;  %4205 = vtanh.bf16 %v7400_v41 }
 0x320   : > { %vm3325_vm9 = vcmp.gt.f32.partialorder %v3321_v26, %v3324_v28  ;;  %v4180_v45 = vpop.eup %4179  ;;  %2111 = vmatprep.subr.bf16.mxu1 %v4178_v27 }
 0x321   : > { %v3326_v7 = vsel %vm3325_vm9, %v6122_v15, %v6140_v60  ;;  %v3327_v34 = vsel %vm3325_vm9, %v6140_v60, %v6126_v12  ;;  %v4182_v29 = vpop.eup %4181 }
 0x322   : > { %v3328_v31 = vadd.f32 %v3327_v34, %v3326_v7  ;;  %v4184_v61 = vpop.eup %4183  ;;  %2071 = vmatpush1.bf16.msra.mxu0 %v4182_v29 }
 0x323   : > { %v4186_v30 = vpop.eup %4185  ;;  %2112 = vmatpush1.bf16.msra.mxu1 %v4184_v61  ;;  %2072 = vmatprep.subr.bf16.mxu0 %v4180_v45 }
 0x324   : > { %v3329_v46 = vmul.f32 0.5, %v3328_v31  ;;  %v4188_v40 = vpop.eup %4187  ;;  %2113 = vmatprep.subr.bf16.mxu1 %v4186_v30 }
 0x325   : > { %v4190_v42 = vpop.eup %4189 }
 0x326   : > { %v3330_v36 = vmul.f32 1.442695, %v3329_v46  ;;  %v3332_v50 = vmul.f32 2.4494898, %v3329_v46  ;;  %v4192_v37 = vpop.eup %4191  ;;  %2073 = vmatpush1.bf16.msra.mxu0 %v4190_v42 }
 0x327   : > { %v4194_v56 = vpop.eup %4193  ;;  %2114 = vmatpush1.bf16.msra.mxu1 %v4192_v37  ;;  %2074 = vmatprep.subr.bf16.mxu0 %v4188_v40 }
 0x328   : > { %4207 = vpow2.f32 %v3330_v36  ;;  %v3333_v15 = vadd.f32 %v3332_v50, %v5058_v13  ;;  %v4196_v12 = vpop.eup %4195  ;;  %2115 = vmatprep.subr.bf16.mxu1 %v4194_v56 }
 0x329   : > { %v4198_v60 = vpop.eup %4197 }
 0x32a   : > { %v3334_v39 = vmul.f32 1.442695, %v3333_v15  ;;  %v4200_v9 = vpop.eup %4199  ;;  %2075 = vmatpush1.bf16.msra.mxu0 %v4198_v60 }
 0x32b   : > { %v4202_v59 = vpop.eup %4201  ;;  %2116 = vmatpush1.bf16.msra.mxu1 %v4200_v9  ;;  %2076 = vmatprep.subr.bf16.mxu0 %v4196_v12 }
 0x32c   : > { %4209 = vpow2.f32 %v3334_v39  ;;  %2117 = vmatprep.subr.bf16.mxu1 %v4202_v59  ;;  %v4204_v33 = vpop.eup %4203 }
 0x32d   : > { %v4206_v24 = vpop.eup %4205 }
 0x32e   : > { %2077 = vmatpush1.bf16.msra.mxu0 %v4204_v33 }
 0x32f   : > { %2118 = vmatpush1.bf16.msra.mxu1 %v4206_v24 }
 0x331   : > { %2095 = vmatmul.mubr.bf16.vlgmr.msra.gmra.mxu0 %v7401_v22 }
 0x332   : > { %2136 = vmatmul.mubr.bf16.vlgmr.msra.gmra.mxu1 %v7401_v22 }
 0x335   : > { %v4208_v52 = vpop.eup %4207 }
 0x336   : > { %v3337_v17 = vmul.f32 1.8164966, %v4208_v52  ;;  %v3340_v3 = vmul.f32 0.18350342, %v4208_v52 }
 0x338   : > { %v3338_v2 = vadd.f32 0.18350342, %v3337_v17  ;;  %v3341_v57 = vadd.f32 1.8164966, %v3340_v3 }
 0x339   : > { %v4210_v14 = vpop.eup %4209 }
 0x33a   : > { %v3336_v47 = vmul.f32 %v4210_v14, %v5100_v18  ;;  %v3342_v16 = vmul.f32 %v3341_v57, %v5107_v51 }
 0x33c   : > { %v3339_v1 = vmul.f32 %v3338_v2, %v3336_v47 }
 0x33e   : > { %vm3343_vm10 = vcmp.gt.f32.partialorder %v3339_v1, %v3342_v16 }
 0x33f   : > { %v3344_v63 = vsel %vm3343_vm10, %v3326_v7, %v3329_v46  ;;  %v3345_v6 = vsel %vm3343_vm10, %v3329_v46, %v3327_v34 }
 0x340   : > { %v3346_v62 = vadd.f32 %v3345_v6, %v3344_v63 }
 0x342   : > { %v3347_v0 = vmul.f32 0.5, %v3346_v62  ;;  %v6236_v62 = vpop.permute.xlu0 %1977 }
 0x344   : > { %v3348_v5 = vmul.f32 1.442695, %v3347_v0  ;;  %v3350_v8 = vmul.f32 2.4494898, %v3347_v0 }
 0x346   : > { %4211 = vpow2.f32 %v3348_v5  ;;  %v3351_v58 = vadd.f32 %v3350_v8, %v5058_v13 }
 0x348   : > { %v3352_v44 = vmul.f32 1.442695, %v3351_v58 }
 0x34a   : > { %4213 = vpow2.f32 %v3352_v44 }
 0x353   : > { %v4212_v20 = vpop.eup %4211 }
 0x354   : > { %v3355_v55 = vmul.f32 1.8164966, %v4212_v20  ;;  %v3358_v32 = vmul.f32 0.18350342, %v4212_v20 }
 0x356   : > { %v3356_v28 = vadd.f32 0.18350342, %v3355_v55  ;;  %v3359_v4 = vadd.f32 1.8164966, %v3358_v32 }
 0x357   : > { %v4214_v21 = vpop.eup %4213 }
 0x358   : > { %v3354_v53 = vmul.f32 %v4214_v21, %v5100_v18  ;;  %v3360_v35 = vmul.f32 %v3359_v4, %v5107_v51 }
 0x35a   : > { %v3357_v48 = vmul.f32 %v3356_v28, %v3354_v53 }
 0x35c   : > { %vm3361_vm11 = vcmp.gt.f32.partialorder %v3357_v48, %v3360_v35 }
 0x35d   : > { %v3362_v38 = vsel %vm3361_vm11, %v3344_v63, %v3347_v0  ;;  %v3363_v25 = vsel %vm3361_vm11, %v3347_v0, %v3345_v6 }
 0x35e   : > { %v3364_v10 = vadd.f32 %v3363_v25, %v3362_v38 }
 0x360   : > { %v3365_v26 = vmul.f32 0.5, %v3364_v10 }
 0x362   : > { %v3366_v11 = vmul.f32 1.442695, %v3365_v26  ;;  %v3368_v27 = vmul.f32 2.4494898, %v3365_v26 }
 0x364   : > { %4215 = vpow2.f32 %v3366_v11  ;;  %v3369_v54 = vadd.f32 %v3368_v27, %v5058_v13 }
 0x366   : > { %v3370_v49 = vmul.f32 1.442695, %v3369_v54 }
 0x368   : > { %4217 = vpow2.f32 %v3370_v49 }
 0x371   : > { %v4216_v43 = vpop.eup %4215 }
 0x372   : > { %v3373_v45 = vmul.f32 1.8164966, %v4216_v43  ;;  %v3376_v23 = vmul.f32 0.18350342, %v4216_v43 }
 0x374   : > { %v3374_v19 = vadd.f32 0.18350342, %v3373_v45  ;;  %v3377_v41 = vadd.f32 1.8164966, %v3376_v23 }
 0x375   : > { %v4218_v7 = vpop.eup %4217 }
 0x376   : > { %v3372_v34 = vmul.f32 %v4218_v7, %v5100_v18  ;;  %v3378_v29 = vmul.f32 %v3377_v41, %v5107_v51 }
 0x378   : > { %v3375_v31 = vmul.f32 %v3374_v19, %v3372_v34 }
 0x37a   : > { %vm3379_vm12 = vcmp.gt.f32.partialorder %v3375_v31, %v3378_v29 }
 0x37b   : > { %v3380_v61 = vsel %vm3379_vm12, %v3362_v38, %v3365_v26  ;;  %v3381_v30 = vsel %vm3379_vm12, %v3365_v26, %v3363_v25 }
 0x37c   : > { %v3382_v46 = vadd.f32 %v3381_v30, %v3380_v61 }
 0x37e   : > { %v3383_v40 = vmul.f32 0.5, %v3382_v46 }
 0x380   : > { %v3384_v42 = vmul.f32 1.442695, %v3383_v40  ;;  %v3386_v36 = vmul.f32 2.4494898, %v3383_v40 }
 0x382   : > { %4219 = vpow2.f32 %v3384_v42  ;;  %v3387_v50 = vadd.f32 %v3386_v36, %v5058_v13 }
 0x384   : > { %v3388_v37 = vmul.f32 1.442695, %v3387_v50  ;;  %v4594_v50 = vmov 1966171168  }
 0x386   : > { %4221 = vpow2.f32 %v3388_v37  ;;  %v2194_v37 = vunpack.c.l.s4 %v4594_v50 }
 0x38f   : > { %v4220_v56 = vpop.eup %4219 }
 0x390   : > { %v3391_v15 = vmul.f32 1.8164966, %v4220_v56  ;;  %v3394_v12 = vmul.f32 0.18350342, %v4220_v56  ;;  %v2196_v56 = vlaneseq }
 0x392   : > { %v3392_v60 = vadd.f32 0.18350342, %v3391_v15  ;;  %v3395_v39 = vadd.f32 1.8164966, %v3394_v12  ;;  %v2195_v12 = vunpack.c.0.s8 %v2194_v37 }
 0x393   : > { %v4222_v9 = vpop.eup %4221 }
 0x394   : > { %v3390_v59 = vmul.f32 %v4222_v9, %v5100_v18  ;;  %v3396_v33 = vmul.f32 %v3395_v39, %v5107_v51 }
 0x396   : > { %v3393_v24 = vmul.f32 %v3392_v60, %v3390_v59  ;;  %v2197_v60 = vshrl.u32 %v2196_v56, 7 }
 0x398   : > { %vm3397_vm13 = vcmp.gt.f32.partialorder %v3393_v24, %v3396_v33 }
 0x399   : > { %v3398_v22 = vsel %vm3397_vm13, %v3380_v61, %v3383_v40  ;;  %v3399_v52 = vsel %vm3397_vm13, %v3383_v40, %v3381_v30 }
 0x39a   : > { %v3400_v17 = vadd.f32 %v3399_v52, %v3398_v22 }
 0x39c   : > { %v3401_v3 = vmul.f32 0.5, %v3400_v17 }
 0x39e   : > { %v3402_v2 = vmul.f32 1.442695, %v3401_v3  ;;  %v3404_v57 = vmul.f32 2.4494898, %v3401_v3 }
 0x3a0   : > { %4223 = vpow2.f32 %v3402_v2  ;;  %v3405_v14 = vadd.f32 %v3404_v57, %v5058_v13 }
 0x3a2   : > { %v3406_v47 = vmul.f32 1.442695, %v3405_v14 }
 0x3a4   : > { %4225 = vpow2.f32 %v3406_v47 }
 0x3ad   : > { %v4224_v16 = vpop.eup %4223 }
 0x3ae   : > { %v3409_v1 = vmul.f32 1.8164966, %v4224_v16  ;;  %v3412_v63 = vmul.f32 0.18350342, %v4224_v16 }
 0x3b0   : > { %v3413_v6 = vadd.f32 1.8164966, %v3412_v63  ;;  %v3410_v5 = vadd.f32 0.18350342, %v3409_v1 }
 0x3b1   : > { %v2014_v0 = vpop.f32.mrf.mxu0  ;;  %v4226_v8 = vpop.eup %4225 }
 0x3b2   : > { %v2015_v58 = vadd.f32 %v2014_v0, %v6236_v62  ;;  %v2055_v44 = vpop.f32.mrf.mxu1  ;;  %v3408_v32 = vmul.f32 %v4226_v8, %v5100_v18  ;;  %v3414_v28 = vmul.f32 %v3413_v6, %v5107_v51 }
 0x3b3   : > { %v2056_v20 = vadd.f32 %v2055_v44, %v6236_v62  ;;  %v2016_v55 = vpop.f32.mrf.mxu0 }
 0x3b4   : > { %v3750_v4 = vmul.f32 -1.442695, %v2015_v58  ;;  %v2017_v21 = vadd.f32 %v2016_v55, %v6236_v62  ;;  %v2057_v53 = vpop.f32.mrf.mxu1  ;;  %v3411_v25 = vmul.f32 %v3410_v5, %v3408_v32 }
 0x3b5   : > { %v3752_v35 = vmul.f32 -1.442695, %v2056_v20  ;;  %v2058_v48 = vadd.f32 %v2057_v53, %v6236_v62  ;;  %v2018_v38 = vpop.f32.mrf.mxu0 }
 0x3b6   : > { %4227 = vpow2.f32 %v3750_v4  ;;  %v3751_v10 = vmul.f32 -1.442695, %v2017_v21  ;;  %v2059_v26 = vpop.f32.mrf.mxu1  ;;  %vm3415_vm14 = vcmp.gt.f32.partialorder %v3411_v25, %v3414_v28 }
 0x3b7   : > { %4229 = vpow2.f32 %v3752_v35  ;;  %v3753_v11 = vmul.f32 -1.442695, %v2058_v48  ;;  %v2019_v27 = vpop.f32.mrf.mxu0  ;;  %v3416_v49 = vsel %vm3415_vm14, %v3398_v22, %v3401_v3  ;;  %v3417_v43 = vsel %vm3415_vm14, %v3401_v3, %v3399_v52 }
 0x3b8   : > { %4231 = vpow2.f32 %v3751_v10  ;;  %v2060_v54 = vpop.f32.mrf.mxu1  ;;  %v3418_v45 = vadd.f32 %v3417_v43, %v3416_v49  ;;  %v6245_v22 = vsub.s32 %v2195_v12, %v2197_v60 }
 0x3b9   : > { %4233 = vpow2.f32 %v3753_v11 }
 0x3ba   : > { %v3419_v23 = vmul.f32 0.5, %v3418_v45 }
 0x3bc   : > { %v3420_v19 = vmul.f32 1.442695, %v3419_v23  ;;  %v3422_v41 = vmul.f32 2.4494898, %v3419_v23 }
 0x3be   : > { %4235 = vpow2.f32 %v3420_v19  ;;  %v3423_v7 = vadd.f32 %v3422_v41, %v5058_v13 }
 0x3c0   : > { %v3424_v34 = vmul.f32 1.442695, %v3423_v7 }
 0x3c2   : > { %4237 = vpow2.f32 %v3424_v34 }
 0x3c3   : > { %v4228_v29 = vpop.eup %4227 }
 0x3c4   : > { %v4230_v31 = vpop.eup %4229  ;;  %v2168_v61 = vadd.f32 1.0, %v4228_v29 }
 0x3c5   : > { %v4232_v30 = vpop.eup %4231  ;;  %v2170_v46 = vadd.f32 1.0, %v4230_v31 }
 0x3c6   : > { %v4234_v40 = vpop.eup %4233  ;;  %4239 = vrcp.f32 %v2168_v61  ;;  %v2169_v42 = vadd.f32 1.0, %v4232_v30 }
 0x3c7   : > { %4241 = vrcp.f32 %v2170_v46  ;;  %v2171_v36 = vadd.f32 1.0, %v4234_v40 }
 0x3c8   : > { %4243 = vrcp.f32 %v2169_v42 }
 0x3c9   : > { %4245 = vrcp.f32 %v2171_v36 }
 0x3cb   : > { %v4236_v15 = vpop.eup %4235 }
 0x3cc   : > { %v3427_v39 = vmul.f32 1.8164966, %v4236_v15  ;;  %v3430_v9 = vmul.f32 0.18350342, %v4236_v15 }
 0x3ce   : > { %v3428_v59 = vadd.f32 0.18350342, %v3427_v39  ;;  %v3431_v33 = vadd.f32 1.8164966, %v3430_v9 }
 0x3cf   : > { %v4238_v24 = vpop.eup %4237 }
 0x3d0   : > { %v3426_v52 = vmul.f32 %v4238_v24, %v5100_v18  ;;  %v3432_v17 = vmul.f32 %v3431_v33, %v5107_v51 }
 0x3d2   : > { %v3429_v2 = vmul.f32 %v3428_v59, %v3426_v52 }
 0x3d3   : > { %v4240_v3 = vpop.eup %4239 }
 0x3d4   : > { %v4242_v57 = vpop.eup %4241  ;;  %v2199_v14 = vrot.slane %v4240_v3, %v6245_v22  ;;  %vm3433_vm15 = vcmp.gt.f32.partialorder %v3429_v2, %v3432_v17 }
 0x3d5   : > { %v4244_v47 = vpop.eup %4243  ;;  %v2265_v16 = vrot.slane %v4242_v57, %v6245_v22  ;;  %v6253_v5 = vsel %vm3433_vm15, %v3416_v49, %v3419_v23  ;;  %v6257_v20 = vsel %vm3433_vm15, %v3419_v23, %v3417_v43 }
 0x3d6   : > { %v4246_v1 = vpop.eup %4245  ;;  %v2200_v63 = vcombine.high %v2199_v14, %v2199_v14  ;;  %v2207_v6 = vrot.slane %v2199_v14, %v6245_v22  ;;  %3758 = vst.sshfl [vmem:[#allocation3] sm:$0x1 pattern:$0x73625140] %v2199_v14  ;;  %v2232_v0 = vrot.slane %v4244_v47, %v6245_v22  ;;  %v3436_v26 = vadd.f32 %v6257_v20, %v6253_v5 }
 0x3d7   : > { %v2266_v8 = vcombine.high %v2265_v16, %v2265_v16  ;;  %v2273_v58 = vrot.slane %v2265_v16, %v6245_v22  ;;  %3762 = vst.sshfl [vmem:[#allocation3 + $0x2] sm:$0x1 pattern:$0x73625140] %v2265_v16  ;;  %v2298_v44 = vrot.slane %v4246_v1, %v6245_v22 }
 0x3d8   : > { %v2214_v55 = vrot.slane %v2200_v63, %v6245_v22  ;;  %v2215_v32 = vcombine.high %v2207_v6, %v2207_v6  ;;  %3759 = vst.sshfl [vmem:[#allocation3 + $0x8] sm:$0x1 pattern:$0x73625140] %v2200_v63  ;;  %v2233_v28 = vcombine.high %v2232_v0, %v2232_v0  ;;  %v2240_v4 = vrot.slane %v2232_v0, %v6245_v22 }
 0x3d9   : > { %3760 = vst.sshfl [vmem:[#allocation3 + $0x1] sm:$0x1 pattern:$0x73625140] %v2232_v0  ;;  %v2280_v21 = vrot.slane %v2266_v8, %v6245_v22  ;;  %v2281_v53 = vcombine.high %v2273_v58, %v2273_v58  ;;  %v2299_v35 = vcombine.high %v2298_v44, %v2298_v44  ;;  %v2306_v48 = vrot.slane %v2298_v44, %v6245_v22 }
 0x3da   : > { %3763 = vst.sshfl [vmem:[#allocation3 + $0xa] sm:$0x1 pattern:$0x73625140] %v2266_v8  ;;  %v2216_v38 = vcombine.high %v2214_v55, %v2214_v55  ;;  %2223 = vst [vmem:[#allocation3 + $0x10] sm:$0x1] %v2215_v32  ;;  %v2247_v25 = vrot.slane %v2233_v28, %v6245_v22  ;;  %v2248_v10 = vcombine.high %v2240_v4, %v2240_v4 }
 0x3db   : > { %3764 = vst.sshfl [vmem:[#allocation3 + $0x3] sm:$0x1 pattern:$0x73625140] %v2298_v44  ;;  %v2282_v11 = vcombine.high %v2280_v21, %v2280_v21  ;;  %2289 = vst [vmem:[#allocation3 + $0x12] sm:$0x1] %v2281_v53  ;;  %v2313_v27 = vrot.slane %v2299_v35, %v6245_v22  ;;  %v2314_v54 = vcombine.high %v2306_v48, %v2306_v48 }
 0x3dc   : > { %3761 = vst.sshfl [vmem:[#allocation3 + $0x9] sm:$0x1 pattern:$0x73625140] %v2233_v28  ;;  %2224 = vst [vmem:[#allocation3 + $0x18] sm:$0x1] %v2216_v38  ;;  %v2249_v49 = vcombine.high %v2247_v25, %v2247_v25 }
 0x3dd   : > { %3765 = vst.sshfl [vmem:[#allocation3 + $0xb] sm:$0x1 pattern:$0x73625140] %v2299_v35  ;;  %2256 = vst [vmem:[#allocation3 + $0x11] sm:$0x1] %v2248_v10  ;;  %v2315_v45 = vcombine.high %v2313_v27, %v2313_v27 }
 0x3de   : > { %v3437_v43 = vmul.f32 0.5, %v3436_v26  ;;  %2290 = vst [vmem:[#allocation3 + $0x1a] sm:$0x1] %v2282_v11  ;;  %2322 = vst [vmem:[#allocation3 + $0x13] sm:$0x1] %v2314_v54  ;;  %v6289_v48 = vld [vmem:[%s4756_s19 + $0x18] sm:$0xff] }
 0x3df   : > { %2257 = vst [vmem:[#allocation3 + $0x19] sm:$0x1] %v2249_v49  ;;  %2323 = vst [vmem:[#allocation3 + $0x1b] sm:$0x1] %v2315_v45 }
 0x3e0   : > { %v3438_v23 = vmul.f32 1.442695, %v3437_v43  ;;  %v3440_v19 = vmul.f32 2.4494898, %v3437_v43 }
 0x3e2   : > { %4247 = vpow2.f32 %v3438_v23  ;;  %v3441_v41 = vadd.f32 %v3440_v19, %v5058_v13 }
 0x3e4   : > { %v3442_v7 = vmul.f32 1.442695, %v3441_v41 }
 0x3e6   : > { %4249 = vpow2.f32 %v3442_v7 }
 0x3ef   : > { %v4248_v34 = vpop.eup %4247 }
 0x3f0   : > { %v3445_v29 = vmul.f32 1.8164966, %v4248_v34  ;;  %v3448_v31 = vmul.f32 0.18350342, %v4248_v34 }
 0x3f1   : > { %v2096_v40 = vpop.f32.mrf.mxu0 }
 0x3f2   : > { %v3446_v61 = vadd.f32 0.18350342, %v3445_v29  ;;  %v3449_v30 = vadd.f32 1.8164966, %v3448_v31  ;;  %v2097_v36 = vadd.f32 %v2096_v40, %v6236_v62  ;;  %v2137_v50 = vpop.f32.mrf.mxu1 }
 0x3f3   : > { %v4250_v46 = vpop.eup %4249  ;;  %v2138_v56 = vadd.f32 %v2137_v50, %v6236_v62  ;;  %v2098_v15 = vpop.f32.mrf.mxu0 }
 0x3f4   : > { %v3444_v42 = vmul.f32 %v4250_v46, %v5100_v18  ;;  %v3450_v37 = vmul.f32 %v3449_v30, %v5107_v51  ;;  %v3754_v60 = vmul.f32 -1.442695, %v2097_v36  ;;  %v2099_v39 = vadd.f32 %v2098_v15, %v6236_v62  ;;  %v2139_v9 = vpop.f32.mrf.mxu1 }
 0x3f5   : > { %v3756_v59 = vmul.f32 -1.442695, %v2138_v56  ;;  %v2140_v33 = vadd.f32 %v2139_v9, %v6236_v62  ;;  %v2100_v24 = vpop.f32.mrf.mxu0 }
 0x3f6   : > { %v3447_v12 = vmul.f32 %v3446_v61, %v3444_v42  ;;  %4251 = vpow2.f32 %v3754_v60  ;;  %v3755_v52 = vmul.f32 -1.442695, %v2099_v39  ;;  %v2141_v17 = vpop.f32.mrf.mxu1  ;;  %v4458_v60 = vld [vmem:[%s4756_s19 + $0x8] sm:$0xff]  ;;  %v6305_v39 = vld [vmem:[%s4756_s19 + $0x20] sm:$0xff] }
 0x3f7   : > { %4253 = vpow2.f32 %v3756_v59  ;;  %v3757_v3 = vmul.f32 -1.442695, %v2140_v33  ;;  %v2101_v2 = vpop.f32.mrf.mxu0  ;;  %v2480_v9 = vsub.f32 %v4458_v60, %v6305_v39 }
 0x3f8   : > { %vm3451_vm0 = vcmp.gt.f32.partialorder %v3447_v12, %v3450_v37  ;;  %4255 = vpow2.f32 %v3755_v52  ;;  %v2142_v57 = vpop.f32.mrf.mxu1  ;;  %v2482_v52 = vmul.f32 2.5, %v6305_v39 }
 0x3f9   : > { %4257 = vpow2.f32 %v3757_v3  ;;  %v6275_v14 = vsel %vm3451_vm0, %v6253_v5, %v3437_v43  ;;  %v6278_v47 = vsel %vm3451_vm0, %v3437_v43, %v6257_v20 }
 0x3fa   : > { %v3454_v62 = vadd.f32 %v6278_v47, %v6275_v14 }
 0x3fc   : > { %v6282_v16 = vmul.f32 0.5, %v3454_v62 }
 0x3fe   : > { %v3458_v0 = vmul.f32 2.4494898, %v6282_v16  ;;  %v3456_v20 = vmul.f32 1.442695, %v6282_v16 }
 0x400   : > { %v3459_v32 = vadd.f32 %v3458_v0, %v5058_v13 }
 0x402   : > { %v3460_v28 = vmul.f32 1.442695, %v3459_v32 }
 0x403   : > { %v4252_v1 = vpop.eup %4251 }
 0x404   : > { %v4254_v63 = vpop.eup %4253  ;;  %v2172_v6 = vadd.f32 1.0, %v4252_v1 }
 0x405   : > { %v4256_v8 = vpop.eup %4255  ;;  %v2174_v58 = vadd.f32 1.0, %v4254_v63 }
 0x406   : > { %v4258_v44 = vpop.eup %4257  ;;  %4259 = vrcp.f32 %v2172_v6  ;;  %v2173_v5 = vadd.f32 1.0, %v4256_v8 }
 0x407   : > { %4261 = vrcp.f32 %v2174_v58  ;;  %v2175_v55 = vadd.f32 1.0, %v4258_v44 }
 0x408   : > { %4263 = vrcp.f32 %v2173_v5 }
 0x409   : > { %4265 = vrcp.f32 %v2175_v55 }
 0x40a   : > { %4267 = vpow2.f32 %v3456_v20 }
 0x40b   : > { %4269 = vpow2.f32 %v3460_v28 }
 0x40c   : > { %4271 = vrcp.f32 %v6289_v48 }
 0x413   : > { %v4260_v4 = vpop.eup %4259 }
 0x414   : > { %v4262_v21 = vpop.eup %4261  ;;  %v2331_v53 = vrot.slane %v4260_v4, %v6245_v22 }
 0x415   : > { %v4264_v35 = vpop.eup %4263  ;;  %v2397_v38 = vrot.slane %v4262_v21, %v6245_v22 }
 0x416   : > { %v4266_v25 = vpop.eup %4265  ;;  %v2332_v10 = vcombine.high %v2331_v53, %v2331_v53  ;;  %v2339_v26 = vrot.slane %v2331_v53, %v6245_v22  ;;  %3766 = vst.sshfl [vmem:[#allocation3 + $0x4] sm:$0x1 pattern:$0x73625140] %v2331_v53  ;;  %v2364_v11 = vrot.slane %v4264_v35, %v6245_v22 }
 0x417   : > { %v2398_v27 = vcombine.high %v2397_v38, %v2397_v38  ;;  %v2405_v54 = vrot.slane %v2397_v38, %v6245_v22  ;;  %3770 = vst.sshfl [vmem:[#allocation3 + $0x6] sm:$0x1 pattern:$0x73625140] %v2397_v38  ;;  %v2430_v49 = vrot.slane %v4266_v25, %v6245_v22  ;;  %v4268_v41 = vpop.eup %4267 }
 0x418   : > { %v2346_v43 = vrot.slane %v2332_v10, %v6245_v22  ;;  %v2347_v45 = vcombine.high %v2339_v26, %v2339_v26  ;;  %3767 = vst.sshfl [vmem:[#allocation3 + $0xc] sm:$0x1 pattern:$0x73625140] %v2332_v10  ;;  %v2365_v23 = vcombine.high %v2364_v11, %v2364_v11  ;;  %v2372_v19 = vrot.slane %v2364_v11, %v6245_v22  ;;  %v4270_v15 = vpop.eup %4269 }
 0x419   : > { %3768 = vst.sshfl [vmem:[#allocation3 + $0x5] sm:$0x1 pattern:$0x73625140] %v2364_v11  ;;  %v2412_v7 = vrot.slane %v2398_v27, %v6245_v22  ;;  %v2413_v34 = vcombine.high %v2405_v54, %v2405_v54  ;;  %v2431_v29 = vcombine.high %v2430_v49, %v2430_v49  ;;  %v2438_v31 = vrot.slane %v2430_v49, %v6245_v22  ;;  %v6310_v3 = vpop.eup %4271 }
 0x41a   : > { %3771 = vst.sshfl [vmem:[#allocation3 + $0xe] sm:$0x1 pattern:$0x73625140] %v2398_v27  ;;  %v2348_v61 = vcombine.high %v2346_v43, %v2346_v43  ;;  %2355 = vst [vmem:[#allocation3 + $0x14] sm:$0x1] %v2347_v45  ;;  %v2379_v30 = vrot.slane %v2365_v23, %v6245_v22  ;;  %v2380_v46 = vcombine.high %v2372_v19, %v2372_v19 }
 0x41b   : > { %3772 = vst.sshfl [vmem:[#allocation3 + $0x7] sm:$0x1 pattern:$0x73625140] %v2430_v49  ;;  %v2414_v40 = vcombine.high %v2412_v7, %v2412_v7  ;;  %2421 = vst [vmem:[#allocation3 + $0x16] sm:$0x1] %v2413_v34  ;;  %v2445_v42 = vrot.slane %v2431_v29, %v6245_v22  ;;  %v2446_v36 = vcombine.high %v2438_v31, %v2438_v31 }
 0x41c   : > { %3769 = vst.sshfl [vmem:[#allocation3 + $0xd] sm:$0x1 pattern:$0x73625140] %v2365_v23  ;;  %2356 = vst [vmem:[#allocation3 + $0x1c] sm:$0x1] %v2348_v61  ;;  %v2381_v50 = vcombine.high %v2379_v30, %v2379_v30  ;;  %v3462_v22 = vmul.f32 %v4270_v15, %v5100_v18  ;;  %v2483_v0 = vmul.f32 %v6310_v3, %v2482_v52 }
 0x41d   : > { %3773 = vst.sshfl [vmem:[#allocation3 + $0xf] sm:$0x1 pattern:$0x73625140] %v2431_v29  ;;  %2388 = vst [vmem:[#allocation3 + $0x15] sm:$0x1] %v2380_v46  ;;  %v2447_v12 = vcombine.high %v2445_v42, %v2445_v42 }
 0x41e   : > { %v3463_v37 = vmul.f32 1.8164966, %v4268_v41  ;;  %v3466_v56 = vmul.f32 0.18350342, %v4268_v41  ;;  %2422 = vst [vmem:[#allocation3 + $0x1e] sm:$0x1] %v2414_v40 }
 0x41f   : > { %2454 = vst [vmem:[#allocation3 + $0x17] sm:$0x1] %v2446_v36  ;;  %2389 = vst [vmem:[#allocation3 + $0x1d] sm:$0x1] %v2381_v50  ;;  %v6332_v32 = vadd.f32 1.0, %v2483_v0  ;;  %v7406_v41 = vld [vmem:[#allocation15_spill] sm:$0xff] }
 0x420   : > { %2455 = vst [vmem:[#allocation3 + $0x1f] sm:$0x1] %v2447_v12  ;;  %v3464_v33 = vadd.f32 0.18350342, %v3463_v37  ;;  %v3467_v24 = vadd.f32 1.8164966, %v3466_v56 }
 0x421   : > { %v7407_v12 = vld [vmem:[#allocation14_spill] sm:$0xff] }
 0x422   : > { %v2500_v59 = vld [vmem:[#allocation3] sm:$0xff]  ;;  %v3465_v63 = vmul.f32 %v3464_v33, %v3462_v22  ;;  %v3468_v6 = vmul.f32 %v3467_v24, %v5107_v51 }
 0x423   : > { %v2501_v17 = vmul.f32 %v2500_v59, %v2480_v9 }
 0x424   : > { %v2626_v2 = vld [vmem:[#allocation3 + $0x8] sm:$0xff]  ;;  %vm3469_vm1 = vcmp.gt.f32.partialorder %v3465_v63, %v3468_v6 }
 0x425   : > { %v6313_v57 = vadd.f32 %v6305_v39, %v2501_v17  ;;  %v2627_v62 = vmul.f32 %v2626_v2, %v2480_v9  ;;  %v6341_v21 = vsel %vm3469_vm1, %v6275_v14, %v6282_v16  ;;  %v6345_v53 = vsel %vm3469_vm1, %v6282_v16, %v6278_v47 }
 0x426   : > { %v2758_v1 = vld [vmem:[#allocation3 + $0x10] sm:$0xff]  ;;  %v3472_v14 = vadd.f32 %v6345_v53, %v6341_v21  ;;  %v6367_v16 = vmul.f32 %v6332_v32, %v6332_v32 }
 0x427   : > { %7402 = vst [vmem:[#allocation36_spill] sm:$0xff] %v6313_v57  ;;  %4273 = vlog2.f32 %v6313_v57  ;;  %v6319_v8 = vmul.f32 2.5, %v6313_v57  ;;  %v6322_v58 = vadd.f32 %v6305_v39, %v2627_v62  ;;  %v2759_v44 = vmul.f32 %v2758_v1, %v2480_v9  ;;  %v2890_v5 = vld [vmem:[#allocation3 + $0x18] sm:$0xff] }
 0x428   : > { %v6336_v28 = vsub.f32 %v6313_v57, %v6305_v39  ;;  %v2891_v4 = vmul.f32 %v2890_v5, %v2480_v9  ;;  %v6373_v54 = vmul.f32 0.5, %v3472_v14 }
 0x429   : > { %7403 = vst [vmem:[#allocation26_spill] sm:$0xff] %v6322_v58  ;;  %4275 = vrcp.f32 %v6319_v8  ;;  %v6327_v55 = vmul.f32 2.5, %v6322_v58  ;;  %v6330_v20 = vadd.f32 %v6305_v39, %v2759_v44  ;;  %v6349_v35 = vsub.f32 %v6322_v58, %v6305_v39 }
 0x42a   : > { %4277 = vlog2.f32 %v6322_v58  ;;  %v2547_v25 = vmul.f32 %v6336_v28, %v6332_v32  ;;  %v6357_v10 = vadd.f32 %v6305_v39, %v2891_v4  ;;  %v3474_v61 = vmul.f32 1.442695, %v6373_v54 }
 0x42b   : > { %7404 = vst [vmem:[#allocation30_spill] sm:$0xff] %v6330_v20  ;;  %4279 = vrcp.f32 %v6327_v55  ;;  %v6352_v38 = vmul.f32 2.5, %v6330_v20  ;;  %v2672_v47 = vmul.f32 %v6349_v35, %v6332_v32  ;;  %v6377_v43 = vsub.f32 %v6330_v20, %v6305_v39 }
 0x42c   : > { %7405 = vst [vmem:[#allocation18_spill] sm:$0xff] %v6357_v10  ;;  %4281 = vlog2.f32 %v6330_v20  ;;  %v2548_v26 = vmul.f32 %v6310_v3, %v2547_v25  ;;  %v6371_v27 = vmul.f32 2.5, %v6357_v10  ;;  %v3476_v30 = vmul.f32 2.4494898, %v6373_v54 }
 0x42d   : > { %4283 = vrcp.f32 %v6352_v38  ;;  %v2673_v23 = vmul.f32 %v6310_v3, %v2672_v47  ;;  %v2804_v36 = vmul.f32 %v6377_v43, %v6332_v32  ;;  %v6405_v15 = vsub.f32 %v6357_v10, %v6305_v39 }
 0x42e   : > { %v2549_v29 = vadd.f32 %v2548_v26, %v6367_v16  ;;  %4285 = vrcp.f32 %v6371_v27 }
 0x42f   : > { %4287 = vlog2.f32 %v6357_v10  ;;  %v2674_v56 = vadd.f32 %v2673_v23, %v6367_v16  ;;  %v2805_v0 = vmul.f32 %v6310_v3, %v2804_v36  ;;  %v2936_v14 = vmul.f32 %v6405_v15, %v6332_v32 }
 0x430   : > { %v2550_v9 = vsub.f32 0.0, %v2549_v29  ;;  %4289 = vpow2.f32 %v3474_v61 }
 0x431   : > { %v2675_v63 = vsub.f32 0.0, %v2674_v56 }
 0x434   : > { %v4274_v11 = vpop.eup %4273 }
 0x435   : > { %v2504_v49 = vmul.f32 0.6931472, %v4274_v11 }
 0x436   : > { %v6379_v45 = vpop.eup %4275 }
 0x437   : > { %v4278_v19 = vpop.eup %4277  ;;  %v2505_v7 = vsub.f32 %v2504_v49, %v7406_v41  ;;  %v6385_v34 = vmul.f32 %v6379_v45, %v6336_v28 }
 0x438   : > { %v2630_v31 = vmul.f32 0.6931472, %v4278_v19  ;;  %v6391_v46 = vpop.eup %4279 }
 0x439   : > { %v2506_v40 = vmul.f32 0.6, %v2505_v7  ;;  %v2545_v42 = vsub.f32 1.0, %v6385_v34  ;;  %v6400_v37 = vmul.f32 %v6391_v46, %v6349_v35  ;;  %v2551_v2 = vmul.f32 %v6385_v34, %v6385_v34  ;;  %v4282_v39 = vpop.eup %4281 }
 0x43a   : > { %v2631_v50 = vsub.f32 %v2630_v31, %v7406_v41  ;;  %v6418_v44 = vpop.eup %4283  ;;  %v2762_v7 = vmul.f32 0.6931472, %v4282_v39 }
 0x43b   : > { %v6408_v60 = vadd.f32 %v2506_v40, %v7407_v12  ;;  %v2552_v59 = vmul.f32 4.0, %v2545_v42  ;;  %v2557_v22 = vmax.f32 %v2545_v42, 1e-12  ;;  %v2558_v33 = vmin.f32 %v2545_v42, -1e-12 }
 0x43c   : > { %v2632_v24 = vmul.f32 0.6, %v2631_v50  ;;  %v2671_v52 = vsub.f32 1.0, %v6400_v37  ;;  %vm2556_vm2 = vcmp.ge.f32.partialorder %v2545_v42, 0.0  ;;  %v2676_v25 = vmul.f32 %v6400_v37, %v6400_v37 }
 0x43d   : > { %v2510_v17 = vsub.f32 %v2504_v49, %v6408_v60  ;;  %v2553_v62 = vmul.f32 %v2552_v59, %v2550_v9  ;;  %v2559_v47 = vsel %vm2556_vm2, %v2557_v22, %v2558_v33  ;;  %v6429_v40 = vmul.f32 %v6418_v44, %v6377_v43  ;;  %v6438_v59 = vpop.eup %4285 }
 0x43e   : > { %v6415_v1 = vadd.f32 %v2632_v24, %v7407_v12  ;;  %v2677_v6 = vmul.f32 4.0, %v2671_v52  ;;  %v2682_v49 = vmax.f32 %v2671_v52, 1e-12  ;;  %v2683_v19 = vmin.f32 %v2671_v52, -1e-12  ;;  %v4288_v24 = vpop.eup %4287 }
 0x43f   : > { %v2511_v5 = vmul.f32 1.442695, %v2510_v17  ;;  %v2554_v4 = vsub.f32 %v2551_v2, %v2553_v62  ;;  %vm2681_vm3 = vcmp.ge.f32.partialorder %v2671_v52, 0.0  ;;  %v2806_v42 = vadd.f32 %v2805_v0, %v6367_v16 }
 0x440   : > { %v2636_v26 = vsub.f32 %v2630_v31, %v6415_v1  ;;  %v2678_v11 = vmul.f32 %v2677_v6, %v2675_v63  ;;  %v3477_v31 = vadd.f32 %v3476_v30, %v5058_v13  ;;  %v2569_v36 = vmul.f32 2.0, %v2559_v47  ;;  %v6447_v63 = vpop.eup %4289 }
 0x441   : > { %4291 = vpow2.f32 %v2511_v5  ;;  %v6425_v23 = vmax.f32 %v2554_v4, 0.0  ;;  %v2763_v56 = vsub.f32 %v2762_v7, %v7406_v41  ;;  %v2937_v9 = vmul.f32 %v6310_v3, %v2936_v14 }
 0x442   : > { %v2637_v29 = vmul.f32 1.442695, %v2636_v26  ;;  %v2679_v61 = vsub.f32 %v2676_v25, %v2678_v11  ;;  %v2684_v22 = vsel %vm2681_vm3, %v2682_v49, %v2683_v19  ;;  %v2803_v33 = vsub.f32 1.0, %v6429_v40 }
 0x443   : > { %4293 = vrsqrt.f32 %v6425_v23  ;;  %v2764_v52 = vmul.f32 0.6, %v2763_v56  ;;  %v2807_v17 = vsub.f32 0.0, %v2806_v42  ;;  %v3478_v13 = vmul.f32 1.442695, %v3477_v31 }
 0x444   : > { %v6434_v50 = vmax.f32 %v2679_v61, 0.0  ;;  %4295 = vpow2.f32 %v2637_v29  ;;  %v2809_v2 = vmul.f32 4.0, %v2803_v33  ;;  %v2694_v30 = vmul.f32 2.0, %v2684_v22 }
 0x445   : > { %v6444_v62 = vmul.f32 %v6438_v59, %v6405_v15  ;;  %v2938_v39 = vadd.f32 %v2937_v9, %v6367_v16  ;;  %v6450_v6 = vadd.f32 %v2764_v52, %v7407_v12  ;;  %v2808_v0 = vmul.f32 %v6429_v40, %v6429_v40 }
 0x446   : > { %4297 = vrsqrt.f32 %v6434_v50  ;;  %v2810_v5 = vmul.f32 %v2809_v2, %v2807_v17  ;;  %v2894_v4 = vmul.f32 0.6931472, %v4288_v24  ;;  %v2814_v25 = vmax.f32 %v2803_v33, 1e-12 }
 0x447   : > { %4299 = vrcp.f32 %v2569_v36  ;;  %v2815_v14 = vmin.f32 %v2803_v33, -1e-12  ;;  %v2935_v47 = vsub.f32 1.0, %v6444_v62  ;;  %v2768_v26 = vsub.f32 %v2762_v7, %v6450_v6 }
 0x448   : > { %v2811_v11 = vsub.f32 %v2808_v0, %v2810_v5  ;;  %vm2813_vm4 = vcmp.ge.f32.partialorder %v2803_v33, 0.0  ;;  %4301 = vpow2.f32 %v3478_v13  ;;  %v2895_v16 = vsub.f32 %v2894_v4, %v7406_v41 }
 0x449   : > { %4303 = vrcp.f32 %v2694_v30  ;;  %v2939_v49 = vsub.f32 0.0, %v2938_v39  ;;  %v2941_v19 = vmul.f32 4.0, %v2935_v47  ;;  %v2560_v29 = vsub.f32 0.0, %v6385_v34 }
 0x44a   : > { %v2769_v61 = vmul.f32 1.442695, %v2768_v26  ;;  %v6458_v42 = vmax.f32 %v2811_v11, 0.0  ;;  %v2685_v36 = vsub.f32 0.0, %v6400_v37  ;;  %v2816_v56 = vsel %vm2813_vm4, %v2814_v25, %v2815_v14 }
 0x44b   : > { %v2896_v9 = vmul.f32 0.6, %v2895_v16  ;;  %v2942_v7 = vmul.f32 %v2941_v19, %v2939_v49  ;;  %vm2563_vm5 = vcmp.eq.f32.partialorder %v6425_v23, inf  ;;  %v2940_v33 = vmul.f32 %v6444_v62, %v6444_v62 }
 0x44c   : > { %4305 = vpow2.f32 %v2769_v61  ;;  %vm2565_vm6 = vcmp.eq.f32.partialorder %v6425_v23, 0.0  ;;  %v2566_v34 = vand.u32 2147483648, %v6425_v23  ;;  %v2826_v2 = vmul.f32 2.0, %v2816_v56 }
 0x44d   : > { %4307 = vrsqrt.f32 %v6458_v42  ;;  %v6471_v37 = vadd.f32 %v2896_v9, %v7407_v12  ;;  %v2943_v13 = vsub.f32 %v2940_v33, %v2942_v7  ;;  %vm2688_vm7 = vcmp.eq.f32.partialorder %v6434_v50, inf }
 0x44e   : > { %v6460_v31 = vpop.eup %4291  ;;  %v2946_v0 = vmax.f32 %v2935_v47, 1e-12  ;;  %v2947_v5 = vmin.f32 %v2935_v47, -1e-12  ;;  %vm2945_vm8 = vcmp.ge.f32.partialorder %v2935_v47, 0.0  ;;  %v2691_v49 = vand.u32 2147483648, %v6434_v50 }
 0x44f   : > { %v2513_v22 = vmul.f32 2.5, %v6460_v31  ;;  %v2900_v39 = vsub.f32 %v2894_v4, %v6471_v37  ;;  %v6491_v9 = vmax.f32 %v2943_v13, 0.0  ;;  %vm2690_vm9 = vcmp.eq.f32.partialorder %v6434_v50, 0.0 }
 0x450   : > { %v4294_v24 = vpop.eup %4293  ;;  %vm2820_vm10 = vcmp.eq.f32.partialorder %v6458_v42, inf  ;;  %vm2822_vm11 = vcmp.eq.f32.partialorder %v6458_v42, 0.0 }
 0x451   : > { %v6473_v52 = vadd.f32 1.0, %v2513_v22  ;;  %v2562_v17 = vmul.f32 %v4294_v24, %v6425_v23  ;;  %v6476_v30 = vpop.eup %4295  ;;  %v2901_v4 = vmul.f32 1.442695, %v2900_v39  ;;  %v3481_v24 = vmul.f32 1.8164966, %v6447_v63 }
 0x452   : > { %v2639_v26 = vmul.f32 2.5, %v6476_v30  ;;  %v6508_v39 = vmul.f32 %v6310_v3, %v6332_v32  ;;  %vm2952_vm12 = vcmp.eq.f32.partialorder %v6491_v9, inf  ;;  %vm2954_vm14 = vcmp.eq.f32.partialorder %v6491_v9, 0.0 }
 0x453   : > { %v4298_v25 = vpop.eup %4297  ;;  %4309 = vrcp.f32 %v6473_v52  ;;  %v2564_v14 = vsel %vm2563_vm5, %v6425_v23, %v2562_v17  ;;  %v2948_v23 = vsel %vm2945_vm8, %v2946_v0, %v2947_v5  ;;  %v6514_v5 = vld [vmem:[%s4756_s19 + $0x28] sm:$0xff] }
 0x454   : > { %v2567_v11 = vsel %vm2565_vm6, %v2566_v34, %v2564_v14  ;;  %v2687_v16 = vmul.f32 %v4298_v25, %v6434_v50  ;;  %v4300_v19 = vpop.eup %4299  ;;  %v6489_v56 = vadd.f32 1.0, %v2639_v26  ;;  %4311 = vrcp.f32 %v2826_v2 }
 0x455   : > { %v2568_v61 = vadd.f32 %v2567_v11, %v2560_v29  ;;  %4313 = vpow2.f32 %v2901_v4  ;;  %v4302_v29 = vpop.eup %4301  ;;  %v2958_v2 = vmul.f32 2.0, %v2948_v23  ;;  %v2485_v25 = vmul.f32 %v6514_v5, %v6514_v5 }
 0x456   : > { %v2689_v7 = vsel %vm2688_vm7, %v6434_v50, %v2687_v16  ;;  %4315 = vrcp.f32 %v6489_v56  ;;  %v4304_v34 = vpop.eup %4303  ;;  %v3484_v50 = vmul.f32 0.18350342, %v6447_v63  ;;  %v3480_v63 = vmul.f32 %v4302_v29, %v5100_v18 }
 0x457   : > { %v6497_v47 = vmul.f32 %v4300_v19, %v2568_v61  ;;  %v2692_v22 = vsel %vm2690_vm9, %v2691_v49, %v2689_v7  ;;  %4317 = vrsqrt.f32 %v6491_v9  ;;  %v3482_v26 = vadd.f32 0.18350342, %v3481_v24 }
 0x458   : > { %v2693_v33 = vadd.f32 %v2692_v22, %v2685_v36  ;;  %v3485_v4 = vadd.f32 1.8164966, %v3484_v50  ;;  %v2515_v19 = vmul.f32 1.6666666, %v6460_v31  ;;  %v2823_v29 = vand.u32 2147483648, %v6458_v42 }
 0x459   : > { %v3774_v17 = vadd.f32 -1.0, %v6497_v47  ;;  %v6511_v36 = vpop.eup %4305  ;;  %v2817_v24 = vsub.f32 0.0, %v6429_v40 }
 0x45a   : > { %v6504_v13 = vmul.f32 %v4304_v34, %v2693_v33  ;;  %v4308_v11 = vpop.eup %4307  ;;  %v2771_v49 = vmul.f32 2.5, %v6511_v36 }
 0x45b   : > { %4319 = vrcp.f32 %v3774_v17  ;;  %v2576_v0 = vmul.f32 %v3774_v17, %v6497_v47  ;;  %v2819_v7 = vmul.f32 %v4308_v11, %v6458_v42 }
 0x45c   : > { %v3775_v14 = vadd.f32 -1.0, %v6504_v13  ;;  %4321 = vrcp.f32 %v2958_v2  ;;  %v6526_v22 = vadd.f32 1.0, %v2771_v49 }
 0x45d   : > { %v2577_v16 = vmul.f32 %v6379_v45, %v2576_v0  ;;  %v2821_v31 = vsel %vm2820_vm10, %v6458_v42, %v2819_v7  ;;  %v6544_v7 = vsub.f32 1.0, %v2485_v25 }
 0x45e   : > { %4323 = vrcp.f32 %v3775_v14  ;;  %v2700_v61 = vmul.f32 %v3775_v14, %v6504_v13  ;;  %v2824_v2 = vsel %vm2822_vm11, %v2823_v29, %v2821_v31 }
 0x45f   : > { %v2578_v23 = vsub.f32 %v6508_v39, %v2577_v16  ;;  %4325 = vrcp.f32 %v6526_v22  ;;  %v2825_v14 = vadd.f32 %v2824_v2, %v2817_v24  ;;  %v3483_v16 = vmul.f32 %v3482_v26, %v3480_v63 }
 0x460   : > { %v4310_v45 = vpop.eup %4309  ;;  %v2701_v33 = vmul.f32 %v6391_v46, %v2700_v61  ;;  %v3486_v46 = vmul.f32 %v3485_v4, %v5107_v51 }
 0x461   : > { %v6534_v34 = vmul.f32 %v4310_v45, %v2515_v19  ;;  %v2579_v17 = vmax.f32 %v2578_v23, 1e-12  ;;  %v4312_v50 = vpop.eup %4311  ;;  %v2641_v23 = vmul.f32 1.6666666, %v6476_v30  ;;  %v2955_v45 = vand.u32 2147483648, %v6491_v9 }
 0x462   : > { %v2702_v0 = vsub.f32 %v6508_v39, %v2701_v33  ;;  %v6538_v11 = vpop.eup %4313  ;;  %v6541_v61 = vmul.f32 %v4312_v50, %v2825_v14  ;;  %vm3487_vm13 = vcmp.gt.f32.partialorder %v3483_v16, %v3486_v46  ;;  %v2949_v30 = vsub.f32 0.0, %v6444_v62 }
 0x463   : > { %v4316_v40 = vpop.eup %4315  ;;  %4327 = vrcp.f32 %v2579_v17  ;;  %v2903_v42 = vmul.f32 2.5, %v6538_v11  ;;  %v3488_v62 = vsel %vm3487_vm13, %v6341_v21, %v6373_v54  ;;  %v2704_v46 = vmax.f32 %v6349_v35, 1e-12 }
 0x464   : > { %v2703_v49 = vmax.f32 %v2702_v0, 1e-12  ;;  %7408 = vst [vmem:[#allocation23_spill] sm:$0xff] %v6541_v61  ;;  %v4318_v19 = vpop.eup %4317  ;;  %4329 = vrsqrt.f32 %v6534_v34  ;;  %v6549_v29 = vadd.f32 -1.0, %v6541_v61  ;;  %v6554_v4 = vmul.f32 %v4316_v40, %v2641_v23 }
 0x465   : > { %v6551_v63 = vadd.f32 1.0, %v2903_v42  ;;  %v2951_v26 = vmul.f32 %v4318_v19, %v6491_v9  ;;  %vm2520_vm15 = vcmp.eq.f32.partialorder %v6534_v34, inf  ;;  %vm2522_vm0 = vcmp.eq.f32.partialorder %v6534_v34, 0.0 }
 0x466   : > { %4331 = vrcp.f32 %v2703_v49  ;;  %v2832_v33 = vmul.f32 %v6549_v29, %v6541_v61  ;;  %v2773_v49 = vmul.f32 1.6666666, %v6511_v36  ;;  %vm2646_vm1 = vcmp.eq.f32.partialorder %v6554_v4, inf }
 0x467   : > { %7409 = vst [vmem:[#allocation19_spill] sm:$0xff] %v6551_v63  ;;  %v2953_v24 = vsel %vm2952_vm12, %v6491_v9, %v2951_v26  ;;  %4333 = vrsqrt.f32 %v6544_v7  ;;  %vm2648_vm2 = vcmp.eq.f32.partialorder %v6554_v4, 0.0 }
 0x468   : > { %v4320_v25 = vpop.eup %4319  ;;  %v2956_v17 = vsel %vm2954_vm14, %v2955_v45, %v2953_v24  ;;  %v2833_v50 = vmul.f32 %v6418_v44, %v2832_v33  ;;  %4335 = vrcp.f32 %v6551_v63  ;;  %v3489_v44 = vsel %vm3487_vm13, %v6373_v54, %v6345_v53 }
 0x469   : > { %v6565_v31 = vmul.f32 %v4320_v25, %v6319_v8  ;;  %v4322_v2 = vpop.eup %4321  ;;  %v2957_v0 = vadd.f32 %v2956_v17, %v2949_v30  ;;  %4337 = vrsqrt.f32 %v6554_v4  ;;  %v3490_v21 = vadd.f32 %v3489_v44, %v3488_v62 }
 0x46a   : > { %v2834_v8 = vsub.f32 %v6508_v39, %v2833_v50  ;;  %v2905_v62 = vmul.f32 1.6666666, %v6538_v11  ;;  %v2836_v11 = vmax.f32 %v6377_v43, 1e-12 }
 0x46b   : > { %v4324_v14 = vpop.eup %4323  ;;  %v6577_v40 = vmul.f32 %v4322_v2, %v2957_v0  ;;  %v3491_v36 = vmul.f32 0.5, %v3490_v21 }
 0x46c   : > { %v6574_v9 = vmul.f32 %v4324_v14, %v6327_v55  ;;  %v4326_v42 = vpop.eup %4325  ;;  %v2835_v19 = vmax.f32 %v2834_v8, 1e-12  ;;  %v2580_v55 = vmax.f32 %v6336_v28, 1e-12 }
 0x46d   : > { %7410 = vst [vmem:[#allocation32_spill] sm:$0xff] %v6577_v40  ;;  %v6584_v23 = vadd.f32 -1.0, %v6577_v40  ;;  %v6586_v26 = vmul.f32 %v4326_v42, %v2773_v49  ;;  %v3492_v0 = vmul.f32 1.442695, %v3491_v36  ;;  %v2523_v49 = vand.u32 2147483648, %v6534_v34 }
 0x46e   : > { %4339 = vrcp.f32 %v2835_v19 }
 0x46f   : > { %v2964_v45 = vmul.f32 %v6584_v23, %v6577_v40  ;;  %4341 = vrsqrt.f32 %v6586_v26  ;;  %vm2778_vm5 = vcmp.eq.f32.partialorder %v6586_v26, inf  ;;  %vm2780_vm7 = vcmp.eq.f32.partialorder %v6586_v26, 0.0 }
 0x470   : > { %v4328_v25 = vpop.eup %4327 }
 0x471   : > { %v4330_v33 = vpop.eup %4329  ;;  %v2582_v16 = vmul.f32 %v4328_v25, %v2580_v55  ;;  %v2965_v54 = vmul.f32 %v6438_v59, %v2964_v45 }
 0x472   : > { %v2519_v24 = vmul.f32 %v4330_v33, %v6534_v34 }
 0x473   : > { %v4332_v53 = vpop.eup %4331  ;;  %4343 = vrsqrt.f32 %v2582_v16  ;;  %v2966_v50 = vsub.f32 %v6508_v39, %v2965_v54  ;;  %vm2585_vm3 = vcmp.eq.f32.partialorder %v2582_v16, inf  ;;  %vm2587_vm4 = vcmp.eq.f32.partialorder %v2582_v16, 0.0 }
 0x474   : > { %v6594_v30 = vpop.eup %4333  ;;  %v6597_v17 = vmul.f32 %v4332_v53, %v2704_v46  ;;  %v2521_v8 = vsel %vm2520_vm15, %v6534_v34, %v2519_v24  ;;  %v2649_v34 = vand.u32 2147483648, %v6554_v4  ;;  %v2588_v24 = vand.u32 2147483648, %v2582_v16 }
 0x475   : > { %v4336_v2 = vpop.eup %4335  ;;  %v2488_v59 = vmul.f32 %v6289_v48, %v6594_v30  ;;  %v2967_v39 = vmax.f32 %v2966_v50, 1e-12  ;;  %v6612_v21 = vsel %vm2522_vm0, %v2523_v49, %v2521_v8 }
 0x476   : > { %v4338_v14 = vpop.eup %4337  ;;  %4345 = vrsqrt.f32 %v6597_v17  ;;  %v6606_v44 = vmul.f32 %v4336_v2, %v2905_v62  ;;  %v2525_v33 = vsub.f32 0.8164966, %v6612_v21  ;;  %v2529_v50 = vadd.f32 0.8164966, %v6612_v21 }
 0x477   : > { %v2645_v42 = vmul.f32 %v4338_v14, %v6554_v4  ;;  %4347 = vpow2.f32 %v3492_v0  ;;  %v6618_v45 = vmul.f32 %v2488_v59, %v2488_v59  ;;  %vm2709_vm6 = vcmp.eq.f32.partialorder %v6597_v17, inf }
 0x478   : > { %4349 = vrcp.f32 %v2967_v39  ;;  %vm2711_vm8 = vcmp.eq.f32.partialorder %v6597_v17, 0.0  ;;  %vm2910_vm11 = vcmp.eq.f32.partialorder %v6606_v44, inf  ;;  %vm2912_vm12 = vcmp.eq.f32.partialorder %v6606_v44, 0.0 }
 0x479   : > { %4351 = vrsqrt.f32 %v6606_v44  ;;  %v2647_v25 = vsel %vm2646_vm1, %v6554_v4, %v2645_v42  ;;  %v6630_v2 = vmul.f32 %v6618_v45, %v6544_v7  ;;  %v2781_v42 = vand.u32 2147483648, %v6586_v26 }
 0x47a   : > { %v6625_v36 = vsel %vm2648_vm2, %v2649_v34, %v2647_v25  ;;  %v2968_v34 = vmax.f32 %v6405_v15, 1e-12 }
 0x47b   : > { %v4340_v19 = vpop.eup %4339  ;;  %v2651_v4 = vsub.f32 0.8164966, %v6625_v36 }
 0x47c   : > { %v6615_v48 = vmul.f32 %v4340_v19, %v2836_v11  ;;  %v4342_v55 = vpop.eup %4341  ;;  %v2655_v11 = vadd.f32 0.8164966, %v6625_v36 }
 0x47d   : > { %v2777_v46 = vmul.f32 %v4342_v55, %v6586_v26 }
 0x47e   : > { %4353 = vrsqrt.f32 %v6615_v48  ;;  %vm2841_vm9 = vcmp.eq.f32.partialorder %v6615_v48, inf  ;;  %vm2843_vm10 = vcmp.eq.f32.partialorder %v6615_v48, 0.0 }
 0x47f   : > { %4355 = vlog2.f32 %v2525_v33  ;;  %v2779_v8 = vsel %vm2778_vm5, %v6586_v26, %v2777_v46  ;;  %v2712_v33 = vand.u32 2147483648, %v6597_v17  ;;  %vm2494_vm5 = vcmp.eq.f32.partialorder %v6544_v7, inf }
 0x480   : > { %v4344_v53 = vpop.eup %4343  ;;  %4357 = vlog2.f32 %v2529_v50  ;;  %v6651_v55 = vsel %vm2780_vm7, %v2781_v42, %v2779_v8  ;;  %v2844_v42 = vand.u32 2147483648, %v6615_v48 }
 0x481   : > { %v2584_v54 = vmul.f32 %v4344_v53, %v2582_v16  ;;  %4359 = vlog2.f32 %v2651_v4  ;;  %v2783_v46 = vsub.f32 0.8164966, %v6651_v55 }
 0x483   : > { %v2586_v0 = vsel %vm2585_vm3, %v2582_v16, %v2584_v54  ;;  %v4346_v62 = vpop.eup %4345 }
 0x484   : > { %v6633_v14 = vsel %vm2587_vm4, %v2588_v24, %v2586_v0  ;;  %v2708_v49 = vmul.f32 %v4346_v62, %v6597_v17  ;;  %v6642_v39 = vpop.eup %4347 }
 0x485   : > { %v2591_v59 = vmul.f32 %v6633_v14, %v6633_v14  ;;  %v4350_v25 = vpop.eup %4349  ;;  %v3496_v54 = vadd.f32 1.0, %v6642_v39 }
 0x486   : > { %v2710_v19 = vsel %vm2709_vm6, %v6597_v17, %v2708_v49  ;;  %v4352_v53 = vpop.eup %4351  ;;  %v6661_v24 = vmul.f32 %v4350_v25, %v2968_v34  ;;  %v2913_v34 = vand.u32 2147483648, %v6606_v44  ;;  %vm2496_vm6 = vcmp.eq.f32.partialorder %v6544_v7, 0.0 }
 0x487   : > { %v6645_v16 = vadd.f32 %v6630_v2, %v2591_v59  ;;  %v6658_v26 = vsel %vm2711_vm8, %v2712_v33, %v2710_v19  ;;  %v2603_v4 = vadd.f32 %v2591_v59, %v6618_v45  ;;  %v2909_v8 = vmul.f32 %v4352_v53, %v6606_v44 }
 0x488   : > { %v2714_v0 = vmul.f32 %v6658_v26, %v6658_v26  ;;  %v2787_v59 = vadd.f32 0.8164966, %v6651_v55  ;;  %vm2973_vm15 = vcmp.eq.f32.partialorder %v6661_v24, inf  ;;  %vm2975_vm0 = vcmp.eq.f32.partialorder %v6661_v24, 0.0 }
 0x489   : > { %4361 = vrsqrt.f32 %v6645_v16  ;;  %v2911_v25 = vsel %vm2910_vm11, %v6606_v44, %v2909_v8  ;;  %v3494_v8 = vsub.f32 1.0, %v6642_v39  ;;  %vm2596_vm13 = vcmp.eq.f32.partialorder %v6645_v16, inf }
 0x48a   : > { %4363 = vlog2.f32 %v2655_v11  ;;  %v6670_v17 = vadd.f32 %v2714_v0, %v6630_v2  ;;  %vm2598_vm14 = vcmp.eq.f32.partialorder %v6645_v16, 0.0 }
 0x48b   : > { %v4354_v50 = vpop.eup %4353  ;;  %4365 = vrsqrt.f32 %v6661_v24  ;;  %v3495_v40 = vmul.f32 0.8164966, %v3494_v8 }
 0x48c   : > { %v2840_v62 = vmul.f32 %v4354_v50, %v6615_v48  ;;  %4367 = vrcp.f32 %v3496_v54  ;;  %v4356_v11 = vpop.eup %4355  ;;  %v6690_v50 = vsel %vm2912_vm12, %v2913_v34, %v2911_v25  ;;  %vm2718_vm1 = vcmp.eq.f32.partialorder %v6670_v17, inf }
 0x48d   : > { %4369 = vlog2.f32 %v2783_v46  ;;  %v2527_v53 = vmul.f32 0.6931472, %v4356_v11  ;;  %v4358_v54 = vpop.eup %4357  ;;  %v2915_v44 = vsub.f32 0.8164966, %v6690_v50  ;;  %vm2720_vm2 = vcmp.eq.f32.partialorder %v6670_v17, 0.0 }
 0x48e   : > { %v2842_v49 = vsel %vm2841_vm9, %v6615_v48, %v2840_v62  ;;  %4371 = vrsqrt.f32 %v6670_v17  ;;  %v2725_v48 = vadd.f32 %v2714_v0, %v6618_v45  ;;  %v2599_v0 = vand.u32 2147483648, %v6645_v16 }
 0x48f   : > { %4373 = vrcp.f32 %v2603_v4  ;;  %v6679_v19 = vsel %vm2843_vm10, %v2844_v42, %v2842_v49  ;;  %v4360_v4 = vpop.eup %4359  ;;  %v7411_v49 = vld [vmem:[#allocation17_spill] sm:$0xff]  ;;  %v2531_v34 = vmul.f32 0.6931472, %v4358_v54 }
 0x490   : > { %v2846_v33 = vmul.f32 %v6679_v19, %v6679_v19  ;;  %4375 = vlog2.f32 %v2787_v59  ;;  %v2528_v42 = vadd.f32 %v2527_v53, %v7411_v49  ;;  %v2653_v10 = vmul.f32 0.6931472, %v4360_v4 }
 0x491   : > { %v6701_v59 = vmul.f32 %v6514_v5, %v6618_v45 }
 0x492   : > { %v6688_v46 = vadd.f32 %v2846_v33, %v6630_v2  ;;  %v2857_v20 = vadd.f32 %v2846_v33, %v6618_v45  ;;  %v2532_v58 = vsub.f32 %v2528_v42, %v2531_v34  ;;  %v2654_v57 = vadd.f32 %v2653_v10, %v7411_v49 }
 0x493   : > { %v2919_v33 = vadd.f32 0.8164966, %v6690_v50  ;;  %v2721_v34 = vand.u32 2147483648, %v6670_v17 }
 0x494   : > { %4377 = vrsqrt.f32 %v6688_v46  ;;  %vm2850_vm3 = vcmp.eq.f32.partialorder %v6688_v46, inf  ;;  %vm2852_vm4 = vcmp.eq.f32.partialorder %v6688_v46, 0.0 }
 0x495   : > { %4379 = vrcp.f32 %v2725_v48 }
 0x496   : > { %v4362_v62 = vpop.eup %4361  ;;  %4381 = vlog2.f32 %v2915_v44 }
 0x497   : > { %v2595_v11 = vmul.f32 %v4362_v62, %v6645_v16  ;;  %v4364_v25 = vpop.eup %4363  ;;  %4383 = vrcp.f32 %v2857_v20 }
 0x498   : > { %v4366_v53 = vpop.eup %4365  ;;  %v2657_v61 = vmul.f32 0.6931472, %v4364_v25  ;;  %4385 = vlog2.f32 %v2919_v33 }
 0x499   : > { %v2597_v39 = vsel %vm2596_vm13, %v6645_v16, %v2595_v11  ;;  %v4368_v63 = vpop.eup %4367  ;;  %v2972_v54 = vmul.f32 %v4366_v53, %v6661_v24  ;;  %v2976_v16 = vand.u32 2147483648, %v6661_v24 }
 0x49a   : > { %v2600_v62 = vsel %vm2598_vm14, %v2599_v0, %v2597_v39  ;;  %v4370_v48 = vpop.eup %4369 }
 0x49b   : > { %v2601_v4 = vmul.f32 %v2600_v62, %v6633_v14  ;;  %v4372_v11 = vpop.eup %4371  ;;  %v2974_v8 = vsel %vm2973_vm15, %v6661_v24, %v2972_v54  ;;  %v2785_v39 = vmul.f32 0.6931472, %v4370_v48  ;;  %v2658_v62 = vsub.f32 %v2654_v57, %v2657_v61 }
 0x49c   : > { %v4374_v42 = vpop.eup %4373  ;;  %v2717_v44 = vmul.f32 %v4372_v11, %v6670_v17  ;;  %v6717_v10 = vsel %vm2975_vm0, %v2976_v16, %v2974_v8  ;;  %v6726_v24 = vmul.f32 %v4368_v63, %v3495_v40  ;;  %v2533_v48 = vmul.f32 2.4494898, %v2532_v58 }
 0x49d   : > { %v2602_v0 = vadd.f32 %v2601_v4, %v6701_v59  ;;  %v2978_v53 = vmul.f32 %v6717_v10, %v6717_v10  ;;  %v4376_v11 = vpop.eup %4375  ;;  %v2786_v61 = vadd.f32 %v2785_v39, %v7411_v49  ;;  %v2659_v63 = vmul.f32 2.4494898, %v2658_v62 }
 0x49e   : > { %v2719_v4 = vsel %vm2718_vm1, %v6670_v17, %v2717_v44  ;;  %v6740_v33 = vmul.f32 %v6726_v24, %v6726_v24  ;;  %v2789_v58 = vmul.f32 0.6931472, %v4376_v11  ;;  %v2853_v44 = vand.u32 2147483648, %v6688_v46 }
 0x49f   : > { %v6719_v25 = vmul.f32 %v4374_v42, %v2602_v0  ;;  %v2722_v54 = vsel %vm2720_vm2, %v2721_v34, %v2719_v4  ;;  %v6731_v16 = vadd.f32 %v2978_v53, %v6630_v2  ;;  %v2534_v34 = vmul.f32 1.442695, %v2533_v48 }
 0x4a0   : > { %v2723_v0 = vmul.f32 %v2722_v54, %v6658_v26  ;;  %v2790_v4 = vsub.f32 %v2786_v61, %v2789_v58  ;;  %v2989_v54 = vadd.f32 %v2978_v53, %v6618_v45  ;;  %v3501_v48 = vsub.f32 0.6666667, %v6740_v33 }
 0x4a1   : > { %v2606_v20 = vmul.f32 %v6719_v25, %v6719_v25  ;;  %v4378_v8 = vpop.eup %4377  ;;  %4387 = vrsqrt.f32 %v6731_v16  ;;  %v2493_v61 = vmul.f32 %v6594_v30, %v6544_v7  ;;  %v2497_v58 = vand.u32 2147483648, %v6544_v7 }
 0x4a2   : > { %v2724_v40 = vadd.f32 %v2723_v0, %v6701_v59  ;;  %v2849_v17 = vmul.f32 %v4378_v8, %v6688_v46  ;;  %v4380_v2 = vpop.eup %4379  ;;  %v2660_v8 = vmul.f32 1.442695, %v2659_v63  ;;  %v2791_v45 = vmul.f32 2.4494898, %v2790_v4 }
 0x4a3   : > { %v2607_v57 = vsub.f32 1.0, %v2606_v20  ;;  %v4382_v0 = vpop.eup %4381  ;;  %vm2982_vm7 = vcmp.eq.f32.partialorder %v6731_v16, inf  ;;  %vm2984_vm8 = vcmp.eq.f32.partialorder %v6731_v16, 0.0 }
 0x4a4   : > { %v6744_v39 = vmul.f32 %v4380_v2, %v2724_v40  ;;  %v2851_v62 = vsel %vm2850_vm3, %v6688_v46, %v2849_v17  ;;  %v4384_v17 = vpop.eup %4383  ;;  %v2917_v53 = vmul.f32 0.6931472, %v4382_v0 }
 0x4a5   : > { %v2608_v42 = vmax.f32 %v2607_v57, 1e-12  ;;  %v2854_v20 = vsel %vm2852_vm4, %v2853_v44, %v2851_v62  ;;  %v2792_v62 = vmul.f32 1.442695, %v2791_v45 }
 0x4a6   : > { %v2728_v11 = vmul.f32 %v6744_v39, %v6744_v39  ;;  %v2855_v57 = vmul.f32 %v2854_v20, %v6679_v19  ;;  %v2918_v4 = vadd.f32 %v2917_v53, %v7411_v49 }
 0x4a7   : > { %4389 = vrsqrt.f32 %v2608_v42  ;;  %v4386_v42 = vpop.eup %4385 }
 0x4a8   : > { %4391 = vrcp.f32 %v6633_v14  ;;  %v2729_v40 = vsub.f32 1.0, %v2728_v11  ;;  %v2856_v46 = vadd.f32 %v2855_v57, %v6701_v59  ;;  %v3502_v14 = vmax.f32 %v3501_v48, 1e-12 }
 0x4a9   : > { %4393 = vpow2.f32 %v2534_v34  ;;  %v2495_v34 = vsel %vm2494_vm5, %v6544_v7, %v2493_v61  ;;  %v2921_v0 = vmul.f32 0.6931472, %v4386_v42 }
 0x4aa   : > { %4395 = vrcp.f32 %v2989_v54  ;;  %v2730_v63 = vmax.f32 %v2729_v40, 1e-12  ;;  %v6758_v2 = vmul.f32 %v4384_v17, %v2856_v46  ;;  %v3503_v11 = vmul.f32 1.6666666, %v3502_v14 }
 0x4ab   : > { %4397 = vpow2.f32 %v2660_v8  ;;  %v2498_v57 = vsel %vm2496_vm6, %v2497_v58, %v2495_v34  ;;  %v2985_v40 = vand.u32 2147483648, %v6731_v16  ;;  %v2922_v46 = vsub.f32 %v2918_v4, %v2921_v0 }
 0x4ac   : > { %4399 = vrsqrt.f32 %v2730_v63  ;;  %v2860_v44 = vmul.f32 %v6758_v2, %v6758_v2  ;;  %v6773_v17 = vmul.f32 %v6310_v3, %v2498_v57 }
 0x4ad   : > { %4401 = vrcp.f32 %v6658_v26  ;;  %v2923_v42 = vmul.f32 2.4494898, %v2922_v46 }
 0x4ae   : > { %v4388_v20 = vpop.eup %4387  ;;  %v2861_v54 = vsub.f32 1.0, %v2860_v44  ;;  %4403 = vpow2.f32 %v2792_v62 }
 0x4af   : > { %v2981_v8 = vmul.f32 %v4388_v20, %v6731_v16  ;;  %v6787_v20 = vmul.f32 %v6594_v30, %v6332_v32 }
 0x4b0   : > { %v2862_v48 = vmax.f32 %v2861_v54, 1e-12  ;;  %v2924_v54 = vmul.f32 1.442695, %v2923_v42 }
 0x4b1   : > { %v2983_v7 = vsel %vm2982_vm7, %v6731_v16, %v2981_v8 }
 0x4b2   : > { %4405 = vrsqrt.f32 %v2862_v48  ;;  %v2986_v26 = vsel %vm2984_vm8, %v2985_v40, %v2983_v7 }
 0x4b3   : > { %v2987_v45 = vmul.f32 %v2986_v26, %v6717_v10  ;;  %4407 = vrcp.f32 %v3503_v11 }
 0x4b4   : > { %v4390_v49 = vpop.eup %4389  ;;  %4409 = vrcp.f32 %v6679_v19 }
 0x4b5   : > { %v2614_v61 = vmul.f32 %v6514_v5, %v4390_v49  ;;  %v4392_v53 = vpop.eup %4391  ;;  %v2988_v58 = vadd.f32 %v2987_v45, %v6701_v59  ;;  %4411 = vpow2.f32 %v2924_v54  ;;  %v3500_v45 = vmul.f32 0.6666667, %v6740_v33 }
 0x4b6   : > { %v4394_v63 = vpop.eup %4393  ;;  %v2508_v54 = vmul.f32 1.442695, %v6408_v60 }
 0x4b7   : > { %v2615_v14 = vmul.f32 %v4392_v53, %v2614_v61  ;;  %v4396_v16 = vpop.eup %4395  ;;  %v6783_v3 = vmul.f32 %v4394_v63, %v5100_v18 }
 0x4b8   : > { %v4398_v44 = vpop.eup %4397  ;;  %v6780_v62 = vmul.f32 %v4396_v16, %v2988_v58 }
 0x4b9   : > { %v2616_v34 = vadd.f32 %v2615_v14, %v6773_v17  ;;  %v4400_v4 = vpop.eup %4399  ;;  %v6793_v0 = vmul.f32 %v4398_v44, %v5100_v18  ;;  %v2538_v40 = vadd.f32 %v6783_v3, %v5107_v51 }
 0x4ba   : > { %v2992_v59 = vmul.f32 %v6780_v62, %v6780_v62  ;;  %v2736_v8 = vmul.f32 %v6514_v5, %v4400_v4  ;;  %v4402_v11 = vpop.eup %4401 }
 0x4bb   : > { %v2617_v19 = vmul.f32 %v2616_v34, %v6336_v28  ;;  %v4404_v46 = vpop.eup %4403  ;;  %v2664_v7 = vadd.f32 %v6793_v0, %v5107_v51 }
 0x4bc   : > { %v2993_v48 = vsub.f32 1.0, %v2992_v59  ;;  %v2737_v32 = vmul.f32 %v4402_v11, %v2736_v8  ;;  %v6806_v16 = vmul.f32 %v4404_v46, %v5100_v18  ;;  %v2611_v59 = vmul.f32 %v4390_v49, %v6336_v28 }
 0x4bd   : > { %v2618_v57 = vadd.f32 %v2617_v19, %v6787_v20  ;;  %v2733_v28 = vmul.f32 %v4400_v4, %v6349_v35  ;;  %v2537_v4 = vsub.f32 %v6783_v3, %v5107_v51 }
 0x4be   : > { %v2994_v30 = vmax.f32 %v2993_v48, 1e-12  ;;  %v2738_v26 = vadd.f32 %v2737_v32, %v6773_v17  ;;  %v2612_v60 = vmul.f32 %v4392_v53, %v2611_v59 }
 0x4bf   : > { %4413 = vrcp.f32 %v2618_v57  ;;  %v4406_v61 = vpop.eup %4405  ;;  %v2796_v57 = vadd.f32 %v6806_v16, %v5107_v51 }
 0x4c0   : > { %4415 = vrsqrt.f32 %v2994_v30  ;;  %v4408_v63 = vpop.eup %4407  ;;  %v2739_v14 = vmul.f32 %v2738_v26, %v6349_v35  ;;  %v2868_v42 = vmul.f32 %v6514_v5, %v4406_v61  ;;  %v2734_v26 = vmul.f32 %v4402_v11, %v2733_v28 }
 0x4c1   : > { %4417 = vrcp.f32 %v2538_v40  ;;  %v4410_v58 = vpop.eup %4409  ;;  %v6810_v19 = vmul.f32 %v4408_v63, %v3500_v45  ;;  %v2634_v40 = vmul.f32 1.442695, %v6415_v1  ;;  %v2766_v1 = vmul.f32 1.442695, %v6450_v6 }
 0x4c2   : > { %4419 = vrcp.f32 %v6717_v10  ;;  %v2740_v44 = vadd.f32 %v2739_v14, %v6787_v20  ;;  %v2869_v34 = vmul.f32 %v4410_v58, %v2868_v42  ;;  %v6820_v10 = vmul.f32 %v6514_v5, %v6787_v20  ;;  %v4412_v32 = vpop.eup %4411 }
 0x4c3   : > { %4421 = vrcp.f32 %v2664_v7  ;;  %v6829_v63 = vmul.f32 %v4412_v32, %v5100_v18  ;;  %v2865_v42 = vmul.f32 %v4406_v61, %v6377_v43  ;;  %v2663_v6 = vsub.f32 %v6793_v0, %v5107_v51 }
 0x4c4   : > { %4423 = vrcp.f32 %v2740_v44  ;;  %v2870_v8 = vadd.f32 %v2869_v34, %v6773_v17  ;;  %v2613_v7 = vadd.f32 %v2612_v60, %v6820_v10  ;;  %v2735_v18 = vadd.f32 %v2734_v26, %v6820_v10 }
 0x4c5   : > { %4425 = vlog2.f32 %v6810_v19  ;;  %v3508_v61 = vmul.f32 1.6666666, %v7407_v12 }
 0x4c6   : > { %v2871_v48 = vmul.f32 %v2870_v8, %v6377_v43  ;;  %4427 = vpow2.f32 %v2508_v54 }
 0x4c7   : > { %4429 = vrcp.f32 %v2796_v57  ;;  %v2866_v57 = vmul.f32 %v4410_v58, %v2865_v42  ;;  %v3509_v26 = vsub.f32 %v7406_v41, %v3508_v61 }
 0x4c8   : > { %v2872_v49 = vadd.f32 %v2871_v48, %v6787_v20 }
 0x4ca   : > { %4431 = vrcp.f32 %v2872_v49 }
 0x4cb   : > { %4433 = vpow2.f32 %v2634_v40 }
 0x4cc   : > { %v4414_v30 = vpop.eup %4413  ;;  %4435 = vrcp.f32 %v6549_v29 }
 0x4cd   : > { %v4416_v46 = vpop.eup %4415  ;;  %v2620_v14 = vmul.f32 %v4414_v30, %v2613_v7  ;;  %4437 = vpow2.f32 %v2766_v1  ;;  %v2867_v30 = vadd.f32 %v2866_v57, %v6820_v10  ;;  %v2795_v7 = vsub.f32 %v6806_v16, %v5107_v51 }
 0x4ce   : > { %v4418_v45 = vpop.eup %4417  ;;  %v3000_v53 = vmul.f32 %v6514_v5, %v4416_v46  ;;  %v2928_v5 = vadd.f32 %v6829_v63, %v5107_v51 }
 0x4cf   : > { %v4420_v35 = vpop.eup %4419  ;;  %v2540_v11 = vmul.f32 %v4418_v45, %v2537_v4  ;;  %v2898_v4 = vmul.f32 1.442695, %v6471_v37  ;;  %v3517_v37 = vsub.f32 1.0, %v6740_v33 }
 0x4d0   : > { %v4422_v44 = vpop.eup %4421  ;;  %v3001_v34 = vmul.f32 %v4420_v35, %v3000_v53  ;;  %4439 = vrcp.f32 %v2928_v5 }
 0x4d1   : > { %v4424_v54 = vpop.eup %4423  ;;  %v2621_v59 = vsub.f32 %v2540_v11, %v2620_v14  ;;  %v2666_v8 = vmul.f32 %v4422_v44, %v2663_v6  ;;  %v2623_v57 = vadd.f32 %v2620_v14, %v2540_v11 }
 0x4d2   : > { %v3002_v3 = vadd.f32 %v3001_v34, %v6773_v17  ;;  %v2742_v29 = vmul.f32 %v4424_v54, %v2735_v18  ;;  %v4426_v48 = vpop.eup %4425  ;;  %v2997_v34 = vmul.f32 %v4416_v46, %v6405_v15 }
 0x4d3   : > { %v4428_v0 = vpop.eup %4427  ;;  %v2622_v49 = vand.u32 2147483647, %v2621_v59  ;;  %v3507_v58 = vmul.f32 0.6931472, %v4426_v48  ;;  %v2624_v14 = vmul.f32 0.5, %v2623_v57 }
 0x4d4   : > { %v3003_v43 = vmul.f32 %v3002_v3, %v6405_v15  ;;  %v2743_v40 = vsub.f32 %v2666_v8, %v2742_v29  ;;  %v4430_v28 = vpop.eup %4429  ;;  %v7414_v3 = vld [vmem:[#allocation16_spill] sm:$0xff]  ;;  %v2998_v15 = vmul.f32 %v4420_v35, %v2997_v34  ;;  %v2927_v35 = vsub.f32 %v6829_v63, %v5107_v51 }
 0x4d5   : > { %v2798_v53 = vmul.f32 %v4430_v28, %v2795_v7  ;;  %v3510_v6 = vsub.f32 %v3507_v58, %v3509_v26 }
 0x4d6   : > { %v3004_v60 = vadd.f32 %v3003_v43, %v6787_v20  ;;  %v2744_v32 = vand.u32 2147483647, %v2743_v40  ;;  %v2999_v48 = vadd.f32 %v2998_v15, %v6820_v10 }
 0x4d7   : > { %v4432_v17 = vpop.eup %4431 }
 0x4d8   : > { %4441 = vrcp.f32 %v3004_v60  ;;  %v4434_v12 = vpop.eup %4433  ;;  %vm6849_vm9 = vcmp.lt.f32.partialorder %v2744_v32, %v2622_v49  ;;  %v2874_v1 = vmul.f32 %v4432_v17, %v2867_v30 }
 0x4d9   : > { %v2750_v20 = vsel %vm6849_vm9, %v4434_v12, %v4428_v0  ;;  %v2753_v16 = vsel %vm6849_vm9, %v6574_v9, %v6565_v31  ;;  %v2755_v41 = vsel %vm6849_vm9, %v6744_v39, %v6719_v25  ;;  %v4436_v42 = vpop.eup %4435  ;;  %4443 = vrcp.f32 %v6584_v23  ;;  %v4461_v9 = vld [vmem:[%s4756_s19 + $0x10] sm:$0xff]  ;;  %s3790_s19 = smul.u32 24, %s4753_s20 }
 0x4da   : > { %v2875_v44 = vsub.f32 %v2798_v53, %v2874_v1  ;;  %v2748_v18 = vsel %vm6849_vm9, %v2744_v32, %v2622_v49  ;;  %v4438_v5 = vpop.eup %4437  ;;  %v2831_v31 = vmul.f32 %v4436_v42, %v6352_v38  ;;  %4445 = vpow2.f32 %v2898_v4 }
 0x4db   : > { %v3026_v25 = vmul.f32 %v4461_v9, %v7414_v3  ;;  %v2745_v39 = vadd.f32 %v2742_v29, %v2666_v8  ;;  %v3511_v23 = vmul.f32 1.5, %v3510_v6  ;;  %v2877_v33 = vadd.f32 %v2874_v1, %v2798_v53  ;;  %s385_s9 = scalar_lea.vmem [#allocation10], %s3790_s19 }
 0x4dc   : > { %v2876_v54 = vand.u32 2147483647, %v2875_v44  ;;  %4447 = vrsqrt.f32 %v3517_v37  ;;  %v3515_v12 = vmul.f32 2.5, %v6810_v19  ;;  %v3025_v6 = vsub.f32 %v4461_v9, %v7414_v3  ;;  %s3590_s8 = sshll.u32 %s385_s9, 4  ;;  %s7032_s8 = int_to_ptr.vmem [resolvable:$true] %s3590_s8 }
 0x4dd   : > { %v4440_v61 = vpop.eup %4439  ;;  %v3027_v8 = vsub.f32 1.0, %v3026_v25  ;;  %v2746_v29 = vmul.f32 0.5, %v2745_v39  ;;  %v3512_v40 = vmul.f32 1.442695, %v3511_v23  ;;  %v2878_v28 = vmul.f32 0.5, %v2877_v33  ;;  %s4514_s22 = scalar_lea.vmem %s7032_s8, 384  ;;  %p4521_p7 = scmp.lt.s32.totalorder %s7032_s8, %s4519_s21 }
 0x4de   : > { %vm6872_vm10 = vcmp.lt.f32.partialorder %v2876_v54, %v2748_v18  ;;  %v2930_v11 = vmul.f32 %v4440_v61, %v2927_v35  ;;  %v3516_v42 = vadd.f32 1.0, %v3515_v12  ;;  %v2751_v15 = vsel %vm6849_vm9, %v6489_v56, %v6473_v52  ;;  %v7423_v35 = vld [vmem:[#allocation26_spill] sm:$0xff]  ;;  %p4515_p12 = scmp.ne.s32.totalorder %s7032_s8, %s4514_s22  ;;  %p4522_p3 = scmp.lt.s32.totalorder %s4520_s11, %s4514_s22 }
 0x4df   : > { %v2882_v46 = vsel %vm6872_vm10, %v4438_v5, %v2750_v20  ;;  %v2885_v38 = vsel %vm6872_vm10, %v2831_v31, %v2753_v16  ;;  %v2887_v43 = vsel %vm6872_vm10, %v6758_v2, %v2755_v41  ;;  %v2752_v2 = vsel %vm6849_vm9, %v6625_v36, %v6612_v21 }
 0x4e0   : > { %4449 = vrcp.f32 %v3027_v8  ;;  %v2756_v49 = vsel %vm6849_vm9, %v2746_v29, %v2624_v14  ;;  %v2880_v10 = vsel %vm6872_vm10, %v2876_v54, %v2748_v18  ;;  %v2884_v63 = vsel %vm6872_vm10, %v6651_v55, %v2752_v2  ;;  %v7422_v29 = vld [vmem:[#allocation36_spill] sm:$0xff]  ;;  %p4516_p2 = pnand %p4515_p12, %p7432_p1  ;;  %p4523_p8 = por %p4522_p3, %p4521_p7 }
 0x4e1   : > { %4451 = vpow2.f32 %v3512_v40  ;;  %v2888_v21 = vsel %vm6872_vm10, %v2878_v28, %v2756_v49  ;;  %v2754_v23 = vsel %vm6849_vm9, %v6504_v13, %v6497_v47  ;;  %v2883_v57 = vsel %vm6872_vm10, %v6526_v22, %v2751_v15  ;;  %v7424_v40 = vld [vmem:[#allocation19_spill] sm:$0xff]  ;;  %v7425_v14 = vld [vmem:[#allocation32_spill] sm:$0xff] }
 0x4e2   : > { %p4517_p0 = pneg %p4516_p2 }
 0x4e4   : > { %p4524_p9 = pnand %p4523_p8, %p4517_p0 }
 0x4e5   : > { %v4442_v0 = vpop.eup %4441 }
 0x4e6   : > { %v3006_v60 = vmul.f32 %v4442_v0, %v2999_v48  ;;  %v4444_v51 = vpop.eup %4443  ;;  %v2749_v48 = vsel %vm6849_vm9, %v7423_v35, %v7422_v29 }
 0x4e7   : > { %v4446_v36 = vpop.eup %4445  ;;  %v2963_v58 = vmul.f32 %v4444_v51, %v6371_v27 }
 0x4e8   : > { %v3007_v32 = vsub.f32 %v2930_v11, %v3006_v60  ;;  %v3009_v30 = vadd.f32 %v3006_v60, %v2930_v11 }
 0x4e9   : > { %v4448_v4 = vpop.eup %4447 }
 0x4ea   : > { %v3008_v17 = vand.u32 2147483647, %v3007_v32  ;;  %v3010_v7 = vmul.f32 0.5, %v3009_v30  ;;  %v3520_v18 = vmul.f32 %v4448_v4, %v4448_v4  ;;  %v3525_v54 = vmul.f32 %v4448_v4, %v3516_v42  ;;  %v3532_v30 = vld [vmem:[%s4759_s0 + $0x8] sm:$0xff] }
 0x4ec   : > { %vm6900_vm11 = vcmp.lt.f32.partialorder %v3008_v17, %v2880_v10  ;;  %v3780_v39 = vadd.f32 -1.0, %v3525_v54 }
 0x4ed   : > { %v3013_v1 = vsel %vm6900_vm11, %v4446_v36, %v2882_v46  ;;  %v3015_v55 = vsel %vm6900_vm11, %v6690_v50, %v2884_v63  ;;  %v3016_v20 = vsel %vm6900_vm11, %v2963_v58, %v2885_v38  ;;  %v6915_v27 = vsel %vm6900_vm11, %v6780_v62, %v2887_v43  ;;  %v4450_v34 = vpop.eup %4449  ;;  %v3531_v46 = vld [vmem:[%s4759_s0] sm:$0xff]  ;;  %v7421_v38 = vld [vmem:[#allocation23_spill] sm:$0xff] }
 0x4ee   : > { %v6919_v53 = vsel %vm6900_vm11, %v3010_v7, %v2888_v21  ;;  %vm3546_vm13 = vcmp.gt.f32.partialorder %v6915_v27, 0.0  ;;  %v4452_v5 = vpop.eup %4451  ;;  %v6931_v31 = vmul.f32 %v4450_v34, %v3025_v6  ;;  %v2886_v43 = vsel %vm6872_vm10, %v7421_v38, %v2754_v23 }
 0x4ef   : > { %v3021_v16 = vmul.f32 %v6919_v53, %v3015_v55  ;;  %v3030_v41 = vmul.f32 %v6919_v53, %v6919_v53  ;;  %vm3545_vm12 = vcmp.le.f32.partialorder %v6919_v53, 0.0  ;;  %v3519_v25 = vmul.f32 %v4452_v5, %v4448_v4  ;;  %v7430_v4 = vld [vmem:[#allocation30_spill] sm:$0xff] }
 0x4f0   : > { %vm6926_vm14 = vmand %vm3545_vm12, %vm3546_vm13  ;;  %v3521_v37 = vmul.f32 %v4452_v5, %v3520_v18  ;;  %vm3538_vm15 = vcmp.ge.f32.partialorder %v6931_v31, 0.0  ;;  %v3020_v52 = vsub.f32 %v6919_v53, %v3015_v55  ;;  %vm3539_vm0 = vcmp.lt.f32.partialorder %v6931_v31, 0.0 }
 0x4f1   : > { %v3022_v50 = vsub.f32 1.0, %v3021_v16  ;;  %v3031_v44 = vsub.f32 1.0, %v3030_v41  ;;  %v3527_v3 = vmul.f32 %v3780_v39, %v3519_v25  ;;  %v3551_v56 = vsel %vm3538_vm15, %v3531_v46, 0.0  ;;  %v3781_v16 = vld [vmem:[%s4759_s0 + $0x18] sm:$0xff]  ;;  %v7431_v46 = vld [vmem:[#allocation18_spill] sm:$0xff] }
 0x4f2   : > { %v3522_v9 = vmul.f32 %v3521_v37, %v3516_v42  ;;  %v3514_v13 = vmul.f32 %v4452_v5, %v6810_v19  ;;  %v3524_v22 = vmul.f32 %v3519_v25, %v6726_v24  ;;  %v3014_v0 = vsel %vm6900_vm11, %v7424_v40, %v2883_v57  ;;  %v3782_v25 = vld [vmem:[%s4759_s0 + $0x20] sm:$0xff] }
 0x4f3   : > { %4453 = vrcp.f32 %v3022_v50  ;;  %v3528_v33 = vmul.f32 %v3527_v3, %v6726_v24  ;;  %v3017_v19 = vsel %vm6900_vm11, %v7425_v14, %v2886_v43  ;;  %vm3543_vm3 = vcmp.gt.f32.partialorder %v6919_v53, 0.0  ;;  %v3533_v50 = vld [vmem:[%s4759_s0 + $0x10] sm:$0xff] }
 0x4f4   : > { %4455 = vrsqrt.f32 %v3031_v44  ;;  %v3523_v61 = vmul.f32 %v3522_v9, %v6726_v24  ;;  %v3552_v41 = vsel %vm3538_vm15, %v3532_v30, 0.0  ;;  %v2881_v42 = vsel %vm6872_vm10, %v7430_v4, %v2749_v48 }
 0x4f5   : > { %vm3548_vm6 = vcmp.le.f32.partialorder %v6915_v27, 0.0  ;;  %v3553_v9 = vsel %vm3538_vm15, %v3533_v50, 0.0  ;;  %v3012_v57 = vsel %vm6900_vm11, %v7431_v46, %v2881_v42 }
 0x4f6   : > { %v3529_v36 = vmul.f32 %v3523_v61, %v6726_v24 }
 0x4f8   : > { %v3530_v5 = vadd.f32 %v3529_v36, %v3514_v13 }
 0x500   : > { %v4454_v47 = vpop.eup %4453 }
 0x501   : > { %v4456_v8 = vpop.eup %4455  ;;  %v3024_v11 = vmul.f32 %v4454_v47, %v3020_v52  ;;  %v3783_v52 = vld [vmem:[%s4759_s0 + $0x28] sm:$0xff]  ;;  %s3578_s0 = scalar_lea.sflag [#allocation7], %s4753_s20 }
 0x502   : > { %v3033_v60 = vmul.f32 %v4456_v8, %v3013_v1  ;;  %v3034_v2 = vmul.f32 %v4456_v8, %v3016_v20  ;;  %v3035_v28 = vmul.f32 %v4456_v8, %v4456_v8  ;;  %v3043_v49 = vmul.f32 %v4456_v8, %v3014_v0 }
 0x503   : > { %v3050_v32 = vmul.f32 %v4456_v8, %v3017_v19  ;;  %vm3540_vm1 = vcmp.ge.f32.partialorder %v3024_v11, 0.0  ;;  %vm3542_vm2 = vcmp.lt.f32.partialorder %v3024_v11, 0.0 }
 0x504   : > { %v3036_v45 = vmul.f32 %v3035_v28, %v3013_v1  ;;  %v3039_v51 = vmul.f32 %v3035_v28, %v3016_v20  ;;  %v3042_v10 = vmul.f32 %v3033_v60, %v6919_v53  ;;  %v3778_v63 = vadd.f32 -1.0, %v3043_v49  ;;  %vm6973_vm4 = vmand %vm3539_vm0, %vm3540_vm1 }
 0x505   : > { %v3049_v7 = vmul.f32 %v3034_v2, %v6919_v53  ;;  %v3779_v21 = vadd.f32 -1.0, %v3050_v32  ;;  %vm6979_vm5 = vmand %vm3542_vm2, %vm3543_vm3  ;;  %v3556_v12 = vsel %vm6973_vm4, %v3524_v22, %v3551_v56  ;;  %v3557_v37 = vsel %vm6973_vm4, %v3528_v33, %v3552_v41 }
 0x506   : > { %v3037_v1 = vmul.f32 %v3036_v45, %v3014_v0  ;;  %v3040_v55 = vmul.f32 %v3039_v51, %v3017_v19  ;;  %v3045_v20 = vmul.f32 %v3778_v63, %v3033_v60  ;;  %v3561_v44 = vsel %vm6979_vm5, %v3042_v10, %v3556_v12 }
 0x507   : > { %v3052_v24 = vmul.f32 %v3779_v21, %v3034_v2  ;;  %v3566_v54 = vsel %vm6926_vm14, %v3049_v7, %v3561_v44  ;;  %v3558_v56 = vsel %vm6973_vm4, %v3530_v5, %v3553_v9 }
 0x508   : > { %v3038_v34 = vmul.f32 %v3037_v1, %v6919_v53  ;;  %v3041_v6 = vmul.f32 %v3040_v55, %v6919_v53  ;;  %v3046_v18 = vmul.f32 %v3045_v20, %v6919_v53  ;;  %v3571_v39 = vsel %vm3548_vm6, %v3781_v16, %v3566_v54 }
 0x509   : > { %v3053_v59 = vmul.f32 %v3052_v24, %v6919_v53  ;;  %3574 = vst [vmem:[%s385_s9] sm:$0xff] %v3571_v39 }
 0x50a   : > { %v3047_v15 = vmul.f32 %v3038_v34, %v6919_v53  ;;  %v3054_v23 = vmul.f32 %v3041_v6, %v6919_v53  ;;  %v3562_v3 = vsel %vm6979_vm5, %v3046_v18, %v3557_v37 }
 0x50b   : > { %v3567_v38 = vsel %vm6926_vm14, %v3053_v59, %v3562_v3 }
 0x50c   : > { %v3048_v53 = vadd.f32 %v3047_v15, %v3012_v57  ;;  %v3055_v31 = vadd.f32 %v3054_v23, %v3012_v57  ;;  %v3572_v43 = vsel %vm3548_vm6, %v3782_v25, %v3567_v38 }
 0x50d   : > { %3575 = vst [vmem:[%s385_s9 + $0x8] sm:$0xff] %v3572_v43 }
 0x50e   : > { %v3563_v26 = vsel %vm6979_vm5, %v3048_v53, %v3558_v56 }
 0x50f   : > { %v3568_v47 = vsel %vm6926_vm14, %v3055_v31, %v3563_v26 }
 0x510   : > { %v3573_v13 = vsel %vm3548_vm6, %v3783_v52, %v3568_v47 }
 0x511   : > { %3576 = vst [vmem:[%s385_s9 + $0x10] sm:$0xff] %v3573_v13 }
 0x512   : > { %4527 = shalt.err (!%p4524_p9)
}
 0x513   : > { %s4528_s12 = scalar_lea.hbm %s7028_s17, 384  ;;  %s4532_s19 = scalar_lea.hbm %s7085_s7, 1536 }
 0x514   : > { %p4529_p10 = scmp.ne.s32.totalorder %s7028_s17, %s4528_s12  ;;  %p4533_p4 = scmp.lt.s32.totalorder %s7028_s17, %s7085_s7 }
 0x515   : > { %p4534_p5 = scmp.lt.s32.totalorder %s4532_s19, %s4528_s12 }
 0x516   : > { %p4530_p6 = pnand %p4529_p10, %p7432_p1 }
 0x517   : > { %p4535_p13 = por %p4534_p5, %p4533_p4 }
 0x518   : > { %p4531_p11 = pneg %p4530_p6 }
 0x51a   : > { %p4536_p12 = pnand %p4535_p13, %p4531_p11 }
 0x51c   : > { %4539 = shalt.err (!%p4536_p12)
}
 0x51d   : > { %s4596_s28 = smov 128   ;;  %s4597_s18 = smov 512  }
 0x51e   : > { %s4598_s22 = smov 8  }
 0x51f   : > { %3797 = dma.vmem_to_hbm [thread:$0]  (%p7432_p1), %s7032_s8, 384, %s7028_s17, %s3578_s0, %s4596_s28, %s4597_s18, %s4598_s22  }
 0x520 PF: > { %p3809_p2 = scmp.ge.s32.totalorder %s4582_s27, 2  ;;  %s3605_s23 = sand.u32 1, %s4570_s24  }
 0x521   : > { %p7433_p0 = scmp.ne.s32.totalorder %s7180_s14, 0  ;;  %s3606_s21 = scalar_lea.sflag [#allocation7], %s3605_s23 }
 0x523   : > { %p3804_p7 = pnand %p3809_p2, %p7433_p0 }
 0x525   : > { %p3805_p3 = pneg %p3804_p7 }
 0x527   : > { %4565 = dma.done.wait (%p3805_p3), %s3606_s21, 384  }
 0x528   : > { %4567 = vsyncadd (%p3805_p3), %s3606_s21, 4294966912  ;;  %p21_p8 = scmp.ge.s32.totalorder %s4664_s30, 6   ;;  %s7434_s24 = smov %s4574_s25 }
 0x529   : > { %s7435_s25 = smov %s4578_s26  ;;  %s7436_s26 = smov %s4676_s10 }
 0x52a   : > { %s7437_s27 = smov %s4664_s30  ;;  %23 = sbr.rel (!%p21_p8) target bundleno = 8 (0x8), region = 148 }
 0x52f   :  { %3611 = vsyncpa [#allocation6], 1 }
 0x530   :  { %3613 = vsyncpa [#allocation6 + $0x1], 1 }
 0x531   :  { %3614 = vsyncpa [#allocation9], 1 }
 0x532   :  { %3615 = vsyncpa [#allocation7], 1 }
 0x533   :  { %3617 = vsyncpa [#allocation7 + $0x1], 1 }

</bundles_post_ra>
